<compile_context>
chip_gen: v7x
topology: tpu7x:2x2x1
jax: 0.10.0
libtpu: 0.0.40
codegen_flags: <defaults>
</compile_context>

<pallas_src>
import jax
import jax.numpy as jnp
from jax import lax
from jax.experimental import pallas as pl
from jax.experimental.pallas import tpu as pltpu


# ------------------------------- Pallas kernel -------------------------------

def _make_basic_block_kernel(h, w, c, tile_m):
    """Builds the fused kernel for fixed (static) spatial/channel sizes."""
    wp = w + 2                      # padded width (flat-layout row stride)
    m = h * wp                      # rows of the flat padded-width output layout
    lyp = (h + 3) * wp              # conv1-activation scratch rows (covers tap (2,2) overrun)
    taps = [(ky, kx) for ky in range(3) for kx in range(3)]
    chunks = [(s, min(tile_m, m - s)) for s in range(0, m, tile_m)]

    def kernel(xp_ref, ident_ref, w1_ref, w2_ref, o_ref, yp_ref):
        """
        xp_ref   : ((h+3)*wp, C) bf16  zero-padded input, flattened row-major (pad: top1/bot2/l1/r1)
        ident_ref: (h*wp, C)     f32   identity (original x), flat padded-width layout
        w1_ref   : (9, C, C)     bf16  conv1 weights, tap-major (ky*3+kx, Cin, Cout)
        w2_ref   : (9, C, C)     bf16  conv2 weights, tap-major
        o_ref    : (h*wp, C)     f32   output, flat padded-width layout (2 garbage cols per row)
        yp_ref   : ((h+3)*wp, C) bf16  VMEM scratch: zero-padded conv1 activation (never hits HBM)
        """
        # Zero only the halo rows of the padded conv1 activation (not the whole buffer):
        # prefix = top halo row + left halo of first interior row; suffix = bottom halo + overrun.
        yp_ref[pl.ds(0, wp + 1), :] = jnp.zeros((wp + 1, c), jnp.bfloat16)
        tail = lyp - (wp + 1 + m)
        yp_ref[pl.ds(wp + 1 + m, tail), :] = jnp.zeros((tail, c), jnp.bfloat16)

        # ---- conv1: per M-chunk, 9 contiguous-slab (tm, C) @ (C, C) matmuls, f32 value acc ----
        for s, tm in chunks:
            acc = None
            for t, (ky, kx) in enumerate(taps):
                a = xp_ref[pl.ds(s + ky * wp + kx, tm), :]                 # bf16, contiguous slab
                p = jnp.dot(a, w1_ref[t], preferred_element_type=jnp.float32)
                acc = p if acc is None else acc + p
            # Mask the wrap-around garbage columns (flat col >= w) -> they become the zero halo
            # of the padded activation; store once per chunk (single bf16 cast, no full re-pad).
            rows = lax.broadcasted_iota(jnp.int32, (tm, c), 0) + s
            valid = (rows % wp) < w
            yp_ref[pl.ds(wp + 1 + s, tm), :] = jnp.where(valid, acc, 0.0).astype(jnp.bfloat16)

        # ---- conv2 + residual: same slab structure reading the VMEM-resident activation ----
        for s, tm in chunks:
            acc = None
            for t, (ky, kx) in enumerate(taps):
                a = yp_ref[pl.ds(s + ky * wp + kx, tm), :]                 # bf16, contiguous slab
                p = jnp.dot(a, w2_ref[t], preferred_element_type=jnp.float32)
                acc = p if acc is None else acc + p
            o_ref[pl.ds(s, tm), :] = acc + ident_ref[pl.ds(s, tm), :]      # f32 residual add

    return kernel, m, lyp


# -------------------------------- wrapper ------------------------------------

def basic_block_forward(x_nchw, conv1_w_oihw, conv2_w_oihw, *, tile_m=128):
    """BasicBlock.forward with stride=1, downsample=None (module defaults)."""
    n, c, h, w = x_nchw.shape
    cout = conv1_w_oihw.shape[0]
    assert conv1_w_oihw.shape == (cout, c, 3, 3)
    assert conv2_w_oihw.shape == (cout, cout, 3, 3)
    assert c == cout, "identity add requires inplanes == planes when downsample is None"
    assert c % 128 == 0, "lane-dense layout assumes channels are a multiple of 128"

    wp = w + 2
    lx = (h + 3) * wp

    # Layout glue (no compute).  NOTE(perf): in a real model these preps (and the weight
    # transpose/cast below) should be done once at init, not per call.
    x_nhwc = jnp.transpose(x_nchw, (0, 2, 3, 1))
    # Padded input: 1 halo row/col on top/left/right, 2 rows on the bottom so the flat slab
    # for tap (2,2) never reads past the buffer.  Flatten rows, cast to bf16 ONCE.
    xp_flat = jnp.pad(x_nhwc, ((0, 0), (1, 2), (1, 1), (0, 0))) \
                 .reshape(n, lx, c).astype(jnp.bfloat16)
    # f32 identity in the same flat padded-width layout (2 zero garbage columns per row).
    ident = jnp.pad(x_nhwc, ((0, 0), (0, 0), (0, 2), (0, 0))).reshape(n, h * wp, c)
    # Weights: OIHW -> (tap, Cin, Cout), cast once to bf16 for the MXU.
    w1 = jnp.transpose(conv1_w_oihw, (2, 3, 1, 0)).reshape(9, c, cout).astype(jnp.bfloat16)
    w2 = jnp.transpose(conv2_w_oihw, (2, 3, 1, 0)).reshape(9, cout, cout).astype(jnp.bfloat16)

    kernel, m, lyp = _make_basic_block_kernel(h, w, c, tile_m)

    out_flat = pl.pallas_call(
        kernel,
        out_shape=jax.ShapeDtypeStruct((n, m, cout), jnp.float32),
        grid=(n,),
        in_specs=[
            pl.BlockSpec((None, lx, c), lambda i: (i, 0, 0)),       # padded input, batch-squeezed
            pl.BlockSpec((None, m, c), lambda i: (i, 0, 0)),        # f32 identity
            pl.BlockSpec((9, c, cout), lambda i: (0, 0, 0)),        # constant block: no re-DMA
            pl.BlockSpec((9, cout, cout), lambda i: (0, 0, 0)),     # constant block: no re-DMA
        ],
        out_specs=pl.BlockSpec((None, m, cout), lambda i: (i, 0, 0)),
        scratch_shapes=[
            pltpu.VMEM((lyp, cout), jnp.bfloat16),                  # padded conv1 activation
        ],
        compiler_params=pltpu.CompilerParams(
            dimension_semantics=("parallel",),                      # batch steps across TCs
            vmem_limit_bytes=32 * 1024 * 1024,
        ),
    )(xp_flat, ident, w1, w2)

    # Drop the 2 wrap-around garbage columns per row, back to NCHW like PyTorch.
    out_nhwc = out_flat.reshape(n, h, wp, cout)[:, :, :w, :]
    return jnp.transpose(out_nhwc, (0, 3, 1, 2))


# --------------------------- pure-JAX f32 reference ---------------------------

def _reference(x_nchw, w1, w2):
    def conv(x, wt):
        return lax.conv_general_dilated(
            x, wt, window_strides=(1, 1), padding=((1, 1), (1, 1)),
            dimension_numbers=("NCHW", "OIHW", "NCHW"),
            precision=lax.Precision.HIGHEST,
        )
    return conv(conv(x_nchw, w1), w2) + x_nchw


# ----------------------------------- main -------------------------------------

if __name__ == "__main__":
    key = jax.random.PRNGKey(0)
    kxk, k1, k2 = jax.random.split(key, 3)

    # Small, lane-friendly BasicBlock: inplanes = planes = 128 (stride=1, no downsample),
    # batch=2, 16x16 spatial.
    N, C, H, W = 2, 128, 16, 16
    x = jax.random.normal(kxk, (N, C, H, W), jnp.float32)
    conv1_w = 0.03 * jax.random.normal(k1, (C, C, 3, 3), jnp.float32)
    conv2_w = 0.03 * jax.random.normal(k2, (C, C, 3, 3), jnp.float32)

    out = jax.jit(basic_block_forward)(x, conv1_w, conv2_w)
    out = jax.block_until_ready(out)

    ref = _reference(x, conv1_w, conv2_w)
    assert out.shape == (N, C, H, W), out.shape
    assert bool(jnp.all(jnp.isfinite(out)))
    max_err = float(jnp.max(jnp.abs(out - ref)))
    # bf16 MXU operands + bf16 intermediate activation with f32 accumulation / f32 residual:
    # tolerance sized for the K = 9*128 contractions.
    assert bool(jnp.allclose(out, ref, rtol=5e-2, atol=5e-2)), f"max abs err = {max_err}"

    print("KERNEL_OK")
</pallas_src>

<mosaic_0001>
module attributes {stable_mosaic.version = 11 : i64} {
  func.func @kernel(%arg0: i32, %arg1: memref<1x342x128xbf16, #tpu.memory_space<vmem>>, %arg2: memref<1x288x128xf32, #tpu.memory_space<vmem>>, %arg3: memref<9x128x128xbf16, #tpu.memory_space<vmem>>, %arg4: memref<9x128x128xbf16, #tpu.memory_space<vmem>>, %arg5: memref<1x288x128xf32, #tpu.memory_space<vmem>>, %arg6: memref<342x128xbf16, #tpu.memory_space<vmem>>) attributes {dimension_semantics = [#tpu.dimension_semantics<parallel>], iteration_bounds = array<i64: 2>, scalar_prefetch = 0 : i64, scratch_operands = 1 : i64, tpu.core_type = #tpu.core_type<tc>, window_params = [{transform_indices = @transform_0, window_bounds = array<i64: 1, 342, 128>}, {transform_indices = @transform_1, window_bounds = array<i64: 1, 288, 128>}, {pipeline_mode = #tpu.pipeline_mode<synchronous>, transform_indices = @transform_2, window_bounds = array<i64: 9, 128, 128>}, {pipeline_mode = #tpu.pipeline_mode<synchronous>, transform_indices = @transform_3, window_bounds = array<i64: 9, 128, 128>}, {transform_indices = @transform_4, window_bounds = array<i64: 1, 288, 128>}]} {
    %cst = arith.constant 0.000000e+00 : bf16
    %0 = vector.broadcast %cst : bf16 to vector<19x128xbf16>
    %c0 = arith.constant 0 : index
    %c0_0 = arith.constant 0 : index
    %1 = vector.load %arg6[%c0, %c0_0] : memref<342x128xbf16, #tpu.memory_space<vmem>>, vector<19x128xbf16>
    tpu.vector_store %arg6[%c0, %c0_0], %0 {strides = array<i32>} : memref<342x128xbf16, #tpu.memory_space<vmem>>, vector<19x128xbf16>,
    %cst_1 = arith.constant 0.000000e+00 : bf16
    %2 = vector.broadcast %cst_1 : bf16 to vector<35x128xbf16>
    %c307 = arith.constant 307 : index
    %c0_2 = arith.constant 0 : index
    %3 = vector.load %arg6[%c307, %c0_2] : memref<342x128xbf16, #tpu.memory_space<vmem>>, vector<35x128xbf16>
    tpu.vector_store %arg6[%c307, %c0_2], %2 {strides = array<i32>} : memref<342x128xbf16, #tpu.memory_space<vmem>>, vector<35x128xbf16>,
    %c0_3 = arith.constant 0 : index
    %c0_4 = arith.constant 0 : index
    %c0_5 = arith.constant 0 : index
    %4 = vector.load %arg1[%c0_3, %c0_4, %c0_5] : memref<1x342x128xbf16, #tpu.memory_space<vmem>>, vector<1x128x128xbf16>
    %5 = vector.shape_cast %4 : vector<1x128x128xbf16> to vector<128x128xbf16>
    %c0_6 = arith.constant 0 : index
    %c0_7 = arith.constant 0 : index
    %c0_8 = arith.constant 0 : index
    %6 = vector.load %arg3[%c0_6, %c0_7, %c0_8] : memref<9x128x128xbf16, #tpu.memory_space<vmem>>, vector<1x128x128xbf16>
    %7 = vector.shape_cast %6 : vector<1x128x128xbf16> to vector<128x128xbf16>
    %cst_9 = arith.constant dense<0.000000e+00> : vector<128x128xf32>
    %8 = tpu.matmul %5, %7, %cst_9 {dimension_numbers = #tpu.dot_dimension_numbers<[1], [0], [0], [1], [0, 0, 1, 1], [], []>} : vector<128x128xbf16>, vector<128x128xbf16>, vector<128x128xf32> -> vector<128x128xf32>
    %c0_10 = arith.constant 0 : index
    %c1 = arith.constant 1 : index
    %c0_11 = arith.constant 0 : index
    %9 = vector.load %arg1[%c0_10, %c1, %c0_11] : memref<1x342x128xbf16, #tpu.memory_space<vmem>>, vector<1x128x128xbf16>
    %10 = vector.shape_cast %9 : vector<1x128x128xbf16> to vector<128x128xbf16>
    %c1_12 = arith.constant 1 : index
    %c0_13 = arith.constant 0 : index
    %c0_14 = arith.constant 0 : index
    %11 = vector.load %arg3[%c1_12, %c0_13, %c0_14] : memref<9x128x128xbf16, #tpu.memory_space<vmem>>, vector<1x128x128xbf16>
    %12 = vector.shape_cast %11 : vector<1x128x128xbf16> to vector<128x128xbf16>
    %cst_15 = arith.constant dense<0.000000e+00> : vector<128x128xf32>
    %13 = tpu.matmul %10, %12, %cst_15 {dimension_numbers = #tpu.dot_dimension_numbers<[1], [0], [0], [1], [0, 0, 1, 1], [], []>} : vector<128x128xbf16>, vector<128x128xbf16>, vector<128x128xf32> -> vector<128x128xf32>
    %14 = arith.addf %8, %13 : vector<128x128xf32>
    %c0_16 = arith.constant 0 : index
    %c2 = arith.constant 2 : index
    %c0_17 = arith.constant 0 : index
    %15 = vector.load %arg1[%c0_16, %c2, %c0_17] : memref<1x342x128xbf16, #tpu.memory_space<vmem>>, vector<1x128x128xbf16>
    %16 = vector.shape_cast %15 : vector<1x128x128xbf16> to vector<128x128xbf16>
    %c2_18 = arith.constant 2 : index
    %c0_19 = arith.constant 0 : index
    %c0_20 = arith.constant 0 : index
    %17 = vector.load %arg3[%c2_18, %c0_19, %c0_20] : memref<9x128x128xbf16, #tpu.memory_space<vmem>>, vector<1x128x128xbf16>
    %18 = vector.shape_cast %17 : vector<1x128x128xbf16> to vector<128x128xbf16>
    %cst_21 = arith.constant dense<0.000000e+00> : vector<128x128xf32>
    %19 = tpu.matmul %16, %18, %cst_21 {dimension_numbers = #tpu.dot_dimension_numbers<[1], [0], [0], [1], [0, 0, 1, 1], [], []>} : vector<128x128xbf16>, vector<128x128xbf16>, vector<128x128xf32> -> vector<128x128xf32>
    %20 = arith.addf %14, %19 : vector<128x128xf32>
    %c0_22 = arith.constant 0 : index
    %c18 = arith.constant 18 : index
    %c0_23 = arith.constant 0 : index
    %21 = vector.load %arg1[%c0_22, %c18, %c0_23] : memref<1x342x128xbf16, #tpu.memory_space<vmem>>, vector<1x128x128xbf16>
    %22 = vector.shape_cast %21 : vector<1x128x128xbf16> to vector<128x128xbf16>
    %c3 = arith.constant 3 : index
    %c0_24 = arith.constant 0 : index
    %c0_25 = arith.constant 0 : index
    %23 = vector.load %arg3[%c3, %c0_24, %c0_25] : memref<9x128x128xbf16, #tpu.memory_space<vmem>>, vector<1x128x128xbf16>
    %24 = vector.shape_cast %23 : vector<1x128x128xbf16> to vector<128x128xbf16>
    %cst_26 = arith.constant dense<0.000000e+00> : vector<128x128xf32>
    %25 = tpu.matmul %22, %24, %cst_26 {dimension_numbers = #tpu.dot_dimension_numbers<[1], [0], [0], [1], [0, 0, 1, 1], [], []>} : vector<128x128xbf16>, vector<128x128xbf16>, vector<128x128xf32> -> vector<128x128xf32>
    %26 = arith.addf %20, %25 : vector<128x128xf32>
    %c0_27 = arith.constant 0 : index
    %c19 = arith.constant 19 : index
    %c0_28 = arith.constant 0 : index
    %27 = vector.load %arg1[%c0_27, %c19, %c0_28] : memref<1x342x128xbf16, #tpu.memory_space<vmem>>, vector<1x128x128xbf16>
    %28 = vector.shape_cast %27 : vector<1x128x128xbf16> to vector<128x128xbf16>
    %c4 = arith.constant 4 : index
    %c0_29 = arith.constant 0 : index
    %c0_30 = arith.constant 0 : index
    %29 = vector.load %arg3[%c4, %c0_29, %c0_30] : memref<9x128x128xbf16, #tpu.memory_space<vmem>>, vector<1x128x128xbf16>
    %30 = vector.shape_cast %29 : vector<1x128x128xbf16> to vector<128x128xbf16>
    %cst_31 = arith.constant dense<0.000000e+00> : vector<128x128xf32>
    %31 = tpu.matmul %28, %30, %cst_31 {dimension_numbers = #tpu.dot_dimension_numbers<[1], [0], [0], [1], [0, 0, 1, 1], [], []>} : vector<128x128xbf16>, vector<128x128xbf16>, vector<128x128xf32> -> vector<128x128xf32>
    %32 = arith.addf %26, %31 : vector<128x128xf32>
    %c0_32 = arith.constant 0 : index
    %c20 = arith.constant 20 : index
    %c0_33 = arith.constant 0 : index
    %33 = vector.load %arg1[%c0_32, %c20, %c0_33] : memref<1x342x128xbf16, #tpu.memory_space<vmem>>, vector<1x128x128xbf16>
    %34 = vector.shape_cast %33 : vector<1x128x128xbf16> to vector<128x128xbf16>
    %c5 = arith.constant 5 : index
    %c0_34 = arith.constant 0 : index
    %c0_35 = arith.constant 0 : index
    %35 = vector.load %arg3[%c5, %c0_34, %c0_35] : memref<9x128x128xbf16, #tpu.memory_space<vmem>>, vector<1x128x128xbf16>
    %36 = vector.shape_cast %35 : vector<1x128x128xbf16> to vector<128x128xbf16>
    %cst_36 = arith.constant dense<0.000000e+00> : vector<128x128xf32>
    %37 = tpu.matmul %34, %36, %cst_36 {dimension_numbers = #tpu.dot_dimension_numbers<[1], [0], [0], [1], [0, 0, 1, 1], [], []>} : vector<128x128xbf16>, vector<128x128xbf16>, vector<128x128xf32> -> vector<128x128xf32>
    %38 = arith.addf %32, %37 : vector<128x128xf32>
    %c0_37 = arith.constant 0 : index
    %c36 = arith.constant 36 : index
    %c0_38 = arith.constant 0 : index
    %39 = vector.load %arg1[%c0_37, %c36, %c0_38] : memref<1x342x128xbf16, #tpu.memory_space<vmem>>, vector<1x128x128xbf16>
    %40 = vector.shape_cast %39 : vector<1x128x128xbf16> to vector<128x128xbf16>
    %c6 = arith.constant 6 : index
    %c0_39 = arith.constant 0 : index
    %c0_40 = arith.constant 0 : index
    %41 = vector.load %arg3[%c6, %c0_39, %c0_40] : memref<9x128x128xbf16, #tpu.memory_space<vmem>>, vector<1x128x128xbf16>
    %42 = vector.shape_cast %41 : vector<1x128x128xbf16> to vector<128x128xbf16>
    %cst_41 = arith.constant dense<0.000000e+00> : vector<128x128xf32>
    %43 = tpu.matmul %40, %42, %cst_41 {dimension_numbers = #tpu.dot_dimension_numbers<[1], [0], [0], [1], [0, 0, 1, 1], [], []>} : vector<128x128xbf16>, vector<128x128xbf16>, vector<128x128xf32> -> vector<128x128xf32>
    %44 = arith.addf %38, %43 : vector<128x128xf32>
    %c0_42 = arith.constant 0 : index
    %c37 = arith.constant 37 : index
    %c0_43 = arith.constant 0 : index
    %45 = vector.load %arg1[%c0_42, %c37, %c0_43] : memref<1x342x128xbf16, #tpu.memory_space<vmem>>, vector<1x128x128xbf16>
    %46 = vector.shape_cast %45 : vector<1x128x128xbf16> to vector<128x128xbf16>
    %c7 = arith.constant 7 : index
    %c0_44 = arith.constant 0 : index
    %c0_45 = arith.constant 0 : index
    %47 = vector.load %arg3[%c7, %c0_44, %c0_45] : memref<9x128x128xbf16, #tpu.memory_space<vmem>>, vector<1x128x128xbf16>
    %48 = vector.shape_cast %47 : vector<1x128x128xbf16> to vector<128x128xbf16>
    %cst_46 = arith.constant dense<0.000000e+00> : vector<128x128xf32>
    %49 = tpu.matmul %46, %48, %cst_46 {dimension_numbers = #tpu.dot_dimension_numbers<[1], [0], [0], [1], [0, 0, 1, 1], [], []>} : vector<128x128xbf16>, vector<128x128xbf16>, vector<128x128xf32> -> vector<128x128xf32>
    %50 = arith.addf %44, %49 : vector<128x128xf32>
    %c0_47 = arith.constant 0 : index
    %c38 = arith.constant 38 : index
    %c0_48 = arith.constant 0 : index
    %51 = vector.load %arg1[%c0_47, %c38, %c0_48] : memref<1x342x128xbf16, #tpu.memory_space<vmem>>, vector<1x128x128xbf16>
    %52 = vector.shape_cast %51 : vector<1x128x128xbf16> to vector<128x128xbf16>
    %c8 = arith.constant 8 : index
    %c0_49 = arith.constant 0 : index
    %c0_50 = arith.constant 0 : index
    %53 = vector.load %arg3[%c8, %c0_49, %c0_50] : memref<9x128x128xbf16, #tpu.memory_space<vmem>>, vector<1x128x128xbf16>
    %54 = vector.shape_cast %53 : vector<1x128x128xbf16> to vector<128x128xbf16>
    %cst_51 = arith.constant dense<0.000000e+00> : vector<128x128xf32>
    %55 = tpu.matmul %52, %54, %cst_51 {dimension_numbers = #tpu.dot_dimension_numbers<[1], [0], [0], [1], [0, 0, 1, 1], [], []>} : vector<128x128xbf16>, vector<128x128xbf16>, vector<128x128xf32> -> vector<128x128xf32>
    %56 = arith.addf %50, %55 : vector<128x128xf32>
    %57 = tpu.iota {dimensions = array<i32: 0>} : vector<128x128xi32>
    %c0_i32 = arith.constant 0 : i32
    %58 = vector.broadcast %c0_i32 : i32 to vector<128x128xi32>
    %59 = arith.addi %57, %58 : vector<128x128xi32>
    %c18_i32 = arith.constant 18 : i32
    %c0_i32_52 = arith.constant 0 : i32
    %60 = arith.cmpi eq, %c18_i32, %c0_i32_52 : i32
    %c1_i32 = arith.constant 1 : i32
    %61 = arith.select %60, %c1_i32, %c18_i32 : i32
    %62 = vector.broadcast %61 : i32 to vector<128x128xi32>
    %63 = arith.remsi %59, %62 : vector<128x128xi32>
    %c0_i32_53 = arith.constant 0 : i32
    %64 = vector.broadcast %c0_i32_53 : i32 to vector<128x128xi32>
    %65 = arith.cmpi ne, %63, %64 : vector<128x128xi32>
    %c0_i32_54 = arith.constant 0 : i32
    %66 = vector.broadcast %c0_i32_54 : i32 to vector<128x128xi32>
    %67 = arith.cmpi slt, %63, %66 : vector<128x128xi32>
    %c0_i32_55 = arith.constant 0 : i32
    %68 = arith.cmpi slt, %61, %c0_i32_55 : i32
    %69 = vector.broadcast %68 : i1 to vector<128x128xi1>
    %70 = vector.broadcast %69 : vector<128x128xi1> to vector<128x128xi1>
    %71 = arith.xori %67, %70 : vector<128x128xi1>
    %72 = arith.andi %71, %65 : vector<128x128xi1>
    %73 = vector.broadcast %61 : i32 to vector<128x128xi32>
    %74 = arith.addi %63, %73 : vector<128x128xi32>
    %75 = arith.select %72, %74, %63 : vector<128x128xi1>, vector<128x128xi32>
    %c16_i32 = arith.constant 16 : i32
    %76 = vector.broadcast %c16_i32 : i32 to vector<128x128xi32>
    %77 = arith.cmpi slt, %75, %76 : vector<128x128xi32>
    %cst_56 = arith.constant 0.000000e+00 : f32
    %78 = vector.broadcast %cst_56 : f32 to vector<128x128xf32>
    %79 = arith.select %77, %56, %78 : vector<128x128xi1>, vector<128x128xf32>
    %80 = arith.truncf %79 : vector<128x128xf32> to vector<128x128xbf16>
    %c19_57 = arith.constant 19 : index
    %c0_58 = arith.constant 0 : index
    %81 = vector.load %arg6[%c19_57, %c0_58] : memref<342x128xbf16, #tpu.memory_space<vmem>>, vector<128x128xbf16>
    tpu.vector_store %arg6[%c19_57, %c0_58], %80 {strides = array<i32>} : memref<342x128xbf16, #tpu.memory_space<vmem>>, vector<128x128xbf16>,
    %c0_59 = arith.constant 0 : index
    %c128 = arith.constant 128 : index
    %c0_60 = arith.constant 0 : index
    %82 = vector.load %arg1[%c0_59, %c128, %c0_60] : memref<1x342x128xbf16, #tpu.memory_space<vmem>>, vector<1x128x128xbf16>
    %83 = vector.shape_cast %82 : vector<1x128x128xbf16> to vector<128x128xbf16>
    %c0_61 = arith.constant 0 : index
    %c0_62 = arith.constant 0 : index
    %c0_63 = arith.constant 0 : index
    %84 = vector.load %arg3[%c0_61, %c0_62, %c0_63] : memref<9x128x128xbf16, #tpu.memory_space<vmem>>, vector<1x128x128xbf16>
    %85 = vector.shape_cast %84 : vector<1x128x128xbf16> to vector<128x128xbf16>
    %cst_64 = arith.constant dense<0.000000e+00> : vector<128x128xf32>
    %86 = tpu.matmul %83, %85, %cst_64 {dimension_numbers = #tpu.dot_dimension_numbers<[1], [0], [0], [1], [0, 0, 1, 1], [], []>} : vector<128x128xbf16>, vector<128x128xbf16>, vector<128x128xf32> -> vector<128x128xf32>
    %c0_65 = arith.constant 0 : index
    %c129 = arith.constant 129 : index
    %c0_66 = arith.constant 0 : index
    %87 = vector.load %arg1[%c0_65, %c129, %c0_66] : memref<1x342x128xbf16, #tpu.memory_space<vmem>>, vector<1x128x128xbf16>
    %88 = vector.shape_cast %87 : vector<1x128x128xbf16> to vector<128x128xbf16>
    %c1_67 = arith.constant 1 : index
    %c0_68 = arith.constant 0 : index
    %c0_69 = arith.constant 0 : index
    %89 = vector.load %arg3[%c1_67, %c0_68, %c0_69] : memref<9x128x128xbf16, #tpu.memory_space<vmem>>, vector<1x128x128xbf16>
    %90 = vector.shape_cast %89 : vector<1x128x128xbf16> to vector<128x128xbf16>
    %cst_70 = arith.constant dense<0.000000e+00> : vector<128x128xf32>
    %91 = tpu.matmul %88, %90, %cst_70 {dimension_numbers = #tpu.dot_dimension_numbers<[1], [0], [0], [1], [0, 0, 1, 1], [], []>} : vector<128x128xbf16>, vector<128x128xbf16>, vector<128x128xf32> -> vector<128x128xf32>
    %92 = arith.addf %86, %91 : vector<128x128xf32>
    %c0_71 = arith.constant 0 : index
    %c130 = arith.constant 130 : index
    %c0_72 = arith.constant 0 : index
    %93 = vector.load %arg1[%c0_71, %c130, %c0_72] : memref<1x342x128xbf16, #tpu.memory_space<vmem>>, vector<1x128x128xbf16>
    %94 = vector.shape_cast %93 : vector<1x128x128xbf16> to vector<128x128xbf16>
    %c2_73 = arith.constant 2 : index
    %c0_74 = arith.constant 0 : index
    %c0_75 = arith.constant 0 : index
    %95 = vector.load %arg3[%c2_73, %c0_74, %c0_75] : memref<9x128x128xbf16, #tpu.memory_space<vmem>>, vector<1x128x128xbf16>
    %96 = vector.shape_cast %95 : vector<1x128x128xbf16> to vector<128x128xbf16>
    %cst_76 = arith.constant dense<0.000000e+00> : vector<128x128xf32>
    %97 = tpu.matmul %94, %96, %cst_76 {dimension_numbers = #tpu.dot_dimension_numbers<[1], [0], [0], [1], [0, 0, 1, 1], [], []>} : vector<128x128xbf16>, vector<128x128xbf16>, vector<128x128xf32> -> vector<128x128xf32>
    %98 = arith.addf %92, %97 : vector<128x128xf32>
    %c0_77 = arith.constant 0 : index
    %c146 = arith.constant 146 : index
    %c0_78 = arith.constant 0 : index
    %99 = vector.load %arg1[%c0_77, %c146, %c0_78] : memref<1x342x128xbf16, #tpu.memory_space<vmem>>, vector<1x128x128xbf16>
    %100 = vector.shape_cast %99 : vector<1x128x128xbf16> to vector<128x128xbf16>
    %c3_79 = arith.constant 3 : index
    %c0_80 = arith.constant 0 : index
    %c0_81 = arith.constant 0 : index
    %101 = vector.load %arg3[%c3_79, %c0_80, %c0_81] : memref<9x128x128xbf16, #tpu.memory_space<vmem>>, vector<1x128x128xbf16>
    %102 = vector.shape_cast %101 : vector<1x128x128xbf16> to vector<128x128xbf16>
    %cst_82 = arith.constant dense<0.000000e+00> : vector<128x128xf32>
    %103 = tpu.matmul %100, %102, %cst_82 {dimension_numbers = #tpu.dot_dimension_numbers<[1], [0], [0], [1], [0, 0, 1, 1], [], []>} : vector<128x128xbf16>, vector<128x128xbf16>, vector<128x128xf32> -> vector<128x128xf32>
    %104 = arith.addf %98, %103 : vector<128x128xf32>
    %c0_83 = arith.constant 0 : index
    %c147 = arith.constant 147 : index
    %c0_84 = arith.constant 0 : index
    %105 = vector.load %arg1[%c0_83, %c147, %c0_84] : memref<1x342x128xbf16, #tpu.memory_space<vmem>>, vector<1x128x128xbf16>
    %106 = vector.shape_cast %105 : vector<1x128x128xbf16> to vector<128x128xbf16>
    %c4_85 = arith.constant 4 : index
    %c0_86 = arith.constant 0 : index
    %c0_87 = arith.constant 0 : index
    %107 = vector.load %arg3[%c4_85, %c0_86, %c0_87] : memref<9x128x128xbf16, #tpu.memory_space<vmem>>, vector<1x128x128xbf16>
    %108 = vector.shape_cast %107 : vector<1x128x128xbf16> to vector<128x128xbf16>
    %cst_88 = arith.constant dense<0.000000e+00> : vector<128x128xf32>
    %109 = tpu.matmul %106, %108, %cst_88 {dimension_numbers = #tpu.dot_dimension_numbers<[1], [0], [0], [1], [0, 0, 1, 1], [], []>} : vector<128x128xbf16>, vector<128x128xbf16>, vector<128x128xf32> -> vector<128x128xf32>
    %110 = arith.addf %104, %109 : vector<128x128xf32>
    %c0_89 = arith.constant 0 : index
    %c148 = arith.constant 148 : index
    %c0_90 = arith.constant 0 : index
    %111 = vector.load %arg1[%c0_89, %c148, %c0_90] : memref<1x342x128xbf16, #tpu.memory_space<vmem>>, vector<1x128x128xbf16>
    %112 = vector.shape_cast %111 : vector<1x128x128xbf16> to vector<128x128xbf16>
    %c5_91 = arith.constant 5 : index
    %c0_92 = arith.constant 0 : index
    %c0_93 = arith.constant 0 : index
    %113 = vector.load %arg3[%c5_91, %c0_92, %c0_93] : memref<9x128x128xbf16, #tpu.memory_space<vmem>>, vector<1x128x128xbf16>
    %114 = vector.shape_cast %113 : vector<1x128x128xbf16> to vector<128x128xbf16>
    %cst_94 = arith.constant dense<0.000000e+00> : vector<128x128xf32>
    %115 = tpu.matmul %112, %114, %cst_94 {dimension_numbers = #tpu.dot_dimension_numbers<[1], [0], [0], [1], [0, 0, 1, 1], [], []>} : vector<128x128xbf16>, vector<128x128xbf16>, vector<128x128xf32> -> vector<128x128xf32>
    %116 = arith.addf %110, %115 : vector<128x128xf32>
    %c0_95 = arith.constant 0 : index
    %c164 = arith.constant 164 : index
    %c0_96 = arith.constant 0 : index
    %117 = vector.load %arg1[%c0_95, %c164, %c0_96] : memref<1x342x128xbf16, #tpu.memory_space<vmem>>, vector<1x128x128xbf16>
    %118 = vector.shape_cast %117 : vector<1x128x128xbf16> to vector<128x128xbf16>
    %c6_97 = arith.constant 6 : index
    %c0_98 = arith.constant 0 : index
    %c0_99 = arith.constant 0 : index
    %119 = vector.load %arg3[%c6_97, %c0_98, %c0_99] : memref<9x128x128xbf16, #tpu.memory_space<vmem>>, vector<1x128x128xbf16>
    %120 = vector.shape_cast %119 : vector<1x128x128xbf16> to vector<128x128xbf16>
    %cst_100 = arith.constant dense<0.000000e+00> : vector<128x128xf32>
    %121 = tpu.matmul %118, %120, %cst_100 {dimension_numbers = #tpu.dot_dimension_numbers<[1], [0], [0], [1], [0, 0, 1, 1], [], []>} : vector<128x128xbf16>, vector<128x128xbf16>, vector<128x128xf32> -> vector<128x128xf32>
    %122 = arith.addf %116, %121 : vector<128x128xf32>
    %c0_101 = arith.constant 0 : index
    %c165 = arith.constant 165 : index
    %c0_102 = arith.constant 0 : index
    %123 = vector.load %arg1[%c0_101, %c165, %c0_102] : memref<1x342x128xbf16, #tpu.memory_space<vmem>>, vector<1x128x128xbf16>
    %124 = vector.shape_cast %123 : vector<1x128x128xbf16> to vector<128x128xbf16>
    %c7_103 = arith.constant 7 : index
    %c0_104 = arith.constant 0 : index
    %c0_105 = arith.constant 0 : index
    %125 = vector.load %arg3[%c7_103, %c0_104, %c0_105] : memref<9x128x128xbf16, #tpu.memory_space<vmem>>, vector<1x128x128xbf16>
    %126 = vector.shape_cast %125 : vector<1x128x128xbf16> to vector<128x128xbf16>
    %cst_106 = arith.constant dense<0.000000e+00> : vector<128x128xf32>
    %127 = tpu.matmul %124, %126, %cst_106 {dimension_numbers = #tpu.dot_dimension_numbers<[1], [0], [0], [1], [0, 0, 1, 1], [], []>} : vector<128x128xbf16>, vector<128x128xbf16>, vector<128x128xf32> -> vector<128x128xf32>
    %128 = arith.addf %122, %127 : vector<128x128xf32>
    %c0_107 = arith.constant 0 : index
    %c166 = arith.constant 166 : index
    %c0_108 = arith.constant 0 : index
    %129 = vector.load %arg1[%c0_107, %c166, %c0_108] : memref<1x342x128xbf16, #tpu.memory_space<vmem>>, vector<1x128x128xbf16>
    %130 = vector.shape_cast %129 : vector<1x128x128xbf16> to vector<128x128xbf16>
    %c8_109 = arith.constant 8 : index
    %c0_110 = arith.constant 0 : index
    %c0_111 = arith.constant 0 : index
    %131 = vector.load %arg3[%c8_109, %c0_110, %c0_111] : memref<9x128x128xbf16, #tpu.memory_space<vmem>>, vector<1x128x128xbf16>
    %132 = vector.shape_cast %131 : vector<1x128x128xbf16> to vector<128x128xbf16>
    %cst_112 = arith.constant dense<0.000000e+00> : vector<128x128xf32>
    %133 = tpu.matmul %130, %132, %cst_112 {dimension_numbers = #tpu.dot_dimension_numbers<[1], [0], [0], [1], [0, 0, 1, 1], [], []>} : vector<128x128xbf16>, vector<128x128xbf16>, vector<128x128xf32> -> vector<128x128xf32>
    %134 = arith.addf %128, %133 : vector<128x128xf32>
    %135 = tpu.iota {dimensions = array<i32: 0>} : vector<128x128xi32>
    %c128_i32 = arith.constant 128 : i32
    %136 = vector.broadcast %c128_i32 : i32 to vector<128x128xi32>
    %137 = arith.addi %135, %136 : vector<128x128xi32>
    %c18_i32_113 = arith.constant 18 : i32
    %c0_i32_114 = arith.constant 0 : i32
    %138 = arith.cmpi eq, %c18_i32_113, %c0_i32_114 : i32
    %c1_i32_115 = arith.constant 1 : i32
    %139 = arith.select %138, %c1_i32_115, %c18_i32_113 : i32
    %140 = vector.broadcast %139 : i32 to vector<128x128xi32>
    %141 = arith.remsi %137, %140 : vector<128x128xi32>
    %c0_i32_116 = arith.constant 0 : i32
    %142 = vector.broadcast %c0_i32_116 : i32 to vector<128x128xi32>
    %143 = arith.cmpi ne, %141, %142 : vector<128x128xi32>
    %c0_i32_117 = arith.constant 0 : i32
    %144 = vector.broadcast %c0_i32_117 : i32 to vector<128x128xi32>
    %145 = arith.cmpi slt, %141, %144 : vector<128x128xi32>
    %c0_i32_118 = arith.constant 0 : i32
    %146 = arith.cmpi slt, %139, %c0_i32_118 : i32
    %147 = vector.broadcast %146 : i1 to vector<128x128xi1>
    %148 = vector.broadcast %147 : vector<128x128xi1> to vector<128x128xi1>
    %149 = arith.xori %145, %148 : vector<128x128xi1>
    %150 = arith.andi %149, %143 : vector<128x128xi1>
    %151 = vector.broadcast %139 : i32 to vector<128x128xi32>
    %152 = arith.addi %141, %151 : vector<128x128xi32>
    %153 = arith.select %150, %152, %141 : vector<128x128xi1>, vector<128x128xi32>
    %c16_i32_119 = arith.constant 16 : i32
    %154 = vector.broadcast %c16_i32_119 : i32 to vector<128x128xi32>
    %155 = arith.cmpi slt, %153, %154 : vector<128x128xi32>
    %cst_120 = arith.constant 0.000000e+00 : f32
    %156 = vector.broadcast %cst_120 : f32 to vector<128x128xf32>
    %157 = arith.select %155, %134, %156 : vector<128x128xi1>, vector<128x128xf32>
    %158 = arith.truncf %157 : vector<128x128xf32> to vector<128x128xbf16>
    %c147_121 = arith.constant 147 : index
    %c0_122 = arith.constant 0 : index
    %159 = vector.load %arg6[%c147_121, %c0_122] : memref<342x128xbf16, #tpu.memory_space<vmem>>, vector<128x128xbf16>
    tpu.vector_store %arg6[%c147_121, %c0_122], %158 {strides = array<i32>} : memref<342x128xbf16, #tpu.memory_space<vmem>>, vector<128x128xbf16>,
    %c0_123 = arith.constant 0 : index
    %c256 = arith.constant 256 : index
    %c0_124 = arith.constant 0 : index
    %160 = vector.load %arg1[%c0_123, %c256, %c0_124] : memref<1x342x128xbf16, #tpu.memory_space<vmem>>, vector<1x32x128xbf16>
    %161 = vector.shape_cast %160 : vector<1x32x128xbf16> to vector<32x128xbf16>
    %c0_125 = arith.constant 0 : index
    %c0_126 = arith.constant 0 : index
    %c0_127 = arith.constant 0 : index
    %162 = vector.load %arg3[%c0_125, %c0_126, %c0_127] : memref<9x128x128xbf16, #tpu.memory_space<vmem>>, vector<1x128x128xbf16>
    %163 = vector.shape_cast %162 : vector<1x128x128xbf16> to vector<128x128xbf16>
    %cst_128 = arith.constant dense<0.000000e+00> : vector<32x128xf32>
    %164 = tpu.matmul %161, %163, %cst_128 {dimension_numbers = #tpu.dot_dimension_numbers<[1], [0], [0], [1], [0, 0, 1, 1], [], []>} : vector<32x128xbf16>, vector<128x128xbf16>, vector<32x128xf32> -> vector<32x128xf32>
    %c0_129 = arith.constant 0 : index
    %c257 = arith.constant 257 : index
    %c0_130 = arith.constant 0 : index
    %165 = vector.load %arg1[%c0_129, %c257, %c0_130] : memref<1x342x128xbf16, #tpu.memory_space<vmem>>, vector<1x32x128xbf16>
    %166 = vector.shape_cast %165 : vector<1x32x128xbf16> to vector<32x128xbf16>
    %c1_131 = arith.constant 1 : index
    %c0_132 = arith.constant 0 : index
    %c0_133 = arith.constant 0 : index
    %167 = vector.load %arg3[%c1_131, %c0_132, %c0_133] : memref<9x128x128xbf16, #tpu.memory_space<vmem>>, vector<1x128x128xbf16>
    %168 = vector.shape_cast %167 : vector<1x128x128xbf16> to vector<128x128xbf16>
    %cst_134 = arith.constant dense<0.000000e+00> : vector<32x128xf32>
    %169 = tpu.matmul %166, %168, %cst_134 {dimension_numbers = #tpu.dot_dimension_numbers<[1], [0], [0], [1], [0, 0, 1, 1], [], []>} : vector<32x128xbf16>, vector<128x128xbf16>, vector<32x128xf32> -> vector<32x128xf32>
    %170 = arith.addf %164, %169 : vector<32x128xf32>
    %c0_135 = arith.constant 0 : index
    %c258 = arith.constant 258 : index
    %c0_136 = arith.constant 0 : index
    %171 = vector.load %arg1[%c0_135, %c258, %c0_136] : memref<1x342x128xbf16, #tpu.memory_space<vmem>>, vector<1x32x128xbf16>
    %172 = vector.shape_cast %171 : vector<1x32x128xbf16> to vector<32x128xbf16>
    %c2_137 = arith.constant 2 : index
    %c0_138 = arith.constant 0 : index
    %c0_139 = arith.constant 0 : index
    %173 = vector.load %arg3[%c2_137, %c0_138, %c0_139] : memref<9x128x128xbf16, #tpu.memory_space<vmem>>, vector<1x128x128xbf16>
    %174 = vector.shape_cast %173 : vector<1x128x128xbf16> to vector<128x128xbf16>
    %cst_140 = arith.constant dense<0.000000e+00> : vector<32x128xf32>
    %175 = tpu.matmul %172, %174, %cst_140 {dimension_numbers = #tpu.dot_dimension_numbers<[1], [0], [0], [1], [0, 0, 1, 1], [], []>} : vector<32x128xbf16>, vector<128x128xbf16>, vector<32x128xf32> -> vector<32x128xf32>
    %176 = arith.addf %170, %175 : vector<32x128xf32>
    %c0_141 = arith.constant 0 : index
    %c274 = arith.constant 274 : index
    %c0_142 = arith.constant 0 : index
    %177 = vector.load %arg1[%c0_141, %c274, %c0_142] : memref<1x342x128xbf16, #tpu.memory_space<vmem>>, vector<1x32x128xbf16>
    %178 = vector.shape_cast %177 : vector<1x32x128xbf16> to vector<32x128xbf16>
    %c3_143 = arith.constant 3 : index
    %c0_144 = arith.constant 0 : index
    %c0_145 = arith.constant 0 : index
    %179 = vector.load %arg3[%c3_143, %c0_144, %c0_145] : memref<9x128x128xbf16, #tpu.memory_space<vmem>>, vector<1x128x128xbf16>
    %180 = vector.shape_cast %179 : vector<1x128x128xbf16> to vector<128x128xbf16>
    %cst_146 = arith.constant dense<0.000000e+00> : vector<32x128xf32>
    %181 = tpu.matmul %178, %180, %cst_146 {dimension_numbers = #tpu.dot_dimension_numbers<[1], [0], [0], [1], [0, 0, 1, 1], [], []>} : vector<32x128xbf16>, vector<128x128xbf16>, vector<32x128xf32> -> vector<32x128xf32>
    %182 = arith.addf %176, %181 : vector<32x128xf32>
    %c0_147 = arith.constant 0 : index
    %c275 = arith.constant 275 : index
    %c0_148 = arith.constant 0 : index
    %183 = vector.load %arg1[%c0_147, %c275, %c0_148] : memref<1x342x128xbf16, #tpu.memory_space<vmem>>, vector<1x32x128xbf16>
    %184 = vector.shape_cast %183 : vector<1x32x128xbf16> to vector<32x128xbf16>
    %c4_149 = arith.constant 4 : index
    %c0_150 = arith.constant 0 : index
    %c0_151 = arith.constant 0 : index
    %185 = vector.load %arg3[%c4_149, %c0_150, %c0_151] : memref<9x128x128xbf16, #tpu.memory_space<vmem>>, vector<1x128x128xbf16>
    %186 = vector.shape_cast %185 : vector<1x128x128xbf16> to vector<128x128xbf16>
    %cst_152 = arith.constant dense<0.000000e+00> : vector<32x128xf32>
    %187 = tpu.matmul %184, %186, %cst_152 {dimension_numbers = #tpu.dot_dimension_numbers<[1], [0], [0], [1], [0, 0, 1, 1], [], []>} : vector<32x128xbf16>, vector<128x128xbf16>, vector<32x128xf32> -> vector<32x128xf32>
    %188 = arith.addf %182, %187 : vector<32x128xf32>
    %c0_153 = arith.constant 0 : index
    %c276 = arith.constant 276 : index
    %c0_154 = arith.constant 0 : index
    %189 = vector.load %arg1[%c0_153, %c276, %c0_154] : memref<1x342x128xbf16, #tpu.memory_space<vmem>>, vector<1x32x128xbf16>
    %190 = vector.shape_cast %189 : vector<1x32x128xbf16> to vector<32x128xbf16>
    %c5_155 = arith.constant 5 : index
    %c0_156 = arith.constant 0 : index
    %c0_157 = arith.constant 0 : index
    %191 = vector.load %arg3[%c5_155, %c0_156, %c0_157] : memref<9x128x128xbf16, #tpu.memory_space<vmem>>, vector<1x128x128xbf16>
    %192 = vector.shape_cast %191 : vector<1x128x128xbf16> to vector<128x128xbf16>
    %cst_158 = arith.constant dense<0.000000e+00> : vector<32x128xf32>
    %193 = tpu.matmul %190, %192, %cst_158 {dimension_numbers = #tpu.dot_dimension_numbers<[1], [0], [0], [1], [0, 0, 1, 1], [], []>} : vector<32x128xbf16>, vector<128x128xbf16>, vector<32x128xf32> -> vector<32x128xf32>
    %194 = arith.addf %188, %193 : vector<32x128xf32>
    %c0_159 = arith.constant 0 : index
    %c292 = arith.constant 292 : index
    %c0_160 = arith.constant 0 : index
    %195 = vector.load %arg1[%c0_159, %c292, %c0_160] : memref<1x342x128xbf16, #tpu.memory_space<vmem>>, vector<1x32x128xbf16>
    %196 = vector.shape_cast %195 : vector<1x32x128xbf16> to vector<32x128xbf16>
    %c6_161 = arith.constant 6 : index
    %c0_162 = arith.constant 0 : index
    %c0_163 = arith.constant 0 : index
    %197 = vector.load %arg3[%c6_161, %c0_162, %c0_163] : memref<9x128x128xbf16, #tpu.memory_space<vmem>>, vector<1x128x128xbf16>
    %198 = vector.shape_cast %197 : vector<1x128x128xbf16> to vector<128x128xbf16>
    %cst_164 = arith.constant dense<0.000000e+00> : vector<32x128xf32>
    %199 = tpu.matmul %196, %198, %cst_164 {dimension_numbers = #tpu.dot_dimension_numbers<[1], [0], [0], [1], [0, 0, 1, 1], [], []>} : vector<32x128xbf16>, vector<128x128xbf16>, vector<32x128xf32> -> vector<32x128xf32>
    %200 = arith.addf %194, %199 : vector<32x128xf32>
    %c0_165 = arith.constant 0 : index
    %c293 = arith.constant 293 : index
    %c0_166 = arith.constant 0 : index
    %201 = vector.load %arg1[%c0_165, %c293, %c0_166] : memref<1x342x128xbf16, #tpu.memory_space<vmem>>, vector<1x32x128xbf16>
    %202 = vector.shape_cast %201 : vector<1x32x128xbf16> to vector<32x128xbf16>
    %c7_167 = arith.constant 7 : index
    %c0_168 = arith.constant 0 : index
    %c0_169 = arith.constant 0 : index
    %203 = vector.load %arg3[%c7_167, %c0_168, %c0_169] : memref<9x128x128xbf16, #tpu.memory_space<vmem>>, vector<1x128x128xbf16>
    %204 = vector.shape_cast %203 : vector<1x128x128xbf16> to vector<128x128xbf16>
    %cst_170 = arith.constant dense<0.000000e+00> : vector<32x128xf32>
    %205 = tpu.matmul %202, %204, %cst_170 {dimension_numbers = #tpu.dot_dimension_numbers<[1], [0], [0], [1], [0, 0, 1, 1], [], []>} : vector<32x128xbf16>, vector<128x128xbf16>, vector<32x128xf32> -> vector<32x128xf32>
    %206 = arith.addf %200, %205 : vector<32x128xf32>
    %c0_171 = arith.constant 0 : index
    %c294 = arith.constant 294 : index
    %c0_172 = arith.constant 0 : index
    %207 = vector.load %arg1[%c0_171, %c294, %c0_172] : memref<1x342x128xbf16, #tpu.memory_space<vmem>>, vector<1x32x128xbf16>
    %208 = vector.shape_cast %207 : vector<1x32x128xbf16> to vector<32x128xbf16>
    %c8_173 = arith.constant 8 : index
    %c0_174 = arith.constant 0 : index
    %c0_175 = arith.constant 0 : index
    %209 = vector.load %arg3[%c8_173, %c0_174, %c0_175] : memref<9x128x128xbf16, #tpu.memory_space<vmem>>, vector<1x128x128xbf16>
    %210 = vector.shape_cast %209 : vector<1x128x128xbf16> to vector<128x128xbf16>
    %cst_176 = arith.constant dense<0.000000e+00> : vector<32x128xf32>
    %211 = tpu.matmul %208, %210, %cst_176 {dimension_numbers = #tpu.dot_dimension_numbers<[1], [0], [0], [1], [0, 0, 1, 1], [], []>} : vector<32x128xbf16>, vector<128x128xbf16>, vector<32x128xf32> -> vector<32x128xf32>
    %212 = arith.addf %206, %211 : vector<32x128xf32>
    %213 = tpu.iota {dimensions = array<i32: 0>} : vector<32x128xi32>
    %c256_i32 = arith.constant 256 : i32
    %214 = vector.broadcast %c256_i32 : i32 to vector<32x128xi32>
    %215 = arith.addi %213, %214 : vector<32x128xi32>
    %c18_i32_177 = arith.constant 18 : i32
    %c0_i32_178 = arith.constant 0 : i32
    %216 = arith.cmpi eq, %c18_i32_177, %c0_i32_178 : i32
    %c1_i32_179 = arith.constant 1 : i32
    %217 = arith.select %216, %c1_i32_179, %c18_i32_177 : i32
    %218 = vector.broadcast %217 : i32 to vector<32x128xi32>
    %219 = arith.remsi %215, %218 : vector<32x128xi32>
    %c0_i32_180 = arith.constant 0 : i32
    %220 = vector.broadcast %c0_i32_180 : i32 to vector<32x128xi32>
    %221 = arith.cmpi ne, %219, %220 : vector<32x128xi32>
    %c0_i32_181 = arith.constant 0 : i32
    %222 = vector.broadcast %c0_i32_181 : i32 to vector<32x128xi32>
    %223 = arith.cmpi slt, %219, %222 : vector<32x128xi32>
    %c0_i32_182 = arith.constant 0 : i32
    %224 = arith.cmpi slt, %217, %c0_i32_182 : i32
    %225 = vector.broadcast %224 : i1 to vector<32x128xi1>
    %226 = vector.broadcast %225 : vector<32x128xi1> to vector<32x128xi1>
    %227 = arith.xori %223, %226 : vector<32x128xi1>
    %228 = arith.andi %227, %221 : vector<32x128xi1>
    %229 = vector.broadcast %217 : i32 to vector<32x128xi32>
    %230 = arith.addi %219, %229 : vector<32x128xi32>
    %231 = arith.select %228, %230, %219 : vector<32x128xi1>, vector<32x128xi32>
    %c16_i32_183 = arith.constant 16 : i32
    %232 = vector.broadcast %c16_i32_183 : i32 to vector<32x128xi32>
    %233 = arith.cmpi slt, %231, %232 : vector<32x128xi32>
    %cst_184 = arith.constant 0.000000e+00 : f32
    %234 = vector.broadcast %cst_184 : f32 to vector<32x128xf32>
    %235 = arith.select %233, %212, %234 : vector<32x128xi1>, vector<32x128xf32>
    %236 = arith.truncf %235 : vector<32x128xf32> to vector<32x128xbf16>
    %c275_185 = arith.constant 275 : index
    %c0_186 = arith.constant 0 : index
    %237 = vector.load %arg6[%c275_185, %c0_186] : memref<342x128xbf16, #tpu.memory_space<vmem>>, vector<32x128xbf16>
    tpu.vector_store %arg6[%c275_185, %c0_186], %236 {strides = array<i32>} : memref<342x128xbf16, #tpu.memory_space<vmem>>, vector<32x128xbf16>,
    %c0_187 = arith.constant 0 : index
    %c0_188 = arith.constant 0 : index
    %238 = vector.load %arg6[%c0_187, %c0_188] : memref<342x128xbf16, #tpu.memory_space<vmem>>, vector<128x128xbf16>
    %c0_189 = arith.constant 0 : index
    %c0_190 = arith.constant 0 : index
    %c0_191 = arith.constant 0 : index
    %239 = vector.load %arg4[%c0_189, %c0_190, %c0_191] : memref<9x128x128xbf16, #tpu.memory_space<vmem>>, vector<1x128x128xbf16>
    %240 = vector.shape_cast %239 : vector<1x128x128xbf16> to vector<128x128xbf16>
    %cst_192 = arith.constant dense<0.000000e+00> : vector<128x128xf32>
    %241 = tpu.matmul %238, %240, %cst_192 {dimension_numbers = #tpu.dot_dimension_numbers<[1], [0], [0], [1], [0, 0, 1, 1], [], []>} : vector<128x128xbf16>, vector<128x128xbf16>, vector<128x128xf32> -> vector<128x128xf32>
    %c1_193 = arith.constant 1 : index
    %c0_194 = arith.constant 0 : index
    %242 = vector.load %arg6[%c1_193, %c0_194] : memref<342x128xbf16, #tpu.memory_space<vmem>>, vector<128x128xbf16>
    %c1_195 = arith.constant 1 : index
    %c0_196 = arith.constant 0 : index
    %c0_197 = arith.constant 0 : index
    %243 = vector.load %arg4[%c1_195, %c0_196, %c0_197] : memref<9x128x128xbf16, #tpu.memory_space<vmem>>, vector<1x128x128xbf16>
    %244 = vector.shape_cast %243 : vector<1x128x128xbf16> to vector<128x128xbf16>
    %cst_198 = arith.constant dense<0.000000e+00> : vector<128x128xf32>
    %245 = tpu.matmul %242, %244, %cst_198 {dimension_numbers = #tpu.dot_dimension_numbers<[1], [0], [0], [1], [0, 0, 1, 1], [], []>} : vector<128x128xbf16>, vector<128x128xbf16>, vector<128x128xf32> -> vector<128x128xf32>
    %246 = arith.addf %241, %245 : vector<128x128xf32>
    %c2_199 = arith.constant 2 : index
    %c0_200 = arith.constant 0 : index
    %247 = vector.load %arg6[%c2_199, %c0_200] : memref<342x128xbf16, #tpu.memory_space<vmem>>, vector<128x128xbf16>
    %c2_201 = arith.constant 2 : index
    %c0_202 = arith.constant 0 : index
    %c0_203 = arith.constant 0 : index
    %248 = vector.load %arg4[%c2_201, %c0_202, %c0_203] : memref<9x128x128xbf16, #tpu.memory_space<vmem>>, vector<1x128x128xbf16>
    %249 = vector.shape_cast %248 : vector<1x128x128xbf16> to vector<128x128xbf16>
    %cst_204 = arith.constant dense<0.000000e+00> : vector<128x128xf32>
    %250 = tpu.matmul %247, %249, %cst_204 {dimension_numbers = #tpu.dot_dimension_numbers<[1], [0], [0], [1], [0, 0, 1, 1], [], []>} : vector<128x128xbf16>, vector<128x128xbf16>, vector<128x128xf32> -> vector<128x128xf32>
    %251 = arith.addf %246, %250 : vector<128x128xf32>
    %c18_205 = arith.constant 18 : index
    %c0_206 = arith.constant 0 : index
    %252 = vector.load %arg6[%c18_205, %c0_206] : memref<342x128xbf16, #tpu.memory_space<vmem>>, vector<128x128xbf16>
    %c3_207 = arith.constant 3 : index
    %c0_208 = arith.constant 0 : index
    %c0_209 = arith.constant 0 : index
    %253 = vector.load %arg4[%c3_207, %c0_208, %c0_209] : memref<9x128x128xbf16, #tpu.memory_space<vmem>>, vector<1x128x128xbf16>
    %254 = vector.shape_cast %253 : vector<1x128x128xbf16> to vector<128x128xbf16>
    %cst_210 = arith.constant dense<0.000000e+00> : vector<128x128xf32>
    %255 = tpu.matmul %252, %254, %cst_210 {dimension_numbers = #tpu.dot_dimension_numbers<[1], [0], [0], [1], [0, 0, 1, 1], [], []>} : vector<128x128xbf16>, vector<128x128xbf16>, vector<128x128xf32> -> vector<128x128xf32>
    %256 = arith.addf %251, %255 : vector<128x128xf32>
    %c19_211 = arith.constant 19 : index
    %c0_212 = arith.constant 0 : index
    %257 = vector.load %arg6[%c19_211, %c0_212] : memref<342x128xbf16, #tpu.memory_space<vmem>>, vector<128x128xbf16>
    %c4_213 = arith.constant 4 : index
    %c0_214 = arith.constant 0 : index
    %c0_215 = arith.constant 0 : index
    %258 = vector.load %arg4[%c4_213, %c0_214, %c0_215] : memref<9x128x128xbf16, #tpu.memory_space<vmem>>, vector<1x128x128xbf16>
    %259 = vector.shape_cast %258 : vector<1x128x128xbf16> to vector<128x128xbf16>
    %cst_216 = arith.constant dense<0.000000e+00> : vector<128x128xf32>
    %260 = tpu.matmul %257, %259, %cst_216 {dimension_numbers = #tpu.dot_dimension_numbers<[1], [0], [0], [1], [0, 0, 1, 1], [], []>} : vector<128x128xbf16>, vector<128x128xbf16>, vector<128x128xf32> -> vector<128x128xf32>
    %261 = arith.addf %256, %260 : vector<128x128xf32>
    %c20_217 = arith.constant 20 : index
    %c0_218 = arith.constant 0 : index
    %262 = vector.load %arg6[%c20_217, %c0_218] : memref<342x128xbf16, #tpu.memory_space<vmem>>, vector<128x128xbf16>
    %c5_219 = arith.constant 5 : index
    %c0_220 = arith.constant 0 : index
    %c0_221 = arith.constant 0 : index
    %263 = vector.load %arg4[%c5_219, %c0_220, %c0_221] : memref<9x128x128xbf16, #tpu.memory_space<vmem>>, vector<1x128x128xbf16>
    %264 = vector.shape_cast %263 : vector<1x128x128xbf16> to vector<128x128xbf16>
    %cst_222 = arith.constant dense<0.000000e+00> : vector<128x128xf32>
    %265 = tpu.matmul %262, %264, %cst_222 {dimension_numbers = #tpu.dot_dimension_numbers<[1], [0], [0], [1], [0, 0, 1, 1], [], []>} : vector<128x128xbf16>, vector<128x128xbf16>, vector<128x128xf32> -> vector<128x128xf32>
    %266 = arith.addf %261, %265 : vector<128x128xf32>
    %c36_223 = arith.constant 36 : index
    %c0_224 = arith.constant 0 : index
    %267 = vector.load %arg6[%c36_223, %c0_224] : memref<342x128xbf16, #tpu.memory_space<vmem>>, vector<128x128xbf16>
    %c6_225 = arith.constant 6 : index
    %c0_226 = arith.constant 0 : index
    %c0_227 = arith.constant 0 : index
    %268 = vector.load %arg4[%c6_225, %c0_226, %c0_227] : memref<9x128x128xbf16, #tpu.memory_space<vmem>>, vector<1x128x128xbf16>
    %269 = vector.shape_cast %268 : vector<1x128x128xbf16> to vector<128x128xbf16>
    %cst_228 = arith.constant dense<0.000000e+00> : vector<128x128xf32>
    %270 = tpu.matmul %267, %269, %cst_228 {dimension_numbers = #tpu.dot_dimension_numbers<[1], [0], [0], [1], [0, 0, 1, 1], [], []>} : vector<128x128xbf16>, vector<128x128xbf16>, vector<128x128xf32> -> vector<128x128xf32>
    %271 = arith.addf %266, %270 : vector<128x128xf32>
    %c37_229 = arith.constant 37 : index
    %c0_230 = arith.constant 0 : index
    %272 = vector.load %arg6[%c37_229, %c0_230] : memref<342x128xbf16, #tpu.memory_space<vmem>>, vector<128x128xbf16>
    %c7_231 = arith.constant 7 : index
    %c0_232 = arith.constant 0 : index
    %c0_233 = arith.constant 0 : index
    %273 = vector.load %arg4[%c7_231, %c0_232, %c0_233] : memref<9x128x128xbf16, #tpu.memory_space<vmem>>, vector<1x128x128xbf16>
    %274 = vector.shape_cast %273 : vector<1x128x128xbf16> to vector<128x128xbf16>
    %cst_234 = arith.constant dense<0.000000e+00> : vector<128x128xf32>
    %275 = tpu.matmul %272, %274, %cst_234 {dimension_numbers = #tpu.dot_dimension_numbers<[1], [0], [0], [1], [0, 0, 1, 1], [], []>} : vector<128x128xbf16>, vector<128x128xbf16>, vector<128x128xf32> -> vector<128x128xf32>
    %276 = arith.addf %271, %275 : vector<128x128xf32>
    %c38_235 = arith.constant 38 : index
    %c0_236 = arith.constant 0 : index
    %277 = vector.load %arg6[%c38_235, %c0_236] : memref<342x128xbf16, #tpu.memory_space<vmem>>, vector<128x128xbf16>
    %c8_237 = arith.constant 8 : index
    %c0_238 = arith.constant 0 : index
    %c0_239 = arith.constant 0 : index
    %278 = vector.load %arg4[%c8_237, %c0_238, %c0_239] : memref<9x128x128xbf16, #tpu.memory_space<vmem>>, vector<1x128x128xbf16>
    %279 = vector.shape_cast %278 : vector<1x128x128xbf16> to vector<128x128xbf16>
    %cst_240 = arith.constant dense<0.000000e+00> : vector<128x128xf32>
    %280 = tpu.matmul %277, %279, %cst_240 {dimension_numbers = #tpu.dot_dimension_numbers<[1], [0], [0], [1], [0, 0, 1, 1], [], []>} : vector<128x128xbf16>, vector<128x128xbf16>, vector<128x128xf32> -> vector<128x128xf32>
    %281 = arith.addf %276, %280 : vector<128x128xf32>
    %c0_241 = arith.constant 0 : index
    %c0_242 = arith.constant 0 : index
    %c0_243 = arith.constant 0 : index
    %282 = vector.load %arg2[%c0_241, %c0_242, %c0_243] : memref<1x288x128xf32, #tpu.memory_space<vmem>>, vector<1x128x128xf32>
    %283 = vector.shape_cast %282 : vector<1x128x128xf32> to vector<128x128xf32>
    %284 = arith.addf %281, %283 : vector<128x128xf32>
    %c0_244 = arith.constant 0 : index
    %c0_245 = arith.constant 0 : index
    %c0_246 = arith.constant 0 : index
    %285 = vector.load %arg5[%c0_244, %c0_245, %c0_246] : memref<1x288x128xf32, #tpu.memory_space<vmem>>, vector<1x128x128xf32>
    %286 = vector.shape_cast %285 : vector<1x128x128xf32> to vector<128x128xf32>
    %287 = vector.shape_cast %284 : vector<128x128xf32> to vector<1x128x128xf32>
    tpu.vector_store %arg5[%c0_244, %c0_245, %c0_246], %287 {strides = array<i32>} : memref<1x288x128xf32, #tpu.memory_space<vmem>>, vector<1x128x128xf32>,
    %c128_247 = arith.constant 128 : index
    %c0_248 = arith.constant 0 : index
    %288 = vector.load %arg6[%c128_247, %c0_248] : memref<342x128xbf16, #tpu.memory_space<vmem>>, vector<128x128xbf16>
    %c0_249 = arith.constant 0 : index
    %c0_250 = arith.constant 0 : index
    %c0_251 = arith.constant 0 : index
    %289 = vector.load %arg4[%c0_249, %c0_250, %c0_251] : memref<9x128x128xbf16, #tpu.memory_space<vmem>>, vector<1x128x128xbf16>
    %290 = vector.shape_cast %289 : vector<1x128x128xbf16> to vector<128x128xbf16>
    %cst_252 = arith.constant dense<0.000000e+00> : vector<128x128xf32>
    %291 = tpu.matmul %288, %290, %cst_252 {dimension_numbers = #tpu.dot_dimension_numbers<[1], [0], [0], [1], [0, 0, 1, 1], [], []>} : vector<128x128xbf16>, vector<128x128xbf16>, vector<128x128xf32> -> vector<128x128xf32>
    %c129_253 = arith.constant 129 : index
    %c0_254 = arith.constant 0 : index
    %292 = vector.load %arg6[%c129_253, %c0_254] : memref<342x128xbf16, #tpu.memory_space<vmem>>, vector<128x128xbf16>
    %c1_255 = arith.constant 1 : index
    %c0_256 = arith.constant 0 : index
    %c0_257 = arith.constant 0 : index
    %293 = vector.load %arg4[%c1_255, %c0_256, %c0_257] : memref<9x128x128xbf16, #tpu.memory_space<vmem>>, vector<1x128x128xbf16>
    %294 = vector.shape_cast %293 : vector<1x128x128xbf16> to vector<128x128xbf16>
    %cst_258 = arith.constant dense<0.000000e+00> : vector<128x128xf32>
    %295 = tpu.matmul %292, %294, %cst_258 {dimension_numbers = #tpu.dot_dimension_numbers<[1], [0], [0], [1], [0, 0, 1, 1], [], []>} : vector<128x128xbf16>, vector<128x128xbf16>, vector<128x128xf32> -> vector<128x128xf32>
    %296 = arith.addf %291, %295 : vector<128x128xf32>
    %c130_259 = arith.constant 130 : index
    %c0_260 = arith.constant 0 : index
    %297 = vector.load %arg6[%c130_259, %c0_260] : memref<342x128xbf16, #tpu.memory_space<vmem>>, vector<128x128xbf16>
    %c2_261 = arith.constant 2 : index
    %c0_262 = arith.constant 0 : index
    %c0_263 = arith.constant 0 : index
    %298 = vector.load %arg4[%c2_261, %c0_262, %c0_263] : memref<9x128x128xbf16, #tpu.memory_space<vmem>>, vector<1x128x128xbf16>
    %299 = vector.shape_cast %298 : vector<1x128x128xbf16> to vector<128x128xbf16>
    %cst_264 = arith.constant dense<0.000000e+00> : vector<128x128xf32>
    %300 = tpu.matmul %297, %299, %cst_264 {dimension_numbers = #tpu.dot_dimension_numbers<[1], [0], [0], [1], [0, 0, 1, 1], [], []>} : vector<128x128xbf16>, vector<128x128xbf16>, vector<128x128xf32> -> vector<128x128xf32>
    %301 = arith.addf %296, %300 : vector<128x128xf32>
    %c146_265 = arith.constant 146 : index
    %c0_266 = arith.constant 0 : index
    %302 = vector.load %arg6[%c146_265, %c0_266] : memref<342x128xbf16, #tpu.memory_space<vmem>>, vector<128x128xbf16>
    %c3_267 = arith.constant 3 : index
    %c0_268 = arith.constant 0 : index
    %c0_269 = arith.constant 0 : index
    %303 = vector.load %arg4[%c3_267, %c0_268, %c0_269] : memref<9x128x128xbf16, #tpu.memory_space<vmem>>, vector<1x128x128xbf16>
    %304 = vector.shape_cast %303 : vector<1x128x128xbf16> to vector<128x128xbf16>
    %cst_270 = arith.constant dense<0.000000e+00> : vector<128x128xf32>
    %305 = tpu.matmul %302, %304, %cst_270 {dimension_numbers = #tpu.dot_dimension_numbers<[1], [0], [0], [1], [0, 0, 1, 1], [], []>} : vector<128x128xbf16>, vector<128x128xbf16>, vector<128x128xf32> -> vector<128x128xf32>
    %306 = arith.addf %301, %305 : vector<128x128xf32>
    %c147_271 = arith.constant 147 : index
    %c0_272 = arith.constant 0 : index
    %307 = vector.load %arg6[%c147_271, %c0_272] : memref<342x128xbf16, #tpu.memory_space<vmem>>, vector<128x128xbf16>
    %c4_273 = arith.constant 4 : index
    %c0_274 = arith.constant 0 : index
    %c0_275 = arith.constant 0 : index
    %308 = vector.load %arg4[%c4_273, %c0_274, %c0_275] : memref<9x128x128xbf16, #tpu.memory_space<vmem>>, vector<1x128x128xbf16>
    %309 = vector.shape_cast %308 : vector<1x128x128xbf16> to vector<128x128xbf16>
    %cst_276 = arith.constant dense<0.000000e+00> : vector<128x128xf32>
    %310 = tpu.matmul %307, %309, %cst_276 {dimension_numbers = #tpu.dot_dimension_numbers<[1], [0], [0], [1], [0, 0, 1, 1], [], []>} : vector<128x128xbf16>, vector<128x128xbf16>, vector<128x128xf32> -> vector<128x128xf32>
    %311 = arith.addf %306, %310 : vector<128x128xf32>
    %c148_277 = arith.constant 148 : index
    %c0_278 = arith.constant 0 : index
    %312 = vector.load %arg6[%c148_277, %c0_278] : memref<342x128xbf16, #tpu.memory_space<vmem>>, vector<128x128xbf16>
    %c5_279 = arith.constant 5 : index
    %c0_280 = arith.constant 0 : index
    %c0_281 = arith.constant 0 : index
    %313 = vector.load %arg4[%c5_279, %c0_280, %c0_281] : memref<9x128x128xbf16, #tpu.memory_space<vmem>>, vector<1x128x128xbf16>
    %314 = vector.shape_cast %313 : vector<1x128x128xbf16> to vector<128x128xbf16>
    %cst_282 = arith.constant dense<0.000000e+00> : vector<128x128xf32>
    %315 = tpu.matmul %312, %314, %cst_282 {dimension_numbers = #tpu.dot_dimension_numbers<[1], [0], [0], [1], [0, 0, 1, 1], [], []>} : vector<128x128xbf16>, vector<128x128xbf16>, vector<128x128xf32> -> vector<128x128xf32>
    %316 = arith.addf %311, %315 : vector<128x128xf32>
    %c164_283 = arith.constant 164 : index
    %c0_284 = arith.constant 0 : index
    %317 = vector.load %arg6[%c164_283, %c0_284] : memref<342x128xbf16, #tpu.memory_space<vmem>>, vector<128x128xbf16>
    %c6_285 = arith.constant 6 : index
    %c0_286 = arith.constant 0 : index
    %c0_287 = arith.constant 0 : index
    %318 = vector.load %arg4[%c6_285, %c0_286, %c0_287] : memref<9x128x128xbf16, #tpu.memory_space<vmem>>, vector<1x128x128xbf16>
    %319 = vector.shape_cast %318 : vector<1x128x128xbf16> to vector<128x128xbf16>
    %cst_288 = arith.constant dense<0.000000e+00> : vector<128x128xf32>
    %320 = tpu.matmul %317, %319, %cst_288 {dimension_numbers = #tpu.dot_dimension_numbers<[1], [0], [0], [1], [0, 0, 1, 1], [], []>} : vector<128x128xbf16>, vector<128x128xbf16>, vector<128x128xf32> -> vector<128x128xf32>
    %321 = arith.addf %316, %320 : vector<128x128xf32>
    %c165_289 = arith.constant 165 : index
    %c0_290 = arith.constant 0 : index
    %322 = vector.load %arg6[%c165_289, %c0_290] : memref<342x128xbf16, #tpu.memory_space<vmem>>, vector<128x128xbf16>
    %c7_291 = arith.constant 7 : index
    %c0_292 = arith.constant 0 : index
    %c0_293 = arith.constant 0 : index
    %323 = vector.load %arg4[%c7_291, %c0_292, %c0_293] : memref<9x128x128xbf16, #tpu.memory_space<vmem>>, vector<1x128x128xbf16>
    %324 = vector.shape_cast %323 : vector<1x128x128xbf16> to vector<128x128xbf16>
    %cst_294 = arith.constant dense<0.000000e+00> : vector<128x128xf32>
    %325 = tpu.matmul %322, %324, %cst_294 {dimension_numbers = #tpu.dot_dimension_numbers<[1], [0], [0], [1], [0, 0, 1, 1], [], []>} : vector<128x128xbf16>, vector<128x128xbf16>, vector<128x128xf32> -> vector<128x128xf32>
    %326 = arith.addf %321, %325 : vector<128x128xf32>
    %c166_295 = arith.constant 166 : index
    %c0_296 = arith.constant 0 : index
    %327 = vector.load %arg6[%c166_295, %c0_296] : memref<342x128xbf16, #tpu.memory_space<vmem>>, vector<128x128xbf16>
    %c8_297 = arith.constant 8 : index
    %c0_298 = arith.constant 0 : index
    %c0_299 = arith.constant 0 : index
    %328 = vector.load %arg4[%c8_297, %c0_298, %c0_299] : memref<9x128x128xbf16, #tpu.memory_space<vmem>>, vector<1x128x128xbf16>
    %329 = vector.shape_cast %328 : vector<1x128x128xbf16> to vector<128x128xbf16>
    %cst_300 = arith.constant dense<0.000000e+00> : vector<128x128xf32>
    %330 = tpu.matmul %327, %329, %cst_300 {dimension_numbers = #tpu.dot_dimension_numbers<[1], [0], [0], [1], [0, 0, 1, 1], [], []>} : vector<128x128xbf16>, vector<128x128xbf16>, vector<128x128xf32> -> vector<128x128xf32>
    %331 = arith.addf %326, %330 : vector<128x128xf32>
    %c0_301 = arith.constant 0 : index
    %c128_302 = arith.constant 128 : index
    %c0_303 = arith.constant 0 : index
    %332 = vector.load %arg2[%c0_301, %c128_302, %c0_303] : memref<1x288x128xf32, #tpu.memory_space<vmem>>, vector<1x128x128xf32>
    %333 = vector.shape_cast %332 : vector<1x128x128xf32> to vector<128x128xf32>
    %334 = arith.addf %331, %333 : vector<128x128xf32>
    %c0_304 = arith.constant 0 : index
    %c128_305 = arith.constant 128 : index
    %c0_306 = arith.constant 0 : index
    %335 = vector.load %arg5[%c0_304, %c128_305, %c0_306] : memref<1x288x128xf32, #tpu.memory_space<vmem>>, vector<1x128x128xf32>
    %336 = vector.shape_cast %335 : vector<1x128x128xf32> to vector<128x128xf32>
    %337 = vector.shape_cast %334 : vector<128x128xf32> to vector<1x128x128xf32>
    tpu.vector_store %arg5[%c0_304, %c128_305, %c0_306], %337 {strides = array<i32>} : memref<1x288x128xf32, #tpu.memory_space<vmem>>, vector<1x128x128xf32>,
    %c256_307 = arith.constant 256 : index
    %c0_308 = arith.constant 0 : index
    %338 = vector.load %arg6[%c256_307, %c0_308] : memref<342x128xbf16, #tpu.memory_space<vmem>>, vector<32x128xbf16>
    %c0_309 = arith.constant 0 : index
    %c0_310 = arith.constant 0 : index
    %c0_311 = arith.constant 0 : index
    %339 = vector.load %arg4[%c0_309, %c0_310, %c0_311] : memref<9x128x128xbf16, #tpu.memory_space<vmem>>, vector<1x128x128xbf16>
    %340 = vector.shape_cast %339 : vector<1x128x128xbf16> to vector<128x128xbf16>
    %cst_312 = arith.constant dense<0.000000e+00> : vector<32x128xf32>
    %341 = tpu.matmul %338, %340, %cst_312 {dimension_numbers = #tpu.dot_dimension_numbers<[1], [0], [0], [1], [0, 0, 1, 1], [], []>} : vector<32x128xbf16>, vector<128x128xbf16>, vector<32x128xf32> -> vector<32x128xf32>
    %c257_313 = arith.constant 257 : index
    %c0_314 = arith.constant 0 : index
    %342 = vector.load %arg6[%c257_313, %c0_314] : memref<342x128xbf16, #tpu.memory_space<vmem>>, vector<32x128xbf16>
    %c1_315 = arith.constant 1 : index
    %c0_316 = arith.constant 0 : index
    %c0_317 = arith.constant 0 : index
    %343 = vector.load %arg4[%c1_315, %c0_316, %c0_317] : memref<9x128x128xbf16, #tpu.memory_space<vmem>>, vector<1x128x128xbf16>
    %344 = vector.shape_cast %343 : vector<1x128x128xbf16> to vector<128x128xbf16>
    %cst_318 = arith.constant dense<0.000000e+00> : vector<32x128xf32>
    %345 = tpu.matmul %342, %344, %cst_318 {dimension_numbers = #tpu.dot_dimension_numbers<[1], [0], [0], [1], [0, 0, 1, 1], [], []>} : vector<32x128xbf16>, vector<128x128xbf16>, vector<32x128xf32> -> vector<32x128xf32>
    %346 = arith.addf %341, %345 : vector<32x128xf32>
    %c258_319 = arith.constant 258 : index
    %c0_320 = arith.constant 0 : index
    %347 = vector.load %arg6[%c258_319, %c0_320] : memref<342x128xbf16, #tpu.memory_space<vmem>>, vector<32x128xbf16>
    %c2_321 = arith.constant 2 : index
    %c0_322 = arith.constant 0 : index
    %c0_323 = arith.constant 0 : index
    %348 = vector.load %arg4[%c2_321, %c0_322, %c0_323] : memref<9x128x128xbf16, #tpu.memory_space<vmem>>, vector<1x128x128xbf16>
    %349 = vector.shape_cast %348 : vector<1x128x128xbf16> to vector<128x128xbf16>
    %cst_324 = arith.constant dense<0.000000e+00> : vector<32x128xf32>
    %350 = tpu.matmul %347, %349, %cst_324 {dimension_numbers = #tpu.dot_dimension_numbers<[1], [0], [0], [1], [0, 0, 1, 1], [], []>} : vector<32x128xbf16>, vector<128x128xbf16>, vector<32x128xf32> -> vector<32x128xf32>
    %351 = arith.addf %346, %350 : vector<32x128xf32>
    %c274_325 = arith.constant 274 : index
    %c0_326 = arith.constant 0 : index
    %352 = vector.load %arg6[%c274_325, %c0_326] : memref<342x128xbf16, #tpu.memory_space<vmem>>, vector<32x128xbf16>
    %c3_327 = arith.constant 3 : index
    %c0_328 = arith.constant 0 : index
    %c0_329 = arith.constant 0 : index
    %353 = vector.load %arg4[%c3_327, %c0_328, %c0_329] : memref<9x128x128xbf16, #tpu.memory_space<vmem>>, vector<1x128x128xbf16>
    %354 = vector.shape_cast %353 : vector<1x128x128xbf16> to vector<128x128xbf16>
    %cst_330 = arith.constant dense<0.000000e+00> : vector<32x128xf32>
    %355 = tpu.matmul %352, %354, %cst_330 {dimension_numbers = #tpu.dot_dimension_numbers<[1], [0], [0], [1], [0, 0, 1, 1], [], []>} : vector<32x128xbf16>, vector<128x128xbf16>, vector<32x128xf32> -> vector<32x128xf32>
    %356 = arith.addf %351, %355 : vector<32x128xf32>
    %c275_331 = arith.constant 275 : index
    %c0_332 = arith.constant 0 : index
    %357 = vector.load %arg6[%c275_331, %c0_332] : memref<342x128xbf16, #tpu.memory_space<vmem>>, vector<32x128xbf16>
    %c4_333 = arith.constant 4 : index
    %c0_334 = arith.constant 0 : index
    %c0_335 = arith.constant 0 : index
    %358 = vector.load %arg4[%c4_333, %c0_334, %c0_335] : memref<9x128x128xbf16, #tpu.memory_space<vmem>>, vector<1x128x128xbf16>
    %359 = vector.shape_cast %358 : vector<1x128x128xbf16> to vector<128x128xbf16>
    %cst_336 = arith.constant dense<0.000000e+00> : vector<32x128xf32>
    %360 = tpu.matmul %357, %359, %cst_336 {dimension_numbers = #tpu.dot_dimension_numbers<[1], [0], [0], [1], [0, 0, 1, 1], [], []>} : vector<32x128xbf16>, vector<128x128xbf16>, vector<32x128xf32> -> vector<32x128xf32>
    %361 = arith.addf %356, %360 : vector<32x128xf32>
    %c276_337 = arith.constant 276 : index
    %c0_338 = arith.constant 0 : index
    %362 = vector.load %arg6[%c276_337, %c0_338] : memref<342x128xbf16, #tpu.memory_space<vmem>>, vector<32x128xbf16>
    %c5_339 = arith.constant 5 : index
    %c0_340 = arith.constant 0 : index
    %c0_341 = arith.constant 0 : index
    %363 = vector.load %arg4[%c5_339, %c0_340, %c0_341] : memref<9x128x128xbf16, #tpu.memory_space<vmem>>, vector<1x128x128xbf16>
    %364 = vector.shape_cast %363 : vector<1x128x128xbf16> to vector<128x128xbf16>
    %cst_342 = arith.constant dense<0.000000e+00> : vector<32x128xf32>
    %365 = tpu.matmul %362, %364, %cst_342 {dimension_numbers = #tpu.dot_dimension_numbers<[1], [0], [0], [1], [0, 0, 1, 1], [], []>} : vector<32x128xbf16>, vector<128x128xbf16>, vector<32x128xf32> -> vector<32x128xf32>
    %366 = arith.addf %361, %365 : vector<32x128xf32>
    %c292_343 = arith.constant 292 : index
    %c0_344 = arith.constant 0 : index
    %367 = vector.load %arg6[%c292_343, %c0_344] : memref<342x128xbf16, #tpu.memory_space<vmem>>, vector<32x128xbf16>
    %c6_345 = arith.constant 6 : index
    %c0_346 = arith.constant 0 : index
    %c0_347 = arith.constant 0 : index
    %368 = vector.load %arg4[%c6_345, %c0_346, %c0_347] : memref<9x128x128xbf16, #tpu.memory_space<vmem>>, vector<1x128x128xbf16>
    %369 = vector.shape_cast %368 : vector<1x128x128xbf16> to vector<128x128xbf16>
    %cst_348 = arith.constant dense<0.000000e+00> : vector<32x128xf32>
    %370 = tpu.matmul %367, %369, %cst_348 {dimension_numbers = #tpu.dot_dimension_numbers<[1], [0], [0], [1], [0, 0, 1, 1], [], []>} : vector<32x128xbf16>, vector<128x128xbf16>, vector<32x128xf32> -> vector<32x128xf32>
    %371 = arith.addf %366, %370 : vector<32x128xf32>
    %c293_349 = arith.constant 293 : index
    %c0_350 = arith.constant 0 : index
    %372 = vector.load %arg6[%c293_349, %c0_350] : memref<342x128xbf16, #tpu.memory_space<vmem>>, vector<32x128xbf16>
    %c7_351 = arith.constant 7 : index
    %c0_352 = arith.constant 0 : index
    %c0_353 = arith.constant 0 : index
    %373 = vector.load %arg4[%c7_351, %c0_352, %c0_353] : memref<9x128x128xbf16, #tpu.memory_space<vmem>>, vector<1x128x128xbf16>
    %374 = vector.shape_cast %373 : vector<1x128x128xbf16> to vector<128x128xbf16>
    %cst_354 = arith.constant dense<0.000000e+00> : vector<32x128xf32>
    %375 = tpu.matmul %372, %374, %cst_354 {dimension_numbers = #tpu.dot_dimension_numbers<[1], [0], [0], [1], [0, 0, 1, 1], [], []>} : vector<32x128xbf16>, vector<128x128xbf16>, vector<32x128xf32> -> vector<32x128xf32>
    %376 = arith.addf %371, %375 : vector<32x128xf32>
    %c294_355 = arith.constant 294 : index
    %c0_356 = arith.constant 0 : index
    %377 = vector.load %arg6[%c294_355, %c0_356] : memref<342x128xbf16, #tpu.memory_space<vmem>>, vector<32x128xbf16>
    %c8_357 = arith.constant 8 : index
    %c0_358 = arith.constant 0 : index
    %c0_359 = arith.constant 0 : index
    %378 = vector.load %arg4[%c8_357, %c0_358, %c0_359] : memref<9x128x128xbf16, #tpu.memory_space<vmem>>, vector<1x128x128xbf16>
    %379 = vector.shape_cast %378 : vector<1x128x128xbf16> to vector<128x128xbf16>
    %cst_360 = arith.constant dense<0.000000e+00> : vector<32x128xf32>
    %380 = tpu.matmul %377, %379, %cst_360 {dimension_numbers = #tpu.dot_dimension_numbers<[1], [0], [0], [1], [0, 0, 1, 1], [], []>} : vector<32x128xbf16>, vector<128x128xbf16>, vector<32x128xf32> -> vector<32x128xf32>
    %381 = arith.addf %376, %380 : vector<32x128xf32>
    %c0_361 = arith.constant 0 : index
    %c256_362 = arith.constant 256 : index
    %c0_363 = arith.constant 0 : index
    %382 = vector.load %arg2[%c0_361, %c256_362, %c0_363] : memref<1x288x128xf32, #tpu.memory_space<vmem>>, vector<1x32x128xf32>
    %383 = vector.shape_cast %382 : vector<1x32x128xf32> to vector<32x128xf32>
    %384 = arith.addf %381, %383 : vector<32x128xf32>
    %c0_364 = arith.constant 0 : index
    %c256_365 = arith.constant 256 : index
    %c0_366 = arith.constant 0 : index
    %385 = vector.load %arg5[%c0_364, %c256_365, %c0_366] : memref<1x288x128xf32, #tpu.memory_space<vmem>>, vector<1x32x128xf32>
    %386 = vector.shape_cast %385 : vector<1x32x128xf32> to vector<32x128xf32>
    %387 = vector.shape_cast %384 : vector<32x128xf32> to vector<1x32x128xf32>
    tpu.vector_store %arg5[%c0_364, %c256_365, %c0_366], %387 {strides = array<i32>} : memref<1x288x128xf32, #tpu.memory_space<vmem>>, vector<1x32x128xf32>,
    return
  }
  func.func @transform_0(%arg0: i32) -> (i32, i32, i32) {
    %c0_i32 = arith.constant 0 : i32
    %c0_i32_0 = arith.constant 0 : i32
    %c0_i32_1 = arith.constant 0 : i32
    return %arg0, %c0_i32, %c0_i32_0 : i32, i32, i32
  }
  func.func @transform_1(%arg0: i32) -> (i32, i32, i32) {
    %c0_i32 = arith.constant 0 : i32
    %c0_i32_0 = arith.constant 0 : i32
    %c0_i32_1 = arith.constant 0 : i32
    return %arg0, %c0_i32, %c0_i32_0 : i32, i32, i32
  }
  func.func @transform_2(%arg0: i32) -> (i32, i32, i32) {
    %c0_i32 = arith.constant 0 : i32
    %c0_i32_0 = arith.constant 0 : i32
    %c0_i32_1 = arith.constant 0 : i32
    %c0_i32_2 = arith.constant 0 : i32
    return %c0_i32, %c0_i32_0, %c0_i32_1 : i32, i32, i32
  }
  func.func @transform_3(%arg0: i32) -> (i32, i32, i32) {
    %c0_i32 = arith.constant 0 : i32
    %c0_i32_0 = arith.constant 0 : i32
    %c0_i32_1 = arith.constant 0 : i32
    %c0_i32_2 = arith.constant 0 : i32
    return %c0_i32, %c0_i32_0, %c0_i32_1 : i32, i32, i32
  }
  func.func @transform_4(%arg0: i32) -> (i32, i32, i32) {
    %c0_i32 = arith.constant 0 : i32
    %c0_i32_0 = arith.constant 0 : i32
    %c0_i32_1 = arith.constant 0 : i32
    return %arg0, %c0_i32, %c0_i32_0 : i32, i32, i32
  }
}

</mosaic_0001>

<bundles_post_ra>
// kernel: basic_block_forward.1
= control target key start
LH: loop header
LB: loop body
LE: loop exit
PB: predicated region body
PF: predicated region fallthrough
CT: control target
= control target key end

     0   :  { %s17730_s15 = smov 0   ;;  %s22409_s0 = inlined_call_operand.vmem [shape: bf16[2,342,128], index: 0, kind: input, shape index: {}]   ;;  %s22410_s1 = inlined_call_operand.vmem [shape: f32[2,288,128], index: 1, kind: input, shape index: {}]   ;;  %s22411_s2 = inlined_call_operand.vmem [shape: bf16[9,128,128], index: 2, kind: input, shape index: {}]   ;;  %s22412_s3 = inlined_call_operand.vmem [shape: bf16[9,128,128], index: 3, kind: input, shape index: {}]   ;;  %s22413_s4 = inlined_call_operand.vmem [shape: f32[2,288,128], index: 4, kind: output, shape index: {}]  }
   0x1 LB: > { %s12728_s16 = sadd.s32 4294967295, %s17702_s15   ;;  %p12732_p0 = scmp.ge.s32.totalorder %s17702_s15, 1  ;;  %s17702_s15 = sphi %s17730_s15, %s14_s15  }
   0x2   : > { %p172_p1 = scmp.lt.s32.totalorder %s17702_s15, 3 }
   0x4   : > { %p173_p2 = pnand %p12732_p0, %p172_p1 }
   0x6   : > { %176 = sbr.rel (%p173_p2) target bundleno = 1381 (0x565), region = 36 }
   0xd   : > { %v17093_v0 = vld [vmem:[%s22411_s2 + $0x40] sm:$0xff]   ;;  %p203_p3 = scmp.lt.s32.totalorder %s12728_s16, 1  ;;  %v17095_v2 = vld [vmem:[%s22411_s2 + $0x48] sm:$0xff]   ;;  %v17097_v4 = vld [vmem:[%s22411_s2 + $0x50] sm:$0xff]   ;;  %vm22434_vm0 = vsmask.f32 7424 }
   0xe   : > { %v17094_v1 = vld [vmem:[%s22411_s2 + $0x40] sm:$0xff]   ;;  %14922 = vmatprep.subr.bf16.mxu0 %v17093_v0  ;;  %v17096_v3 = vld [vmem:[%s22411_s2 + $0x48] sm:$0xff]   ;;  %v17098_v5 = vld [vmem:[%s22411_s2 + $0x50] sm:$0xff]   ;;  %vm22433_vm1 = vcmask 1046528   ;;  %vm22438_vm2 = vcmask 1045504   ;;  %vm22437_vm4 = vcmask 1044480  }
   0xf   : > { %15210 = vmatprep.subr.bf16.mxu1 %v17094_v1  ;;  %14923 = vmatpush3.bf16.msra.mxu0 %v17093_v0  ;;  %s23203_s16 = smov (!%p203_p3, %s12728_s16), 1  ;;  %v17099_v6 = vld [vmem:[%s22411_s2 + $0x58] sm:$0xff]   ;;  %v17101_v8 = vld [vmem:[%s22411_s2 + $0x60] sm:$0xff]   ;;  %v17103_v10 = vld [vmem:[%s22411_s2 + $0x68] sm:$0xff]   ;;  %vm22432_vm3 = vsmask.f32 6400 }
  0x10   : > { %15211 = vmatpush3.bf16.msra.mxu1 %v17094_v1  ;;  %14924 = vmatprep.subr.bf16.mxu0 %v17095_v2  ;;  %v17100_v7 = vld [vmem:[%s22411_s2 + $0x58] sm:$0xff]   ;;  %s17010_s7 = smul.u32 172, %s23203_s16  ;;  %v17102_v9 = vld [vmem:[%s22411_s2 + $0x60] sm:$0xff]   ;;  %v17104_v11 = vld [vmem:[%s22411_s2 + $0x68] sm:$0xff]   ;;  %vm22436_vm5 = vsmask.f32 5376 }
  0x11   : > { %15212 = vmatprep.subr.bf16.mxu1 %v17096_v3  ;;  %v17105_v17 = vld [vmem:[%s22411_s2 + $0x70] sm:$0xff]   ;;  %v17107_v31 = vld [vmem:[%s22411_s2 + $0x78] sm:$0xff]   ;;  %v17114_v44 = vld [vmem:[%s22411_s2] sm:$0xff]   ;;  %vm221_vm6 = vcmask 1041408   ;;  %vm22435_vm7 = vsmask.f32 1280 }
  0x12   : > { %s17774_s14 = scalar_lea.vmem %s22409_s0, %s17010_s7  ;;  %v17106_v25 = vld [vmem:[%s22411_s2 + $0x70] sm:$0xff]   ;;  %v17108_v40 = vld [vmem:[%s22411_s2 + $0x78] sm:$0xff]   ;;  %v17116_v48 = vld [vmem:[%s22411_s2] sm:$0xff]   ;;  %vm227_vm9 = vcmask 1043457   ;;  %vm228_vm10 = vsmask.f32 7942 }
  0x13   : > { %14925 = vmatpush3.bf16.msra.mxu0 %v17095_v2  ;;  %v237_v12 = vld [vmem:[%s17774_s14] sm:$0xf]  ;;  %v17784_v13 = vld [vmem:[%s17774_s14 + $0x4] sm:$0xf]  ;;  %v17790_v15 = vld [vmem:[%s17774_s14 + $0x8] sm:$0xff]   ;;  %s17011_s25 = smul.u32 288, %s23203_s16 }
  0x14   : > { %15213 = vmatpush3.bf16.msra.mxu1 %v17096_v3  ;;  %14926 = vmatprep.subr.bf16.mxu0 %v17097_v4  ;;  %v17787_v14 = vcombine.low %v237_v12, %v17784_v13  ;;  %v17793_v16 = vld [vmem:[%s17774_s14 + $0x48] sm:$0xff]   ;;  %v2949_v18 = vld [vmem:[%s17774_s14 + $0x40] sm:$0xf]  ;;  %v17800_v19 = vld [vmem:[%s17774_s14 + $0x44] sm:$0xf]  ;;  %v339_v22 = vshll.u32 %v17790_v15, 16 }
  0x15   : > { %15214 = vmatprep.subr.bf16.mxu1 %v17098_v5  ;;  %v17806_v23 = vcombine.low %v2949_v18, %v17800_v19  ;;  %v17809_v24 = vld [vmem:[%s17774_s14 + $0x10] sm:$0xff]   ;;  %v3049_v26 = vshll.u32 %v17793_v16, 16  ;;  %v343_v32 = vshrl.u32 %v17790_v15, 16  ;;  %v3053_v38 = vshrl.u32 %v17793_v16, 16  ;;  %v17841_v52 = vld [vmem:[%s17774_s14 + $0x18] sm:$0xff]   ;;  %v17117_v54 = vld [vmem:[%s22411_s2 + $0x8] sm:$0xff]   ;;  %s22255_s28 = scalar_lea.vmem %s22410_s1, %s17011_s25  ;;  %s22268_s8 = scalar_lea.vmem %s22413_s4, %s17011_s25 }
  0x16   : > { %v332_v20 = vshrl.u32 %v17787_v14, 16  ;;  %v334_v21 = vshll.u32 %v17787_v14, 16  ;;  %v341_v28 = vrot.slane %v339_v22, 1  ;;  %v347_v33 = vshll.u32 %v17809_v24, 16  ;;  %v17823_v34 = vld [vmem:[%s17774_s14 + $0x50] sm:$0xff]   ;;  %v17844_v53 = vld [vmem:[%s17774_s14 + $0x58] sm:$0xff]   ;;  %vm19171_vm8 = vmand %vm221_vm6, %vm22435_vm7 }
  0x17   : > { %14927 = vmatpush3.bf16.msra.mxu0 %v17097_v4  ;;  %v3042_v29 = vshrl.u32 %v17806_v23, 16  ;;  %v3044_v30 = vshll.u32 %v17806_v23, 16  ;;  %v3051_v37 = vrot.slane %v3049_v26, 1  ;;  %v3057_v39 = vshll.u32 %v17823_v34, 16  ;;  %v17851_v57 = vld [vmem:[%s17774_s14 + $0x20] sm:$0xff]   ;;  %v17118_v0 = vld [vmem:[%s22411_s2 + $0x8] sm:$0xff]   ;;  %vm19198_vm11 = vmand %vm227_vm9, %vm228_vm10 }
  0x18   : > { %15215 = vmatpush3.bf16.msra.mxu1 %v17098_v5  ;;  %14928 = vmatprep.subr.bf16.mxu0 %v17099_v6  ;;  %v336_v27 = vrot.slane %v334_v21, 1  ;;  %v349_v43 = vrot.slane %v347_v33, 1  ;;  %v351_v45 = vshrl.u32 %v17809_v24, 16  ;;  %v345_v47 = vor.u32 %v343_v32, %v341_v28  ;;  %v17857_v62 = vld [vmem:[%s17774_s14 + $0x60] sm:$0xff]   ;;  %v17124_v12 = vld [vmem:[%s22411_s2 + $0x10] sm:$0xff]   ;;  %v17875_v18 = vld [vmem:[%s17774_s14 + $0x28] sm:$0xff]  }
  0x19   : > { %15216 = vmatprep.subr.bf16.mxu1 %v17100_v7  ;;  %v3046_v36 = vrot.slane %v3044_v30, 1  ;;  %v3061_v49 = vshrl.u32 %v17823_v34, 16  ;;  %v3055_v50 = vor.u32 %v3053_v38, %v3051_v37  ;;  %v3059_v51 = vrot.slane %v3057_v39, 1  ;;  %v17879_v21 = vld [vmem:[%s17774_s14 + $0x68] sm:$0xff]   ;;  %v17898_v38 = vld [vmem:[%s17774_s14 + $0x70] sm:$0xff]  }
  0x1a   : > { %v337_v35 = vor.u32 %v336_v27, %v332_v20  ;;  %v353_v55 = vor.u32 %v351_v45, %v349_v43  ;;  %v355_v56 = vshll.u32 %v17841_v52, 16  ;;  %v359_v58 = vshrl.u32 %v17841_v52, 16 }
  0x1b   : > { %14929 = vmatpush3.bf16.msra.mxu0 %v17099_v6  ;;  %v3047_v42 = vor.u32 %v3046_v36, %v3042_v29  ;;  %v350_v59 = vsel %vm22434_vm0, %v345_v47, %v349_v43  ;;  %v3063_v60 = vor.u32 %v3061_v49, %v3059_v51  ;;  %v3065_v61 = vshll.u32 %v17844_v53, 16  ;;  %v17130_v43 = vld [vmem:[%s22411_s2 + $0x20] sm:$0xff]  }
  0x1c   : > { %15217 = vmatpush3.bf16.msra.mxu1 %v17100_v7  ;;  %14930 = vmatprep.subr.bf16.mxu0 %v17101_v8  ;;  %v342_v41 = vsel %vm22434_vm0, %v337_v35, %v341_v28  ;;  %v3060_v63 = vsel %vm22434_vm0, %v3055_v50, %v3059_v51  ;;  %v357_v1 = vrot.slane %v355_v56, 1  ;;  %v363_v2 = vshll.u32 %v17851_v57, 16  ;;  %v17122_v7 = vld [vmem:[%s22411_s2 + $0x10] sm:$0xff]   ;;  %v17126_v35 = vld [vmem:[%s22411_s2 + $0x18] sm:$0xff]   ;;  %v17132_v50 = vld [vmem:[%s22411_s2 + $0x20] sm:$0xff]  }
  0x1d   : > { %15218 = vmatprep.subr.bf16.mxu1 %v17102_v9  ;;  %14938 = vmatprep.mubr.bf16.mxu0 %v342_v41  ;;  %v3052_v46 = vsel %vm22434_vm0, %v3047_v42, %v3051_v37  ;;  %v3069_v3 = vshrl.u32 %v17844_v53, 16  ;;  %v3067_v4 = vrot.slane %v3065_v61, 1  ;;  %v3073_v5 = vshll.u32 %v17857_v62, 16  ;;  %v17887_v28 = vld [vmem:[%s17774_s14 + $0x30] sm:$0xff]   ;;  %v17912_v51 = vld [vmem:[%s17774_s14 + $0x38] sm:$0xff]  }
  0x1e   : > { %15226 = vmatprep.mubr.bf16.mxu1 %v3052_v46  ;;  %v358_v6 = vsel %vm22434_vm0, %v353_v55, %v357_v1  ;;  %v367_v20 = vshrl.u32 %v17851_v57, 16  ;;  %v3077_v22 = vshrl.u32 %v17857_v62, 16  ;;  %v371_v27 = vshll.u32 %v17875_v18, 16  ;;  %v17133_v55 = vld [vmem:[%s22411_s2 + $0x28] sm:$0xff]   ;;  %v17919_v56 = vld [vmem:[%s17774_s14 + $0x78] sm:$0xff]  }
  0x1f   : > { %14931 = vmatpush3.bf16.msra.mxu0 %v17101_v8  ;;  %v3068_v8 = vsel %vm22434_vm0, %v3063_v60, %v3067_v4  ;;  %v375_v32 = vshrl.u32 %v17875_v18, 16  ;;  %v379_v37 = vshll.u32 %v17887_v28, 16  ;;  %v728_v45 = vrot.slane %v17790_v15, 1  ;;  %v17134_v60 = vld [vmem:[%s22411_s2 + $0x28] sm:$0xff]  }
  0x20   : > { %15219 = vmatpush3.bf16.msra.mxu1 %v17102_v9  ;;  %14932 = vmatprep.subr.bf16.mxu0 %v17103_v10  ;;  %v361_v9 = vor.u32 %v359_v58, %v357_v1  ;;  %v373_v36 = vrot.slane %v371_v27, 1  ;;  %v3093_v58 = vshrl.u32 %v17898_v38, 16  ;;  %v391_v1 = vshrl.u32 %v17912_v51, 16  ;;  %v17140_v27 = vld [vmem:[%s22411_s2 + $0x30] sm:$0xff]  }
  0x21   : > { %15220 = vmatprep.subr.bf16.mxu1 %v17104_v11  ;;  %v381_v42 = vrot.slane %v379_v37, 1  ;;  %v732_v37 = vrot.slane %v17841_v52, 1 }
  0x22   : > { %v377_v47 = vor.u32 %v375_v32, %v373_v36 }
  0x23   : > { %14933 = vmatpush3.bf16.msra.mxu0 %v17103_v10  ;;  %v365_v10 = vrot.slane %v363_v2, 1 }
  0x24   : > { %15221 = vmatpush3.bf16.msra.mxu1 %v17104_v11  ;;  %14934 = vmatprep.subr.bf16.mxu0 %v17105_v17  ;;  %v3075_v11 = vrot.slane %v3073_v5, 1  ;;  %v3101_v5 = vshrl.u32 %v17919_v56, 16 }
  0x25   : > { %15222 = vmatprep.subr.bf16.mxu1 %v17106_v25  ;;  %v369_v26 = vor.u32 %v367_v20, %v365_v10  ;;  %v366_v29 = vsel %vm22434_vm0, %v361_v9, %v365_v10  ;;  %v17936_v9 = vld [vmem:[%s17774_s14 + $0x80] ss:$0 sps:$4 sm:$0x11]  }
  0x26   : > { %v3079_v30 = vor.u32 %v3077_v22, %v3075_v11  ;;  %v17138_v22 = vld [vmem:[%s22411_s2 + $0x30] sm:$0xff]  }
  0x27   : > { %14935 = vmatpush3.bf16.msra.mxu0 %v17105_v17  ;;  %v3071_v17 = vor.u32 %v3069_v3, %v3067_v4  ;;  %v374_v41 = vsel %vm22434_vm0, %v369_v26, %v373_v36  ;;  %v3097_v4 = vshll.u32 %v17919_v56, 16  ;;  %v3105_v26 = vshll.u32 %v17936_v9, 16  ;;  %v17141_v36 = vld [vmem:[%s22411_s2 + $0x38] sm:$0xff]  }
  0x28   : > { %15223 = vmatpush3.bf16.msra.mxu1 %v17106_v25  ;;  %14936 = vmatprep.subr.bf16.mxu0 %v17107_v31  ;;  %v17125_v25 = vld [vmem:[%s22411_s2 + $0x18] sm:$0xff]  }
  0x29   : > { %15224 = vmatprep.subr.bf16.mxu1 %v17108_v40  ;;  %v3076_v33 = vsel %vm22434_vm0, %v3071_v17, %v3075_v11  ;;  %v3436_v17 = vrot.slane %v17793_v16, 1 }
  0x2b   : > { %14937 = vmatpush3.bf16.msra.mxu0 %v17107_v31  ;;  %v3081_v31 = vshll.u32 %v17879_v21, 16 }
  0x2c   : > { %15225 = vmatpush3.bf16.msra.mxu1 %v17108_v40  ;;  %14954 = vmatprep.subr.bf16.mxu0 %v17114_v44  ;;  %v3085_v40 = vshrl.u32 %v17879_v21, 16 }
  0x2d   : > { %15242 = vmatprep.subr.bf16.mxu1 %v17116_v48  ;;  %v3083_v39 = vrot.slane %v3081_v31, 1 }
  0x2e   : > { %14939 = vmatmul.mubr.bf16.vlgmr.msra.gmra.mrb[0].mxu0 %v350_v59  ;;  %v382_v59 = vsel %vm22434_vm0, %v377_v47, %v381_v42  ;;  %v17143_v47 = vld [vmem:[%s22411_s2 + $0x80] sm:$0xff]  }
  0x2f   : > { %15227 = vmatmul.mubr.bf16.vlgmr.msra.gmra.mrb[0].mxu1 %v3060_v63  ;;  %14955 = vmatpush3.bf16.msra.mxu0 %v17114_v44  ;;  %v3089_v44 = vshll.u32 %v17898_v38, 16  ;;  %v3084_v46 = vsel %vm22434_vm0, %v3079_v30, %v3083_v39  ;;  %v387_v63 = vshll.u32 %v17912_v51, 16  ;;  %v3107_v30 = vrot.slane %v3105_v26, 1 }
  0x30   : > { %15243 = vmatpush3.bf16.msra.mxu1 %v17116_v48  ;;  %14956 = vmatprep.subr.bf16.mxu0 %v17117_v54  ;;  %v3087_v48 = vor.u32 %v3085_v40, %v3083_v39  ;;  %v17142_v39 = vld [vmem:[%s22411_s2 + $0x38] sm:$0xff]  }
  0x31   : > { %15244 = vmatprep.subr.bf16.mxu1 %v17118_v0  ;;  %14942 = vmatprep.mubr.bf16.mxu0 %v358_v6  ;;  %v3091_v49 = vrot.slane %v3089_v44, 1  ;;  %v389_v6 = vrot.slane %v387_v63, 1 }
  0x32   : > { %15230 = vmatprep.mubr.bf16.mxu1 %v3068_v8  ;;  %v3099_v8 = vrot.slane %v3097_v4, 1 }
  0x33   : > { %14957 = vmatpush3.bf16.msra.mxu0 %v17117_v54  ;;  %v383_v54 = vshrl.u32 %v17887_v28, 16  ;;  %v3092_v2 = vsel %vm22434_vm0, %v3087_v48, %v3091_v49  ;;  %v3095_v3 = vor.u32 %v3093_v58, %v3091_v49  ;;  %v393_v11 = vor.u32 %v391_v1, %v389_v6  ;;  %v17146_v1 = vld [vmem:[%s22411_s2 + $0x88] sm:$0xff]  }
  0x34   : > { %15245 = vmatpush3.bf16.msra.mxu1 %v17118_v0  ;;  %14958 = vmatprep.subr.bf16.mxu0 %v17122_v7  ;;  %v17928_v0 = vld [vmem:[%s17774_s14 + $0x40] ss:$0 sps:$4 sm:$0x11]   ;;  %v736_v49 = vrot.slane %v17875_v18, 1 }
  0x35   : > { %15246 = vmatprep.subr.bf16.mxu1 %v17124_v12  ;;  %v385_v61 = vor.u32 %v383_v54, %v381_v42  ;;  %v3100_v20 = vsel %vm22434_vm0, %v3095_v3, %v3099_v8  ;;  %v3448_v3 = vrot.slane %v17919_v56, 1 }
  0x36   : > { %14943 = vmatmul.mubr.bf16.gmra.mrb[4].mxu0 %v366_v29  ;;  %v730_v29 = vrot.slane %v17809_v24, 1 }
  0x37   : > { %15231 = vmatmul.mubr.bf16.gmra.mrb[4].mxu1 %v3076_v33  ;;  %14959 = vmatpush3.bf16.msra.mxu0 %v17122_v7  ;;  %v395_v7 = vshll.u32 %v17928_v0, 16  ;;  %v390_v10 = vsel %vm22434_vm0, %v385_v61, %v389_v6  ;;  %v3438_v33 = vrot.slane %v17823_v34, 1  ;;  %v17145_v61 = vld [vmem:[%s22411_s2 + $0x88] sm:$0xff]  }
  0x38   : > { %15247 = vmatpush3.bf16.msra.mxu1 %v17124_v12  ;;  %14960 = vmatprep.subr.bf16.mxu0 %v17125_v25  ;;  %v17953_v32 = vsel %vm22433_vm1, %v728_v45, %v730_v29  ;;  %v17971_v42 = vsel %vm22433_vm1, %v730_v29, %v732_v37  ;;  %v17168_v29 = vld [vmem:[%s22411_s2 + $0xd8] sm:$0xff]  }
  0x39   : > { %15248 = vmatprep.subr.bf16.mxu1 %v17126_v35  ;;  %14946 = vmatprep.mubr.bf16.mxu0 %v374_v41  ;;  %v397_v12 = vrot.slane %v395_v7, 1  ;;  %v17967_v40 = vsel %vm22433_vm1, %v3436_v17, %v3438_v33  ;;  %v3440_v41 = vrot.slane %v17844_v53, 1  ;;  %v3450_v7 = vrot.slane %v17936_v9, 1 }
  0x3a   : > { %15234 = vmatprep.mubr.bf16.mxu1 %v3084_v46  ;;  %v3442_v46 = vrot.slane %v17857_v62, 1 }
  0x3b   : > { %14961 = vmatpush3.bf16.msra.mxu0 %v17125_v25  ;;  %v3103_v25 = vor.u32 %v3101_v5, %v3099_v8  ;;  %v398_v31 = vsel %vm22434_vm0, %v393_v11, %v397_v12  ;;  %v17975_v44 = vsel %vm22433_vm1, %v3438_v33, %v3440_v41  ;;  %v742_v5 = vrot.slane %v17928_v0, 1  ;;  %v17147_v8 = vld [vmem:[%s22411_s2 + $0x90] sm:$0xff]   ;;  %v705_v11 = vld [vmem:[%s17774_s14] sm:$0xe]  ;;  %v18129_v33 = vld [vmem:[%s17774_s14 + $0xc] sm:$0xf] }
  0x3c   : > { %15249 = vmatpush3.bf16.msra.mxu1 %v17126_v35  ;;  %14962 = vmatprep.subr.bf16.mxu0 %v17130_v43  ;;  %v17990_v54 = vsel %vm22433_vm1, %v3440_v41, %v3442_v46  ;;  %v17148_v0 = vld [vmem:[%s22411_s2 + $0x90] sm:$0xff]   ;;  %v3415_v12 = vld [vmem:[%s17774_s14 + $0x40] sm:$0xe]  ;;  %v18039_v9 = vsel %vm22433_vm1, %v3448_v3, %v3450_v7 }
  0x3d   : > { %15250 = vmatprep.subr.bf16.mxu1 %v17132_v50  ;;  %v3108_v35 = vsel %vm22434_vm0, %v3103_v25, %v3107_v30  ;;  %v17169_v30 = vld [vmem:[%s22411_s2 + $0xe0] sm:$0xff]   ;;  %v18146_v41 = vld [vmem:[%s17774_s14 + $0x10] sm:$0xff]  }
  0x3e   : > { %14947 = vmatmul.mubr.bf16.gmra.mrb[8].mxu0 %v382_v59  ;;  %v738_v59 = vrot.slane %v17887_v28, 1 }
  0x3f   : > { %15235 = vmatmul.mubr.bf16.gmra.mrb[8].mxu1 %v3092_v2  ;;  %14963 = vmatpush3.bf16.msra.mxu0 %v17130_v43  ;;  %v734_v43 = vrot.slane %v17851_v57, 1 }
  0x40   : > { %15251 = vmatpush3.bf16.msra.mxu1 %v17132_v50  ;;  %14964 = vmatprep.subr.bf16.mxu0 %v17133_v55  ;;  %v17144_v50 = vld [vmem:[%s22411_s2 + $0x80] sm:$0xff]   ;;  %v18006_v63 = vsel %vm22433_vm1, %v736_v49, %v738_v59 }
  0x41   : > { %15252 = vmatprep.subr.bf16.mxu1 %v17134_v60  ;;  %14950 = vmatprep.mubr.bf16.mxu0 %v390_v10  ;;  %v17982_v48 = vsel %vm22433_vm1, %v732_v37, %v734_v43  ;;  %v17995_v58 = vsel %vm22433_vm1, %v734_v43, %v736_v49  ;;  %v18137_v37 = vld [vmem:[%s17774_s14 + $0x4c] sm:$0xf]  ;;  %v18154_v43 = vld [vmem:[%s17774_s14 + $0x50] sm:$0xff]  }
  0x42   : > { %15238 = vmatprep.mubr.bf16.mxu1 %v3100_v20  ;;  %v12793_v20 = vcombine.low %v705_v11, %v17784_v13 }
  0x43   : > { %14965 = vmatpush3.bf16.msra.mxu0 %v17133_v55  ;;  %v3444_v55 = vrot.slane %v17879_v21, 1 }
  0x44   : > { %15253 = vmatpush3.bf16.msra.mxu1 %v17134_v60  ;;  %14966 = vmatprep.subr.bf16.mxu0 %v17138_v22  ;;  %v727_v25 = vrot.slane %v12793_v20, 1  ;;  %v18217_v20 = vld [vmem:[%s17774_s14 + $0x30] sm:$0xff]  }
  0x45   : > { %15254 = vmatprep.subr.bf16.mxu1 %v17140_v27  ;;  %v17999_v60 = vsel %vm22433_vm1, %v3442_v46, %v3444_v55  ;;  %v17174_v46 = vld [vmem:[%s22411_s2 + $0xf0] sm:$0xff]  }
  0x46   : > { %14951 = vmatmul.mubr.bf16.gmra.mrb[12].mxu0 %v398_v31  ;;  %v729_v13 = vsel %vm22433_vm1, %v727_v25, %v728_v45  ;;  %v17164_v45 = vld [vmem:[%s22411_s2 + $0xc8] sm:$0xff]   ;;  %v17170_v31 = vld [vmem:[%s22411_s2 + $0xe0] sm:$0xff]   ;;  %v1210_v25 = vshll.u32 %v18146_v41, 16 }
  0x47   : > { %15239 = vmatmul.mubr.bf16.gmra.mrb[12].mxu1 %v3108_v35  ;;  %14967 = vmatpush3.bf16.msra.mxu0 %v17138_v22  ;;  %v13041_v22 = vcombine.low %v3415_v12, %v17800_v19  ;;  %v17171_v35 = vld [vmem:[%s22411_s2 + $0xe8] sm:$0xff]  }
  0x48   : > { %15255 = vmatpush3.bf16.msra.mxu1 %v17140_v27  ;;  %14968 = vmatprep.subr.bf16.mxu0 %v17141_v36  ;;  %v17150_v27 = vld [vmem:[%s22411_s2 + $0x98] sm:$0xff]  }
  0x49   : > { %15256 = vmatprep.subr.bf16.mxu1 %v17142_v39  ;;  %14970 = vmatprep.mubr.bf16.mxu0 %v17787_v14  ;;  %v3446_v14 = vrot.slane %v17898_v38, 1  ;;  %v3435_v26 = vrot.slane %v13041_v22, 1  ;;  %v1207_v22 = vshrl.u32 %v18146_v41, 16 }
  0x4a   : > { %15258 = vmatprep.mubr.bf16.mxu1 %v17806_v23  ;;  %v740_v23 = vrot.slane %v17912_v51, 1 }
  0x4b   : > { %14969 = vmatpush3.bf16.msra.mxu0 %v17141_v36  ;;  %v18013_v2 = vsel %vm22433_vm1, %v3444_v55, %v3446_v14  ;;  %v18023_v6 = vsel %vm22433_vm1, %v3446_v14, %v3448_v3  ;;  %v3437_v19 = vsel %vm22433_vm1, %v3435_v26, %v3436_v17  ;;  %v17167_v17 = vld [vmem:[%s22411_s2 + $0xd8] sm:$0xff]   ;;  %v3621_v36 = vld [vmem:[%s17774_s14 + $0x48] sm:$0xe]  ;;  %v18183_v14 = vld [vmem:[%s17774_s14 + $0x20] sm:$0xff]  }
  0x4c   : > { %15257 = vmatpush3.bf16.msra.mxu1 %v17142_v39  ;;  %14986 = vmatprep.subr.bf16.mxu0 %v17143_v47  ;;  %v18018_v4 = vsel %vm22433_vm1, %v738_v59, %v740_v23  ;;  %v18030_v10 = vsel %vm22433_vm1, %v740_v23, %v742_v5  ;;  %v17172_v39 = vld [vmem:[%s22411_s2 + $0xe8] sm:$0xff]   ;;  %v18172_v55 = vld [vmem:[%s17774_s14 + $0x58] sm:$0xff]   ;;  %v17182_v23 = vld [vmem:[%s22411_s2 + $0x100] sm:$0xff]   ;;  %v995_v5 = vrot.slane %v18183_v14, 1 }
  0x4d   : > { %15274 = vmatprep.subr.bf16.mxu1 %v17144_v50  ;;  %v17176_v59 = vld [vmem:[%s22411_s2 + $0xf8] sm:$0xff]   ;;  %v17184_v3 = vld [vmem:[%s22411_s2 + $0x100] sm:$0xff]  }
  0x4e   : > { %14971 = vmatmul.mubr.bf16.vlgmr.msra.gmra.mrb[0].mxu0 %v17790_v15  ;;  %v17152_v15 = vld [vmem:[%s22411_s2 + $0xa0] sm:$0xff]  }
  0x4f   : > { %15259 = vmatmul.mubr.bf16.vlgmr.msra.gmra.mrb[0].mxu1 %v17793_v16  ;;  %14987 = vmatpush3.bf16.msra.mxu0 %v17143_v47  ;;  %v17153_v16 = vld [vmem:[%s22411_s2 + $0xa8] sm:$0xff]  }
  0x50   : > { %15275 = vmatpush3.bf16.msra.mxu1 %v17144_v50  ;;  %14988 = vmatprep.subr.bf16.mxu0 %v17145_v61  ;;  %v18168_v50 = vld [vmem:[%s17774_s14 + $0x18] sm:$0xff]  }
  0x51   : > { %15276 = vmatprep.subr.bf16.mxu1 %v17146_v1  ;;  %14974 = vmatprep.mubr.bf16.mxu0 %v17809_v24  ;;  %v17149_v24 = vld [vmem:[%s22411_s2 + $0x98] sm:$0xff]  }
  0x52   : > { %15262 = vmatprep.mubr.bf16.mxu1 %v17823_v34  ;;  %v17151_v34 = vld [vmem:[%s22411_s2 + $0xa0] sm:$0xff]  }
  0x53   : > { %14989 = vmatpush3.bf16.msra.mxu0 %v17145_v61 }
  0x54   : > { %15277 = vmatpush3.bf16.msra.mxu1 %v17146_v1  ;;  %14990 = vmatprep.subr.bf16.mxu0 %v17147_v8  ;;  %v3700_v1 = vrot.slane %v18172_v55, 1 }
  0x55   : > { %15278 = vmatprep.subr.bf16.mxu1 %v17148_v0 }
  0x56   : > { %14975 = vmatmul.mubr.bf16.gmra.mrb[4].mxu0 %v17841_v52  ;;  %v17154_v52 = vld [vmem:[%s22411_s2 + $0xa8] sm:$0xff]  }
  0x57   : > { %15263 = vmatmul.mubr.bf16.gmra.mrb[4].mxu1 %v17844_v53  ;;  %14991 = vmatpush3.bf16.msra.mxu0 %v17147_v8  ;;  %v17155_v53 = vld [vmem:[%s22411_s2 + $0xb0] sm:$0xff]   ;;  %v17186_v8 = vld [vmem:[%s22411_s2 + $0x108] sm:$0xff]  }
  0x58   : > { %15279 = vmatpush3.bf16.msra.mxu1 %v17148_v0  ;;  %14992 = vmatprep.subr.bf16.mxu0 %v17149_v24  ;;  %v18209_v0 = vld [vmem:[%s17774_s14 + $0x28] sm:$0xff]  }
  0x59   : > { %15280 = vmatprep.subr.bf16.mxu1 %v17150_v27  ;;  %14978 = vmatprep.mubr.bf16.mxu0 %v17851_v57  ;;  %v17156_v57 = vld [vmem:[%s22411_s2 + $0xb0] sm:$0xff]  }
  0x5a   : > { %15266 = vmatprep.mubr.bf16.mxu1 %v17857_v62  ;;  %v17157_v62 = vld [vmem:[%s22411_s2 + $0xb8] sm:$0xff]  }
  0x5b   : > { %14993 = vmatpush3.bf16.msra.mxu0 %v17149_v24  ;;  %v18221_v24 = vld [vmem:[%s17774_s14 + $0x70] sm:$0xff]  }
  0x5c   : > { %15281 = vmatpush3.bf16.msra.mxu1 %v17150_v27  ;;  %14994 = vmatprep.subr.bf16.mxu0 %v17151_v34  ;;  %v18226_v27 = vld [vmem:[%s17774_s14 + $0x38] sm:$0xff]  }
  0x5d   : > { %15282 = vmatprep.subr.bf16.mxu1 %v17152_v15 }
  0x5e   : > { %14979 = vmatmul.mubr.bf16.gmra.mrb[8].mxu0 %v17875_v18  ;;  %v17158_v18 = vld [vmem:[%s22411_s2 + $0xb8] sm:$0xff]  }
  0x5f   : > { %15267 = vmatmul.mubr.bf16.gmra.mrb[8].mxu1 %v17879_v21  ;;  %14995 = vmatpush3.bf16.msra.mxu0 %v17151_v34  ;;  %v17161_v21 = vld [vmem:[%s22411_s2 + $0xc0] sm:$0xff]   ;;  %v997_v34 = vrot.slane %v18209_v0, 1 }
  0x60   : > { %15283 = vmatpush3.bf16.msra.mxu1 %v17152_v15  ;;  %14996 = vmatprep.subr.bf16.mxu0 %v17153_v16 }
  0x61   : > { %15284 = vmatprep.subr.bf16.mxu1 %v17154_v52  ;;  %14982 = vmatprep.mubr.bf16.mxu0 %v17887_v28  ;;  %v17162_v28 = vld [vmem:[%s22411_s2 + $0xc0] sm:$0xff]  }
  0x62   : > { %15270 = vmatprep.mubr.bf16.mxu1 %v17898_v38  ;;  %v17163_v38 = vld [vmem:[%s22411_s2 + $0xc8] sm:$0xff]  }
  0x63   : > { %14997 = vmatpush3.bf16.msra.mxu0 %v17153_v16  ;;  %v17190_v16 = vld [vmem:[%s22411_s2 + $0x110] sm:$0xff]  }
  0x64   : > { %15285 = vmatpush3.bf16.msra.mxu1 %v17154_v52  ;;  %14998 = vmatprep.subr.bf16.mxu0 %v17155_v53 }
  0x65   : > { %15286 = vmatprep.subr.bf16.mxu1 %v17156_v57 }
  0x66   : > { %14983 = vmatmul.mubr.bf16.gmra.mrb[12].mxu0 %v17912_v51  ;;  %v17165_v51 = vld [vmem:[%s22411_s2 + $0xd0] sm:$0xff]  }
  0x67   : > { %15271 = vmatmul.mubr.bf16.gmra.mrb[12].mxu1 %v17919_v56  ;;  %14999 = vmatpush3.bf16.msra.mxu0 %v17155_v53  ;;  %v17166_v56 = vld [vmem:[%s22411_s2 + $0xd0] sm:$0xff]  }
  0x68   : > { %15287 = vmatpush3.bf16.msra.mxu1 %v17156_v57  ;;  %15000 = vmatprep.subr.bf16.mxu0 %v17157_v62  ;;  %v17192_v53 = vld [vmem:[%s22411_s2 + $0x110] sm:$0xff]  }
  0x69   : > { %15288 = vmatprep.subr.bf16.mxu1 %v17158_v18  ;;  %15002 = vmatprep.mubr.bf16.mxu0 %v729_v13 }
  0x6a   : > { %15290 = vmatprep.mubr.bf16.mxu1 %v3437_v19 }
  0x6b   : > { %15001 = vmatpush3.bf16.msra.mxu0 %v17157_v62  ;;  %v999_v62 = vrot.slane %v18217_v20, 1 }
  0x6c   : > { %15289 = vmatpush3.bf16.msra.mxu1 %v17158_v18  ;;  %15018 = vmatprep.subr.bf16.mxu0 %v17161_v21  ;;  %v3706_v18 = vrot.slane %v18221_v24, 1 }
  0x6d   : > { %15306 = vmatprep.subr.bf16.mxu1 %v17162_v28 }
  0x6e   : > { %15003 = vmatmul.mubr.bf16.vlgmr.msra.gmra.mrb[0].mxu0 %v17953_v32  ;;  %v913_v32 = vld [vmem:[%s17774_s14 + $0x8] sm:$0xe] }
  0x6f   : > { %15291 = vmatmul.mubr.bf16.vlgmr.msra.gmra.mrb[0].mxu1 %v17967_v40  ;;  %15019 = vmatpush3.bf16.msra.mxu0 %v17161_v21  ;;  %v18143_v40 = vcombine.low %v913_v32, %v18129_v33  ;;  %v18244_v21 = vrot.slane %v1207_v22, 1  ;;  %v18267_v32 = vld [vmem:[%s17774_s14 + $0x48] ss:$0 sps:$4 sm:$0x11]  }
  0x70   : > { %15307 = vmatpush3.bf16.msra.mxu1 %v17162_v28  ;;  %15020 = vmatprep.subr.bf16.mxu0 %v17163_v38  ;;  %v18246_v28 = vrot.slane %v1210_v25, 2 }
  0x71   : > { %15308 = vmatprep.subr.bf16.mxu1 %v17164_v45  ;;  %15006 = vmatprep.mubr.bf16.mxu0 %v17971_v42  ;;  %v18150_v42 = vcombine.low %v3621_v36, %v18137_v37  ;;  %v990_v47 = vrot.slane %v18143_v40, 1  ;;  %v1202_v11 = vshll.u32 %v18143_v40, 16 }
  0x72   : > { %15294 = vmatprep.mubr.bf16.mxu1 %v17975_v44  ;;  %v17173_v44 = vld [vmem:[%s22411_s2 + $0xf0] sm:$0xff]  }
  0x73   : > { %15021 = vmatpush3.bf16.msra.mxu0 %v17163_v38  ;;  %v3697_v49 = vrot.slane %v18150_v42, 1  ;;  %v18232_v15 = vrot.slane %v1202_v11, 2  ;;  %v3904_v57 = vshrl.u32 %v18150_v42, 16  ;;  %v17193_v38 = vld [vmem:[%s22411_s2 + $0x118] sm:$0xff]  }
  0x74   : > { %15309 = vmatpush3.bf16.msra.mxu1 %v17164_v45  ;;  %15022 = vmatprep.subr.bf16.mxu0 %v17165_v51  ;;  %v1001_v45 = vrot.slane %v18226_v27, 1 }
  0x75   : > { %15310 = vmatprep.subr.bf16.mxu1 %v17166_v56  ;;  %v18270_v36 = vrot.slane %v3904_v57, 1  ;;  %v1234_v57 = vshrl.u32 %v18209_v0, 16 }
  0x76   : > { %15007 = vmatmul.mubr.bf16.gmra.mrb[4].mxu0 %v17982_v48  ;;  %v991_v48 = vrot.slane %v18146_v41, 1  ;;  %v1002_v25 = vsel %vm22433_vm1, %v999_v62, %v1001_v45 }
  0x77   : > { %15295 = vmatmul.mubr.bf16.gmra.mrb[4].mxu1 %v17990_v54  ;;  %15023 = vmatpush3.bf16.msra.mxu0 %v17165_v51  ;;  %v3698_v54 = vrot.slane %v18154_v43, 1  ;;  %v18253_v51 = vld [vmem:[%s17774_s14 + $0x78] sm:$0xff]  }
  0x78   : > { %15311 = vmatpush3.bf16.msra.mxu1 %v17166_v56  ;;  %15024 = vmatprep.subr.bf16.mxu0 %v17167_v17  ;;  %v18256_v56 = vld [vmem:[%s17774_s14 + $0x40] sm:$0xff]  }
  0x79   : > { %15312 = vmatprep.subr.bf16.mxu1 %v17168_v29  ;;  %15010 = vmatprep.mubr.bf16.mxu0 %v17995_v58  ;;  %v17175_v58 = vld [vmem:[%s22411_s2 + $0xf8] sm:$0xff]   ;;  %v3699_v61 = vsel %vm22433_vm1, %v3697_v49, %v3698_v54  ;;  %v3701_v12 = vsel %vm22433_vm1, %v3698_v54, %v3700_v1  ;;  %v1219_v49 = vshll.u32 %v18168_v50, 16  ;;  %v3921_v54 = vshrl.u32 %v18172_v55, 16 }
  0x7a   : > { %15298 = vmatprep.mubr.bf16.mxu1 %v17999_v60  ;;  %v992_v60 = vsel %vm22433_vm1, %v990_v47, %v991_v48  ;;  %v17198_v47 = vld [vmem:[%s22411_s2 + $0x120] sm:$0xff]  }
  0x7b   : > { %15025 = vmatpush3.bf16.msra.mxu0 %v17167_v17  ;;  %v3907_v17 = vshll.u32 %v18150_v42, 16  ;;  %v18307_v11 = vrot.slane %v1219_v49, 2 }
  0x7c   : > { %15313 = vmatpush3.bf16.msra.mxu1 %v17168_v29  ;;  %15026 = vmatprep.subr.bf16.mxu0 %v17169_v30  ;;  %v998_v29 = vsel %vm22433_vm1, %v995_v5, %v997_v34 }
  0x7d   : > { %15314 = vmatprep.subr.bf16.mxu1 %v17170_v31 }
  0x7e   : > { %15011 = vmatmul.mubr.bf16.gmra.mrb[8].mxu0 %v18006_v63  ;;  %v993_v63 = vrot.slane %v18168_v50, 1 }
  0x7f   : > { %15299 = vmatmul.mubr.bf16.gmra.mrb[8].mxu1 %v18013_v2  ;;  %15027 = vmatpush3.bf16.msra.mxu0 %v17169_v30  ;;  %v18193_v2 = vld [vmem:[%s17774_s14 + $0x60] sm:$0xff]   ;;  %v17194_v30 = vld [vmem:[%s22411_s2 + $0x118] sm:$0xff]  }
  0x80   : > { %15315 = vmatpush3.bf16.msra.mxu1 %v17170_v31  ;;  %15028 = vmatprep.subr.bf16.mxu0 %v17171_v35  ;;  %v994_v7 = vsel %vm22433_vm1, %v991_v48, %v993_v63  ;;  %v996_v26 = vsel %vm22433_vm1, %v993_v63, %v995_v5  ;;  %v18264_v31 = vld [vmem:[%s17774_s14 + $0x80] sm:$0xff]   ;;  %v1216_v48 = vshrl.u32 %v18168_v50, 16 }
  0x81   : > { %15316 = vmatprep.subr.bf16.mxu1 %v17172_v39  ;;  %15014 = vmatprep.mubr.bf16.mxu0 %v18018_v4  ;;  %v17185_v4 = vld [vmem:[%s22411_s2 + $0x108] sm:$0xff]   ;;  %v3710_v63 = vrot.slane %v18264_v31, 1 }
  0x82   : > { %15302 = vmatprep.mubr.bf16.mxu1 %v18023_v6  ;;  %v1199_v6 = vshrl.u32 %v18143_v40, 16  ;;  %v1000_v40 = vsel %vm22433_vm1, %v997_v34, %v999_v62  ;;  %v3930_v34 = vshrl.u32 %v18193_v2, 16  ;;  %v1447_v62 = vld [vmem:[%s17774_s14 + $0x8] sm:$0xc] }
  0x83   : > { %15029 = vmatpush3.bf16.msra.mxu0 %v17171_v35 }
  0x84   : > { %15317 = vmatpush3.bf16.msra.mxu1 %v17172_v39  ;;  %15030 = vmatprep.subr.bf16.mxu0 %v17173_v44  ;;  %v18228_v13 = vrot.slane %v1199_v6, 1  ;;  %v3912_v39 = vshrl.u32 %v18154_v43, 16  ;;  %v1225_v6 = vshrl.u32 %v18183_v14, 16 }
  0x85   : > { %15318 = vmatprep.subr.bf16.mxu1 %v17174_v46 }
  0x86   : > { %15015 = vmatmul.mubr.bf16.gmra.mrb[12].mxu0 %v18030_v10  ;;  %v3702_v10 = vrot.slane %v18193_v2, 1 }
  0x87   : > { %15303 = vmatmul.mubr.bf16.gmra.mrb[12].mxu1 %v18039_v9  ;;  %15031 = vmatpush3.bf16.msra.mxu0 %v17173_v44  ;;  %v18214_v9 = vld [vmem:[%s17774_s14 + $0x68] sm:$0xff]  }
  0x88   : > { %15319 = vmatpush3.bf16.msra.mxu1 %v17174_v46  ;;  %15032 = vmatprep.subr.bf16.mxu0 %v17175_v58  ;;  %v3703_v19 = vsel %vm22433_vm1, %v3700_v1, %v3702_v10  ;;  %v3704_v52 = vrot.slane %v18214_v9, 1  ;;  %v18278_v44 = vld [vmem:[%s17774_s14 + $0x88] ss:$0 sps:$4 sm:$0x11]   ;;  %v3915_v46 = vshll.u32 %v18154_v43, 16  ;;  %v1005_v1 = vrot.slane %v18267_v32, 1 }
  0x89   : > { %15320 = vmatprep.subr.bf16.mxu1 %v17176_v59  ;;  %15034 = vmatprep.mubr.bf16.mxu0 %v992_v60  ;;  %v17200_v60 = vld [vmem:[%s22411_s2 + $0x120] sm:$0xff]   ;;  %v17208_v32 = vld [vmem:[%s22411_s2 + $0x130] sm:$0xff]  }
  0x8a   : > { %15322 = vmatprep.mubr.bf16.mxu1 %v3699_v61  ;;  %v3705_v35 = vsel %vm22433_vm1, %v3702_v10, %v3704_v52  ;;  %v3707_v42 = vsel %vm22433_vm1, %v3704_v52, %v3706_v18  ;;  %v1003_v61 = vrot.slane %v18256_v56, 1  ;;  %v3917_v5 = vrot.slane %v3915_v46, 2 }
  0x8b   : > { %15033 = vmatpush3.bf16.msra.mxu0 %v17175_v58  ;;  %v3924_v58 = vshll.u32 %v18172_v55, 16  ;;  %v18305_v10 = vrot.slane %v1216_v48, 1  ;;  %v17209_v48 = vld [vmem:[%s22411_s2 + $0x138] sm:$0xff]  }
  0x8c   : > { %15321 = vmatpush3.bf16.msra.mxu1 %v17176_v59  ;;  %15050 = vmatprep.subr.bf16.mxu0 %v17182_v23  ;;  %v3708_v59 = vrot.slane %v18253_v51, 1 }
  0x8d   : > { %15338 = vmatprep.subr.bf16.mxu1 %v17184_v3  ;;  %v18311_v22 = vrot.slane %v3924_v58, 2  ;;  %v1476_v58 = vrot.slane %v18209_v0, 2 }
  0x8e   : > { %15035 = vmatmul.mubr.bf16.vlgmr.msra.gmra.mrb[0].mxu0 %v994_v7  ;;  %v1228_v7 = vshll.u32 %v18183_v14, 16  ;;  %v3709_v52 = vsel %vm22433_vm1, %v3706_v18, %v3708_v59  ;;  %v12876_v18 = vcombine.low %v1447_v62, %v18129_v33  ;;  %v3711_v33 = vsel %vm22433_vm1, %v3708_v59, %v3710_v63 }
  0x8f   : > { %15323 = vmatmul.mubr.bf16.vlgmr.msra.gmra.mrb[0].mxu1 %v3701_v12  ;;  %15051 = vmatpush3.bf16.msra.mxu0 %v17182_v23  ;;  %v18294_v23 = vrot.slane %v3907_v17, 2  ;;  %v18309_v12 = vrot.slane %v3921_v54, 1  ;;  %v4177_v54 = vrot.slane %v18193_v2, 2 }
  0x90   : > { %15339 = vmatpush3.bf16.msra.mxu1 %v17184_v3  ;;  %15052 = vmatprep.subr.bf16.mxu0 %v17185_v4  ;;  %v18297_v3 = vrot.slane %v3912_v39, 1  ;;  %v18338_v17 = vrot.slane %v1228_v7, 2  ;;  %v1469_v39 = vrot.slane %v12876_v18, 2  ;;  %v1222_v7 = vor.u32 %v18307_v11, %v18305_v10 }
  0x91   : > { %15340 = vmatprep.subr.bf16.mxu1 %v17186_v8  ;;  %15038 = vmatprep.mubr.bf16.mxu0 %v996_v26  ;;  %v17202_v26 = vld [vmem:[%s22411_s2 + $0x128] sm:$0xff]   ;;  %v1246_v18 = vshll.u32 %v18217_v20, 16 }
  0x92   : > { %15326 = vmatprep.mubr.bf16.mxu1 %v3703_v19  ;;  %v1205_v19 = vor.u32 %v18232_v15, %v18228_v13  ;;  %v1004_v13 = vsel %vm22433_vm1, %v1001_v45, %v1003_v61  ;;  %v18336_v15 = vrot.slane %v1225_v6, 1  ;;  %v1472_v45 = vrot.slane %v18168_v50, 2 }
  0x93   : > { %15053 = vmatpush3.bf16.msra.mxu0 %v17185_v4  ;;  %v3712_v4 = vrot.slane %v18278_v44, 1  ;;  %v18359_v50 = vrot.slane %v3930_v34, 1  ;;  %v3918_v59 = vor.u32 %v3917_v5, %v18297_v3  ;;  %v4181_v6 = vrot.slane %v18221_v24, 2 }
  0x94   : > { %15341 = vmatpush3.bf16.msra.mxu1 %v17186_v8  ;;  %15054 = vmatprep.subr.bf16.mxu0 %v17190_v16  ;;  %v17201_v8 = vld [vmem:[%s22411_s2 + $0x128] sm:$0xff]  }
  0x95   : > { %15342 = vmatprep.subr.bf16.mxu1 %v17192_v53 }
  0x96   : > { %15039 = vmatmul.mubr.bf16.gmra.mrb[4].mxu0 %v998_v29  ;;  %v4152_v29 = vld [vmem:[%s17774_s14 + $0x48] sm:$0xc] }
  0x97   : > { %15327 = vmatmul.mubr.bf16.gmra.mrb[4].mxu1 %v3705_v35  ;;  %15055 = vmatpush3.bf16.msra.mxu0 %v17190_v16  ;;  %v3933_v16 = vshll.u32 %v18193_v2, 16  ;;  %v3910_v35 = vor.u32 %v18294_v23, %v18270_v36  ;;  %v1236_v23 = vrot.slane %v1234_v57, 1  ;;  %v1243_v57 = vshrl.u32 %v18217_v20, 16 }
  0x98   : > { %15343 = vmatpush3.bf16.msra.mxu1 %v17192_v53  ;;  %15056 = vmatprep.subr.bf16.mxu0 %v17193_v38  ;;  %v18328_v53 = vor.u32 %v18246_v28, %v18244_v21  ;;  %v17206_v21 = vld [vmem:[%s22411_s2 + $0x130] sm:$0xff]   ;;  %v1237_v28 = vshll.u32 %v18209_v0, 16 }
  0x99   : > { %15344 = vmatprep.subr.bf16.mxu1 %v17194_v30  ;;  %15042 = vmatprep.mubr.bf16.mxu0 %v1000_v40  ;;  %v3935_v44 = vrot.slane %v3933_v16, 2  ;;  %v3919_v34 = vsel %vm22432_vm3, %v3910_v35, %v3918_v59  ;;  %v17212_v16 = vld [vmem:[%s22411_s2 + $0x140] sm:$0xff]  }
  0x9a   : > { %15330 = vmatprep.mubr.bf16.mxu1 %v3707_v42  ;;  %v1214_v3 = vsel %vm22432_vm3, %v1205_v19, %v18328_v53  ;;  %v1480_v19 = vrot.slane %v18226_v27, 2 }
  0x9b   : > { %15057 = vmatpush3.bf16.msra.mxu0 %v17193_v38  ;;  %v1470_v38 = vrot.slane %v18146_v41, 2  ;;  %v13124_v41 = vcombine.low %v4152_v29, %v18137_v37  ;;  %v4175_v37 = vrot.slane %v18172_v55, 2  ;;  %v1474_v55 = vrot.slane %v18183_v14, 2  ;;  %v17210_v14 = vld [vmem:[%s22411_s2 + $0x138] sm:$0xff]  }
  0x9c   : > { %15345 = vmatpush3.bf16.msra.mxu1 %v17194_v30  ;;  %15058 = vmatprep.subr.bf16.mxu0 %v17198_v47  ;;  %v4173_v30 = vrot.slane %v18154_v43, 2  ;;  %v1006_v43 = vsel %vm22433_vm1, %v1003_v61, %v1005_v1  ;;  %v1478_v1 = vrot.slane %v18217_v20, 2  ;;  %v3936_v20 = vor.u32 %v3935_v44, %v18359_v50 }
  0x9d   : > { %15346 = vmatprep.subr.bf16.mxu1 %v17200_v60  ;;  %v4172_v40 = vrot.slane %v13124_v41, 2  ;;  %v18362_v42 = vsel %vm22438_vm2, %v1470_v38, %v1472_v45  ;;  %v18365_v46 = vsel %vm22438_vm2, %v1469_v39, %v1470_v38  ;;  %v18388_v61 = vsel %vm22438_vm2, %v1472_v45, %v1474_v55  ;;  %v17215_v39 = vld [vmem:[%s22411_s2 + $0x150] sm:$0xff]  }
  0x9e   : > { %15043 = vmatmul.mubr.bf16.gmra.mrb[8].mxu0 %v1002_v25  ;;  %v18368_v36 = vsel %vm22438_vm2, %v4173_v30, %v4175_v37  ;;  %v18392_v2 = vsel %vm22438_vm2, %v4175_v37, %v4177_v54  ;;  %v18395_v0 = vsel %vm22438_vm2, %v1474_v55, %v1476_v58  ;;  %v3942_v25 = vshll.u32 %v18214_v9, 16  ;;  %v17216_v55 = vld [vmem:[%s22411_s2 + $0x150] sm:$0xff]  }
  0x9f   : > { %15331 = vmatmul.mubr.bf16.gmra.mrb[8].mxu1 %v3709_v52  ;;  %15059 = vmatpush3.bf16.msra.mxu0 %v17198_v47  ;;  %v3713_v47 = vsel %vm22433_vm1, %v3710_v63, %v3712_v4  ;;  %v18378_v49 = vsel %vm22438_vm2, %v4172_v40, %v4173_v30  ;;  %v4179_v63 = vrot.slane %v18214_v9, 2  ;;  %v1239_v4 = vrot.slane %v1237_v28, 2 }
  0xa0   : > { %15347 = vmatpush3.bf16.msra.mxu1 %v17200_v60  ;;  %15060 = vmatprep.subr.bf16.mxu0 %v17201_v8  ;;  %v3939_v60 = vshrl.u32 %v18214_v9, 16  ;;  %v4183_v52 = vrot.slane %v18253_v51, 2  ;;  %v3927_v9 = vor.u32 %v18311_v22, %v18309_v12  ;;  %v18426_v62 = vsel %vm22438_vm2, %v1478_v1, %v1480_v19 }
  0xa1   : > { %15348 = vmatprep.subr.bf16.mxu1 %v17202_v26  ;;  %15046 = vmatprep.mubr.bf16.mxu0 %v1004_v13  ;;  %v18401_v5 = vsel %vm22438_vm2, %v4177_v54, %v4179_v63  ;;  %v18419_v11 = vsel %vm22438_vm2, %v4179_v63, %v4181_v6  ;;  %v1482_v38 = vrot.slane %v18256_v56, 2  ;;  %v1231_v13 = vor.u32 %v18338_v17, %v18336_v15  ;;  %v18474_v63 = vld [vmem:[%s17774_s14 + $0x48] ss:$0 sps:$4 sm:$0x33]  }
  0xa2   : > { %15334 = vmatprep.mubr.bf16.mxu1 %v3711_v33  ;;  %v3941_v10 = vrot.slane %v3939_v60, 1  ;;  %v18433_v29 = vsel %vm22438_vm2, %v4181_v6, %v4183_v52  ;;  %v1223_v12 = vsel %vm22432_vm3, %v18328_v53, %v1222_v7  ;;  %v3948_v22 = vshrl.u32 %v18221_v24, 16  ;;  %v17213_v53 = vld [vmem:[%s22411_s2 + $0x148] sm:$0xff]  }
  0xa3   : > { %15061 = vmatpush3.bf16.msra.mxu0 %v17201_v8  ;;  %v17211_v8 = vld [vmem:[%s22411_s2 + $0x140] sm:$0xff]   ;;  %v3951_v28 = vshll.u32 %v18221_v24, 16  ;;  %v18443_v41 = vsel %vm22438_vm2, %v1480_v19, %v1482_v38  ;;  %v3944_v15 = vrot.slane %v3942_v25, 2  ;;  %v1252_v17 = vshrl.u32 %v18226_v27, 16  ;;  %v17214_v33 = vld [vmem:[%s22411_s2 + $0x148] sm:$0xff]  }
  0xa4   : > { %15349 = vmatpush3.bf16.msra.mxu1 %v17202_v26  ;;  %15062 = vmatprep.subr.bf16.mxu0 %v17206_v21  ;;  %v18411_v26 = vsel %vm22438_vm2, %v1476_v58, %v1478_v1  ;;  %v3928_v24 = vsel %vm22432_vm3, %v3918_v59, %v3927_v9  ;;  %v1255_v45 = vshll.u32 %v18226_v27, 16  ;;  %v1240_v35 = vor.u32 %v1239_v4, %v1236_v23  ;;  %v17217_v23 = vld [vmem:[%s22411_s2 + $0x158] sm:$0xff]  }
  0xa5   : > { %15350 = vmatprep.subr.bf16.mxu1 %v17208_v32  ;;  %v1245_v37 = vrot.slane %v1243_v57, 1  ;;  %v3950_v50 = vrot.slane %v3948_v22, 1  ;;  %v3953_v40 = vrot.slane %v3951_v28, 2  ;;  %v3937_v27 = vsel %vm22432_vm3, %v3927_v9, %v3936_v20 }
  0xa6   : > { %15047 = vmatmul.mubr.bf16.gmra.mrb[12].mxu0 %v1006_v43  ;;  %v1248_v43 = vrot.slane %v1246_v18, 2  ;;  %v3945_v44 = vor.u32 %v3944_v15, %v3941_v10  ;;  %v1257_v54 = vrot.slane %v1255_v45, 2  ;;  %v3960_v58 = vshll.u32 %v18253_v51, 16 }
  0xa7   : > { %15335 = vmatmul.mubr.bf16.gmra.mrb[12].mxu1 %v3713_v47  ;;  %15063 = vmatpush3.bf16.msra.mxu0 %v17206_v21  ;;  %v4185_v21 = vrot.slane %v18264_v31, 2  ;;  %v1254_v47 = vrot.slane %v1252_v17, 1  ;;  %v1264_v59 = vshll.u32 %v18256_v56, 16  ;;  %v3966_v60 = vshrl.u32 %v18264_v31, 16  ;;  %v17220_v17 = vld [vmem:[%s22411_s2 + $0x160] sm:$0xff]  }
  0xa8   : > { %15351 = vmatpush3.bf16.msra.mxu1 %v17208_v32  ;;  %15064 = vmatprep.subr.bf16.mxu0 %v17209_v48  ;;  %v1232_v32 = vsel %vm22432_vm3, %v1222_v7, %v1231_v13  ;;  %v1249_v1 = vor.u32 %v1248_v43, %v1245_v37  ;;  %v3954_v4 = vor.u32 %v3953_v40, %v3950_v50  ;;  %v3969_v6 = vshll.u32 %v18264_v31, 16  ;;  %v18485_v7 = vld [vmem:[%s17774_s14 + $0x88] ss:$0 sps:$4 sm:$0x33]  }
  0xa9   : > { %15352 = vmatprep.subr.bf16.mxu1 %v17210_v14  ;;  %15066 = vmatprep.mubr.bf16.mxu0 %v1214_v3  ;;  %v18450_v30 = vsel %vm22438_vm2, %v4183_v52, %v4185_v21  ;;  %v1241_v3 = vsel %vm22432_vm3, %v1231_v13, %v1240_v35  ;;  %v3962_v19 = vrot.slane %v3960_v58, 2  ;;  %v17219_v52 = vld [vmem:[%s22411_s2 + $0x160] sm:$0xff]   ;;  %v3968_v9 = vrot.slane %v3966_v60, 1  ;;  %v17222_v50 = vld [vmem:[%s22411_s2 + $0x168] sm:$0xff]  }
  0xaa   : > { %15354 = vmatprep.mubr.bf16.mxu1 %v3919_v34  ;;  %v1250_v10 = vsel %vm22432_vm3, %v1240_v35, %v1249_v1  ;;  %v1270_v57 = vshrl.u32 %v18474_v63, 16  ;;  %v3955_v13 = vsel %vm22432_vm3, %v3945_v44, %v3954_v4  ;;  %v1258_v18 = vor.u32 %v1257_v54, %v1254_v47  ;;  %v17231_v60 = vld [vmem:[%s22411_s2 + $0x180] sm:$0xff]  }
  0xab   : > { %15065 = vmatpush3.bf16.msra.mxu0 %v17209_v48  ;;  %v3957_v48 = vshrl.u32 %v18253_v51, 16  ;;  %v17218_v51 = vld [vmem:[%s22411_s2 + $0x158] sm:$0xff]   ;;  %v1273_v22 = vshll.u32 %v18474_v63, 16  ;;  %v3978_v15 = vshll.u32 %v18485_v7, 16 }
  0xac   : > { %15353 = vmatpush3.bf16.msra.mxu1 %v17210_v14  ;;  %15082 = vmatprep.subr.bf16.mxu0 %v17211_v8  ;;  %v1261_v14 = vshrl.u32 %v18256_v56, 16  ;;  %v1259_v45 = vsel %vm22432_vm3, %v1249_v1, %v1258_v18  ;;  %v17233_v1 = vld [vmem:[%s22411_s2 + $0x188] sm:$0xff]  }
  0xad   : > { %15370 = vmatprep.subr.bf16.mxu1 %v17212_v16  ;;  %v3959_v25 = vrot.slane %v3957_v48, 1  ;;  %v1275_v35 = vrot.slane %v1273_v22, 2  ;;  %v3980_v43 = vrot.slane %v3978_v15, 2  ;;  %v17226_v48 = vld [vmem:[%s22411_s2 + $0x170] sm:$0xff]   ;;  %v18615_v22 = vld [vmem:[%s17774_s14 + $0x68] sm:$0xff]  }
  0xae   : > { %15067 = vmatmul.mubr.bf16.vlgmr.msra.gmra.mrb[0].mxu0 %v1223_v12  ;;  %v1263_v34 = vrot.slane %v1261_v14, 1  ;;  %v3971_v12 = vrot.slane %v3969_v6, 2  ;;  %v17227_v14 = vld [vmem:[%s22411_s2 + $0x178] sm:$0xff]   ;;  %v17239_v6 = vld [vmem:[%s22411_s2 + $0x1a0] sm:$0xff]   ;;  %v18624_v15 = vld [vmem:[%s17774_s14 + $0x70] sm:$0xff]  }
  0xaf   : > { %15355 = vmatmul.mubr.bf16.vlgmr.msra.gmra.mrb[0].mxu1 %v3928_v24  ;;  %15083 = vmatpush3.bf16.msra.mxu0 %v17211_v8  ;;  %v3946_v8 = vsel %vm22432_vm3, %v3936_v20, %v3945_v44  ;;  %v3963_v28 = vor.u32 %v3962_v19, %v3959_v25  ;;  %v3975_v20 = vshrl.u32 %v18485_v7, 16  ;;  %v17221_v24 = vld [vmem:[%s22411_s2 + $0x168] sm:$0xff]   ;;  %v18582_v19 = vld [vmem:[%s17774_s14 + $0x58] sm:$0xff]  }
  0xb0   : > { %15371 = vmatpush3.bf16.msra.mxu1 %v17212_v16  ;;  %15084 = vmatprep.subr.bf16.mxu0 %v17213_v53  ;;  %v1266_v16 = vrot.slane %v1264_v59, 2  ;;  %v17228_v59 = vld [vmem:[%s22411_s2 + $0x178] sm:$0xff]  }
  0xb1   : > { %15372 = vmatprep.subr.bf16.mxu1 %v17214_v33  ;;  %15070 = vmatprep.mubr.bf16.mxu0 %v1232_v32  ;;  %v1272_v32 = vrot.slane %v1270_v57, 1  ;;  %v3977_v37 = vrot.slane %v3975_v20, 1 }
  0xb2   : > { %15358 = vmatprep.mubr.bf16.mxu1 %v3937_v27 }
  0xb3   : > { %15085 = vmatpush3.bf16.msra.mxu0 %v17213_v53  ;;  %v1267_v53 = vor.u32 %v1266_v16, %v1263_v34  ;;  %v1276_v44 = vor.u32 %v1275_v35, %v1272_v32  ;;  %v3981_v47 = vor.u32 %v3980_v43, %v3977_v37  ;;  %v18588_v34 = vld [vmem:[%s17774_s14 + $0x20] sm:$0xff]   ;;  %v1484_v16 = vrot.slane %v18474_v63, 2  ;;  %v18637_v32 = vld [vmem:[%s17774_s14 + $0x78] sm:$0xff]  }
  0xb4   : > { %15373 = vmatpush3.bf16.msra.mxu1 %v17214_v33  ;;  %15086 = vmatprep.subr.bf16.mxu0 %v17215_v39  ;;  %v3972_v33 = vor.u32 %v3971_v12, %v3968_v9  ;;  %v17243_v9 = vld [vmem:[%s22411_s2 + $0x1b0] sm:$0xff]   ;;  %v18612_v12 = vld [vmem:[%s17774_s14 + $0x28] sm:$0xff]   ;;  %v1735_v20 = vrot.slane %v18588_v34, 2  ;;  %v18652_v43 = vld [vmem:[%s17774_s14 + $0x80] sm:$0xff]  }
  0xb5   : > { %15374 = vmatprep.subr.bf16.mxu1 %v17216_v55  ;;  %v1268_v40 = vsel %vm22432_vm3, %v1258_v18, %v1267_v53  ;;  %v1277_v54 = vsel %vm22432_vm3, %v1267_v53, %v1276_v44  ;;  %v18603_v18 = vld [vmem:[%s17774_s14 + $0x60] sm:$0xff]   ;;  %v1737_v37 = vrot.slane %v18612_v12, 2  ;;  %v4441_v44 = vrot.slane %v18624_v15, 2 }
  0xb6   : > { %15071 = vmatmul.mubr.bf16.gmra.mrb[4].mxu0 %v1241_v3  ;;  %v3973_v27 = vsel %vm22432_vm3, %v3963_v28, %v3972_v33  ;;  %v3982_v58 = vsel %vm22432_vm3, %v3972_v33, %v3981_v47  ;;  %v17234_v3 = vld [vmem:[%s22411_s2 + $0x188] sm:$0xff]   ;;  %v4437_v33 = vrot.slane %v18603_v18, 2 }
  0xb7   : > { %15359 = vmatmul.mubr.bf16.gmra.mrb[4].mxu1 %v3946_v8  ;;  %15087 = vmatpush3.bf16.msra.mxu0 %v17215_v39  ;;  %v3964_v39 = vsel %vm22432_vm3, %v3954_v4, %v3963_v28  ;;  %v18562_v4 = vld [vmem:[%s17774_s14 + $0x54] sm:$0xf]  ;;  %v18576_v8 = vld [vmem:[%s17774_s14 + $0x18] sm:$0xff]  }
  0xb8   : > { %15375 = vmatpush3.bf16.msra.mxu1 %v17216_v55  ;;  %15088 = vmatprep.subr.bf16.mxu0 %v17217_v23  ;;  %v17224_v55 = vld [vmem:[%s22411_s2 + $0x170] sm:$0xff]   ;;  %v1733_v57 = vrot.slane %v18576_v8, 2  ;;  %v1952_v53 = vshll.u32 %v18576_v8, 16 }
  0xb9   : > { %15376 = vmatprep.subr.bf16.mxu1 %v17218_v51  ;;  %15074 = vmatprep.mubr.bf16.mxu0 %v1250_v10  ;;  %v4187_v10 = vrot.slane %v18485_v7, 2  ;;  %v4435_v7 = vrot.slane %v18582_v19, 2 }
  0xba   : > { %15362 = vmatprep.mubr.bf16.mxu1 %v3955_v13  ;;  %v18665_v47 = vrot.slane %v1952_v53, 3 }
  0xbb   : > { %15089 = vmatpush3.bf16.msra.mxu0 %v17217_v23  ;;  %v17232_v23 = vld [vmem:[%s22411_s2 + $0x180] sm:$0xff]   ;;  %v4188_v56 = vsel %vm22438_vm2, %v4185_v21, %v4187_v10 }
  0xbc   : > { %15377 = vmatpush3.bf16.msra.mxu1 %v17218_v51  ;;  %15090 = vmatprep.subr.bf16.mxu0 %v17219_v52  ;;  %v18557_v51 = vld [vmem:[%s17774_s14 + $0x14] sm:$0xf]  ;;  %v17252_v21 = vld [vmem:[%s22411_s2 + $0x1c0] sm:$0xff]  }
  0xbd   : > { %15378 = vmatprep.subr.bf16.mxu1 %v17220_v17 }
  0xbe   : > { %15075 = vmatmul.mubr.bf16.gmra.mrb[8].mxu0 %v1259_v45  ;;  %v17245_v45 = vld [vmem:[%s22411_s2 + $0x1b8] sm:$0xff]  }
  0xbf   : > { %15363 = vmatmul.mubr.bf16.gmra.mrb[8].mxu1 %v3964_v39  ;;  %15091 = vmatpush3.bf16.msra.mxu0 %v17219_v52  ;;  %v1485_v39 = vsel %vm22438_vm2, %v1482_v38, %v1484_v16  ;;  %v4439_v38 = vrot.slane %v18615_v22, 2  ;;  %v2214_v16 = vrot.slane %v18588_v34, 3 }
  0xc0   : > { %15379 = vmatpush3.bf16.msra.mxu1 %v17220_v17  ;;  %15092 = vmatprep.subr.bf16.mxu0 %v17221_v24  ;;  %v18627_v17 = vld [vmem:[%s17774_s14 + $0x38] sm:$0xff]  }
  0xc1   : > { %15380 = vmatprep.subr.bf16.mxu1 %v17222_v50  ;;  %15078 = vmatprep.mubr.bf16.mxu0 %v1268_v40  ;;  %v4440_v10 = vsel %vm22438_vm2, %v4437_v33, %v4439_v38 }
  0xc2   : > { %15366 = vmatprep.mubr.bf16.mxu1 %v3973_v27 }
  0xc3   : > { %15093 = vmatpush3.bf16.msra.mxu0 %v17221_v24  ;;  %v1949_v24 = vshrl.u32 %v18576_v8, 16 }
  0xc4   : > { %15381 = vmatpush3.bf16.msra.mxu1 %v17222_v50  ;;  %15094 = vmatprep.subr.bf16.mxu0 %v17224_v55 }
  0xc5   : > { %15382 = vmatprep.subr.bf16.mxu1 %v17226_v48 }
  0xc6   : > { %15079 = vmatmul.mubr.bf16.gmra.mrb[12].mxu0 %v1277_v54  ;;  %v1741_v54 = vrot.slane %v18627_v17, 2 }
  0xc7   : > { %15367 = vmatmul.mubr.bf16.gmra.mrb[12].mxu1 %v3982_v58  ;;  %15095 = vmatpush3.bf16.msra.mxu0 %v17224_v55  ;;  %v18663_v55 = vrot.slane %v1949_v24, 2  ;;  %v4443_v58 = vrot.slane %v18637_v32, 2 }
  0xc8   : > { %15383 = vmatpush3.bf16.msra.mxu1 %v17226_v48  ;;  %15096 = vmatprep.subr.bf16.mxu0 %v17227_v14 }
  0xc9   : > { %15384 = vmatprep.subr.bf16.mxu1 %v17228_v59  ;;  %15098 = vmatprep.mubr.bf16.mxu0 %v18365_v46  ;;  %v17235_v46 = vld [vmem:[%s22411_s2 + $0x190] sm:$0xff]  }
  0xca   : > { %15386 = vmatprep.mubr.bf16.mxu1 %v18378_v49  ;;  %v17238_v49 = vld [vmem:[%s22411_s2 + $0x198] sm:$0xff]  }
  0xcb   : > { %15097 = vmatpush3.bf16.msra.mxu0 %v17227_v14 }
  0xcc   : > { %15385 = vmatpush3.bf16.msra.mxu1 %v17228_v59  ;;  %15114 = vmatprep.subr.bf16.mxu0 %v17231_v60  ;;  %v18678_v59 = vld [vmem:[%s17774_s14 + $0x48] sm:$0xff]  }
  0xcd   : > { %15402 = vmatprep.subr.bf16.mxu1 %v17232_v23 }
  0xce   : > { %15099 = vmatmul.mubr.bf16.vlgmr.msra.gmra.mrb[0].mxu0 %v18362_v42  ;;  %v17236_v42 = vld [vmem:[%s22411_s2 + $0x190] sm:$0xff]  }
  0xcf   : > { %15387 = vmatmul.mubr.bf16.vlgmr.msra.gmra.mrb[0].mxu1 %v18368_v36  ;;  %15115 = vmatpush3.bf16.msra.mxu0 %v17231_v60  ;;  %v17237_v36 = vld [vmem:[%s22411_s2 + $0x198] sm:$0xff]  }
  0xd0   : > { %15403 = vmatpush3.bf16.msra.mxu1 %v17232_v23  ;;  %15116 = vmatprep.subr.bf16.mxu0 %v17233_v1  ;;  %v17254_v23 = vld [vmem:[%s22411_s2 + $0x1c0] sm:$0xff]  }
  0xd1   : > { %15404 = vmatprep.subr.bf16.mxu1 %v17234_v3  ;;  %15102 = vmatprep.mubr.bf16.mxu0 %v18388_v61  ;;  %v1655_v61 = vld [vmem:[%s17774_s14 + $0x10] sm:$0xc] }
  0xd2   : > { %15390 = vmatprep.mubr.bf16.mxu1 %v18392_v2  ;;  %v4358_v2 = vld [vmem:[%s17774_s14 + $0x50] sm:$0xc] }
  0xd3   : > { %15117 = vmatpush3.bf16.msra.mxu0 %v17233_v1  ;;  %v18579_v25 = vcombine.low %v4358_v2, %v18562_v4  ;;  %v4445_v1 = vrot.slane %v18652_v43, 2  ;;  %v18697_v2 = vld [vmem:[%s17774_s14 + $0x88] sm:$0xff]  }
  0xd4   : > { %15405 = vmatpush3.bf16.msra.mxu1 %v17234_v3  ;;  %15118 = vmatprep.subr.bf16.mxu0 %v17235_v46 }
  0xd5   : > { %15406 = vmatprep.subr.bf16.mxu1 %v17236_v42  ;;  %v4434_v13 = vrot.slane %v18579_v25, 2  ;;  %v4641_v40 = vshrl.u32 %v18579_v25, 16  ;;  %v4644_v48 = vshll.u32 %v18579_v25, 16  ;;  %v17255_v25 = vld [vmem:[%s22411_s2 + $0x1c8] sm:$0xff]  }
  0xd6   : > { %15103 = vmatmul.mubr.bf16.gmra.mrb[4].mxu0 %v18395_v0  ;;  %v17240_v0 = vld [vmem:[%s22411_s2 + $0x1a0] sm:$0xff]  }
  0xd7   : > { %15391 = vmatmul.mubr.bf16.gmra.mrb[4].mxu1 %v18401_v5  ;;  %15119 = vmatpush3.bf16.msra.mxu0 %v17235_v46  ;;  %v18572_v5 = vcombine.low %v1655_v61, %v18557_v51  ;;  %v4436_v60 = vsel %vm22438_vm2, %v4434_v13, %v4435_v7  ;;  %v18685_v3 = vrot.slane %v4641_v40, 2  ;;  %v4649_v46 = vshrl.u32 %v18582_v19, 16  ;;  %v17260_v40 = vld [vmem:[%s22411_s2 + $0x1d0] sm:$0xff]  }
  0xd8   : > { %15407 = vmatpush3.bf16.msra.mxu1 %v17236_v42  ;;  %15120 = vmatprep.subr.bf16.mxu0 %v17237_v36  ;;  %v2189_v42 = vld [vmem:[%s17774_s14 + $0x10] sm:$0x8]  ;;  %v4438_v61 = vsel %vm22438_vm2, %v4435_v7, %v4437_v33  ;;  %v4447_v7 = vrot.slane %v18697_v2, 2 }
  0xd9   : > { %15408 = vmatprep.subr.bf16.mxu1 %v17238_v49  ;;  %15106 = vmatprep.mubr.bf16.mxu0 %v18411_v26  ;;  %v17241_v26 = vld [vmem:[%s22411_s2 + $0x1a8] sm:$0xff]   ;;  %v1732_v52 = vrot.slane %v18572_v5, 2  ;;  %v1941_v63 = vshrl.u32 %v18572_v5, 16  ;;  %v1944_v28 = vshll.u32 %v18572_v5, 16  ;;  %v4889_v5 = vld [vmem:[%s17774_s14 + $0x50] sm:$0x8] }
  0xda   : > { %15394 = vmatprep.mubr.bf16.mxu1 %v18419_v11  ;;  %v17242_v11 = vld [vmem:[%s22411_s2 + $0x1a8] sm:$0xff]  }
  0xdb   : > { %15121 = vmatpush3.bf16.msra.mxu0 %v17237_v36  ;;  %v18642_v35 = vrot.slane %v1941_v63, 2  ;;  %v18654_v50 = vrot.slane %v1944_v28, 3  ;;  %v1734_v31 = vsel %vm22438_vm2, %v1732_v52, %v1733_v57  ;;  %v2212_v36 = vrot.slane %v18576_v8, 3  ;;  %v18729_v28 = vld [vmem:[%s17774_s14 + $0x50] ss:$0 sps:$4 sm:$0x33]  }
  0xdc   : > { %15409 = vmatpush3.bf16.msra.mxu1 %v17238_v49  ;;  %15122 = vmatprep.subr.bf16.mxu0 %v17239_v6  ;;  %v1736_v49 = vsel %vm22438_vm2, %v1733_v57, %v1735_v20  ;;  %v13207_v8 = vcombine.low %v4889_v5, %v18562_v4  ;;  %v17256_v4 = vld [vmem:[%s22411_s2 + $0x1c8] sm:$0xff]   ;;  %v2216_v63 = vrot.slane %v18612_v12, 3 }
  0xdd   : > { %15410 = vmatprep.subr.bf16.mxu1 %v17240_v0  ;;  %v18723_v13 = vsel %vm22437_vm4, %v2212_v36, %v2214_v16 }
  0xde   : > { %15107 = vmatmul.mubr.bf16.gmra.mrb[8].mxu0 %v18426_v62  ;;  %v17244_v62 = vld [vmem:[%s22411_s2 + $0x1b0] sm:$0xff]   ;;  %v4909_v57 = vrot.slane %v13207_v8, 3  ;;  %v18742_v33 = vsel %vm22437_vm4, %v2214_v16, %v2216_v63  ;;  %v22414_v8 = vrot.slane %v18697_v2, 3  ;;  %v1958_v16 = vshrl.u32 %v18588_v34, 16 }
  0xdf   : > { %15395 = vmatmul.mubr.bf16.gmra.mrb[8].mxu1 %v18433_v29  ;;  %15123 = vmatpush3.bf16.msra.mxu0 %v17239_v6  ;;  %v18620_v29 = vld [vmem:[%s17774_s14 + $0x30] sm:$0xff]   ;;  %v18699_v6 = vrot.slane %v4644_v48, 3 }
  0xe0   : > { %15411 = vmatpush3.bf16.msra.mxu1 %v17240_v0  ;;  %15124 = vmatprep.subr.bf16.mxu0 %v17241_v26  ;;  %v1739_v27 = vrot.slane %v18620_v29, 2  ;;  %v12959_v0 = vcombine.low %v2189_v42, %v18557_v51  ;;  %v1738_v51 = vsel %vm22438_vm2, %v1735_v20, %v1737_v37  ;;  %v2218_v53 = vrot.slane %v18620_v29, 3 }
  0xe1   : > { %15412 = vmatprep.subr.bf16.mxu1 %v17242_v11  ;;  %15110 = vmatprep.mubr.bf16.mxu0 %v18443_v41  ;;  %v18640_v41 = vld [vmem:[%s17774_s14 + $0x40] sm:$0xff]  }
  0xe2   : > { %15398 = vmatprep.mubr.bf16.mxu1 %v18450_v30  ;;  %v17246_v30 = vld [vmem:[%s22411_s2 + $0x1b8] sm:$0xff]   ;;  %v1743_v14 = vrot.slane %v18640_v41, 2  ;;  %v2211_v52 = vrot.slane %v12959_v0, 3  ;;  %v18755_v48 = vsel %vm22437_vm4, %v2216_v63, %v2218_v53  ;;  %v2222_v42 = vrot.slane %v18640_v41, 3 }
  0xe3   : > { %15125 = vmatpush3.bf16.msra.mxu0 %v17241_v26  ;;  %v1745_v26 = vrot.slane %v18678_v59, 2  ;;  %v1961_v63 = vshll.u32 %v18588_v34, 16  ;;  %v4661_v34 = vshll.u32 %v18603_v18, 16 }
  0xe4   : > { %15413 = vmatpush3.bf16.msra.mxu1 %v17242_v11  ;;  %15126 = vmatprep.subr.bf16.mxu0 %v17243_v9  ;;  %v4910_v11 = vrot.slane %v18582_v19, 3  ;;  %v18732_v20 = vsel %vm22437_vm4, %v2211_v52, %v2212_v36 }
  0xe5   : > { %15414 = vmatprep.subr.bf16.mxu1 %v17244_v62 }
  0xe6   : > { %15111 = vmatmul.mubr.bf16.gmra.mrb[12].mxu0 %v1485_v39 }
  0xe7   : > { %15399 = vmatmul.mubr.bf16.gmra.mrb[12].mxu1 %v4188_v56  ;;  %15127 = vmatpush3.bf16.msra.mxu0 %v17243_v9  ;;  %v4912_v9 = vrot.slane %v18603_v18, 3  ;;  %v18752_v56 = vld [vmem:[%s17774_s14 + $0x90] ss:$0 sps:$4 sm:$0x33]  }
  0xe8   : > { %15415 = vmatpush3.bf16.msra.mxu1 %v17244_v62  ;;  %15128 = vmatprep.subr.bf16.mxu0 %v17245_v45  ;;  %v4914_v62 = vrot.slane %v18615_v22, 3 }
  0xe9   : > { %15416 = vmatprep.subr.bf16.mxu1 %v17246_v30  ;;  %15130 = vmatprep.mubr.bf16.mxu0 %v1734_v31  ;;  %v18735_v24 = vsel %vm22437_vm4, %v4910_v11, %v4912_v9  ;;  %v2220_v31 = vrot.slane %v18627_v17, 3 }
  0xea   : > { %15418 = vmatprep.mubr.bf16.mxu1 %v4436_v60  ;;  %v18745_v39 = vsel %vm22437_vm4, %v4912_v9, %v4914_v62  ;;  %v4918_v60 = vrot.slane %v18637_v32, 3  ;;  %v17263_v9 = vld [vmem:[%s22411_s2 + $0x1d8] sm:$0xff]  }
  0xeb   : > { %15129 = vmatpush3.bf16.msra.mxu0 %v17245_v45  ;;  %v18739_v45 = vsel %vm22437_vm4, %v4909_v57, %v4910_v11  ;;  %v18774_v0 = vsel %vm22437_vm4, %v2218_v53, %v2220_v31  ;;  %v4652_v11 = vshll.u32 %v18582_v19, 16  ;;  %v1747_v57 = vrot.slane %v18729_v28, 2 }
  0xec   : > { %15417 = vmatpush3.bf16.msra.mxu1 %v17246_v30  ;;  %15146 = vmatprep.subr.bf16.mxu0 %v17252_v21  ;;  %v4916_v30 = vrot.slane %v18624_v15, 3  ;;  %v1967_v19 = vshrl.u32 %v18612_v12, 16  ;;  %v4697_v28 = vshll.u32 %v18652_v43, 16 }
  0xed   : > { %15434 = vmatprep.subr.bf16.mxu1 %v17254_v23 }
  0xee   : > { %15131 = vmatmul.mubr.bf16.vlgmr.msra.gmra.mrb[0].mxu0 %v1736_v49  ;;  %v18766_v36 = vsel %vm22437_vm4, %v4914_v62, %v4916_v30  ;;  %v4920_v49 = vrot.slane %v18652_v43, 3  ;;  %v18777_v5 = vsel %vm22437_vm4, %v4916_v30, %v4918_v60  ;;  %v4658_v62 = vshrl.u32 %v18603_v18, 16  ;;  %v17268_v18 = vld [vmem:[%s22411_s2 + $0x1e0] sm:$0xff]  }
  0xef   : > { %15419 = vmatmul.mubr.bf16.vlgmr.msra.gmra.mrb[0].mxu1 %v4438_v61  ;;  %15147 = vmatpush3.bf16.msra.mxu0 %v17252_v21  ;;  %v1740_v21 = vsel %vm22438_vm2, %v1737_v37, %v1739_v27  ;;  %v2224_v61 = vrot.slane %v18678_v59, 3  ;;  %v18780_v37 = vsel %vm22437_vm4, %v2220_v31, %v2222_v42  ;;  %v18814_v30 = vrot.slane %v4649_v46, 2 }
  0xf0   : > { %15435 = vmatpush3.bf16.msra.mxu1 %v17254_v23  ;;  %15148 = vmatprep.subr.bf16.mxu0 %v17255_v25  ;;  %v17262_v23 = vld [vmem:[%s22411_s2 + $0x1d0] sm:$0xff]   ;;  %v18805_v53 = vsel %vm22437_vm4, %v4920_v49, %v22414_v8  ;;  %v4444_v31 = vsel %vm22438_vm2, %v4441_v44, %v4443_v58  ;;  %v18832_v46 = vrot.slane %v4652_v11, 3  ;;  %v4670_v8 = vshll.u32 %v18615_v22, 16 }
  0xf1   : > { %15436 = vmatprep.subr.bf16.mxu1 %v17256_v4  ;;  %15134 = vmatprep.mubr.bf16.mxu0 %v1738_v51  ;;  %v18786_v51 = vsel %vm22437_vm4, %v4918_v60, %v4920_v49  ;;  %v18791_v52 = vsel %vm22437_vm4, %v2222_v42, %v2224_v61  ;;  %v18834_v60 = vrot.slane %v1958_v16, 2  ;;  %v4667_v42 = vshrl.u32 %v18615_v22, 16 }
  0xf2   : > { %15422 = vmatprep.mubr.bf16.mxu1 %v4440_v10  ;;  %v17264_v10 = vld [vmem:[%s22411_s2 + $0x1d8] sm:$0xff]   ;;  %v18841_v49 = vrot.slane %v1961_v63, 3  ;;  %v1976_v11 = vshrl.u32 %v18620_v29, 16  ;;  %v18847_v16 = vrot.slane %v4661_v34, 3  ;;  %v17271_v63 = vld [vmem:[%s22411_s2 + $0x1e8] sm:$0xff]   ;;  %v18868_v34 = vrot.slane %v4670_v8, 3 }
  0xf3   : > { %15149 = vmatpush3.bf16.msra.mxu0 %v17255_v25  ;;  %v4442_v25 = vsel %vm22438_vm2, %v4439_v38, %v4441_v44  ;;  %v4449_v38 = vrot.slane %v18752_v56, 2  ;;  %v17270_v44 = vld [vmem:[%s22411_s2 + $0x1e0] sm:$0xff]   ;;  %v1985_v8 = vshrl.u32 %v18627_v17, 16 }
  0xf4   : > { %15437 = vmatpush3.bf16.msra.mxu1 %v17256_v4  ;;  %15150 = vmatprep.subr.bf16.mxu0 %v17260_v40  ;;  %v1742_v4 = vsel %vm22438_vm2, %v1739_v27, %v1741_v54  ;;  %v1970_v27 = vshll.u32 %v18612_v12, 16  ;;  %v1979_v12 = vshll.u32 %v18620_v29, 16  ;;  %v1744_v29 = vsel %vm22438_vm2, %v1741_v54, %v1743_v14  ;;  %v17281_v56 = vld [vmem:[%s22411_s2 + $0x200] sm:$0xff]  }
  0xf5   : > { %15438 = vmatprep.subr.bf16.mxu1 %v17262_v23  ;;  %v4679_v54 = vshll.u32 %v18624_v15, 16 }
  0xf6   : > { %15135 = vmatmul.mubr.bf16.gmra.mrb[4].mxu0 %v1740_v21  ;;  %v18843_v21 = vrot.slane %v4658_v62, 2  ;;  %v18856_v22 = vrot.slane %v1970_v27, 3  ;;  %v18858_v62 = vrot.slane %v4667_v42, 2  ;;  %v1988_v27 = vshll.u32 %v18627_v17, 16 }
  0xf7   : > { %15423 = vmatmul.mubr.bf16.gmra.mrb[4].mxu1 %v4442_v25  ;;  %15151 = vmatpush3.bf16.msra.mxu0 %v17260_v40  ;;  %v18850_v40 = vrot.slane %v1967_v19, 2  ;;  %v4676_v25 = vshrl.u32 %v18624_v15, 16  ;;  %v4685_v15 = vshrl.u32 %v18637_v32, 16  ;;  %v4448_v42 = vsel %vm22438_vm2, %v4445_v1, %v4447_v7 }
  0xf8   : > { %15439 = vmatpush3.bf16.msra.mxu1 %v17262_v23  ;;  %15152 = vmatprep.subr.bf16.mxu0 %v17263_v9  ;;  %v17272_v23 = vld [vmem:[%s22411_s2 + $0x1e8] sm:$0xff]   ;;  %v18903_v17 = vrot.slane %v4679_v54, 3 }
  0xf9   : > { %15440 = vmatprep.subr.bf16.mxu1 %v17264_v10  ;;  %15138 = vmatprep.mubr.bf16.mxu0 %v1742_v4  ;;  %v18870_v4 = vrot.slane %v1976_v11, 2  ;;  %v18880_v19 = vrot.slane %v4676_v25, 2  ;;  %v4688_v11 = vshll.u32 %v18637_v32, 16  ;;  %v1947_v25 = vor.u32 %v18654_v50, %v18642_v35  ;;  %v17279_v32 = vld [vmem:[%s22411_s2 + $0x1f8] sm:$0xff]  }
  0xfa   : > { %15426 = vmatprep.mubr.bf16.mxu1 %v4444_v31  ;;  %v18877_v31 = vrot.slane %v1979_v12, 3  ;;  %v1994_v12 = vshrl.u32 %v18640_v41, 16  ;;  %v18920_v54 = vrot.slane %v4685_v15, 2  ;;  %v1748_v35 = vsel %vm22438_vm2, %v1745_v26, %v1747_v57  ;;  %v17280_v50 = vld [vmem:[%s22411_s2 + $0x1f8] sm:$0xff]  }
  0xfb   : > { %15153 = vmatpush3.bf16.msra.mxu0 %v17263_v9  ;;  %v4446_v9 = vsel %vm22438_vm2, %v4443_v58, %v4445_v1  ;;  %v17276_v58 = vld [vmem:[%s22411_s2 + $0x1f0] sm:$0xff]   ;;  %v18908_v1 = vrot.slane %v1985_v8, 2  ;;  %v4703_v8 = vshrl.u32 %v18697_v2, 16 }
  0xfc   : > { %15441 = vmatpush3.bf16.msra.mxu1 %v17264_v10  ;;  %15154 = vmatprep.subr.bf16.mxu0 %v17268_v18  ;;  %v1746_v10 = vsel %vm22438_vm2, %v1743_v14, %v1745_v26  ;;  %v17278_v14 = vld [vmem:[%s22411_s2 + $0x1f0] sm:$0xff]  }
  0xfd   : > { %15442 = vmatprep.subr.bf16.mxu1 %v17270_v44 }
  0xfe   : > { %15139 = vmatmul.mubr.bf16.gmra.mrb[8].mxu0 %v1744_v29  ;;  %v4694_v29 = vshrl.u32 %v18652_v43, 16  ;;  %v1964_v43 = vor.u32 %v18841_v49, %v18834_v60  ;;  %v17283_v60 = vld [vmem:[%s22411_s2 + $0x208] sm:$0xff]   ;;  %v1973_v49 = vor.u32 %v18856_v22, %v18850_v40 }
  0xff   : > { %15427 = vmatmul.mubr.bf16.gmra.mrb[8].mxu1 %v4446_v9  ;;  %15155 = vmatpush3.bf16.msra.mxu0 %v17268_v18  ;;  %v1997_v18 = vshll.u32 %v18640_v41, 16  ;;  %v4647_v41 = vor.u32 %v18699_v6, %v18685_v3  ;;  %v18918_v9 = vrot.slane %v1988_v27, 3  ;;  %v18934_v3 = vrot.slane %v1994_v12, 2 }
 0x100   : > { %15443 = vmatpush3.bf16.msra.mxu1 %v17270_v44  ;;  %15156 = vmatprep.subr.bf16.mxu0 %v17271_v63  ;;  %v1955_v44 = vor.u32 %v18665_v47, %v18663_v55  ;;  %v4655_v55 = vor.u32 %v18832_v46, %v18814_v30  ;;  %v18932_v47 = vrot.slane %v4688_v11, 3  ;;  %v4450_v6 = vsel %vm22438_vm2, %v4447_v7, %v4449_v38  ;;  %v17282_v38 = vld [vmem:[%s22411_s2 + $0x200] sm:$0xff]  }
 0x101   : > { %15444 = vmatprep.subr.bf16.mxu1 %v17272_v23  ;;  %15142 = vmatprep.mubr.bf16.mxu0 %v1746_v10  ;;  %v18941_v26 = vrot.slane %v1997_v18, 3  ;;  %v18944_v57 = vrot.slane %v4694_v29, 2  ;;  %v2003_v30 = vshrl.u32 %v18678_v59, 16  ;;  %v4664_v10 = vor.u32 %v18847_v16, %v18843_v21  ;;  %v17285_v18 = vld [vmem:[%s22411_s2 + $0x210] sm:$0xff]  }
 0x102   : > { %15430 = vmatprep.mubr.bf16.mxu1 %v4448_v42  ;;  %v1956_v46 = vsel %vm22436_vm5, %v1947_v25, %v1955_v44  ;;  %v4656_v7 = vsel %vm22436_vm5, %v4647_v41, %v4655_v55  ;;  %v1965_v15 = vsel %vm22436_vm5, %v1955_v44, %v1964_v43  ;;  %v17284_v42 = vld [vmem:[%s22411_s2 + $0x208] sm:$0xff]   ;;  %v4673_v21 = vor.u32 %v18868_v34, %v18858_v62  ;;  %v17286_v25 = vld [vmem:[%s22411_s2 + $0x210] sm:$0xff]  }
 0x103   : > { %15157 = vmatpush3.bf16.msra.mxu0 %v17271_v63  ;;  %v18952_v63 = vld [vmem:[%s17774_s14 + $0x50] ss:$0 sps:$4 sm:$0x77]   ;;  %v2005_v27 = vrot.slane %v2003_v30, 2  ;;  %v4665_v11 = vsel %vm22436_vm5, %v4655_v55, %v4664_v10  ;;  %v4705_v12 = vrot.slane %v4703_v8, 2  ;;  %v1974_v22 = vsel %vm22436_vm5, %v1964_v43, %v1973_v49  ;;  %v17292_v43 = vld [vmem:[%s22411_s2 + $0x228] sm:$0xff]  }
 0x104   : > { %15445 = vmatpush3.bf16.msra.mxu1 %v17272_v23  ;;  %15158 = vmatprep.subr.bf16.mxu0 %v17276_v58  ;;  %v2006_v23 = vshll.u32 %v18678_v59, 16  ;;  %v2012_v40 = vshrl.u32 %v18952_v63, 16  ;;  %v4674_v62 = vsel %vm22436_vm5, %v4664_v10, %v4673_v21  ;;  %v1982_v34 = vor.u32 %v18877_v31, %v18870_v4  ;;  %v18992_v41 = vld [vmem:[%s17774_s14 + $0x90] ss:$0 sps:$4 sm:$0x77]   ;;  %v17287_v4 = vld [vmem:[%s22411_s2 + $0x218] sm:$0xff]  }
 0x105   : > { %15446 = vmatprep.subr.bf16.mxu1 %v17278_v14  ;;  %v4682_v44 = vor.u32 %v18903_v17, %v18880_v19  ;;  %v1991_v31 = vor.u32 %v18918_v9, %v18908_v1  ;;  %v4691_v19 = vor.u32 %v18932_v47, %v18920_v54  ;;  %v17289_v9 = vld [vmem:[%s22411_s2 + $0x220] sm:$0xff]   ;;  %v2000_v54 = vor.u32 %v18941_v26, %v18934_v3 }
 0x106   : > { %15143 = vmatmul.mubr.bf16.gmra.mrb[12].mxu0 %v1748_v35  ;;  %v2008_v16 = vrot.slane %v2006_v23, 3  ;;  %v1983_v35 = vsel %vm22436_vm5, %v1973_v49, %v1982_v34  ;;  %v2014_v17 = vrot.slane %v2012_v40, 2  ;;  %v17290_v47 = vld [vmem:[%s22411_s2 + $0x220] sm:$0xff]   ;;  %v4712_v30 = vshrl.u32 %v18992_v41, 16  ;;  %v17296_v49 = vld [vmem:[%s22411_s2 + $0x230] sm:$0xff]  }
 0x107   : > { %15431 = vmatmul.mubr.bf16.gmra.mrb[12].mxu1 %v4450_v6  ;;  %15159 = vmatpush3.bf16.msra.mxu0 %v17276_v58  ;;  %v4699_v58 = vrot.slane %v4697_v28, 3  ;;  %v4683_v6 = vsel %vm22436_vm5, %v4673_v21, %v4682_v44  ;;  %v1992_v1 = vsel %vm22436_vm5, %v1982_v34, %v1991_v31  ;;  %v4692_v28 = vsel %vm22436_vm5, %v4682_v44, %v4691_v19  ;;  %v17303_v40 = vld [vmem:[%s22411_s2 + $0x50] sm:$0xff]   ;;  %v17311_v59 = vld [vmem:[%s22411_s2] sm:$0xff]  }
 0x108   : > { %15447 = vmatpush3.bf16.msra.mxu1 %v17278_v14  ;;  %15160 = vmatprep.subr.bf16.mxu0 %v17279_v32  ;;  %v4706_v14 = vshll.u32 %v18697_v2, 16  ;;  %v2009_v3 = vor.u32 %v2008_v16, %v2005_v27  ;;  %v2001_v26 = vsel %vm22436_vm5, %v1991_v31, %v2000_v54  ;;  %v4714_v23 = vrot.slane %v4712_v30, 2  ;;  %v17298_v16 = vld [vmem:[%s22411_s2 + $0x238] sm:$0xff]   ;;  %v6041_v30 = vld [vmem:[%s17774_s14 + $0x8c] sm:$0xf] }
 0x109   : > { %15448 = vmatprep.subr.bf16.mxu1 %v17280_v50  ;;  %15162 = vmatprep.mubr.bf16.mxu0 %v1956_v46  ;;  %v4715_v46 = vshll.u32 %v18992_v41, 16 }
 0x10a   : > { %15450 = vmatprep.mubr.bf16.mxu1 %v4656_v7  ;;  %v4708_v29 = vrot.slane %v4706_v14, 3  ;;  %v17291_v7 = vld [vmem:[%s22411_s2 + $0x228] sm:$0xff]   ;;  %v2010_v10 = vsel %vm22436_vm5, %v2000_v54, %v2009_v3  ;;  %v17320_v54 = vld [vmem:[%s22411_s2 + $0x80] sm:$0xff]  }
 0x10b   : > { %15161 = vmatpush3.bf16.msra.mxu0 %v17279_v32  ;;  %v2015_v32 = vshll.u32 %v18952_v63, 16  ;;  %v4717_v8 = vrot.slane %v4715_v46, 3  ;;  %v19137_v46 = vld [vmem:[%s17774_s14 + $0x90] sm:$0xff]  }
 0x10c   : > { %15449 = vmatpush3.bf16.msra.mxu1 %v17280_v50  ;;  %15178 = vmatprep.subr.bf16.mxu0 %v17281_v56  ;;  %v17288_v50 = vld [vmem:[%s22411_s2 + $0x218] sm:$0xff]   ;;  %22544 = vst [vmem:[#allocation3_spill] sm:$0xff] %v19137_v46 }
 0x10d   : > { %15466 = vmatprep.subr.bf16.mxu1 %v17282_v38  ;;  %v2017_v55 = vrot.slane %v2015_v32, 3 }
 0x10e   : > { %15163 = vmatmul.mubr.bf16.vlgmr.msra.gmra.mrb[0].mxu0 %v1965_v15  ;;  %v4718_v15 = vor.u32 %v4717_v8, %v4714_v23  ;;  %v17322_v8 = vld [vmem:[%s22411_s2 + $0x90] sm:$0xff]  }
 0x10f   : > { %15451 = vmatmul.mubr.bf16.vlgmr.msra.gmra.mrb[0].mxu1 %v4665_v11  ;;  %15179 = vmatpush3.bf16.msra.mxu0 %v17281_v56  ;;  %v4700_v56 = vor.u32 %v4699_v58, %v18944_v57  ;;  %v17294_v58 = vld [vmem:[%s22411_s2 + $0x230] sm:$0xff]   ;;  %v17301_v11 = vld [vmem:[%s22411_s2 + $0x40] sm:$0xff]  }
 0x110   : > { %15467 = vmatpush3.bf16.msra.mxu1 %v17282_v38  ;;  %15180 = vmatprep.subr.bf16.mxu0 %v17283_v60  ;;  %v4709_v38 = vor.u32 %v4708_v29, %v4705_v12  ;;  %v17302_v12 = vld [vmem:[%s22411_s2 + $0x48] sm:$0xff]  }
 0x111   : > { %15468 = vmatprep.subr.bf16.mxu1 %v17284_v42  ;;  %15166 = vmatprep.mubr.bf16.mxu0 %v1974_v22  ;;  %v4701_v57 = vsel %vm22436_vm5, %v4691_v19, %v4700_v56  ;;  %v5644_v22 = vld [vmem:[%s17774_s14 + $0x80] sm:$0xf] }
 0x112   : > { %15454 = vmatprep.mubr.bf16.mxu1 %v4674_v62  ;;  %v4710_v27 = vsel %vm22436_vm5, %v4700_v56, %v4709_v38  ;;  %v4719_v14 = vsel %vm22436_vm5, %v4709_v38, %v4718_v15  ;;  %v17316_v19 = vld [vmem:[%s22411_s2 + $0x20] sm:$0xff]   ;;  %v6331_v56 = vld [vmem:[%s17774_s14 + $0x88] sm:$0xc]  ;;  %v22545_v15 = vmov 0 }
 0x113   : > { %15181 = vmatpush3.bf16.msra.mxu0 %v17283_v60  ;;  %v2018_v60 = vor.u32 %v2017_v55, %v2014_v17  ;;  %v17317_v17 = vld [vmem:[%s22411_s2 + $0x28] sm:$0xff]   ;;  %v17318_v55 = vld [vmem:[%s22411_s2 + $0x30] sm:$0xff]   ;;  %v22546_v15 = vsel %vm19171_vm8, 4294967295, %v22545_v15 }
 0x114   : > { %15469 = vmatpush3.bf16.msra.mxu1 %v17284_v42  ;;  %15182 = vmatprep.subr.bf16.mxu0 %v17285_v18  ;;  %v17297_v42 = vld [vmem:[%s22411_s2 + $0x238] sm:$0xff]   ;;  %22547 = vst [vmem:[#allocation4_spill] sm:$0xff] %v22546_v15 }
 0x115   : > { %15470 = vmatprep.subr.bf16.mxu1 %v17286_v25  ;;  %v2019_v21 = vsel %vm22436_vm5, %v2009_v3, %v2018_v60  ;;  %v22415_v3 = vrot.slane %v19137_v46, 2  ;;  %v17326_v60 = vld [vmem:[%s22411_s2 + $0xb0] sm:$0xff]  }
 0x116   : > { %15167 = vmatmul.mubr.bf16.gmra.mrb[4].mxu0 %v1983_v35  ;;  %v17314_v35 = vld [vmem:[%s22411_s2 + $0x10] sm:$0xff]  }
 0x117   : > { %15455 = vmatmul.mubr.bf16.gmra.mrb[4].mxu1 %v4683_v6  ;;  %15183 = vmatpush3.bf16.msra.mxu0 %v17285_v18  ;;  %v5912_v6 = vld [vmem:[%s17774_s14 + $0x80] sm:$0xe] }
 0x118   : > { %15471 = vmatpush3.bf16.msra.mxu1 %v17286_v25  ;;  %15184 = vmatprep.subr.bf16.mxu0 %v17287_v4  ;;  %v19082_v25 = vld [vmem:[%s17774_s14 + $0x90] ss:$0 sps:$4 sm:$0x11]  }
 0x119   : > { %15472 = vmatprep.subr.bf16.mxu1 %v17288_v50  ;;  %15170 = vmatprep.mubr.bf16.mxu0 %v1992_v1  ;;  %v5710_v44 = vshll.u32 %v19082_v25, 16  ;;  %v17319_v1 = vld [vmem:[%s22411_s2 + $0x38] sm:$0xff]  }
 0x11a   : > { %15458 = vmatprep.mubr.bf16.mxu1 %v4692_v28 }
 0x11b   : > { %15185 = vmatpush3.bf16.msra.mxu0 %v17287_v4  ;;  %v5712_v31 = vrot.slane %v5710_v44, 1 }
 0x11c   : > { %15473 = vmatpush3.bf16.msra.mxu1 %v17288_v50  ;;  %15186 = vmatprep.subr.bf16.mxu0 %v17289_v9  ;;  %v17315_v50 = vld [vmem:[%s22411_s2 + $0x18] sm:$0xff]  }
 0x11d   : > { %15474 = vmatprep.subr.bf16.mxu1 %v17290_v47 }
 0x11e   : > { %15171 = vmatmul.mubr.bf16.gmra.mrb[8].mxu0 %v2001_v26  ;;  %v17321_v26 = vld [vmem:[%s22411_s2 + $0x88] sm:$0xff]  }
 0x11f   : > { %15459 = vmatmul.mubr.bf16.gmra.mrb[8].mxu1 %v4701_v57  ;;  %15187 = vmatpush3.bf16.msra.mxu0 %v17289_v9  ;;  %v17323_v57 = vld [vmem:[%s22411_s2 + $0x98] sm:$0xff]  }
 0x120   : > { %15475 = vmatpush3.bf16.msra.mxu1 %v17290_v47  ;;  %15188 = vmatprep.subr.bf16.mxu0 %v17291_v7 }
 0x121   : > { %15476 = vmatprep.subr.bf16.mxu1 %v17292_v43  ;;  %15174 = vmatprep.mubr.bf16.mxu0 %v2010_v10  ;;  %v17324_v10 = vld [vmem:[%s22411_s2 + $0xa0] sm:$0xff]  }
 0x122   : > { %15462 = vmatprep.mubr.bf16.mxu1 %v4710_v27  ;;  %v17363_v27 = vld [vmem:[%s22412_s3 + $0x40] sm:$0xff]  }
 0x123   : > { %15189 = vmatpush3.bf16.msra.mxu0 %v17291_v7  ;;  %v13360_v7 = vcombine.low %v6331_v56, %v6041_v30 }
 0x124   : > { %15477 = vmatpush3.bf16.msra.mxu1 %v17292_v43  ;;  %15190 = vmatprep.subr.bf16.mxu0 %v17294_v58 }
 0x125   : > { %15478 = vmatprep.subr.bf16.mxu1 %v17296_v49  ;;  %v6351_v38 = vrot.slane %v13360_v7, 2  ;;  %v19276_v7 = vld [vmem:[%s17774_s14 + $0x98] ss:$0 sps:$4 sm:$0x33]  }
 0x126   : > { %15175 = vmatmul.mubr.bf16.gmra.mrb[12].mxu0 %v2019_v21  ;;  %v17327_v21 = vld [vmem:[%s22411_s2 + $0xb8] sm:$0xff]   ;;  %22555 = vst [vmem:[#allocation10_spill] sm:$0xff] %v19276_v7 }
 0x127   : > { %15463 = vmatmul.mubr.bf16.gmra.mrb[12].mxu1 %v4719_v14  ;;  %15191 = vmatpush3.bf16.msra.mxu0 %v17294_v58  ;;  %v19149_v23 = vsel %vm22438_vm2, %v6351_v38, %v22415_v3  ;;  %v17325_v58 = vld [vmem:[%s22411_s2 + $0xa8] sm:$0xff]   ;;  %v17346_v3 = vld [vmem:[%s22411_s2 + $0x130] sm:$0xff]  }
 0x128   : > { %15479 = vmatpush3.bf16.msra.mxu1 %v17296_v49  ;;  %15192 = vmatprep.subr.bf16.mxu0 %v17297_v42  ;;  %v6040_v49 = vld [vmem:[%s17774_s14 + $0x88] sm:$0xe] }
 0x129   : > { %15480 = vmatprep.subr.bf16.mxu1 %v17298_v16  ;;  %15194 = vmatprep.mubr.bf16.mxu0 %v18732_v20  ;;  %v19058_v20 = vld [vmem:[%s17774_s14 + $0x84] sm:$0xf] }
 0x12a   : > { %15482 = vmatprep.mubr.bf16.mxu1 %v18739_v45  ;;  %v2226_v45 = vrot.slane %v18952_v63, 3  ;;  %v13248_v18 = vcombine.low %v5644_v22, %v19058_v20  ;;  %v17306_v63 = vld [vmem:[%s22411_s2 + $0x68] sm:$0xff]   ;;  %v13283_v9 = vcombine.low %v5912_v6, %v19058_v20  ;;  %v6075_v20 = vrot.slane %v19137_v46, 1 }
 0x12b   : > { %15193 = vmatpush3.bf16.msra.mxu0 %v17297_v42  ;;  %v224_v42 = vld [vmem:[#allocation2 + $0x8] sm:$0x3] }
 0x12c   : > { %15481 = vmatpush3.bf16.msra.mxu1 %v17298_v16  ;;  %15498 = vmatprep.subr.bf16.mxu0 %v17301_v11  ;;  %v5697_v62 = vshll.u32 %v13248_v18, 16  ;;  %v2227_v32 = vsel %vm22437_vm4, %v2224_v61, %v2226_v45  ;;  %v5932_v47 = vrot.slane %v13283_v9, 1  ;;  %v19178_v16 = vcombine.low %v6040_v49, %v6041_v30  ;;  %v17330_v45 = vld [vmem:[%s22411_s2 + $0xc8] sm:$0xff]  }
 0x12d   : > { %15678 = vmatprep.subr.bf16.mxu1 %v17363_v27  ;;  %v225_v14 = vsel %vm19171_vm8, 0, %v224_v42 }
 0x12e   : > { %15195 = vmatmul.mubr.bf16.vlgmr.msra.gmra.mrb[0].mxu0 %v18723_v13  ;;  %v17304_v13 = vld [vmem:[%s22411_s2 + $0x58] sm:$0xff]   ;;  %226 = vst [vmem:[#allocation2 + $0x8] sm:$0x3] %v225_v14  ;;  %v6074_v22 = vrot.slane %v19178_v16, 1 }
 0x12f   : > { %15483 = vmatmul.mubr.bf16.vlgmr.msra.gmra.mrb[0].mxu1 %v18735_v24  ;;  %15499 = vmatpush3.bf16.msra.mxu0 %v17301_v11  ;;  %v19068_v24 = vld [vmem:[%s17774_s14 + $0x88] sm:$0xff]  }
 0x130   : > { %15500 = vmatprep.subr.bf16.mxu0 %v17302_v12  ;;  %15198 = vmatprep.mubr.bf16.mxu0 %v18742_v33  ;;  %v17305_v33 = vld [vmem:[%s22411_s2 + $0x60] sm:$0xff]   ;;  %v5702_v34 = vshll.u32 %v19068_v24, 16  ;;  %v5933_v28 = vrot.slane %v19068_v24, 1  ;;  %v17365_v11 = vld [vmem:[%s22412_s3 + $0x48] sm:$0xff]  }
 0x131   : > { %15486 = vmatprep.mubr.bf16.mxu1 %v18745_v39  ;;  %v5695_v39 = vshrl.u32 %v13248_v18, 16  ;;  %15679 = vmatpush3.bf16.msra.mxu1 %v17363_v27 }
 0x132   : > { %v5934_v43 = vsel %vm22433_vm1, %v5932_v47, %v5933_v28  ;;  %15680 = vmatprep.subr.bf16.mxu1 %v17365_v11  ;;  %v17336_v47 = vld [vmem:[%s22411_s2 + $0xf8] sm:$0xff]  }
 0x133   : > { %15501 = vmatpush3.bf16.msra.mxu0 %v17302_v12  ;;  %v5935_v12 = vrot.slane %v19082_v25, 1  ;;  %v17332_v25 = vld [vmem:[%s22411_s2 + $0xd8] sm:$0xff]  }
 0x134   : > { %15502 = vmatprep.subr.bf16.mxu0 %v17303_v40 }
 0x135   : > { %15681 = vmatpush3.bf16.msra.mxu1 %v17365_v11 }
 0x136   : > { %15199 = vmatmul.mubr.bf16.gmra.mrb[4].mxu0 %v18755_v48  ;;  %v5699_v48 = vrot.slane %v5697_v62, 1 }
 0x137   : > { %15487 = vmatmul.mubr.bf16.gmra.mrb[4].mxu1 %v18766_v36  ;;  %15503 = vmatpush3.bf16.msra.mxu0 %v17303_v40  ;;  %v17307_v36 = vld [vmem:[%s22411_s2 + $0x70] sm:$0xff]   ;;  %v17329_v40 = vld [vmem:[%s22411_s2 + $0xc0] sm:$0xff]  }
 0x138   : > { %15504 = vmatprep.subr.bf16.mxu0 %v17304_v13  ;;  %15202 = vmatprep.mubr.bf16.mxu0 %v18774_v0  ;;  %v4924_v0 = vrot.slane %v18992_v41, 3  ;;  %v5700_v29 = vor.u32 %v5699_v48, %v5695_v39  ;;  %v22543_v41 = vrot.slane %v18697_v2, 3  ;;  %v17313_v2 = vld [vmem:[%s22411_s2 + $0x8] sm:$0xff]   ;;  %v2397_v39 = vlaneseq  ;;  %v17331_v48 = vld [vmem:[%s22411_s2 + $0xd0] sm:$0xff]  }
 0x139   : > { %15490 = vmatprep.mubr.bf16.mxu1 %v18777_v5  ;;  %v5704_v5 = vrot.slane %v5702_v34, 1 }
 0x13a   : > { %v19210_v34 = vshrl.u32 %v2397_v39, 7 }
 0x13b   : > { %15505 = vmatpush3.bf16.msra.mxu0 %v17304_v13  ;;  %v5936_v13 = vsel %vm22433_vm1, %v5933_v28, %v5935_v12 }
 0x13c   : > { %15506 = vmatprep.subr.bf16.mxu0 %v17305_v33  ;;  %22551 = vst [vmem:[#allocation6_spill] sm:$0xff] %v19210_v34 }
 0x13e   : > { %15203 = vmatmul.mubr.bf16.gmra.mrb[8].mxu0 %v18780_v37  ;;  %v17308_v37 = vld [vmem:[%s22411_s2 + $0x78] sm:$0xff]  }
 0x13f   : > { %15491 = vmatmul.mubr.bf16.gmra.mrb[8].mxu1 %v18786_v51  ;;  %15507 = vmatpush3.bf16.msra.mxu0 %v17305_v33  ;;  %v5706_v51 = vshrl.u32 %v19068_v24, 16  ;;  %v230_v33 = vld [vmem:[#allocation2 + $0x98] sm:$0xe] }
 0x140   : > { %15508 = vmatprep.subr.bf16.mxu0 %v17306_v63  ;;  %15206 = vmatprep.mubr.bf16.mxu0 %v18791_v52  ;;  %v4925_v52 = vsel %vm22437_vm4, %v22543_v41, %v4924_v0  ;;  %v231_v62 = vsel %vm19198_vm11, 0, %v230_v33  ;;  %v17369_v0 = vld [vmem:[%s22412_s3 + $0x58] sm:$0xff]   ;;  %v19236_v41 = vadd.s32 24, %v19210_v34  ;;  %v6223_v33 = vshll.u32 %v19276_v7, 16 }
 0x141   : > { %15494 = vmatprep.mubr.bf16.mxu1 %v18805_v53  ;;  %v5705_v53 = vsel %vm22434_vm0, %v5700_v29, %v5704_v5  ;;  %v5708_v4 = vor.u32 %v5706_v51, %v5704_v5  ;;  %232 = vst [vmem:[#allocation2 + $0x98] sm:$0xe] %v231_v62  ;;  %v17333_v5 = vld [vmem:[%s22411_s2 + $0xe0] sm:$0xff]  }
 0x142   : > { %22553 = vst [vmem:[#allocation8_spill] sm:$0xff] %v19236_v41 }
 0x143   : > { %15509 = vmatpush3.bf16.msra.mxu0 %v17306_v63  ;;  %v5713_v61 = vsel %vm22434_vm0, %v5708_v4, %v5712_v31  ;;  %v17367_v63 = vld [vmem:[%s22412_s3 + $0x50] sm:$0xff]   ;;  %v19243_v4 = vadd.s32 128, %v19210_v34  ;;  %v19246_v31 = vadd.s32 8, %v19210_v34 }
 0x144   : > { %15510 = vmatprep.subr.bf16.mxu0 %v17307_v36  ;;  %15682 = vmatprep.subr.bf16.mxu1 %v17367_v63 }
 0x145   : > { %15683 = vmatpush3.bf16.msra.mxu1 %v17367_v63  ;;  %22554 = vst [vmem:[#allocation9_spill] sm:$0xff] %v19246_v31  ;;  %v19267_v28 = vadd.s32 128, %v19246_v31 }
 0x146   : > { %15207 = vmatmul.mubr.bf16.gmra.mrb[12].mxu0 %v2227_v32  ;;  %15684 = vmatprep.subr.bf16.mxu1 %v17369_v0  ;;  %v6203_v32 = vshrl.u32 %v19178_v16, 16 }
 0x147   : > { %15495 = vmatmul.mubr.bf16.gmra.mrb[12].mxu1 %v4925_v52  ;;  %15511 = vmatpush3.bf16.msra.mxu0 %v17307_v36  ;;  %v19216_v36 = vadd.s32 16, %v19210_v34 }
 0x148   : > { %15512 = vmatprep.subr.bf16.mxu0 %v17308_v37  ;;  %15514 = vmatprep.mubr.bf16.mxu0 %v5705_v53  ;;  %v6205_v6 = vrot.slane %v6203_v32, 1 }
 0x149   : > { %22552 = vst [vmem:[#allocation7_spill] sm:$0xff] %v19216_v36  ;;  %v19225_v29 = vadd.s32 128, %v19216_v36  ;;  %15685 = vmatpush3.bf16.msra.mxu1 %v17369_v0  ;;  %v19232_v51 = vmul.u32.u64.low 3817748708, %v19216_v36  ;;  %v19233_v44 = vmul.u32.u64.high 3817748708, %v19216_v36, %v19232_v51  ;;  %v19317_v0 = vadd.s32 32, %v19210_v34 }
 0x14b   : > { %15513 = vmatpush3.bf16.msra.mxu0 %v17308_v37  ;;  %v17334_v37 = vld [vmem:[%s22411_s2 + $0xe8] sm:$0xff]   ;;  %v19239_v52 = vmul.u32.u64.low 3817748708, %v19225_v29  ;;  %v19240_v53 = vmul.u32.u64.high 3817748708, %v19225_v29, %v19239_v52 }
 0x14c   : > { %15518 = vmatprep.subr.bf16.mxu0 %v17311_v59 }
 0x14d   : > { %v5139_v49 = vshrl.u32 %v19240_v53, 4 }
 0x14e   : > { %15515 = vmatmul.mubr.bf16.vlgmr.msra.gmra.mrb[16].mxu0 %v5713_v61  ;;  %v6211_v61 = vshrl.u32 %v19137_v46, 16 }
 0x14f   : > { %15519 = vmatpush3.bf16.msra.mxu0 %v17311_v59  ;;  %15534 = vmatprep.mubr.bf16.mxu0 %v13248_v18  ;;  %v6076_v18 = vsel %vm22433_vm1, %v6074_v22, %v6075_v20  ;;  %v6206_v59 = vshll.u32 %v19178_v16, 16  ;;  %v17339_v22 = vld [vmem:[%s22411_s2 + $0x100] sm:$0xff]   ;;  %v5140_v62 = vmul.u32 18, %v5139_v49 }
 0x150   : > { %15520 = vmatprep.subr.bf16.mxu0 %v17313_v2  ;;  %v6213_v56 = vrot.slane %v6211_v61, 1 }
 0x151   : > { %v6208_v30 = vrot.slane %v6206_v59, 2 }
 0x153   : > { %15521 = vmatpush3.bf16.msra.mxu0 %v17313_v2 }
 0x154   : > { %15522 = vmatprep.subr.bf16.mxu0 %v17314_v35 }
 0x157   : > { %15523 = vmatpush3.bf16.msra.mxu0 %v17314_v35  ;;  %v19251_v2 = vmul.u32.u64.low 3817748708, %v19210_v34  ;;  %v19252_v35 = vmul.u32.u64.high 3817748708, %v19210_v34, %v19251_v2 }
 0x158   : > { %15524 = vmatprep.subr.bf16.mxu0 %v17315_v50  ;;  %v19342_v2 = vsub.s32 %v19225_v29, %v5140_v62 }
 0x159   : > { %v2420_v16 = vshrl.u32 %v19252_v35, 4 }
 0x15a   : > { %v19381_v49 = vadd.s32 18, %v19342_v2  ;;  %vm5289_vm14 = vcmp.ne.s32.totalorder %v19342_v2, 0  ;;  %vm5305_vm15 = vcmp.lt.s32.totalorder %v19342_v2, 0 }
 0x15b   : > { %15525 = vmatpush3.bf16.msra.mxu0 %v17315_v50  ;;  %v6214_v50 = vshll.u32 %v19137_v46, 16  ;;  %v19577_v46 = vld [vmem:[%s17774_s14 + $0x94] sm:$0xf] }
 0x15c   : > { %15526 = vmatprep.subr.bf16.mxu0 %v17316_v19  ;;  %22557 = vst [vmem:[#allocation12_spill] sm:$0xff] %v19381_v49  ;;  %22566 = vst [vmem:[#allocation21_spill] sm:$0xff] %v19577_v46 }
 0x15d   : > { %v6216_v38 = vrot.slane %v6214_v50, 2 }
 0x15f   : > { %15527 = vmatpush3.bf16.msra.mxu0 %v17316_v19  ;;  %v17335_v19 = vld [vmem:[%s22411_s2 + $0xf0] sm:$0xff]  }
 0x160   : > { %15528 = vmatprep.subr.bf16.mxu0 %v17317_v17 }
 0x163   : > { %15529 = vmatpush3.bf16.msra.mxu0 %v17317_v17  ;;  %v19259_v17 = vadd.s32 128, %v19236_v41 }
 0x164   : > { %15530 = vmatprep.subr.bf16.mxu0 %v17318_v55 }
 0x167   : > { %15531 = vmatpush3.bf16.msra.mxu0 %v17318_v55  ;;  %v17340_v55 = vld [vmem:[%s17774_s14 + $0x98] ss:$0 sps:$4 sm:$0x11]  }
 0x168   : > { %15532 = vmatprep.subr.bf16.mxu0 %v17319_v1  ;;  %v6077_v14 = vrot.slane %v17340_v55, 1 }
 0x16b   : > { %15533 = vmatpush3.bf16.msra.mxu0 %v17319_v1  ;;  %v19263_v1 = vmul.u32.u64.low 3817748708, %v19243_v4  ;;  %v19264_v9 = vmul.u32.u64.high 3817748708, %v19243_v4, %v19263_v1 }
 0x16c   : > { %15538 = vmatprep.subr.bf16.mxu0 %v17320_v54  ;;  %v19353_v1 = vadd.s32 56, %v19210_v34 }
 0x16d   : > { %v5117_v63 = vshrl.u32 %v19264_v9, 4  ;;  %v19355_v9 = vrot.slane %v6223_v33, 2 }
 0x16e   : > { %15535 = vmatmul.mubr.bf16.vlgmr.msra.gmra.mrb[16].mxu0 %v19068_v24  ;;  %v22548_v24 = vmov 0 }
 0x16f   : > { %15539 = vmatpush3.bf16.msra.mxu0 %v17320_v54  ;;  %15554 = vmatprep.mubr.bf16.mxu0 %v5934_v43  ;;  %v22549_v24 = vsel %vm19198_vm11, 4294967295, %v22548_v24  ;;  %v17374_v54 = vld [vmem:[%s22412_s3 + $0x60] sm:$0xff]   ;;  %v5118_v35 = vmul.u32 18, %v5117_v63 }
 0x170   : > { %15540 = vmatprep.subr.bf16.mxu0 %v17321_v26  ;;  %22550 = vst [vmem:[#allocation5_spill] sm:$0xff] %v22549_v24  ;;  %15686 = vmatprep.subr.bf16.mxu1 %v17374_v54 }
 0x171   : > { %15687 = vmatpush3.bf16.msra.mxu1 %v17374_v54 }
 0x173   : > { %15541 = vmatpush3.bf16.msra.mxu0 %v17321_v26  ;;  %v19279_v26 = vmul.u32.u64.low 3817748708, %v19236_v41  ;;  %v19280_v43 = vmul.u32.u64.high 3817748708, %v19236_v41, %v19279_v26 }
 0x174   : > { %15542 = vmatprep.subr.bf16.mxu0 %v17322_v8 }
 0x177   : > { %15543 = vmatpush3.bf16.msra.mxu0 %v17322_v8  ;;  %v19283_v8 = vadd.s32 48, %v19210_v34 }
 0x178   : > { %15544 = vmatprep.subr.bf16.mxu0 %v17323_v57 }
 0x179   : > { %v19301_v11 = vmul.u32.u64.low 3817748708, %v19283_v8  ;;  %v19302_v12 = vmul.u32.u64.high 3817748708, %v19283_v8, %v19301_v11 }
 0x17b   : > { %15545 = vmatpush3.bf16.msra.mxu0 %v17323_v57  ;;  %v2486_v54 = vshrl.u32 %v19302_v12, 4 }
 0x17c   : > { %15546 = vmatprep.subr.bf16.mxu0 %v17324_v10 }
 0x17f   : > { %15547 = vmatpush3.bf16.msra.mxu0 %v17324_v10  ;;  %v19286_v57 = vmul.u32.u64.low 3817748708, %v19259_v17  ;;  %v19287_v10 = vmul.u32.u64.high 3817748708, %v19259_v17, %v19286_v57 }
 0x180   : > { %15548 = vmatprep.subr.bf16.mxu0 %v17325_v58  ;;  %v17378_v57 = vld [vmem:[%s22412_s3 + $0x70] sm:$0xff]  }
 0x181   : > { %v5150_v59 = vshrl.u32 %v19287_v10, 4 }
 0x183   : > { %15549 = vmatpush3.bf16.msra.mxu0 %v17325_v58  ;;  %v19290_v58 = vmul.u32.u64.low 3817748708, %v19246_v31  ;;  %v19291_v27 = vmul.u32.u64.high 3817748708, %v19246_v31, %v19290_v58  ;;  %v5151_v26 = vmul.u32 18, %v5150_v59 }
 0x184   : > { %15550 = vmatprep.subr.bf16.mxu0 %v17326_v60  ;;  %v19375_v58 = vsub.s32 %v19243_v4, %v5118_v35  ;;  %v2487_v4 = vmul.u32 18, %v2486_v54 }
 0x185   : > { %v2431_v61 = vshrl.u32 %v19291_v27, 4 }
 0x186   : > { %vm22612_vm9 = vcmp.lt.s32.totalorder %v19375_v58, 0 }
 0x187   : > { %15551 = vmatpush3.bf16.msra.mxu0 %v17326_v60  ;;  %v2442_v60 = vshrl.u32 %v19233_v44, 4  ;;  %v17341_v44 = vld [vmem:[%s22411_s2 + $0x108] sm:$0xff]  }
 0x188   : > { %15552 = vmatprep.subr.bf16.mxu0 %v17327_v21 }
 0x189   : > { %v2443_v39 = vmul.u32 18, %v2442_v60  ;;  %v19378_v60 = vadd.s32 80, %v19210_v34 }
 0x18b   : > { %15553 = vmatpush3.bf16.msra.mxu0 %v17327_v21  ;;  %v19296_v42 = vmul.u32.u64.low 3817748708, %v19267_v28  ;;  %v19297_v21 = vmul.u32.u64.high 3817748708, %v19267_v28, %v19296_v42 }
 0x18c   : > { %15558 = vmatprep.subr.bf16.mxu0 %v17329_v40 }
 0x18d   : > { %v5128_v50 = vshrl.u32 %v19297_v21, 4  ;;  %v19387_v21 = vadd.s32 128, %v19353_v1 }
 0x18e   : > { %15555 = vmatmul.mubr.bf16.vlgmr.msra.gmra.mrb[16].mxu0 %v5936_v13  ;;  %v6209_v13 = vor.u32 %v6208_v30, %v6205_v6  ;;  %v19349_v55 = vmul.u32.u64.low 3817748708, %v19317_v0  ;;  %v19350_v6 = vmul.u32.u64.high 3817748708, %v19317_v0, %v19349_v55  ;;  %v17342_v30 = vld [vmem:[%s22411_s2 + $0x110] sm:$0xff]  }
 0x18f   : > { %15559 = vmatpush3.bf16.msra.mxu0 %v17329_v40  ;;  %15574 = vmatprep.mubr.bf16.mxu0 %v6076_v18  ;;  %v19305_v40 = vadd.s32 128, %v19283_v8  ;;  %v6220_v18 = vshrl.u32 %v19276_v7, 16  ;;  %v5129_v27 = vmul.u32 18, %v5128_v50 }
 0x190   : > { %15560 = vmatprep.subr.bf16.mxu0 %v17330_v45  ;;  %v19445_v50 = vmul.u32.u64.low 3817748708, %v19378_v60  ;;  %v19446_v55 = vmul.u32.u64.high 3817748708, %v19378_v60, %v19445_v50 }
 0x191   : > { %v19326_v32 = vmul.u32.u64.low 3817748708, %v19305_v40  ;;  %v19327_v51 = vmul.u32.u64.high 3817748708, %v19305_v40, %v19326_v32  ;;  %v19334_v53 = vrot.slane %v6220_v18, 1  ;;  %v19404_v18 = vsub.s32 %v19259_v17, %v5151_v26 }
 0x192   : > { %v19413_v62 = vsub.s32 %v19267_v28, %v5129_v27  ;;  %v17344_v28 = vld [vmem:[%s22411_s2 + $0x120] sm:$0xff]   ;;  %v19464_v27 = vadd.s32 88, %v19210_v34 }
 0x193   : > { %15561 = vmatpush3.bf16.msra.mxu0 %v17330_v45  ;;  %v19310_v45 = vor.u32 %v6216_v38, %v6213_v56  ;;  %v19366_v38 = vadd.s32 40, %v19210_v34 }
 0x194   : > { %15562 = vmatprep.subr.bf16.mxu0 %v17331_v48  ;;  %vm22637_vm4 = vcmp.ne.s32.totalorder %v19413_v62, 0 }
 0x195   : > { %v6218_v52 = vsel %vm22432_vm3, %v6209_v13, %v19310_v45 }
 0x197   : > { %15563 = vmatpush3.bf16.msra.mxu0 %v17331_v48  ;;  %v2421_v48 = vmul.u32 18, %v2420_v16  ;;  %v19390_v16 = vadd.s32 64, %v19210_v34 }
 0x198   : > { %15564 = vmatprep.subr.bf16.mxu0 %v17332_v25 }
 0x199   : > { %v19428_v32 = vadd.s32 128, %v19390_v16 }
 0x19b   : > { %15565 = vmatpush3.bf16.msra.mxu0 %v17332_v25  ;;  %v2453_v25 = vshrl.u32 %v19280_v43, 4  ;;  %v2432_v43 = vmul.u32 18, %v2431_v61 }
 0x19c   : > { %15566 = vmatprep.subr.bf16.mxu0 %v17333_v5 }
 0x19d   : > { %v2454_v29 = vmul.u32 18, %v2453_v25  ;;  %v19407_v33 = vsub.s32 %v19246_v31, %v2432_v43  ;;  %v19420_v25 = vadd.s32 128, %v19378_v60 }
 0x19f   : > { %15567 = vmatpush3.bf16.msra.mxu0 %v17333_v5  ;;  %v17376_v5 = vld [vmem:[%s22412_s3 + $0x68] sm:$0xff]   ;;  %v19401_v13 = vsub.s32 %v19236_v41, %v2454_v29 }
 0x1a0   : > { %15568 = vmatprep.subr.bf16.mxu0 %v17334_v37  ;;  %15688 = vmatprep.subr.bf16.mxu1 %v17376_v5 }
 0x1a1   : > { %15689 = vmatpush3.bf16.msra.mxu1 %v17376_v5  ;;  %v2464_v5 = vshrl.u32 %v19350_v6, 4  ;;  %v19449_v6 = vmul.u32.u64.low 3817748708, %v19420_v25  ;;  %v19450_v29 = vmul.u32.u64.high 3817748708, %v19420_v25, %v19449_v6 }
 0x1a2   : > { %15690 = vmatprep.subr.bf16.mxu1 %v17378_v57 }
 0x1a3   : > { %15569 = vmatpush3.bf16.msra.mxu0 %v17334_v37  ;;  %v6078_v37 = vsel %vm22433_vm1, %v6075_v20, %v6077_v14  ;;  %v19339_v20 = vsub.s32 %v19216_v36, %v2443_v39  ;;  %v5183_v14 = vshrl.u32 %v19327_v51, 4  ;;  %v19410_v39 = vadd.s32 128, %v19366_v38 }
 0x1a4   : > { %15570 = vmatprep.subr.bf16.mxu0 %v17335_v19  ;;  %v19434_v51 = vsub.s32 %v19283_v8, %v2487_v4  ;;  %v19453_v8 = vmul.u32.u64.low 3817748708, %v19390_v16  ;;  %v19454_v54 = vmul.u32.u64.high 3817748708, %v19390_v16, %v19453_v8  ;;  %v2465_v26 = vmul.u32 18, %v2464_v5 }
 0x1a5   : > { %v19372_v10 = vadd.s32 18, %v19339_v20  ;;  %15691 = vmatpush3.bf16.msra.mxu1 %v17378_v57  ;;  %v19441_v61 = vmul.u32.u64.low 3817748708, %v19410_v39  ;;  %v19442_v35 = vmul.u32.u64.high 3817748708, %v19410_v39, %v19441_v61  ;;  %v19477_v5 = vadd.s32 112, %v19210_v34 }
 0x1a6   : > { %v19460_v43 = vmul.u32.u64.low 3817748708, %v19428_v32  ;;  %v19461_v57 = vmul.u32.u64.high 3817748708, %v19428_v32, %v19460_v43  ;;  %v19492_v61 = vadd.s32 18, %v19434_v51  ;;  %v19499_v8 = vadd.s32 128, %v19464_v27 }
 0x1a7   : > { %15571 = vmatpush3.bf16.msra.mxu0 %v17335_v19  ;;  %v19346_v19 = vsub.s32 %v19210_v34, %v2421_v48  ;;  %22556 = vst [vmem:[#allocation11_spill] sm:$0xff] %v19372_v10  ;;  %v19416_v63 = vmul.u32.u64.low 3817748708, %v19353_v1  ;;  %v19417_v48 = vmul.u32.u64.high 3817748708, %v19353_v1, %v19416_v63  ;;  %v19502_v43 = vadd.s32 96, %v19210_v34 }
 0x1a8   : > { %15572 = vmatprep.subr.bf16.mxu0 %v17336_v47  ;;  %v19474_v63 = vadd.s32 18, %v19401_v13  ;;  %22564 = vst [vmem:[#allocation19_spill] sm:$0xff] %v19492_v61  ;;  %v19508_v56 = vsub.s32 %v19317_v0, %v2465_v26  ;;  %v5172_v41 = vshrl.u32 %v19442_v35, 4  ;;  %v19518_v36 = vadd.s32 128, %v19477_v5 }
 0x1a9   : > { %v19384_v42 = vadd.s32 18, %v19346_v19  ;;  %v2497_v6 = vshrl.u32 %v19417_v48, 4  ;;  %v2508_v26 = vshrl.u32 %v19454_v54, 4  ;;  %v19535_v15 = vadd.s32 128, %v19502_v43 }
 0x1aa   : > { %22560 = vst [vmem:[#allocation15_spill] sm:$0xff] %v19474_v63  ;;  %v5173_v10 = vmul.u32 18, %v5172_v41  ;;  %vm2592_vm12 = vcmp.ne.s32.totalorder %v19339_v20, 0  ;;  %vm2608_vm13 = vcmp.lt.s32.totalorder %v19339_v20, 0  ;;  %vm22608_vm0 = vcmp.lt.s32.totalorder %v19346_v19, 0 }
 0x1ab   : > { %15573 = vmatpush3.bf16.msra.mxu0 %v17336_v47  ;;  %v19359_v47 = vadd.s32 128, %v19317_v0  ;;  %22558 = vst [vmem:[#allocation13_spill] sm:$0xff] %v19384_v42  ;;  %v5227_v0 = vshrl.u32 %v19450_v29, 4  ;;  %vm19825_vm6 = vmand %vm2608_vm13, %vm2592_vm12  ;;  %vm22607_vm13 = vcmp.ne.s32.totalorder %v19346_v19, 0 }
 0x1ac   : > { %15578 = vmatprep.subr.bf16.mxu0 %v17339_v22  ;;  %vm19844_vm12 = vmand %vm5305_vm15, %vm5289_vm14  ;;  %vm22615_vm14 = vcmp.ne.s32.totalorder %v19401_v13, 0  ;;  %vm22616_vm15 = vcmp.lt.s32.totalorder %v19401_v13, 0 }
 0x1ad   : > { %v19394_v11 = vmul.u32.u64.low 3817748708, %v19359_v47  ;;  %v19395_v12 = vmul.u32.u64.high 3817748708, %v19359_v47, %v19394_v11  ;;  %vm19852_vm1 = vmand %vm22608_vm0, %vm22607_vm13 }
 0x1ae   : > { %15575 = vmatmul.mubr.bf16.vlgmr.msra.gmra.mrb[16].mxu0 %v6078_v37  ;;  %v19424_v17 = vmul.u32.u64.low 3817748708, %v19387_v21  ;;  %v19425_v37 = vmul.u32.u64.high 3817748708, %v19387_v21, %v19424_v17  ;;  %v19471_v11 = vadd.s32 18, %v19375_v58  ;;  %vm19868_vm5 = vmand %vm22616_vm15, %vm22615_vm14  ;;  %vm22625_vm14 = vcmask 1045504  }
 0x1af   : > { %15579 = vmatpush3.bf16.msra.mxu0 %v17339_v22  ;;  %15594 = vmatprep.mubr.bf16.mxu0 %v6218_v52  ;;  %v17343_v22 = vld [vmem:[%s22411_s2 + $0x118] sm:$0xff]   ;;  %v19437_v52 = vmul.u32.u64.low 3817748708, %v19366_v38  ;;  %v19438_v59 = vmul.u32.u64.high 3817748708, %v19366_v38, %v19437_v52  ;;  %v5161_v4 = vshrl.u32 %v19395_v12, 4  ;;  %v19486_v12 = vadd.s32 18, %v19407_v33  ;;  %vm22628_vm2 = vmmov %vm22625_vm14 }
 0x1b0   : > { %15580 = vmatprep.subr.bf16.mxu0 %v17341_v44  ;;  %22559 = vst [vmem:[#allocation14_spill] sm:$0xff] %v19471_v11  ;;  %v17380_v17 = vld [vmem:[%s22412_s3 + $0x78] sm:$0xff]   ;;  %v19489_v52 = vadd.s32 18, %v19413_v62  ;;  %v2498_v11 = vmul.u32 18, %v2497_v6  ;;  %v2509_v6 = vmul.u32 18, %v2508_v26  ;;  %vm22634_vm15 = vcmp.lt.s32.totalorder %v19407_v33, 0 }
 0x1b1   : > { %22562 = vst [vmem:[#allocation17_spill] sm:$0xff] %v19486_v12  ;;  %15692 = vmatprep.subr.bf16.mxu1 %v17380_v17  ;;  %v5162_v31 = vmul.u32 18, %v5161_v4  ;;  %v19556_v12 = vadd.s32 120, %v19210_v34 }
 0x1b2   : > { %22563 = vst [vmem:[#allocation18_spill] sm:$0xff] %v19489_v52  ;;  %15693 = vmatpush3.bf16.msra.mxu1 %v17380_v17  ;;  %v17347_v17 = vld [vmem:[%s22411_s2 + $0x138] sm:$0xff]  }
 0x1b3   : > { %15581 = vmatpush3.bf16.msra.mxu0 %v17341_v44  ;;  %v5184_v44 = vmul.u32 18, %v5183_v14  ;;  %v19468_v14 = vadd.s32 72, %v19210_v34  ;;  %v19588_v41 = vadd.s32 128, %v19556_v12 }
 0x1b4   : > { %15582 = vmatprep.subr.bf16.mxu0 %v17342_v30 }
 0x1b5   : > { %v19495_v50 = vsub.s32 %v19305_v40, %v5184_v44  ;;  %v5194_v40 = vshrl.u32 %v19425_v37, 4  ;;  %v19512_v48 = vadd.s32 128, %v19468_v14  ;;  %v2475_v44 = vshrl.u32 %v19438_v59, 4 }
 0x1b6   : > { %v19523_v37 = vmul.u32.u64.low 3817748708, %v19464_v27  ;;  %v19524_v4 = vmul.u32.u64.high 3817748708, %v19464_v27, %v19523_v37  ;;  %v5205_v59 = vshrl.u32 %v19461_v57, 4 }
 0x1b7   : > { %15583 = vmatpush3.bf16.msra.mxu0 %v17342_v30  ;;  %v17345_v30 = vld [vmem:[%s22411_s2 + $0x128] sm:$0xff]   ;;  %v19538_v29 = vmul.u32.u64.low 3817748708, %v19468_v14  ;;  %v19539_v54 = vmul.u32.u64.high 3817748708, %v19468_v14, %v19538_v29  ;;  %v19542_v37 = vmul.u32.u64.low 3817748708, %v19512_v48  ;;  %v19543_v24 = vmul.u32.u64.high 3817748708, %v19512_v48, %v19542_v37 }
 0x1b8   : > { %15584 = vmatprep.subr.bf16.mxu0 %v17343_v22  ;;  %v19546_v61 = vmul.u32.u64.low 3817748708, %v19477_v5  ;;  %v19547_v57 = vmul.u32.u64.high 3817748708, %v19477_v5, %v19546_v61  ;;  %v17348_v29 = vld [vmem:[%s22411_s2 + $0x140] sm:$0xff]   ;;  %v5195_v42 = vmul.u32 18, %v5194_v40 }
 0x1b9   : > { %v19566_v61 = vmul.u32.u64.low 3817748708, %v19535_v15  ;;  %v19567_v63 = vmul.u32.u64.high 3817748708, %v19535_v15, %v19566_v61  ;;  %v2476_v49 = vmul.u32 18, %v2475_v44  ;;  %v19594_v44 = vsub.s32 %v19353_v1, %v2498_v11 }
 0x1ba   : > { %v5206_v40 = vmul.u32 18, %v5205_v59  ;;  %v19608_v59 = vld [vmem:[%s17774_s14 + $0xa0] ss:$0 sps:$4 sm:$0x33]   ;;  %v5216_v1 = vshrl.u32 %v19543_v24, 4  ;;  %v17351_v24 = vld [vmem:[%s22411_s2 + $0x150] sm:$0xff]  }
 0x1bb   : > { %15585 = vmatpush3.bf16.msra.mxu0 %v17343_v22  ;;  %v19483_v22 = vadd.s32 18, %v19404_v18  ;;  %22568 = vst [vmem:[#allocation23_spill] sm:$0xff] %v19594_v44 }
 0x1bc   : > { %15586 = vmatprep.subr.bf16.mxu0 %v17344_v28 }
 0x1bd   : > { %22561 = vst [vmem:[#allocation16_spill] sm:$0xff] %v19483_v22  ;;  %v19562_v37 = vmul.u32.u64.low 3817748708, %v19502_v43  ;;  %v19563_v22 = vmul.u32.u64.high 3817748708, %v19502_v43, %v19562_v37 }
 0x1be   : > { %v6459_v37 = vld [vmem:[%s17774_s14 + $0x90] sm:$0xc] }
 0x1bf   : > { %15587 = vmatpush3.bf16.msra.mxu0 %v17344_v28  ;;  %v2530_v28 = vshrl.u32 %v19446_v55, 4  ;;  %v19531_v35 = vmul.u32.u64.low 3817748708, %v19499_v8  ;;  %v19532_v55 = vmul.u32.u64.high 3817748708, %v19499_v8, %v19531_v35  ;;  %v19605_v26 = vcombine.low %v6459_v37, %v19577_v46 }
 0x1c0   : > { %15588 = vmatprep.subr.bf16.mxu0 %v17345_v30  ;;  %v19550_v52 = vmul.u32.u64.low 3817748708, %v19518_v36  ;;  %v19551_v35 = vmul.u32.u64.high 3817748708, %v19518_v36, %v19550_v52  ;;  %v19643_v46 = vadd.s32 104, %v19210_v34  ;;  %v19666_v34 = vsub.s32 %v19390_v16, %v2509_v6 }
 0x1c1   : > { %v17704_v52 = vmov 0   ;;  %v2531_v7 = vmul.u32 18, %v2530_v28  ;;  %v19597_v28 = vsub.s32 %v19387_v21, %v5195_v42  ;;  %v19613_v42 = vld [vmem:[%s17774_s14 + $0x98] sm:$0xff]   ;;  %v2574_v21 = vshrl.u32 %v19547_v57, 4 }
 0x1c2   : > { %219 = vst [vmem:[#allocation2] sm:$0xf] %v17704_v52  ;;  %220 = vst [vmem:[#allocation2 + $0x4] sm:$0xf] %v17704_v52  ;;  %v5271_v11 = vshrl.u32 %v19551_v35, 4  ;;  %v19635_v35 = vadd.s32 18, %v19594_v44 }
 0x1c3   : > { %15589 = vmatpush3.bf16.msra.mxu0 %v17345_v30  ;;  %v6226_v30 = vor.u32 %v19355_v9, %v19334_v53  ;;  %233 = vst [vmem:[#allocation2 + $0x9c] sm:$0xf] %v17704_v52  ;;  %234 = vst [vmem:[#allocation2 + $0xa0] sm:$0xf] %v17704_v52  ;;  %v19570_v53 = vadd.s32 18, %v19495_v50  ;;  %v19573_v9 = vadd.s32 18, %v19508_v56 }
 0x1c4   : > { %15590 = vmatprep.subr.bf16.mxu0 %v17346_v3  ;;  %v17350_v52 = vld [vmem:[%s22411_s2 + $0x148] sm:$0xff]   ;;  %22569 = vst [vmem:[#allocation24_spill] sm:$0xff] %v19597_v28  ;;  %22571 = vst [vmem:[#allocation26_spill] sm:$0xff] %v19635_v35 }
 0x1c5   : > { %22565 = vst [vmem:[#allocation20_spill] sm:$0xff] %v19573_v9  ;;  %v6227_v61 = vsel %vm22432_vm3, %v19310_v45, %v6226_v30  ;;  %v19585_v9 = vsub.s32 %v19359_v47, %v5162_v31  ;;  %v17384_v45 = vld [vmem:[%s22412_s3] sm:$0xff]   ;;  %v2541_v31 = vshrl.u32 %v19524_v4, 4  ;;  %v5238_v47 = vshrl.u32 %v19532_v55, 4  ;;  %22576 = vst [vmem:[#allocation31_spill] sm:$0xff] %v19666_v34 }
 0x1c6   : > { %15710 = vmatprep.subr.bf16.mxu1 %v17384_v45  ;;  %v5249_v55 = vshrl.u32 %v19567_v63, 4  ;;  %v19638_v63 = vadd.s32 18, %v19597_v28  ;;  %v5217_v45 = vmul.u32 18, %v5216_v1  ;;  %v19656_v1 = vsub.s32 %v19378_v60, %v2531_v7 }
 0x1c7   : > { %15591 = vmatpush3.bf16.msra.mxu0 %v17346_v3  ;;  %v5228_v3 = vmul.u32 18, %v5227_v0  ;;  %22567 = vst [vmem:[#allocation22_spill] sm:$0xff] %v19585_v9  ;;  %v19602_v0 = vsub.s32 %v19366_v38, %v2476_v49  ;;  %v19618_v4 = vmul.u32.u64.low 3817748708, %v19556_v12  ;;  %v19619_v38 = vmul.u32.u64.high 3817748708, %v19556_v12, %v19618_v4 }
 0x1c8   : > { %15592 = vmatprep.subr.bf16.mxu0 %v17347_v17  ;;  %v2552_v49 = vshrl.u32 %v19563_v22, 4  ;;  %v19632_v57 = vadd.s32 18, %v19585_v9  ;;  %v2542_v22 = vmul.u32 18, %v2541_v31  ;;  %v5239_v37 = vmul.u32 18, %v5238_v47  ;;  %22572 = vst [vmem:[#allocation27_spill] sm:$0xff] %v19638_v63  ;;  %v17352_v31 = vld [vmem:[%s22411_s2 + $0x158] sm:$0xff]  }
 0x1c9   : > { %22570 = vst [vmem:[#allocation25_spill] sm:$0xff] %v19602_v0  ;;  %v19649_v47 = vadd.s32 18, %v19602_v0  ;;  %v19663_v4 = vsub.s32 %v19420_v25, %v5228_v3  ;;  %vm22611_vm3 = vcmp.ne.s32.totalorder %v19375_v58, 0  ;;  %vm22653_vm11 = vcmp.ne.s32.totalorder %v19585_v9, 0  ;;  %v17362_v63 = vld [vmem:[%s22411_s2 + $0x1a0] sm:$0xff]  }
 0x1ca   : > { %v2553_v35 = vmul.u32 18, %v2552_v49  ;;  %v19669_v49 = vsub.s32 %v19428_v32, %v5206_v40  ;;  %v19675_v7 = vsub.s32 %v19499_v8, %v5239_v37  ;;  %vm19860_vm7 = vmand %vm22612_vm9, %vm22611_vm3  ;;  %vm22629_vm9 = vcmp.ne.s32.totalorder %v19404_v18, 0 }
 0x1cb   : > { %15593 = vmatpush3.bf16.msra.mxu0 %v17347_v17  ;;  %v2519_v17 = vshrl.u32 %v19539_v54, 4  ;;  %v19624_v54 = vmul.u32.u64.low 3817748708, %v19588_v41  ;;  %v19625_v30 = vmul.u32.u64.high 3817748708, %v19588_v41, %v19624_v54  ;;  %22573 = vst [vmem:[#allocation28_spill] sm:$0xff] %v19649_v47  ;;  %22575 = vst [vmem:[#allocation30_spill] sm:$0xff] %v19663_v4  ;;  %v19710_v3 = vadd.s32 18, %v19663_v4 }
 0x1cc   : > { %15598 = vmatprep.subr.bf16.mxu0 %v17348_v29  ;;  %v2575_v54 = vmul.u32 18, %v2574_v21  ;;  %22577 = vst [vmem:[#allocation32_spill] sm:$0xff] %v19669_v49  ;;  %22579 = vst [vmem:[#allocation34_spill] sm:$0xff] %v19675_v7  ;;  %v19690_v32 = vsub.s32 %v19502_v43, %v2553_v35  ;;  %v19707_v43 = vadd.s32 128, %v19643_v46  ;;  %v19716_v6 = vadd.s32 18, %v19669_v49 }
 0x1cd   : > { %v5282_v8 = vshrl.u32 %v19625_v30, 4  ;;  %22587 = vst [vmem:[#allocation42_spill] sm:$0xff] %v19710_v3  ;;  %vm22630_vm3 = vcmp.lt.s32.totalorder %v19404_v18, 0  ;;  %v22690_v3 = vmov 0 }
 0x1ce   : > { %15595 = vmatmul.mubr.bf16.vlgmr.msra.gmra.mrb[16].mxu0 %v6227_v61  ;;  %v2520_v61 = vmul.u32 18, %v2519_v17  ;;  %v19653_v17 = vsub.s32 %v19410_v39, %v5173_v10  ;;  %v19672_v10 = vsub.s32 %v19464_v27, %v2542_v22  ;;  %v19681_v39 = vsub.s32 %v19512_v48, %v5217_v45  ;;  %22584 = vst [vmem:[#allocation39_spill] sm:$0xff] %v19690_v32  ;;  %vm19903_vm10 = vmand %vm22630_vm3, %vm22629_vm9 }
 0x1cf   : > { %15599 = vmatpush3.bf16.msra.mxu0 %v17348_v29  ;;  %15614 = vmatprep.mubr.bf16.mxu0 %v19149_v23  ;;  %v5272_v23 = vmul.u32 18, %v5271_v11  ;;  %v5250_v29 = vmul.u32 18, %v5249_v55  ;;  %v19684_v25 = vsub.s32 %v19477_v5, %v2575_v54  ;;  %v2585_v27 = vshrl.u32 %v19619_v38, 4  ;;  %22589 = vst [vmem:[#allocation44_spill] sm:$0xff] %v19716_v6  ;;  %v17361_v6 = vld [vmem:[%s22411_s2 + $0x198] sm:$0xff]  }
 0x1d0   : > { %15600 = vmatprep.subr.bf16.mxu0 %v17350_v52  ;;  %22574 = vst [vmem:[#allocation29_spill] sm:$0xff] %v19653_v17  ;;  %v19659_v21 = vmul.u32.u64.low 3817748708, %v19643_v46  ;;  %v19660_v11 = vmul.u32.u64.high 3817748708, %v19643_v46, %v19659_v21  ;;  %22578 = vst [vmem:[#allocation33_spill] sm:$0xff] %v19672_v10  ;;  %v19678_v60 = vsub.s32 %v19468_v14, %v2520_v61  ;;  %v17353_v14 = vld [vmem:[%s22411_s2 + $0x160] sm:$0xff]   ;;  %v19698_v48 = vadd.s32 18, %v19653_v17 }
 0x1d1   : > { %22581 = vst [vmem:[#allocation36_spill] sm:$0xff] %v19681_v39  ;;  %22582 = vst [vmem:[#allocation37_spill] sm:$0xff] %v19684_v25  ;;  %v19687_v16 = vsub.s32 %v19518_v36, %v5272_v23  ;;  %v19701_v5 = vadd.s32 18, %v19656_v1  ;;  %v19704_v36 = vsub.s32 %v19535_v15, %v5250_v29  ;;  %v19719_v40 = vadd.s32 18, %v19672_v10  ;;  %v17355_v21 = vld [vmem:[%s22411_s2 + $0x170] sm:$0xff]  }
 0x1d2   : > { %22580 = vst [vmem:[#allocation35_spill] sm:$0xff] %v19678_v60  ;;  %v19722_v38 = vadd.s32 18, %v19675_v7  ;;  %v19725_v15 = vadd.s32 18, %v19678_v60  ;;  %v19728_v55 = vadd.s32 18, %v19681_v39  ;;  %v19731_v30 = vadd.s32 18, %v19684_v25 }
 0x1d3   : > { %15601 = vmatpush3.bf16.msra.mxu0 %v17350_v52  ;;  %22583 = vst [vmem:[#allocation38_spill] sm:$0xff] %v19687_v16  ;;  %22585 = vst [vmem:[#allocation40_spill] sm:$0xff] %v19701_v5  ;;  %v19713_v52 = vadd.s32 18, %v19666_v34  ;;  %v19737_v35 = vadd.s32 18, %v19687_v16  ;;  %v19740_v22 = vadd.s32 18, %v19690_v32  ;;  %v2586_v37 = vmul.u32 18, %v2585_v27 }
 0x1d4   : > { %15602 = vmatprep.subr.bf16.mxu0 %v17351_v24  ;;  %22586 = vst [vmem:[#allocation41_spill] sm:$0xff] %v19704_v36  ;;  %22590 = vst [vmem:[#allocation45_spill] sm:$0xff] %v19719_v40  ;;  %v5283_v29 = vmul.u32 18, %v5282_v8  ;;  %v19743_v61 = vadd.s32 18, %v19704_v36  ;;  %v2563_v45 = vshrl.u32 %v19660_v11, 4  ;;  %vm22641_vm3 = vcmp.ne.s32.totalorder %v19434_v51, 0 }
 0x1d5   : > { %22588 = vst [vmem:[#allocation43_spill] sm:$0xff] %v19713_v52  ;;  %22591 = vst [vmem:[#allocation46_spill] sm:$0xff] %v19722_v38  ;;  %v19747_v54 = vmul.u32.u64.low 3817748708, %v19707_v43  ;;  %v19748_v23 = vmul.u32.u64.high 3817748708, %v19707_v43, %v19747_v54  ;;  %v7019_v27 = vld [vmem:[#allocation2] sm:$0xf] }
 0x1d6   : > { %22592 = vst [vmem:[#allocation47_spill] sm:$0xff] %v19725_v15  ;;  %22593 = vst [vmem:[#allocation48_spill] sm:$0xff] %v19728_v55  ;;  %v7020_v8 = vld [vmem:[#allocation2 + $0x4] sm:$0xf]  ;;  %v22623_v55 = vld [vmem:[#allocation3_spill] sm:$0xff]  ;;  %vm22642_vm9 = vcmp.lt.s32.totalorder %v19434_v51, 0 }
 0x1d7   : > { %15603 = vmatpush3.bf16.msra.mxu0 %v17351_v24  ;;  %22594 = vst [vmem:[#allocation49_spill] sm:$0xff] %v19731_v30  ;;  %v17354_v24 = vld [vmem:[%s22411_s2 + $0x168] sm:$0xff]   ;;  %22595 = vst [vmem:[#allocation50_spill] sm:$0xff] %v19737_v35  ;;  %v19785_v54 = vcombine.low %v7019_v27, %v7020_v8  ;;  %v22624_v15 = vrot.slane %v22623_v55, 2  ;;  %v22661_v40 = vmov 0  ;;  %v22685_v52 = vmov 0 }
 0x1d8   : > { %15604 = vmatprep.subr.bf16.mxu0 %v17352_v31  ;;  %22596 = vst [vmem:[#allocation51_spill] sm:$0xff] %v19740_v22  ;;  %22597 = vst [vmem:[#allocation52_spill] sm:$0xff] %v19743_v61  ;;  %v22621_v35 = vld [vmem:[#allocation10_spill] sm:$0xff]  ;;  %v22627_v61 = vrot.slane %v19605_v26, 2  ;;  %v6633_v5 = vshll.u32 %v19613_v42, 16  ;;  %v22766_v55 = vld [vmem:[#allocation20_spill] sm:$0xff] }
 0x1d9   : > { %22600 = vst [vmem:[#allocation55_spill] sm:$0xff] %v19785_v54  ;;  %v7115_v27 = vshll.u32 %v19785_v54, 16  ;;  %v22622_v30 = vrot.slane %v22621_v35, 2  ;;  %vm19927_vm0 = vmand %vm22642_vm9, %vm22641_vm3  ;;  %v22643_v35 = vmov 0  ;;  %vm22650_vm3 = vcmp.lt.s32.totalorder %v19508_v56, 0 }
 0x1da   : > { %v22644_v35 = vsel %vm19927_vm0, 4294967295, %v22643_v35  ;;  %vm22654_vm0 = vcmp.lt.s32.totalorder %v19585_v9, 0  ;;  %v19960_v54 = vld [vmem:[%s17774_s14 + $0xa0] ss:$0 sps:$4 sm:$0x77]  }
 0x1db   : > { %15605 = vmatpush3.bf16.msra.mxu0 %v17352_v31  ;;  %v19756_v31 = vsub.s32 %v19556_v12, %v2586_v37  ;;  %v19769_v12 = vld [vmem:[%s22411_s2 + $0x178] sm:$0xff]   ;;  %v2564_v37 = vmul.u32 18, %v2563_v45  ;;  %v5260_v45 = vshrl.u32 %v19748_v23, 4  ;;  %v17359_v23 = vld [vmem:[%s22411_s2 + $0x188] sm:$0xff]   ;;  %v19884_v22 = vrot.slane %v7115_v27, 1 }
 0x1dc   : > { %15606 = vmatprep.subr.bf16.mxu0 %v17353_v14  ;;  %v6355_v38 = vsel %vm22625_vm14, %v22624_v15, %v22622_v30  ;;  %vm22633_vm14 = vcmp.ne.s32.totalorder %v19407_v33, 0  ;;  %v22635_v15 = vmov 0  ;;  %v22639_v30 = vmov 0 }
 0x1dd   : > { %22598 = vst [vmem:[#allocation53_spill] sm:$0xff] %v19756_v31  ;;  %v19780_v11 = vadd.s32 18, %v19756_v31  ;;  %22620 = vst [vmem:[#allocation59_spill] sm:$0xff] %v19884_v22  ;;  %v6622_v22 = vshrl.u32 %v19605_v26, 16 }
 0x1de   : > { %vm19911_vm8 = vmand %vm22634_vm15, %vm22633_vm14  ;;  %vm22645_vm15 = vcmp.ne.s32.totalorder %v19495_v50, 0 }
 0x1df   : > { %15607 = vmatpush3.bf16.msra.mxu0 %v17353_v14  ;;  %22599 = vst [vmem:[#allocation54_spill] sm:$0xff] %v19780_v11  ;;  %v19783_v14 = vsub.s32 %v19588_v41, %v5283_v29  ;;  %v17358_v41 = vld [vmem:[%s22411_s2 + $0x180] sm:$0xff]   ;;  %v19810_v29 = vsub.s32 %v19643_v46, %v2564_v37  ;;  %v5261_v11 = vmul.u32 18, %v5260_v45  ;;  %v22626_v45 = vrot.slane %v19613_v42, 2  ;;  %v22719_v46 = vld [vmem:[#allocation12_spill] sm:$0xff] }
 0x1e0   : > { %15608 = vmatprep.subr.bf16.mxu0 %v17354_v24  ;;  %v22636_v15 = vsel %vm19911_vm8, 4294967295, %v22635_v15  ;;  %vm22669_vm8 = vcmp.lt.s32.totalorder %v19602_v0, 0  ;;  %v6642_v37 = vshll.u32 %v19960_v54, 16 }
 0x1e1   : > { %22602 = vst [vmem:[#allocation57_spill] sm:$0xff] %v19810_v29  ;;  %v6495_v27 = vsel %vm22628_vm2, %v22627_v61, %v22626_v45  ;;  %vm22638_vm2 = vcmp.lt.s32.totalorder %v19413_v62, 0  ;;  %v17360_v61 = vld [vmem:[%s22411_s2 + $0x190] sm:$0xff]   ;;  %v22651_v45 = vmov 0 }
 0x1e2   : > { %vm19919_vm13 = vmand %vm22638_vm2, %vm22637_vm4  ;;  %vm22646_vm4 = vcmp.lt.s32.totalorder %v19495_v50, 0  ;;  %vm22649_vm2 = vcmp.ne.s32.totalorder %v19508_v56, 0 }
 0x1e3   : > { %15609 = vmatpush3.bf16.msra.mxu0 %v17354_v24  ;;  %v19807_v24 = vadd.s32 18, %v19783_v14  ;;  %v22640_v30 = vsel %vm19919_vm13, 4294967295, %v22639_v30  ;;  %vm19938_vm14 = vmand %vm22646_vm4, %vm22645_vm15  ;;  %vm22679_vm15 = vcmp.lt.s32.totalorder %v19656_v1, 0 }
 0x1e4   : > { %15610 = vmatprep.subr.bf16.mxu0 %v17355_v21  ;;  %vm19946_vm9 = vmand %vm22650_vm3, %vm22649_vm2  ;;  %vm22659_vm2 = vcmp.ne.s32.totalorder %v19594_v44, 0  ;;  %vm22663_vm3 = vcmp.ne.s32.totalorder %v19597_v28, 0 }
 0x1e5   : > { %22601 = vst [vmem:[#allocation56_spill] sm:$0xff] %v19807_v24  ;;  %v19881_v24 = vadd.s32 18, %v19810_v29  ;;  %v22652_v45 = vsel %vm19946_vm9, 4294967295, %v22651_v45  ;;  %vm19954_vm13 = vmand %vm22654_vm0, %vm22653_vm11  ;;  %vm22660_vm11 = vcmp.lt.s32.totalorder %v19594_v44, 0  ;;  %v17366_v44 = vld [vmem:[%s22411_s2 + $0x1b0] sm:$0xff]  }
 0x1e6   : > { %vm19971_vm0 = vmand %vm22660_vm11, %vm22659_vm2  ;;  %vm22673_vm11 = vcmp.ne.s32.totalorder %v19653_v17, 0 }
 0x1e7   : > { %15611 = vmatpush3.bf16.msra.mxu0 %v17355_v21  ;;  %22619 = vst [vmem:[#allocation58_spill] sm:$0xff] %v19881_v24  ;;  %v19965_v24 = vsub.s32 %v19707_v43, %v5261_v11  ;;  %v22662_v40 = vsel %vm19971_vm0, 4294967295, %v22661_v40  ;;  %v22670_v43 = vmov 0  ;;  %vm22674_vm0 = vcmp.lt.s32.totalorder %v19653_v17, 0  ;;  %v22810_v17 = vld [vmem:[#allocation45_spill] sm:$0xff] }
 0x1e8   : > { %15612 = vmatprep.subr.bf16.mxu0 %v19769_v12  ;;  %v22675_v11 = vmov 0 }
 0x1e9   : > { %22658 = vst [vmem:[#allocation3_spill] sm:$0xff] %v19965_v24 }
 0x1eb   : > { %15613 = vmatpush3.bf16.msra.mxu0 %v19769_v12  ;;  %v22647_v12 = vmov 0 }
 0x1ec   : > { %15618 = vmatprep.subr.bf16.mxu0 %v17358_v41  ;;  %v22648_v12 = vsel %vm19938_vm14, 4294967295, %v22647_v12  ;;  %vm22668_vm14 = vcmp.ne.s32.totalorder %v19602_v0, 0  ;;  %v22805_v0 = vmov 0 }
 0x1ed   : > { %vm19989_vm2 = vmand %vm22669_vm8, %vm22668_vm14  ;;  %vm22683_vm8 = vcmp.ne.s32.totalorder %v19663_v4, 0  ;;  %vm22684_vm14 = vcmp.lt.s32.totalorder %v19663_v4, 0  ;;  %v6625_v4 = vshll.u32 %v19605_v26, 16  ;;  %v22701_v26 = vmov 0 }
 0x1ee   : > { %15615 = vmatmul.mubr.bf16.vlgmr.msra.gmra.mrb[16].mxu0 %v6355_v38  ;;  %v22655_v38 = vmov 0  ;;  %v22671_v43 = vsel %vm19989_vm2, 4294967295, %v22670_v43 }
 0x1ef   : > { %v22656_v38 = vsel %vm19954_vm13, 4294967295, %v22655_v38  ;;  %15619 = vmatpush3.bf16.msra.mxu0 %v17358_v41  ;;  %15634 = vmatprep.mubr.bf16.mxu0 %v6495_v27  ;;  %vm22664_vm13 = vcmp.lt.s32.totalorder %v19597_v28, 0  ;;  %v22665_v41 = vmov 0  ;;  %22672 = vst [vmem:[#allocation61_spill] sm:$0xff] %v22671_v43  ;;  %v22680_v27 = vmov 0  ;;  %v17368_v43 = vld [vmem:[%s22411_s2 + $0x1b8] sm:$0xff]  }
 0x1f0   : > { %22657 = vst [vmem:[#allocation10_spill] sm:$0xff] %v22656_v38  ;;  %15620 = vmatprep.subr.bf16.mxu0 %v17359_v23  ;;  %vm19979_vm9 = vmand %vm22664_vm13, %vm22663_vm3  ;;  %vm22678_vm3 = vcmp.ne.s32.totalorder %v19656_v1, 0  ;;  %v20139_v21 = vrot.slane %v6625_v4, 3  ;;  %v22754_v4 = vld [vmem:[#allocation16_spill] sm:$0xff]  ;;  %v6771_v38 = vrot.slane %v19613_v42, 3  ;;  %v22786_v28 = vrot.slane %v19613_v42, 2 }
 0x1f1   : > { %v22666_v41 = vsel %vm19979_vm9, 4294967295, %v22665_v41  ;;  %vm19997_vm13 = vmand %vm22674_vm0, %vm22673_vm11  ;;  %vm22688_vm11 = vcmp.ne.s32.totalorder %v19666_v34, 0 }
 0x1f2   : > { %22667 = vst [vmem:[#allocation60_spill] sm:$0xff] %v22666_v41  ;;  %v22676_v11 = vsel %vm19997_vm13, 4294967295, %v22675_v11  ;;  %vm20005_vm4 = vmand %vm22679_vm15, %vm22678_vm3  ;;  %vm22689_vm13 = vcmp.lt.s32.totalorder %v19666_v34, 0  ;;  %vm22693_vm3 = vcmp.ne.s32.totalorder %v19669_v49, 0  ;;  %v6639_v34 = vshrl.u32 %v19960_v54, 16 }
 0x1f3   : > { %22677 = vst [vmem:[#allocation62_spill] sm:$0xff] %v22676_v11  ;;  %v22681_v27 = vsel %vm20005_vm4, 4294967295, %v22680_v27  ;;  %vm20016_vm0 = vmand %vm22684_vm14, %vm22683_vm8  ;;  %vm22694_vm4 = vcmp.lt.s32.totalorder %v19669_v49, 0  ;;  %15621 = vmatpush3.bf16.msra.mxu0 %v17359_v23  ;;  %v22698_v49 = vld [vmem:[#allocation11_spill] sm:$0xff]  ;;  %vm22700_vm14 = vcmp.lt.s32.totalorder %v19672_v10, 0  ;;  %v22706_v23 = vmov 0 }
 0x1f4   : > { %22682 = vst [vmem:[#allocation63_spill] sm:$0xff] %v22681_v27  ;;  %v22686_v52 = vsel %vm20016_vm0, 4294967295, %v22685_v52  ;;  %vm20024_vm15 = vmand %vm22689_vm13, %vm22688_vm11  ;;  %v22695_v27 = vmov 0  ;;  %15622 = vmatprep.subr.bf16.mxu0 %v17360_v61  ;;  %vm22705_vm13 = vcmp.lt.s32.totalorder %v19675_v7, 0  ;;  %vm22709_vm8 = vcmp.ne.s32.totalorder %v19678_v60, 0 }
 0x1f5   : > { %22687 = vst [vmem:[#allocation64_spill] sm:$0xff] %v22686_v52  ;;  %v22691_v3 = vsel %vm20024_vm15, 4294967295, %v22690_v3  ;;  %vm20032_vm2 = vmand %vm22694_vm4, %vm22693_vm3  ;;  %v6630_v52 = vshrl.u32 %v19613_v42, 16  ;;  %vm22699_vm4 = vcmp.ne.s32.totalorder %v19672_v10, 0  ;;  %vm22704_vm3 = vcmp.ne.s32.totalorder %v19675_v7, 0  ;;  %v22720_v7 = vld [vmem:[#allocation13_spill] sm:$0xff] }
 0x1f6   : > { %22692 = vst [vmem:[#allocation65_spill] sm:$0xff] %v22691_v3  ;;  %v22696_v27 = vsel %vm20032_vm2, 4294967295, %v22695_v27  ;;  %v2656_v3 = vsel %vm19825_vm6, %v22698_v49, %v19339_v20  ;;  %vm20050_vm11 = vmand %vm22700_vm14, %vm22699_vm4  ;;  %vm22710_vm6 = vcmp.lt.s32.totalorder %v19678_v60, 0  ;;  %v22711_v20 = vmov 0  ;;  %v22823_v10 = vld [vmem:[#allocation50_spill] sm:$0xff] }
 0x1f7   : > { %22697 = vst [vmem:[#allocation66_spill] sm:$0xff] %v22696_v27  ;;  %v22702_v26 = vsel %vm20050_vm11, 4294967295, %v22701_v26  ;;  %vm20058_vm2 = vmand %vm22705_vm13, %vm22704_vm3  ;;  %vm22714_vm4 = vcmp.ne.s32.totalorder %v19681_v39, 0  ;;  %vm22715_vm14 = vcmp.lt.s32.totalorder %v19681_v39, 0  ;;  %v22716_v49 = vmov 0  ;;  %v22722_v39 = vld [vmem:[#allocation15_spill] sm:$0xff]  ;;  %15623 = vmatpush3.bf16.msra.mxu0 %v17360_v61 }
 0x1f8   : > { %22703 = vst [vmem:[#allocation11_spill] sm:$0xff] %v22702_v26  ;;  %v22707_v23 = vsel %vm20058_vm2, 4294967295, %v22706_v23  ;;  %vm20066_vm15 = vmand %vm22710_vm6, %vm22709_vm8  ;;  %v2654_v60 = vsel %vm19852_vm1, %v22720_v7, %v19346_v19  ;;  %vm22723_vm13 = vcmp.ne.s32.totalorder %v19684_v25, 0  ;;  %vm22724_vm8 = vcmp.lt.s32.totalorder %v19684_v25, 0  ;;  %15624 = vmatprep.subr.bf16.mxu0 %v17361_v6  ;;  %v22757_v61 = vld [vmem:[#allocation18_spill] sm:$0xff]  ;;  %v22828_v25 = vld [vmem:[#allocation56_spill] sm:$0xff] }
 0x1f9   : > { %22708 = vst [vmem:[#allocation67_spill] sm:$0xff] %v22707_v23  ;;  %v22712_v20 = vsel %vm20066_vm15, 4294967295, %v22711_v20  ;;  %vm20074_vm11 = vmand %vm22715_vm14, %vm22714_vm4  ;;  %v5353_v23 = vsel %vm19844_vm12, %v22719_v46, %v19342_v2  ;;  %v22725_v2 = vmov 0  ;;  %vm22727_vm1 = vcmp.ne.s32.totalorder %v19687_v16, 0 }
 0x1fa   : > { %22713 = vst [vmem:[#allocation68_spill] sm:$0xff] %v22712_v20  ;;  %v22717_v49 = vsel %vm20074_vm11, 4294967295, %v22716_v49  ;;  %v22721_v20 = vld [vmem:[#allocation14_spill] sm:$0xff]  ;;  %vm20098_vm12 = vmand %vm22724_vm8, %vm22723_vm13  ;;  %vm22728_vm3 = vcmp.lt.s32.totalorder %v19687_v16, 0  ;;  %v22729_v19 = vmov 0  ;;  %vm22735_vm14 = vcmp.ne.s32.totalorder %v19704_v36, 0 }
 0x1fb   : > { %22718 = vst [vmem:[#allocation69_spill] sm:$0xff] %v22717_v49  ;;  %v5351_v26 = vsel %vm19860_vm7, %v22721_v20, %v19375_v58  ;;  %v2657_v49 = vsel %vm19868_vm5, %v22722_v39, %v19401_v13  ;;  %v22726_v2 = vsel %vm20098_vm12, 4294967295, %v22725_v2  ;;  %vm20106_vm6 = vmand %vm22728_vm3, %vm22727_vm1  ;;  %vm22731_vm7 = vcmp.ne.s32.totalorder %v19690_v32, 0  ;;  %15625 = vmatpush3.bf16.msra.mxu0 %v17361_v6  ;;  %v22789_v41 = vld [vmem:[#allocation63_spill] sm:$0xff] }
 0x1fc   : > { %v22730_v19 = vsel %vm20106_vm6, 4294967295, %v22729_v19  ;;  %vm22732_vm5 = vcmp.lt.s32.totalorder %v19690_v32, 0  ;;  %v22733_v58 = vmov 0  ;;  %vm22736_vm13 = vcmp.lt.s32.totalorder %v19704_v36, 0  ;;  %15626 = vmatprep.subr.bf16.mxu0 %v17362_v63  ;;  %v22830_v32 = vld [vmem:[#allocation55_spill] sm:$0xff] }
 0x1fd   : > { %vm20114_vm4 = vmand %vm22732_vm5, %vm22731_vm7  ;;  %v22737_v13 = vmov 0  ;;  %vm22740_vm1 = vcmp.ne.s32.totalorder %v19756_v31, 0  ;;  %vm22741_vm3 = vcmp.lt.s32.totalorder %v19756_v31, 0  ;;  %v22742_v7 = vmov 0  ;;  %v22796_v9 = vld [vmem:[#allocation65_spill] sm:$0xff] }
 0x1fe   : > { %v22734_v58 = vsel %vm20114_vm4, 4294967295, %v22733_v58  ;;  %vm20122_vm8 = vmand %vm22736_vm13, %vm22735_vm14  ;;  %v20137_v39 = vrot.slane %v6622_v22, 2  ;;  %v6632_v8 = vrot.slane %v6630_v52, 2  ;;  %vm20142_vm5 = vcmp.lt.s32.totalorder %v2656_v3, 16  ;;  %v22755_v22 = vld [vmem:[#allocation17_spill] sm:$0xff] }
 0x1ff   : > { %v22738_v13 = vsel %vm20122_vm8, 4294967295, %v22737_v13  ;;  %vm20133_vm7 = vmand %vm22741_vm3, %vm22740_vm1  ;;  %v22745_v20 = vmov 0  ;;  %vm20146_vm14 = vcmp.lt.s32.totalorder %v5353_v23, 16  ;;  %v22748_v46 = vmov 0  ;;  %15627 = vmatpush3.bf16.msra.mxu0 %v17362_v63  ;;  %v22811_v42 = vld [vmem:[#allocation11_spill] sm:$0xff] }
 0x200   : > { %22739 = vst [vmem:[#allocation12_spill] sm:$0xff] %v22738_v13  ;;  %v22743_v7 = vsel %vm20133_vm7, 4294967295, %v22742_v7  ;;  %v22746_v20 = vsel %vm20142_vm5, 4294967295, %v22745_v20  ;;  %v22749_v46 = vsel %vm20146_vm14, 4294967295, %v22748_v46  ;;  %vm20150_vm13 = vcmp.lt.s32.totalorder %v2654_v60, 16  ;;  %v22759_v60 = vld [vmem:[#allocation19_spill] sm:$0xff] }
 0x201   : > { %22744 = vst [vmem:[#allocation13_spill] sm:$0xff] %v22743_v7  ;;  %22747 = vst [vmem:[#allocation14_spill] sm:$0xff] %v22746_v20  ;;  %v22751_v31 = vmov 0  ;;  %v5354_v52 = vsel %vm19903_vm10, %v22754_v4, %v19404_v18  ;;  %vm22756_vm1 = vnez %v22636_v15  ;;  %v22761_v20 = vmov 0  ;;  %v22769_v4 = vld [vmem:[#allocation21_spill] sm:$0xff]  ;;  %v15196_v63 = vpop.f32.mrb[0].mxu0 }
 0x202   : > { %22750 = vst [vmem:[#allocation15_spill] sm:$0xff] %v22749_v46  ;;  %v22752_v31 = vsel %vm20150_vm13, 4294967295, %v22751_v31  ;;  %v2655_v3 = vsel %vm22756_vm1, %v22755_v22, %v19407_v33  ;;  %v6750_v46 = vld [vmem:[%s17774_s14 + $0x90] sm:$0x8]  ;;  %vm20171_vm13 = vcmp.lt.s32.totalorder %v5351_v26, 16  ;;  %vm20175_vm10 = vcmp.lt.s32.totalorder %v2657_v49, 16 }
 0x203   : > { %22753 = vst [vmem:[#allocation70_spill] sm:$0xff] %v22752_v31  ;;  %v22762_v20 = vsel %vm20171_vm13, 4294967295, %v22761_v20  ;;  %v22763_v18 = vmov 0  ;;  %v13437_v49 = vcombine.low %v6750_v46, %v22769_v4  ;;  %v17364_v22 = vld [vmem:[%s22411_s2 + $0x1a8] sm:$0xff]   ;;  %vm22771_vm1 = vcmp.lt.s32.totalorder %v19783_v14, 0  ;;  %v15484_v7 = vpop.f32.mrb[0].mxu1 }
 0x204   : > { %v22764_v18 = vsel %vm20175_vm10, 4294967295, %v22763_v18  ;;  %vm22770_vm10 = vcmp.ne.s32.totalorder %v19783_v14, 0  ;;  %v22772_v33 = vmov 0  ;;  %v6635_v15 = vrot.slane %v6633_v5, 3  ;;  %15628 = vmatprep.subr.bf16.mxu0 %v17364_v22  ;;  %v22832_v13 = vld [vmem:[#allocation59_spill] sm:$0xff]  ;;  %v2318_v47 = vpop.f32.mrb[1].mxu0 }
 0x205   : > { %vm20199_vm13 = vmand %vm22771_vm1, %vm22770_vm10  ;;  %v6641_v31 = vrot.slane %v6639_v34, 2  ;;  %v6644_v23 = vrot.slane %v6642_v37, 3  ;;  %vm22777_vm10 = vcmp.ne.s32.totalorder %v19810_v29, 0  ;;  %vm22778_vm1 = vcmp.lt.s32.totalorder %v19810_v29, 0  ;;  %v22793_v37 = vld [vmem:[#allocation64_spill] sm:$0xff]  ;;  %v5016_v29 = vpop.f32.mrb[1].mxu1  ;;  %15629 = vmatpush3.bf16.msra.mxu0 %v17364_v22 }
 0x206   : > { %v22773_v33 = vsel %vm20199_vm13, 4294967295, %v22772_v33  ;;  %vm20216_vm3 = vmand %vm22778_vm1, %vm22777_vm10  ;;  %v22779_v34 = vmov 0  ;;  %v20221_v5 = vadd.s32 18, %v19965_v24  ;;  %v6770_v6 = vrot.slane %v13437_v49, 3  ;;  %v22788_v49 = vld [vmem:[#allocation40_spill] sm:$0xff]  ;;  %v15197_v16 = vpop.f32.mrb[2].mxu0  ;;  %15630 = vmatprep.subr.bf16.mxu0 %v17366_v44 }
 0x207   : > { %v22780_v34 = vsel %vm20216_vm3, 4294967295, %v22779_v34  ;;  %v22785_v4 = vrot.slane %v19608_v59, 2  ;;  %vm22787_vm10 = vcmask 1045504   ;;  %vm22797_vm9 = vnez %v22796_v9  ;;  %v22814_v9 = vld [vmem:[#allocation46_spill] sm:$0xff]  ;;  %v15485_v22 = vpop.f32.mrb[2].mxu1  ;;  %v22947_v46 = vld [vmem:[#allocation36_spill] sm:$0xff] }
 0x208   : > { %22781 = vst [vmem:[#allocation16_spill] sm:$0xff] %v22780_v34  ;;  %22782 = vst [vmem:[#allocation17_spill] sm:$0xff] %v20221_v5  ;;  %vm22801_vm14 = vcmask 1044480   ;;  %vm22803_vm1 = vcmp.ne.s32.totalorder %v19965_v24, 0  ;;  %vm22804_vm0 = vcmp.lt.s32.totalorder %v19965_v24, 0  ;;  %v6628_v59 = vor.u32 %v20139_v21, %v20137_v39  ;;  %v22817_v21 = vld [vmem:[#allocation47_spill] sm:$0xff] }
 0x209   : > { %v20236_v26 = vsel %vm22787_vm10, %v22786_v28, %v22785_v4  ;;  %v20255_v4 = vsel %vm22801_vm14, %v6770_v6, %v6771_v38  ;;  %vm20264_vm5 = vmand %vm22804_vm0, %vm22803_vm1  ;;  %v6636_v27 = vor.u32 %v6635_v15, %v6632_v8  ;;  %v6645_v28 = vor.u32 %v6644_v23, %v6641_v31  ;;  %v22822_v15 = vld [vmem:[#allocation49_spill] sm:$0xff]  ;;  %v22834_v36 = vld [vmem:[#allocation14_spill] sm:$0xff]  ;;  %15631 = vmatpush3.bf16.msra.mxu0 %v17366_v44 }
 0x20a   : > { %22802 = vst [vmem:[#allocation18_spill] sm:$0xff] %v20255_v4  ;;  %v22806_v0 = vsel %vm20264_vm5, 4294967295, %v22805_v0  ;;  %v6773_v6 = vrot.slane %v19960_v54, 3  ;;  %vm20271_vm14 = vcmp.lt.s32.totalorder %v5354_v52, 16  ;;  %vm22812_vm10 = vnez %v22811_v42  ;;  %v22827_v52 = vld [vmem:[#allocation54_spill] sm:$0xff]  ;;  %15632 = vmatprep.subr.bf16.mxu0 %v17368_v43  ;;  %v22885_v8 = vld [vmem:[#allocation27_spill] sm:$0xff] }
 0x20b   : > { %22807 = vst [vmem:[#allocation19_spill] sm:$0xff] %v22806_v0  ;;  %v22831_v11 = vshrl.u32 %v22830_v32, 16  ;;  %vm22835_vm0 = vnez %v22834_v36  ;;  %vm20326_vm7 = vcmp.lt.s32.totalorder %v2655_v3, 16  ;;  %vm22838_vm3 = vsmask.f32 5376  ;;  %v22840_v3 = vld [vmem:[#allocation15_spill] sm:$0xff] }
 0x20c   : > { %v2688_v39 = vsel %vm22835_vm0, %v15196_v63, 0.0  ;;  %vm22839_vm0 = vmmov %vm22838_vm3  ;;  %vm22841_vm1 = vnez %v22840_v3  ;;  %v22842_v32 = vld [vmem:[#allocation70_spill] sm:$0xff]  ;;  %vm22844_vm8 = vnez %v22640_v30  ;;  %vm22855_vm5 = vnez %v22764_v18  ;;  %v22883_v0 = vld [vmem:[#allocation60_spill] sm:$0xff] }
 0x20d   : > { %v20322_v23 = vor.u32 %v22832_v13, %v22831_v11  ;;  %v20338_v13 = vsel %vm22838_vm3, %v6628_v59, %v6636_v27  ;;  %v20341_v36 = vsel %vm22839_vm0, %v6636_v27, %v6645_v28  ;;  %v14132_v63 = vpack.c.bf16 %v2688_v39, %v2688_v39  ;;  %v2928_v18 = vld [vmem:[#allocation2 + $0x8] sm:$0xe]  ;;  %15633 = vmatpush3.bf16.msra.mxu0 %v17368_v43  ;;  %v22900_v4 = vld [vmem:[#allocation29_spill] sm:$0xff] }
 0x20e   : > { %v5385_v54 = vsel %vm22841_vm1, %v15484_v7, 0.0  ;;  %vm22843_vm13 = vnez %v22842_v32  ;;  %v22845_v11 = vsel %vm22844_vm8, %v22757_v61, %v19413_v62  ;;  %vm22848_vm0 = vnez %v22644_v35  ;;  %v2321_v35 = vpop.f32.mrb[3].mxu0 }
 0x20f   : > { %22833 = vst [vmem:[#allocation20_spill] sm:$0xff] %v20322_v23  ;;  %v2686_v23 = vsel %vm22843_vm13, %v2318_v47, 0.0  ;;  %vm20352_vm3 = vcmp.lt.s32.totalorder %v22845_v11, 16  ;;  %v22849_v27 = vsel %vm22848_vm0, %v22759_v60, %v19434_v51  ;;  %vm22852_vm13 = vcmask 1044480   ;;  %v5019_v11 = vpop.f32.mrb[3].mxu1  ;;  %v15200_v44 = vpop.f32.mrb[4].mxu0 }
 0x210   : > { %vm20361_vm1 = vcmp.lt.s32.totalorder %v22849_v27, 16  ;;  %v20366_v47 = vsel %vm22852_vm13, %v6771_v38, %v6773_v6  ;;  %v14148_v30 = vpack.c.bf16 %v5385_v54, %v5385_v54  ;;  %v14130_v7 = vpack.c.bf16 %v2686_v23, %v2686_v23  ;;  %15635 = vmatmul.mubr.bf16.vlgmr.msra.gmra.mrb[16].mxu0 %v20236_v26 }
 0x211   : > { %22853 = vst [vmem:[#allocation21_spill] sm:$0xff] %v20366_v47  ;;  %vm22854_vm8 = vnez %v22762_v20  ;;  %v2689_v61 = vsel %vm22855_vm5, %v15197_v16, 0.0  ;;  %v2772_v28 = vshrl.u32 %v14132_v63, 16  ;;  %v2775_v51 = vshll.u32 %v14132_v63, 16  ;;  %v17372_v20 = vld [vmem:[%s22411_s2 + $0x1c0] sm:$0xff]   ;;  %15654 = vmatprep.mubr.bf16.mxu0 %v20338_v13 }
 0x212   : > { %v5383_v62 = vsel %vm22854_vm8, %v5016_v29, 0.0  ;;  %v14133_v39 = vpack.c.bf16 %v2689_v61, %v2689_v61  ;;  %v5467_v3 = vshrl.u32 %v14148_v30, 16  ;;  %v5470_v27 = vshll.u32 %v14148_v30, 16  ;;  %15638 = vmatprep.subr.bf16.mxu0 %v17372_v20 }
 0x213   : > { %v14146_v60 = vpack.c.bf16 %v5383_v62, %v5383_v62  ;;  %v2753_v38 = vshrl.u32 %v14130_v7, 16  ;;  %v2756_v6 = vshll.u32 %v14130_v7, 16  ;;  %v2774_v29 = vrot.slane %v2772_v28, 6  ;;  %15639 = vmatpush3.bf16.msra.mxu0 %v17372_v20 }
 0x214   : > { %v2777_v54 = vrot.slane %v2775_v51, 7  ;;  %vm22856_vm5 = vnez %v22648_v12  ;;  %v5469_v30 = vrot.slane %v5467_v3, 6  ;;  %v5472_v7 = vrot.slane %v5470_v27, 7  ;;  %v20392_v3 = vpop.f32.mrb[5].mxu0 }
 0x215   : > { %v5448_v16 = vshrl.u32 %v14146_v60, 16  ;;  %v5451_v23 = vshll.u32 %v14146_v60, 16  ;;  %v22857_v63 = vsel %vm22856_vm5, %v19570_v53, %v19495_v50  ;;  %v2755_v61 = vrot.slane %v2753_v38, 6 }
 0x216   : > { %vm20380_vm0 = vcmp.lt.s32.totalorder %v22857_v63, 16  ;;  %v2758_v47 = vrot.slane %v2756_v6, 7  ;;  %v20384_v28 = vor.u32 %v2777_v54, %v2774_v29  ;;  %v2782_v60 = vshrl.u32 %v14133_v39, 16  ;;  %v15488_v63 = vpop.f32.mrb[4].mxu1  ;;  %v22864_v6 = vld [vmem:[#allocation10_spill] sm:$0xff] }
 0x217   : > { %v5450_v51 = vrot.slane %v5448_v16, 6  ;;  %v5453_v24 = vrot.slane %v5451_v23, 7  ;;  %v20386_v5 = vor.u32 %v5472_v7, %v5469_v30  ;;  %v2785_v50 = vshll.u32 %v14133_v39, 16  ;;  %v20426_v30 = vpop.f32.mrb[6].mxu0 }
 0x218   : > { %v20388_v12 = vor.u32 %v2758_v47, %v2755_v61  ;;  %v5386_v53 = vsel %vm20271_vm14, %v15485_v22, 0.0  ;;  %vm22860_vm13 = vnez %v22652_v45  ;;  %vm22865_vm5 = vnez %v22864_v6  ;;  %v22866_v47 = vld [vmem:[#allocation22_spill] sm:$0xff]  ;;  %v22872_v45 = vld [vmem:[#allocation23_spill] sm:$0xff]  ;;  %v22877_v61 = vld [vmem:[#allocation5_spill] sm:$0xff] }
 0x219   : > { %v22861_v27 = vsel %vm22860_vm13, %v22766_v55, %v19508_v56  ;;  %v22867_v39 = vsel %vm22865_vm5, %v19632_v57, %v22866_v47  ;;  %vm22870_vm14 = vnez %v22662_v40  ;;  %v22871_v22 = vld [vmem:[#allocation26_spill] sm:$0xff]  ;;  %v2780_v55 = vrot.slane %v20384_v28, 4  ;;  %v20424_v57 = vpop.f32.mrb[5].mxu1 }
 0x21a   : > { %vm20399_vm8 = vcmp.lt.s32.totalorder %v22861_v27, 16  ;;  %vm20408_vm4 = vcmp.lt.s32.totalorder %v22867_v39, 16  ;;  %v22873_v29 = vsel %vm22870_vm14, %v22871_v22, %v22872_v45  ;;  %v20422_v54 = vor.u32 %v5453_v24, %v5450_v51  ;;  %v20433_v47 = vpop.f32.mrb[6].mxu1  ;;  %v20435_v24 = vpop.f32.mrb[7].mxu0  ;;  %v17375_v51 = vld [vmem:[%s22411_s2 + $0x1c8] sm:$0xff]  }
 0x21b   : > { %vm20417_vm6 = vcmp.lt.s32.totalorder %v22873_v29, 16  ;;  %v2784_v16 = vrot.slane %v2782_v60, 6  ;;  %v14149_v23 = vpack.c.bf16 %v5386_v53, %v5386_v53  ;;  %v5475_v40 = vrot.slane %v20386_v5, 4  ;;  %v20449_v39 = vpop.f32.mrb[7].mxu1  ;;  %15640 = vmatprep.subr.bf16.mxu0 %v17375_v51  ;;  %v20477_v13 = vpop.f32.mrb[8].mxu0 }
 0x21c   : > { %22876 = vst [vmem:[#allocation40_spill] sm:$0xff] %v20422_v54  ;;  %vm22878_vm13 = vnez %v22877_v61  ;;  %v2787_v6 = vrot.slane %v2785_v50, 7  ;;  %vm22879_vm5 = vsmask.f32 5392  ;;  %vm22880_vm14 = vsmask.f32 1280  ;;  %15641 = vmatpush3.bf16.msra.mxu0 %v17375_v51 }
 0x21d   : > { %v2929_v27 = vsel %vm22878_vm13, %v20388_v12, %v2928_v18  ;;  %vm20442_vm12 = vmor %vm22880_vm14, %vm22879_vm5  ;;  %v5477_v18 = vshrl.u32 %v14149_v23, 16  ;;  %v5480_v50 = vshll.u32 %v14149_v23, 16  ;;  %v2687_v53 = vsel %vm20326_vm7, %v2321_v35, 0.0  ;;  %v22886_v35 = vld [vmem:[#allocation24_spill] sm:$0xff] }
 0x21e   : > { %2930 = vst [vmem:[#allocation2 + $0x8] sm:$0xe] %v2929_v27  ;;  %v20451_v22 = vor.u32 %v2787_v6, %v2784_v16  ;;  %v14131_v45 = vpack.c.bf16 %v2687_v53, %v2687_v53  ;;  %v5384_v29 = vsel %vm20352_vm3, %v5019_v11, 0.0  ;;  %v2692_v7 = vsel %vm20361_vm1, %v15200_v44, 0.0  ;;  %v20481_v53 = vpop.f32.mrb[8].mxu1 }
 0x21f   : > { %v5479_v27 = vrot.slane %v5477_v18, 6  ;;  %v5482_v60 = vrot.slane %v5480_v50, 7  ;;  %v14147_v61 = vpack.c.bf16 %v5384_v29, %v5384_v29  ;;  %v14136_v23 = vpack.c.bf16 %v2692_v7, %v2692_v7 }
 0x220   : > { %vm22884_vm5 = vnez %v22883_v0  ;;  %v2789_v26 = vsel %vm20442_vm12, %v2780_v55, %v20451_v22  ;;  %v2762_v32 = vshrl.u32 %v14131_v45, 16  ;;  %v2765_v11 = vshll.u32 %v14131_v45, 16  ;;  %v17377_v0 = vld [vmem:[%s22411_s2 + $0x1d0] sm:$0xff]   ;;  %v20483_v45 = vpop.f32.mrb[9].mxu0 }
 0x221   : > { %v22887_v34 = vsel %vm22884_vm5, %v22885_v8, %v22886_v35  ;;  %2933 = vst [vmem:[#allocation2 + $0x14] sm:$0xf] %v2789_v26  ;;  %v5457_v44 = vshrl.u32 %v14147_v61, 16  ;;  %v5460_v20 = vshll.u32 %v14147_v61, 16  ;;  %v2812_v7 = vshrl.u32 %v14136_v23, 16  ;;  %v22890_v8 = vld [vmem:[#allocation61_spill] sm:$0xff]  ;;  %15642 = vmatprep.subr.bf16.mxu0 %v17377_v0 }
 0x222   : > { %vm20463_vm7 = vcmp.lt.s32.totalorder %v22887_v34, 16  ;;  %v20475_v34 = vor.u32 %v5482_v60, %v5479_v27  ;;  %v2764_v6 = vrot.slane %v2762_v32, 6  ;;  %v2767_v18 = vrot.slane %v2765_v11, 7  ;;  %v22892_v35 = vld [vmem:[#allocation28_spill] sm:$0xff]  ;;  %v22893_v26 = vld [vmem:[#allocation25_spill] sm:$0xff]  ;;  %v20500_v32 = vpop.f32.mrb[10].mxu0  ;;  %15643 = vmatpush3.bf16.msra.mxu0 %v17377_v0 }
 0x223   : > { %v2815_v55 = vshll.u32 %v14136_v23, 16  ;;  %v5389_v50 = vsel %vm20380_vm0, %v15488_v63, 0.0  ;;  %v5459_v61 = vrot.slane %v5457_v44, 6  ;;  %v5462_v27 = vrot.slane %v5460_v20, 7  ;;  %v20498_v63 = vpop.f32.mrb[9].mxu1 }
 0x224   : > { %v5484_v60 = vsel %vm20442_vm12, %v5475_v40, %v20475_v34  ;;  %vm22891_vm3 = vnez %v22890_v8  ;;  %v17379_v40 = vld [vmem:[%s22411_s2 + $0x1d8] sm:$0xff]   ;;  %v2768_v11 = vor.u32 %v2767_v18, %v2764_v6  ;;  %v2814_v44 = vrot.slane %v2812_v7, 6  ;;  %v20505_v29 = vpop.f32.mrb[10].mxu1 }
 0x225   : > { %v22894_v23 = vsel %vm22891_vm3, %v22892_v35, %v22893_v26  ;;  %5628 = vst [vmem:[#allocation2 + $0x54] sm:$0xf] %v5484_v60  ;;  %v2817_v20 = vrot.slane %v2815_v55, 7  ;;  %v14152_v8 = vpack.c.bf16 %v5389_v50, %v5389_v50  ;;  %v20507_v35 = vpop.f32.mrb[11].mxu0  ;;  %v5463_v26 = vor.u32 %v5462_v27, %v5459_v61  ;;  %v20518_v6 = vpop.f32.mrb[11].mxu1  ;;  %v22910_v27 = vld [vmem:[#allocation30_spill] sm:$0xff]  ;;  %15644 = vmatprep.subr.bf16.mxu0 %v17379_v40 }
 0x226   : > { %vm20494_vm1 = vcmp.lt.s32.totalorder %v22894_v23, 16  ;;  %v2690_v23 = vsel %vm20399_vm8, %v20392_v3, 0.0  ;;  %v5387_v51 = vsel %vm20408_vm4, %v20424_v57, 0.0  ;;  %v2693_v7 = vsel %vm20417_vm6, %v20426_v30, 0.0  ;;  %v22898_v3 = vld [vmem:[#allocation62_spill] sm:$0xff]  ;;  %15645 = vmatpush3.bf16.msra.mxu0 %v17379_v40 }
 0x227   : > { %v22897_v18 = vrot.slane %v20388_v12, 4  ;;  %v2770_v50 = vrot.slane %v2768_v11, 4  ;;  %v20524_v60 = vor.u32 %v2817_v20, %v2814_v44  ;;  %v5507_v38 = vshrl.u32 %v14152_v8, 16  ;;  %v22909_v30 = vld [vmem:[#allocation42_spill] sm:$0xff] }
 0x228   : > { %vm22899_vm0 = vnez %v22898_v3  ;;  %vm22904_vm6 = vnez %v22789_v41  ;;  %vm22908_vm14 = vnez %v22793_v37  ;;  %v22914_v44 = vrot.slane %v20422_v54, 4  ;;  %v17381_v37 = vld [vmem:[%s22411_s2 + $0x1e0] sm:$0xff]  }
 0x229   : > { %v2769_v55 = vsel %vm20442_vm12, %v22897_v18, %v2768_v11  ;;  %v22901_v57 = vsel %vm22899_vm0, %v19698_v48, %v22900_v4  ;;  %v22905_v12 = vsel %vm22904_vm6, %v22788_v49, %v19656_v1  ;;  %v22911_v11 = vsel %vm22908_vm14, %v22909_v30, %v22910_v27  ;;  %v22917_v30 = vld [vmem:[#allocation31_spill] sm:$0xff]  ;;  %15646 = vmatprep.subr.bf16.mxu0 %v17381_v37 }
 0x22a   : > { %vm20531_vm4 = vcmp.lt.s32.totalorder %v22901_v57, 16  ;;  %vm20540_vm8 = vcmp.lt.s32.totalorder %v22905_v12, 16  ;;  %vm20549_vm5 = vcmp.lt.s32.totalorder %v22911_v11, 16  ;;  %2931 = vst [vmem:[#allocation2 + $0xc] sm:$0xf] %v2769_v55  ;;  %v5464_v41 = vsel %vm20442_vm12, %v22914_v44, %v5463_v26  ;;  %v22916_v12 = vld [vmem:[#allocation43_spill] sm:$0xff]  ;;  %15647 = vmatpush3.bf16.msra.mxu0 %v17381_v37 }
 0x22b   : > { %v5465_v1 = vrot.slane %v5463_v26, 4  ;;  %v5510_v49 = vshll.u32 %v14152_v8, 16  ;;  %v14134_v20 = vpack.c.bf16 %v2690_v23, %v2690_v23  ;;  %v2779_v18 = vsel %vm20442_vm12, %v2770_v50, %v20384_v28  ;;  %5626 = vst [vmem:[#allocation2 + $0x4c] sm:$0xf] %v5464_v41  ;;  %v20576_v50 = vpop.f32.mrb[12].mxu0  ;;  %v20581_v44 = vpop.f32.mrb[12].mxu1 }
 0x22c   : > { %v2820_v55 = vrot.slane %v20524_v60, 4  ;;  %v5509_v3 = vrot.slane %v5507_v38, 6  ;;  %v14150_v4 = vpack.c.bf16 %v5387_v51, %v5387_v51  ;;  %2932 = vst [vmem:[#allocation2 + $0x10] sm:$0xf] %v2779_v18  ;;  %v22918_v27 = vsel %vm22797_vm9, %v22916_v12, %v22917_v30  ;;  %v20583_v41 = vpop.f32.mrb[13].mxu0  ;;  %v20590_v57 = vpop.f32.mrb[13].mxu1 }
 0x22d   : > { %v5474_v8 = vsel %vm20442_vm12, %v5465_v1, %v20386_v5  ;;  %v5512_v0 = vrot.slane %v5510_v49, 7  ;;  %v2792_v26 = vshrl.u32 %v14134_v20, 16  ;;  %v2795_v23 = vshll.u32 %v14134_v20, 16  ;;  %v17386_v1 = vld [vmem:[%s22411_s2 + $0x1e8] sm:$0xff]   ;;  %v20594_v30 = vpop.f32.mrb[14].mxu1 }
 0x22e   : > { %vm20572_vm3 = vcmp.lt.s32.totalorder %v22918_v27, 16  ;;  %5627 = vst [vmem:[#allocation2 + $0x50] sm:$0xf] %v5474_v8  ;;  %v5487_v51 = vshrl.u32 %v14150_v4, 16  ;;  %v5490_v38 = vshll.u32 %v14150_v4, 16  ;;  %v14137_v11 = vpack.c.bf16 %v2693_v7, %v2693_v7  ;;  %v20592_v7 = vpop.f32.mrb[14].mxu0  ;;  %15648 = vmatprep.subr.bf16.mxu0 %v17386_v1 }
 0x22f   : > { %v5390_v5 = vsel %vm20463_vm7, %v20433_v47, 0.0  ;;  %v20588_v49 = vor.u32 %v5512_v0, %v5509_v3  ;;  %v2794_v20 = vrot.slane %v2792_v26, 6  ;;  %v2797_v18 = vrot.slane %v2795_v23, 7  ;;  %22921 = vst [vmem:[#allocation63_spill] sm:$0xff] %v20594_v30  ;;  %v20596_v27 = vpop.f32.mrb[15].mxu0  ;;  %15649 = vmatpush3.bf16.msra.mxu0 %v17386_v1 }
 0x230   : > { %v14153_v8 = vpack.c.bf16 %v5390_v5, %v5390_v5  ;;  %v5489_v16 = vrot.slane %v5487_v51, 6  ;;  %v5492_v47 = vrot.slane %v5490_v38, 7  ;;  %v2822_v4 = vshrl.u32 %v14137_v11, 16  ;;  %22922 = vst [vmem:[#allocation64_spill] sm:$0xff] %v20596_v27  ;;  %v20599_v5 = vpop.f32.mrb[15].mxu1 }
 0x231   : > { %v2825_v12 = vshll.u32 %v14137_v11, 16  ;;  %v5515_v3 = vrot.slane %v20588_v49, 4  ;;  %v2798_v0 = vor.u32 %v2797_v18, %v2794_v20  ;;  %22923 = vst [vmem:[#allocation45_spill] sm:$0xff] %v20599_v5  ;;  %v2691_v51 = vsel %vm20494_vm1, %v20435_v24, 0.0  ;;  %v22925_v18 = vld [vmem:[#allocation66_spill] sm:$0xff]  ;;  %v22928_v5 = vld [vmem:[#allocation32_spill] sm:$0xff] }
 0x232   : > { %v5517_v26 = vshrl.u32 %v14153_v8, 16  ;;  %v5520_v23 = vshll.u32 %v14153_v8, 16  ;;  %v20601_v59 = vor.u32 %v5492_v47, %v5489_v16  ;;  %v2824_v54 = vrot.slane %v2822_v4, 6  ;;  %v22927_v8 = vld [vmem:[#allocation44_spill] sm:$0xff]  ;;  %v22932_v24 = vld [vmem:[#allocation33_spill] sm:$0xff] }
 0x233   : > { %v2827_v40 = vrot.slane %v2825_v12, 7  ;;  %v22924_v38 = vrot.slane %v20451_v22, 4  ;;  %v2800_v27 = vrot.slane %v2798_v0, 4  ;;  %vm22926_vm9 = vnez %v22925_v18 }
 0x234   : > { %v5519_v30 = vrot.slane %v5517_v26, 6  ;;  %v5522_v20 = vrot.slane %v5520_v23, 7  ;;  %v22929_v16 = vsel %vm22926_vm9, %v22927_v8, %v22928_v5  ;;  %v22933_v22 = vsel %vm22812_vm10, %v22810_v17, %v22932_v24  ;;  %v17388_v17 = vld [vmem:[%s22411_s2 + $0x1f0] sm:$0xff]  }
 0x235   : > { %v2799_v11 = vsel %vm20442_vm12, %v22924_v38, %v2798_v0  ;;  %vm20615_vm7 = vcmp.lt.s32.totalorder %v22929_v16, 16  ;;  %vm20624_vm1 = vcmp.lt.s32.totalorder %v22933_v22, 16  ;;  %v22936_v4 = vrot.slane %v20475_v34, 4  ;;  %15650 = vmatprep.subr.bf16.mxu0 %v17388_v17  ;;  %v17392_v22 = vld [vmem:[%s22411_s2 + $0x1f8] sm:$0xff]  }
 0x236   : > { %2934 = vst [vmem:[#allocation2 + $0x18] sm:$0xf] %v2799_v11  ;;  %v5495_v0 = vrot.slane %v20601_v59, 4  ;;  %v20634_v26 = vor.u32 %v2827_v40, %v2824_v54  ;;  %v14135_v42 = vpack.c.bf16 %v2691_v51, %v2691_v51  ;;  %v20639_v23 = vor.u32 %v5522_v20, %v5519_v30  ;;  %v22946_v51 = vld [vmem:[#allocation48_spill] sm:$0xff]  ;;  %15651 = vmatpush3.bf16.msra.mxu0 %v17388_v17 }
 0x237   : > { %v5494_v12 = vsel %vm20442_vm12, %v22936_v4, %v20601_v59  ;;  %v5388_v34 = vsel %vm20531_vm4, %v20449_v39, 0.0  ;;  %v2696_v37 = vsel %vm20540_vm8, %v20477_v13, 0.0  ;;  %v5393_v54 = vsel %vm20549_vm5, %v20481_v53, 0.0  ;;  %v22937_v39 = vld [vmem:[#allocation34_spill] sm:$0xff]  ;;  %v22941_v13 = vld [vmem:[#allocation35_spill] sm:$0xff]  ;;  %15652 = vmatprep.subr.bf16.mxu0 %v17392_v22 }
 0x238   : > { %5629 = vst [vmem:[#allocation2 + $0x58] sm:$0xf] %v5494_v12  ;;  %v2829_v59 = vsel %vm20442_vm12, %v2820_v55, %v20634_v26  ;;  %v2830_v5 = vrot.slane %v20634_v26, 4  ;;  %v2802_v30 = vshrl.u32 %v14135_v42, 16  ;;  %v2805_v40 = vshll.u32 %v14135_v42, 16  ;;  %v22971_v26 = vld [vmem:[#allocation41_spill] sm:$0xff] }
 0x239   : > { %v22938_v61 = vsel %vm20058_vm2, %v22814_v9, %v22937_v39  ;;  %v22942_v53 = vsel %vm20066_vm15, %v22817_v21, %v22941_v13  ;;  %v22948_v38 = vsel %vm20074_vm11, %v22946_v51, %v22947_v46  ;;  %2937 = vst [vmem:[#allocation2 + $0x24] sm:$0xf] %v2829_v59  ;;  %v5524_v31 = vsel %vm20442_vm12, %v5515_v3, %v20639_v23 }
 0x23a   : > { %vm20659_vm10 = vcmp.lt.s32.totalorder %v22938_v61, 16  ;;  %vm20668_vm0 = vcmp.lt.s32.totalorder %v22942_v53, 16  ;;  %vm20677_vm4 = vcmp.lt.s32.totalorder %v22948_v38, 16  ;;  %v5525_v21 = vrot.slane %v20639_v23, 4  ;;  %5632 = vst [vmem:[#allocation2 + $0x64] sm:$0xf] %v5524_v31  ;;  %15653 = vmatpush3.bf16.msra.mxu0 %v17392_v22 }
 0x23b   : > { %v14151_v11 = vpack.c.bf16 %v5388_v34, %v5388_v34  ;;  %v14140_v20 = vpack.c.bf16 %v2696_v37, %v2696_v37  ;;  %v2804_v18 = vrot.slane %v2802_v30, 6  ;;  %v2807_v8 = vrot.slane %v2805_v40, 7  ;;  %v17394_v53 = vld [vmem:[%s22411_s2 + $0x200] sm:$0xff]  }
 0x23c   : > { %v14156_v16 = vpack.c.bf16 %v5393_v54, %v5393_v54  ;;  %v2694_v24 = vsel %vm20572_vm3, %v20483_v45, 0.0  ;;  %vm22951_vm2 = vnez %v22726_v2  ;;  %vm22956_vm11 = vnez %v22730_v19  ;;  %v17399_v2 = vld [vmem:[%s22411_s2 + $0x208] sm:$0xff]   ;;  %15658 = vmatprep.subr.bf16.mxu0 %v17394_v53 }
 0x23d   : > { %v5497_v4 = vshrl.u32 %v14151_v11, 16  ;;  %v5500_v3 = vshll.u32 %v14151_v11, 16  ;;  %v2852_v12 = vshrl.u32 %v14140_v20, 16  ;;  %v2855_v42 = vshll.u32 %v14140_v20, 16  ;;  %15655 = vmatmul.mubr.bf16.vlgmr.msra.gmra.mrb[16].mxu0 %v20341_v36  ;;  %v17401_v36 = vld [vmem:[%s22411_s2 + $0x210] sm:$0xff]  }
 0x23e   : > { %v2808_v34 = vor.u32 %v2807_v8, %v2804_v18  ;;  %v5547_v37 = vshrl.u32 %v14156_v16, 16  ;;  %v5550_v1 = vshll.u32 %v14156_v16, 16  ;;  %v14138_v59 = vpack.c.bf16 %v2694_v24, %v2694_v24  ;;  %15659 = vmatpush3.bf16.msra.mxu0 %v17394_v53  ;;  %v22968_v53 = vld [vmem:[#allocation12_spill] sm:$0xff] }
 0x23f   : > { %v5499_v30 = vrot.slane %v5497_v4, 6  ;;  %v5502_v40 = vrot.slane %v5500_v3, 7  ;;  %v2854_v54 = vrot.slane %v2852_v12, 6  ;;  %v2857_v39 = vrot.slane %v2855_v42, 7  ;;  %v22962_v42 = vld [vmem:[#allocation51_spill] sm:$0xff]  ;;  %15660 = vmatprep.subr.bf16.mxu0 %v17399_v2 }
 0x240   : > { %v2809_v45 = vsel %vm20442_vm12, %v2800_v27, %v2808_v34  ;;  %v2810_v28 = vrot.slane %v2808_v34, 4  ;;  %v5549_v61 = vrot.slane %v5547_v37, 6  ;;  %v5552_v13 = vrot.slane %v5550_v1, 7  ;;  %v22963_v34 = vld [vmem:[#allocation39_spill] sm:$0xff] }
 0x241   : > { %2935 = vst [vmem:[#allocation2 + $0x1c] sm:$0xf] %v2809_v45  ;;  %v5503_v55 = vor.u32 %v5502_v40, %v5499_v30  ;;  %v20696_v51 = vor.u32 %v2857_v39, %v2854_v54  ;;  %v2832_v46 = vshrl.u32 %v14138_v59, 16  ;;  %v2835_v38 = vshll.u32 %v14138_v59, 16 }
 0x242   : > { %v2819_v17 = vsel %vm20442_vm12, %v2810_v28, %v20524_v60  ;;  %v20701_v31 = vor.u32 %v5552_v13, %v5549_v61  ;;  %v5391_v27 = vsel %vm20615_vm7, %v20498_v63, 0.0  ;;  %v2697_v11 = vsel %vm20624_vm1, %v20500_v32, 0.0  ;;  %v22952_v60 = vld [vmem:[#allocation37_spill] sm:$0xff]  ;;  %v22957_v63 = vld [vmem:[#allocation38_spill] sm:$0xff]  ;;  %15661 = vmatpush3.bf16.msra.mxu0 %v17399_v2 }
 0x243   : > { %2936 = vst [vmem:[#allocation2 + $0x20] sm:$0xf] %v2819_v17  ;;  %v5504_v20 = vsel %vm20442_vm12, %v5495_v0, %v5503_v55  ;;  %v5505_v18 = vrot.slane %v5503_v55, 4  ;;  %v2860_v8 = vrot.slane %v20696_v51, 4  ;;  %v2834_v16 = vrot.slane %v2832_v46, 6  ;;  %v22970_v55 = vld [vmem:[#allocation52_spill] sm:$0xff]  ;;  %15662 = vmatprep.subr.bf16.mxu0 %v17401_v36 }
 0x244   : > { %v22953_v24 = vsel %vm22951_vm2, %v22822_v15, %v22952_v60  ;;  %v22958_v32 = vsel %vm22956_vm11, %v22823_v10, %v22957_v63  ;;  %5630 = vst [vmem:[#allocation2 + $0x5c] sm:$0xf] %v5504_v20  ;;  %v5555_v15 = vrot.slane %v20701_v31, 4  ;;  %v2837_v0 = vrot.slane %v2835_v38, 7  ;;  %v22975_v20 = vld [vmem:[#allocation13_spill] sm:$0xff] }
 0x245   : > { %vm20717_vm15 = vcmp.lt.s32.totalorder %v22953_v24, 16  ;;  %vm20726_vm6 = vcmp.lt.s32.totalorder %v22958_v32, 16  ;;  %v14154_v4 = vpack.c.bf16 %v5391_v27, %v5391_v27  ;;  %v14141_v3 = vpack.c.bf16 %v2697_v11, %v2697_v11 }
 0x246   : > { %v5514_v10 = vsel %vm20442_vm12, %v5505_v18, %v20588_v49  ;;  %v5394_v19 = vsel %vm20659_vm10, %v20505_v29, 0.0  ;;  %v2695_v22 = vsel %vm20668_vm0, %v20507_v35, 0.0  ;;  %v5392_v12 = vsel %vm20677_vm4, %v20518_v6, 0.0  ;;  %v22977_v18 = vld [vmem:[#allocation53_spill] sm:$0xff]  ;;  %15663 = vmatpush3.bf16.msra.mxu0 %v17401_v36 }
 0x247   : > { %vm22961_vm8 = vnez %v22734_v58  ;;  %5631 = vst [vmem:[#allocation2 + $0x60] sm:$0xf] %v5514_v10  ;;  %v2838_v49 = vor.u32 %v2837_v0, %v2834_v16  ;;  %v5527_v29 = vshrl.u32 %v14154_v4, 16  ;;  %v5530_v56 = vshll.u32 %v14154_v4, 16  ;;  %v22967_v58 = vld [vmem:[#allocation18_spill] sm:$0xff] }
 0x248   : > { %v22964_v37 = vsel %vm22961_vm8, %v22962_v42, %v22963_v34  ;;  %v2862_v59 = vshrl.u32 %v14141_v3, 16  ;;  %v2865_v35 = vshll.u32 %v14141_v3, 16  ;;  %v14157_v48 = vpack.c.bf16 %v5394_v19, %v5394_v19  ;;  %15674 = vmatprep.mubr.bf16.mxu0 %v22967_v58  ;;  %v17407_v58 = vld [vmem:[%s22411_s2 + $0x220] sm:$0xff]   ;;  %v17411_v3 = vld [vmem:[%s22411_s2 + $0x230] sm:$0xff]  }
 0x249   : > { %vm20751_vm14 = vcmp.lt.s32.totalorder %v22964_v37, 16  ;;  %v14139_v9 = vpack.c.bf16 %v2695_v22, %v2695_v22  ;;  %v14155_v6 = vpack.c.bf16 %v5392_v12, %v5392_v12  ;;  %v2839_v30 = vsel %vm20442_vm12, %v2830_v5, %v2838_v49  ;;  %v22985_v37 = vld [vmem:[#allocation16_spill] sm:$0xff]  ;;  %v22999_v5 = vld [vmem:[#allocation63_spill] sm:$0xff] }
 0x24a   : > { %v2840_v40 = vrot.slane %v2838_v49, 4  ;;  %v5529_v54 = vrot.slane %v5527_v29, 6  ;;  %v5532_v39 = vrot.slane %v5530_v56, 7  ;;  %2938 = vst [vmem:[#allocation2 + $0x28] sm:$0xf] %v2839_v30  ;;  %v2864_v45 = vrot.slane %v2862_v59, 6 }
 0x24b   : > { %v2867_v28 = vrot.slane %v2865_v35, 7  ;;  %v5557_v61 = vshrl.u32 %v14157_v48, 16  ;;  %v5560_v13 = vshll.u32 %v14157_v48, 16  ;;  %vm22969_vm5 = vnez %v22968_v53  ;;  %v22987_v49 = vld [vmem:[#allocation58_spill] sm:$0xff]  ;;  %v22992_v59 = vld [vmem:[#allocation19_spill] sm:$0xff]  ;;  %v22994_v35 = vld [vmem:[#allocation17_spill] sm:$0xff] }
 0x24c   : > { %v22972_v46 = vsel %vm22969_vm5, %v22970_v55, %v22971_v26  ;;  %v5533_v38 = vor.u32 %v5532_v39, %v5529_v54  ;;  %v2842_v17 = vshrl.u32 %v14139_v9, 16  ;;  %v2845_v27 = vshll.u32 %v14139_v9, 16  ;;  %v22995_v48 = vld [vmem:[#allocation3_spill] sm:$0xff] }
 0x24d   : > { %vm20769_vm3 = vcmp.lt.s32.totalorder %v22972_v46, 16  ;;  %v5537_v11 = vshrl.u32 %v14155_v6, 16  ;;  %vm22976_vm9 = vnez %v22975_v20  ;;  %v20782_v24 = vor.u32 %v2867_v28, %v2864_v45 }
 0x24e   : > { %v22978_v16 = vsel %vm22976_vm9, %v22827_v52, %v22977_v18  ;;  %v5559_v63 = vrot.slane %v5557_v61, 6  ;;  %v5562_v32 = vrot.slane %v5560_v13, 7  ;;  %v5540_v0 = vshll.u32 %v14155_v6, 16 }
 0x24f   : > { %vm20778_vm7 = vcmp.lt.s32.totalorder %v22978_v16, 16  ;;  %vm22981_vm1 = vnez %v22773_v33  ;;  %v5534_v52 = vsel %vm20442_vm12, %v5525_v21, %v5533_v38  ;;  %v5535_v10 = vrot.slane %v5533_v38, 4  ;;  %v17405_v33 = vld [vmem:[%s22411_s2 + $0x218] sm:$0xff]  }
 0x250   : > { %v22982_v4 = vsel %vm22981_vm1, %v22828_v25, %v19783_v14  ;;  %v2844_v19 = vrot.slane %v2842_v17, 6  ;;  %v2847_v22 = vrot.slane %v2845_v27, 7  ;;  %5633 = vst [vmem:[#allocation2 + $0x68] sm:$0xf] %v5534_v52  ;;  %v2869_v25 = vsel %vm20442_vm12, %v2860_v8, %v20782_v24  ;;  %v22988_v8 = vld [vmem:[#allocation57_spill] sm:$0xff]  ;;  %15664 = vmatprep.subr.bf16.mxu0 %v17405_v33 }
 0x251   : > { %vm20789_vm10 = vcmp.lt.s32.totalorder %v22982_v4, 16  ;;  %v2870_v14 = vrot.slane %v20782_v24, 4  ;;  %v20804_v2 = vor.u32 %v5562_v32, %v5559_v63  ;;  %v5539_v23 = vrot.slane %v5537_v11, 6  ;;  %2941 = vst [vmem:[#allocation2 + $0x34] sm:$0xf] %v2869_v25  ;;  %15665 = vmatpush3.bf16.msra.mxu0 %v17405_v33  ;;  %v17409_v11 = vld [vmem:[%s22411_s2 + $0x228] sm:$0xff]  }
 0x252   : > { %v2848_v21 = vor.u32 %v2847_v22, %v2844_v19  ;;  %v5542_v12 = vrot.slane %v5540_v0, 7  ;;  %v2700_v42 = vsel %vm20717_vm15, %v20576_v50, 0.0  ;;  %v5397_v34 = vsel %vm20726_vm6, %v20581_v44, 0.0  ;;  %15666 = vmatprep.subr.bf16.mxu0 %v17407_v58 }
 0x253   : > { %vm22986_vm0 = vnez %v22985_v37  ;;  %vm22993_vm2 = vnez %v22992_v59  ;;  %v5564_v44 = vsel %vm20442_vm12, %v5555_v15, %v20804_v2  ;;  %v5565_v47 = vrot.slane %v20804_v2, 4 }
 0x254   : > { %v22989_v29 = vsel %vm22986_vm0, %v22987_v49, %v22988_v8  ;;  %v22996_v9 = vsel %vm22993_vm2, %v22994_v35, %v22995_v48  ;;  %v14144_v62 = vpack.c.bf16 %v2700_v42, %v2700_v42  ;;  %v14160_v6 = vpack.c.bf16 %v5397_v34, %v5397_v34  ;;  %5636 = vst [vmem:[#allocation2 + $0x74] sm:$0xf] %v5564_v44  ;;  %v23001_v34 = vld [vmem:[#allocation45_spill] sm:$0xff]  ;;  %v2946_v48 = vld [vmem:[#allocation2 + $0x48] sm:$0x3] }
 0x255   : > { %vm20817_vm4 = vcmp.lt.s32.totalorder %v22989_v29, 16  ;;  %vm20826_vm11 = vcmp.lt.s32.totalorder %v22996_v9, 16  ;;  %v2849_v30 = vsel %vm20442_vm12, %v2840_v40, %v2848_v21  ;;  %v2850_v54 = vrot.slane %v2848_v21, 4  ;;  %15667 = vmatpush3.bf16.msra.mxu0 %v17407_v58  ;;  %v20893_v58 = vld [vmem:[#allocation2 + $0x10] sm:$0xff]  }
 0x256   : > { %v5543_v39 = vor.u32 %v5542_v12, %v5539_v23  ;;  %v2698_v45 = vsel %vm20751_vm14, %v20583_v41, 0.0  ;;  %2939 = vst [vmem:[#allocation2 + $0x2c] sm:$0xf] %v2849_v30  ;;  %v2892_v15 = vshrl.u32 %v14144_v62, 16  ;;  %v2895_v28 = vshll.u32 %v14144_v62, 16  ;;  %15668 = vmatprep.subr.bf16.mxu0 %v17409_v11  ;;  %v23000_v12 = vld [vmem:[#allocation64_spill] sm:$0xff] }
 0x257   : > { %v5587_v61 = vshrl.u32 %v14160_v6, 16  ;;  %v5590_v36 = vshll.u32 %v14160_v6, 16  ;;  %v2859_v13 = vsel %vm20442_vm12, %v2850_v54, %v20696_v51  ;;  %v14142_v55 = vpack.c.bf16 %v2698_v45, %v2698_v45 }
 0x258   : > { %v5544_v53 = vsel %vm20442_vm12, %v5535_v10, %v5543_v39  ;;  %v5545_v40 = vrot.slane %v5543_v39, 4  ;;  %2940 = vst [vmem:[#allocation2 + $0x30] sm:$0xf] %v2859_v13  ;;  %v2894_v26 = vrot.slane %v2892_v15, 6  ;;  %v2897_v1 = vrot.slane %v2895_v28, 7 }
 0x259   : > { %5634 = vst [vmem:[#allocation2 + $0x6c] sm:$0xf] %v5544_v53  ;;  %v5589_v41 = vrot.slane %v5587_v61, 6  ;;  %v5592_v46 = vrot.slane %v5590_v36, 7  ;;  %v2872_v17 = vshrl.u32 %v14142_v55, 16  ;;  %v2875_v27 = vshll.u32 %v14142_v55, 16  ;;  %15669 = vmatpush3.bf16.msra.mxu0 %v17409_v11 }
 0x25a   : > { %v5554_v38 = vsel %vm20442_vm12, %v5545_v40, %v20701_v31  ;;  %v5395_v51 = vsel %vm20769_vm3, %v20590_v57, 0.0  ;;  %v20858_v20 = vor.u32 %v2897_v1, %v2894_v26  ;;  %v2701_v31 = vsel %vm20778_vm7, %v20592_v7, 0.0  ;;  %v20872_v7 = vld [vmem:[#allocation2 + $0x8] sm:$0xff]   ;;  %15670 = vmatprep.subr.bf16.mxu0 %v17411_v3  ;;  %v20906_v26 = vld [vmem:[#allocation2 + $0x18] sm:$0xff]  }
 0x25b   : > { %5635 = vst [vmem:[#allocation2 + $0x70] sm:$0xf] %v5554_v38  ;;  %v20860_v18 = vor.u32 %v5592_v46, %v5589_v41  ;;  %v14158_v16 = vpack.c.bf16 %v5395_v51, %v5395_v51  ;;  %v2874_v63 = vrot.slane %v2872_v17, 6  ;;  %v2877_v32 = vrot.slane %v2875_v27, 7  ;;  %v5641_v61 = vld [vmem:[#allocation2 + $0x88] sm:$0x3] }
 0x25c   : > { %v14145_v0 = vpack.c.bf16 %v2701_v31, %v2701_v31  ;;  %v5398_v57 = vsel %vm20789_vm10, %v22999_v5, 0.0  ;;  %v2900_v4 = vrot.slane %v20858_v20, 4  ;;  %v2699_v42 = vsel %vm20817_vm4, %v23000_v12, 0.0  ;;  %v17416_v17 = vld [vmem:[%s22412_s3 + $0x40] sm:$0xff]   ;;  %v17387_v31 = vld [vmem:[%s22412_s3 + $0x8] sm:$0xff]  }
 0x25d   : > { %v5595_v52 = vrot.slane %v20860_v18, 4  ;;  %v5567_v10 = vshrl.u32 %v14158_v16, 16  ;;  %v5570_v19 = vshll.u32 %v14158_v16, 16  ;;  %v20870_v22 = vor.u32 %v2877_v32, %v2874_v63  ;;  %15671 = vmatpush3.bf16.msra.mxu0 %v17411_v3  ;;  %v20919_v63 = vld [vmem:[#allocation2 + $0x20] sm:$0xff]   ;;  %v17420_v3 = vld [vmem:[%s22412_s3 + $0x48] sm:$0xff]  }
 0x25e   : > { %v2902_v33 = vshrl.u32 %v14145_v0, 16  ;;  %v2905_v25 = vshll.u32 %v14145_v0, 16  ;;  %v14161_v60 = vpack.c.bf16 %v5398_v57, %v5398_v57  ;;  %v5396_v37 = vsel %vm20826_vm11, %v23001_v34, 0.0  ;;  %v23004_v0 = vld [vmem:[#allocation20_spill] sm:$0xff] }
 0x25f   : > { %v5569_v23 = vrot.slane %v5567_v10, 6  ;;  %v5572_v21 = vrot.slane %v5570_v19, 7  ;;  %v2879_v49 = vsel %vm20442_vm12, %v2870_v14, %v20870_v22  ;;  %v2880_v8 = vrot.slane %v20870_v22, 4  ;;  %v17413_v14 = vld [vmem:[%s22411_s2 + $0x238] sm:$0xff]   ;;  %v20923_v10 = vld [vmem:[#allocation2 + $0x28] sm:$0xff]  }
 0x260   : > { %v2904_v29 = vrot.slane %v2902_v33, 6  ;;  %v2907_v59 = vrot.slane %v2905_v25, 7  ;;  %2942 = vst [vmem:[#allocation2 + $0x38] sm:$0xf] %v2879_v49  ;;  %v5597_v56 = vshrl.u32 %v14161_v60, 16  ;;  %v5600_v9 = vshll.u32 %v14161_v60, 16  ;;  %15672 = vmatprep.subr.bf16.mxu0 %v17413_v14 }
 0x261   : > { %v20889_v35 = vor.u32 %v5572_v21, %v5569_v23  ;;  %v14143_v44 = vpack.c.bf16 %v2699_v42, %v2699_v42  ;;  %v14159_v62 = vpack.c.bf16 %v5396_v37, %v5396_v37  ;;  %v7120_v6 = vshll.u32 %v20872_v7, 16  ;;  %v20929_v60 = vld [vmem:[#allocation2 + $0x30] sm:$0xff]   ;;  %15673 = vmatpush3.bf16.msra.mxu0 %v17413_v14 }
 0x262   : > { %v2908_v50 = vor.u32 %v2907_v59, %v2904_v29  ;;  %v7124_v24 = vshrl.u32 %v20872_v7, 16  ;;  %v5599_v39 = vrot.slane %v5597_v56, 6  ;;  %v5602_v45 = vrot.slane %v5600_v9, 7  ;;  %15966 = vmatprep.subr.bf16.mxu0 %v17416_v17  ;;  %v17390_v9 = vld [vmem:[%s22412_s3 + $0x10] sm:$0xff]  }
 0x263   : > { %v5574_v30 = vsel %vm20442_vm12, %v5565_v47, %v20889_v35  ;;  %v5575_v54 = vrot.slane %v20889_v35, 4  ;;  %v2882_v36 = vshrl.u32 %v14143_v44, 16  ;;  %v2885_v13 = vshll.u32 %v14143_v44, 16  ;;  %v23002_v47 = vld [vmem:[#allocation4_spill] sm:$0xff] }
 0x264   : > { %5637 = vst [vmem:[#allocation2 + $0x78] sm:$0xf] %v5574_v30  ;;  %v2909_v15 = vsel %vm20442_vm12, %v2900_v4, %v2908_v50  ;;  %v2910_v28 = vrot.slane %v2908_v50, 4  ;;  %v5603_v53 = vor.u32 %v5602_v45, %v5599_v39  ;;  %v5577_v40 = vshrl.u32 %v14159_v62, 16  ;;  %v23009_v14 = vld [vmem:[#allocation40_spill] sm:$0xff] }
 0x265   : > { %2945 = vst [vmem:[#allocation2 + $0x44] sm:$0xf] %v2909_v15  ;;  %v5580_v55 = vshll.u32 %v14159_v62, 16  ;;  %v7122_v2 = vrot.slane %v7120_v6, 1  ;;  %vm23003_vm15 = vnez %v23002_v47  ;;  %v2884_v41 = vrot.slane %v2882_v36, 6  ;;  %v17542_v30 = vld [vmem:[%s22412_s3 + $0x210] sm:$0xff]  }
 0x266   : > { %v2947_v1 = vsel %vm23003_vm15, %v2910_v28, %v2946_v48  ;;  %v2887_v46 = vrot.slane %v2885_v13, 7  ;;  %v7128_v38 = vshll.u32 %v20893_v58, 16  ;;  %v5604_v27 = vsel %vm20442_vm12, %v5595_v52, %v5603_v53  ;;  %v23007_v48 = vld [vmem:[#allocation21_spill] sm:$0xff] }
 0x267   : > { %2948 = vst [vmem:[#allocation2 + $0x48] sm:$0x3] %v2947_v1  ;;  %v5605_v51 = vrot.slane %v5603_v53, 4  ;;  %v5579_v11 = vrot.slane %v5577_v40, 6  ;;  %v5582_v16 = vrot.slane %v5580_v55, 7  ;;  %v7126_v57 = vor.u32 %v7124_v24, %v7122_v2  ;;  %15675 = vmatmul.mubr.bf16.vlgmr.msra.gmra.mrb[16].mxu0 %v23007_v48  ;;  %v17425_v13 = vld [vmem:[%s22412_s3 + $0x58] sm:$0xff]  }
 0x268   : > { %5640 = vst [vmem:[#allocation2 + $0x84] sm:$0xf] %v5604_v27  ;;  %v2888_v32 = vor.u32 %v2887_v46, %v2884_v41  ;;  %vm23005_vm6 = vsmask.f32 7424  ;;  %v7130_v4 = vrot.slane %v7128_v38, 1  ;;  %v7132_v33 = vshrl.u32 %v20893_v58, 16  ;;  %15967 = vmatpush3.bf16.msra.mxu0 %v17416_v17 }
 0x269   : > { %v7123_v5 = vsel %vm23005_vm6, %v23004_v0, %v7122_v2  ;;  %v5642_v52 = vsel %vm23003_vm15, %v5605_v51, %v5641_v61  ;;  %v5583_v19 = vor.u32 %v5582_v16, %v5579_v11  ;;  %v7136_v25 = vshll.u32 %v20906_v26, 16  ;;  %vm23006_vm8 = vmmov %vm23005_vm6  ;;  %15968 = vmatprep.subr.bf16.mxu0 %v17420_v3  ;;  %v17393_v61 = vld [vmem:[%s22412_s3 + $0x18] sm:$0xff]   ;;  %v17397_v46 = vld [vmem:[%s22412_s3 + $0x20] sm:$0xff]  }
 0x26a   : > { %15694 = vmatprep.mubr.bf16.mxu1 %v7123_v5  ;;  %5643 = vst [vmem:[#allocation2 + $0x88] sm:$0x3] %v5642_v52  ;;  %v2889_v23 = vsel %vm20442_vm12, %v2880_v8, %v2888_v32  ;;  %v2890_v21 = vrot.slane %v2888_v32, 4  ;;  %v7131_v12 = vsel %vm23006_vm8, %v7126_v57, %v7130_v4  ;;  %v7140_v42 = vshrl.u32 %v20906_v26, 16  ;;  %v17681_v8 = vld [vmem:[%s22412_s3] sm:$0xff]   ;;  %vm23008_vm14 = vmmov %vm23005_vm6 }
 0x26b   : > { %2943 = vst [vmem:[#allocation2 + $0x3c] sm:$0xf] %v2889_v23  ;;  %v5584_v34 = vsel %vm20442_vm12, %v5575_v54, %v5583_v19  ;;  %v5585_v37 = vrot.slane %v5583_v19, 4  ;;  %15695 = vmatmul.mubr.bf16.vlgmr.msra.gmra.mrb[16].mxu1 %v7131_v12  ;;  %v7134_v49 = vor.u32 %v7132_v33, %v7130_v4  ;;  %v7138_v29 = vrot.slane %v7136_v25, 1  ;;  %vm23011_vm5 = vmmov %vm23005_vm6  ;;  %v17427_v52 = vld [vmem:[%s22412_s3 + $0x60] sm:$0xff]   ;;  %v17400_v12 = vld [vmem:[%s22412_s3 + $0x28] sm:$0xff]  }
 0x26c   : > { %v2899_v22 = vsel %vm20442_vm12, %v2890_v21, %v20858_v20  ;;  %5638 = vst [vmem:[#allocation2 + $0x7c] sm:$0xf] %v5584_v34  ;;  %15711 = vmatpush3.bf16.msra.mxu1 %v17681_v8  ;;  %v7144_v59 = vshll.u32 %v20919_v63, 16  ;;  %v7152_v35 = vshll.u32 %v20923_v10, 16  ;;  %v7148_v6 = vshrl.u32 %v20919_v63, 16  ;;  %15969 = vmatpush3.bf16.msra.mxu0 %v17420_v3  ;;  %vm23013_vm9 = vmmov %vm23011_vm5 }
 0x26d   : > { %2944 = vst [vmem:[#allocation2 + $0x40] sm:$0xf] %v2899_v22  ;;  %v5594_v56 = vsel %vm20442_vm12, %v5585_v37, %v20860_v18  ;;  %15712 = vmatprep.subr.bf16.mxu1 %v17387_v31  ;;  %v7139_v20 = vsel %vm23008_vm14, %v7134_v49, %v7138_v29  ;;  %v7142_v44 = vor.u32 %v7140_v42, %v7138_v29  ;;  %v17422_v18 = vld [vmem:[%s22412_s3 + $0x50] sm:$0xff]   ;;  %v7160_v39 = vshll.u32 %v20929_v60, 16  ;;  %v20997_v0 = vld [vmem:[#allocation2 + $0x44] sm:$0xf]  ;;  %vm23017_vm0 = vmmov %vm23011_vm5 }
 0x26e   : > { %v5623_v50 = vld [vmem:[#allocation2 + $0x48] sm:$0xe]  ;;  %5639 = vst [vmem:[#allocation2 + $0x80] sm:$0xf] %v5594_v56  ;;  %15698 = vmatprep.mubr.bf16.mxu1 %v7139_v20  ;;  %v7146_v62 = vrot.slane %v7144_v59, 1  ;;  %v7154_v24 = vrot.slane %v7152_v35, 1  ;;  %15970 = vmatprep.subr.bf16.mxu0 %v17422_v18  ;;  %vm23018_vm4 = vmmov %vm23017_vm0 }
 0x26f   : > { %v5624_v54 = vsel %vm22878_vm13, %v23009_v14, %v5623_v50  ;;  %v7510_v45 = vrot.slane %v20893_v58, 1  ;;  %v7512_v15 = vrot.slane %v20906_v26, 1  ;;  %v7156_v53 = vshrl.u32 %v20923_v10, 16  ;;  %v17429_v29 = vld [vmem:[%s22412_s3 + $0x68] sm:$0xff]   ;;  %v17431_v50 = vld [vmem:[%s22412_s3 + $0x70] sm:$0xff]   ;;  %vm23021_vm6 = vmmov %vm23017_vm0 }
 0x270   : > { %5625 = vst [vmem:[#allocation2 + $0x48] sm:$0xe] %v5624_v54  ;;  %15713 = vmatpush3.bf16.msra.mxu1 %v17387_v31  ;;  %v7147_v28 = vsel %vm23011_vm5, %v7142_v44, %v7146_v62  ;;  %v7150_v36 = vor.u32 %v7148_v6, %v7146_v62  ;;  %vm23012_vm3 = vcmask 1046528   ;;  %v7514_v55 = vrot.slane %v20919_v63, 1  ;;  %15971 = vmatpush3.bf16.msra.mxu0 %v17422_v18  ;;  %vm23022_vm8 = vmmov %vm23017_vm0  ;;  %v17406_v14 = vld [vmem:[%s22412_s3 + $0x38] sm:$0xff]  }
 0x271   : > { %15714 = vmatprep.subr.bf16.mxu1 %v17390_v9  ;;  %v20979_v40 = vsel %vm23012_vm3, %v7510_v45, %v7512_v15  ;;  %v7516_v41 = vrot.slane %v20923_v10, 1  ;;  %v7162_v38 = vrot.slane %v7160_v39, 1  ;;  %vm23014_vm7 = vmmov %vm23012_vm3  ;;  %v7158_v27 = vor.u32 %v7156_v53, %v7154_v24  ;;  %15972 = vmatprep.subr.bf16.mxu0 %v17425_v13  ;;  %v21043_v54 = vld [vmem:[#allocation2 + $0x58] sm:$0xff]  }
 0x272   : > { %v7155_v2 = vsel %vm23013_vm9, %v7150_v36, %v7154_v24  ;;  %v20983_v1 = vld [vmem:[#allocation2 + $0x38] sm:$0xff]   ;;  %v20990_v17 = vsel %vm23014_vm7, %v7512_v15, %v7514_v55  ;;  %vm23015_vm1 = vmmov %vm23012_vm3  ;;  %v7164_v31 = vshrl.u32 %v20929_v60, 16  ;;  %v7518_v5 = vrot.slane %v20929_v60, 1  ;;  %v21037_v24 = vld [vmem:[#allocation2 + $0x50] sm:$0xff]  }
 0x273   : > { %15699 = vmatmul.mubr.bf16.gmra.mrb[20].mxu1 %v7147_v28  ;;  %v7168_v51 = vshll.u32 %v20983_v1, 16  ;;  %v20994_v16 = vsel %vm23015_vm1, %v7514_v55, %v7516_v41  ;;  %v7520_v19 = vrot.slane %v20983_v1, 1  ;;  %vm23016_vm10 = vmmov %vm23015_vm1  ;;  %v7163_v23 = vsel %vm23017_vm0, %v7158_v27, %v7162_v38  ;;  %v17433_v39 = vld [vmem:[%s22412_s3 + $0x78] sm:$0xff]   ;;  %v23023_v28 = vld [vmem:[#allocation55_spill] sm:$0xff] }
 0x274   : > { %15715 = vmatpush3.bf16.msra.mxu1 %v17390_v9  ;;  %15702 = vmatprep.mubr.bf16.mxu1 %v7155_v2  ;;  %v17404_v11 = vld [vmem:[#allocation2 + $0x40] ss:$0 sps:$4 sm:$0x11]   ;;  %v7166_v33 = vor.u32 %v7164_v31, %v7162_v38  ;;  %v21010_v3 = vsel %vm23016_vm10, %v7516_v41, %v7518_v5  ;;  %v7172_v49 = vshrl.u32 %v20983_v1, 16  ;;  %vm23019_vm2 = vmmov %vm23015_vm1  ;;  %v17403_v9 = vld [vmem:[%s22412_s3 + $0x30] sm:$0xff]   ;;  %v9329_v15 = vshll.u32 %v21037_v24, 16 }
 0x275   : > { %15716 = vmatprep.subr.bf16.mxu1 %v17393_v61  ;;  %v9221_v32 = vld [vmem:[#allocation2 + $0x40] sm:$0xf]  ;;  %v7170_v57 = vrot.slane %v7168_v51, 1  ;;  %v7176_v21 = vshll.u32 %v17404_v11, 16  ;;  %15973 = vmatpush3.bf16.msra.mxu0 %v17425_v13  ;;  %v21024_v22 = vsel %vm23019_vm2, %v7518_v5, %v7520_v19  ;;  %v7522_v20 = vrot.slane %v17404_v11, 1  ;;  %vm23020_vm11 = vmmov %vm23015_vm1  ;;  %v17410_v38 = vld [vmem:[%s22412_s3 + $0x88] sm:$0xff]  }
 0x276   : > { %v21001_v4 = vcombine.low %v9221_v32, %v20997_v0  ;;  %15974 = vmatprep.subr.bf16.mxu0 %v17427_v52  ;;  %v17436_v13 = vld [vmem:[%s22412_s3] sm:$0xff]   ;;  %v9337_v53 = vshll.u32 %v21043_v54, 16  ;;  %v9331_v2 = vrot.slane %v9329_v15, 1  ;;  %v9333_v27 = vshrl.u32 %v21037_v24, 16  ;;  %v21064_v11 = vld [vmem:[#allocation2 + $0x68] sm:$0xff]   ;;  %vm23024_vm14 = vmmov %vm23017_vm0 }
 0x277   : > { %v21007_v25 = vld [vmem:[#allocation2 + $0x48] sm:$0xff]   ;;  %v7171_v42 = vsel %vm23018_vm4, %v7166_v33, %v7170_v57  ;;  %v7174_v48 = vor.u32 %v7172_v49, %v7170_v57  ;;  %v7178_v56 = vrot.slane %v7176_v21, 1  ;;  %v21034_v62 = vsel %vm23020_vm11, %v7520_v19, %v7522_v20  ;;  %v9687_v55 = vld [vmem:[#allocation2 + $0x40] sm:$0xe]  ;;  %vm23025_vm5 = vmmov %vm23017_vm0 }
 0x278   : > { %15717 = vmatpush3.bf16.msra.mxu1 %v17393_v61  ;;  %v9316_v34 = vshll.u32 %v21001_v4, 16  ;;  %v9321_v37 = vshll.u32 %v21007_v25, 16  ;;  %v9314_v8 = vshrl.u32 %v21001_v4, 16  ;;  %v17408_v61 = vld [vmem:[%s22412_s3 + $0x80] sm:$0xff]   ;;  %v9325_v36 = vshrl.u32 %v21007_v25, 16  ;;  %v17439_v57 = vld [vmem:[%s22412_s3 + $0x8] sm:$0xff]   ;;  %vm23026_vm3 = vmmov %vm23015_vm1 }
 0x279   : > { %15718 = vmatprep.subr.bf16.mxu1 %v17397_v46  ;;  %15975 = vmatpush3.bf16.msra.mxu0 %v17427_v52  ;;  %v7179_v18 = vsel %vm23022_vm8, %v7174_v48, %v7178_v56  ;;  %v21058_v41 = vld [vmem:[#allocation2 + $0x60] sm:$0xff]   ;;  %v9339_v51 = vrot.slane %v9337_v53, 1  ;;  %v13739_v31 = vcombine.low %v9687_v55, %v20997_v0  ;;  %v9708_v32 = vrot.slane %v21007_v25, 1  ;;  %v17412_v0 = vld [vmem:[%s22412_s3 + $0x90] sm:$0xff]   ;;  %v21097_v20 = vld [vmem:[#allocation2 + $0x78] sm:$0xff]  }
 0x27a   : > { %v9318_v59 = vrot.slane %v9316_v34, 1  ;;  %v9323_v35 = vrot.slane %v9321_v37, 1  ;;  %15976 = vmatprep.subr.bf16.mxu0 %v17429_v29  ;;  %v9335_v5 = vor.u32 %v9333_v27, %v9331_v2  ;;  %v9345_v52 = vshll.u32 %v21058_v41, 16  ;;  %v17442_v49 = vld [vmem:[%s22412_s3 + $0x10] sm:$0xff]   ;;  %vm23027_vm9 = vmmov %vm23015_vm1  ;;  %v21111_v15 = vld [vmem:[#allocation2 + $0x18] sm:$0xff]  }
 0x27b   : > { %15703 = vmatmul.mubr.bf16.gmra.mrb[24].mxu1 %v7163_v23  ;;  %v9707_v19 = vrot.slane %v13739_v31, 1  ;;  %v9353_v21 = vshll.u32 %v21064_v11, 16  ;;  %v9341_v34 = vshrl.u32 %v21043_v54, 16  ;;  %v21095_v56 = vld [vmem:[#allocation2 + $0x10] sm:$0xff]   ;;  %vm23028_vm7 = vmmov %vm23017_vm0  ;;  %v7486_v53 = vld [vmem:[#allocation2] sm:$0xe] }
 0x27c   : > { %15719 = vmatpush3.bf16.msra.mxu1 %v17397_v46  ;;  %15706 = vmatprep.mubr.bf16.mxu1 %v7171_v42  ;;  %v9319_v44 = vor.u32 %v9318_v59, %v9314_v8  ;;  %v9327_v46 = vor.u32 %v9325_v36, %v9323_v35  ;;  %v9340_v23 = vsel %vm23025_vm5, %v9335_v5, %v9339_v51  ;;  %v9347_v37 = vrot.slane %v9345_v52, 1  ;;  %v8226_v59 = vld [vmem:[#allocation2 + $0x8] sm:$0xc]  ;;  %vm23029_vm1 = vmmov %vm23017_vm0  ;;  %v21129_v27 = vld [vmem:[#allocation2 + $0x30] sm:$0xff]  }
 0x27d   : > { %15720 = vmatprep.subr.bf16.mxu1 %v17400_v12  ;;  %15977 = vmatpush3.bf16.msra.mxu0 %v17429_v29  ;;  %v21083_v42 = vsel %vm23026_vm3, %v9707_v19, %v9708_v32  ;;  %v21089_v29 = vld [vmem:[#allocation2 + $0x70] sm:$0xff]   ;;  %v22538_v8 = vrot.slane %v21037_v24, 1  ;;  %v9343_v48 = vor.u32 %v9341_v34, %v9339_v51  ;;  %vm23030_vm10 = vcmask 1045504   ;;  %v17421_v31 = vld [vmem:[%s22412_s3 + $0xa8] sm:$0xff]   ;;  %v21137_v5 = vld [vmem:[#allocation2 + $0x38] sm:$0xff]  }
 0x27e   : > { %v9324_v6 = vsel %vm23021_vm6, %v9319_v44, %v9323_v35  ;;  %15978 = vmatprep.subr.bf16.mxu0 %v17431_v50  ;;  %v9332_v33 = vsel %vm23024_vm14, %v9327_v46, %v9331_v2  ;;  %v17414_v35 = vld [vmem:[%s22412_s3 + $0x98] sm:$0xff]   ;;  %v9349_v44 = vshrl.u32 %v21058_v41, 16  ;;  %v17450_v2 = vld [vmem:[%s22412_s3 + $0x20] sm:$0xff]   ;;  %v21126_v46 = vld [vmem:[#allocation2 + $0x28] sm:$0xff]   ;;  %v7989_v47 = vshll.u32 %v21095_v56, 16 }
 0x27f   : > { %15982 = vmatprep.mubr.bf16.mxu0 %v9324_v6  ;;  %v21104_v6 = vsel %vm23027_vm9, %v9708_v32, %v22538_v8  ;;  %v9348_v36 = vsel %vm23028_vm7, %v9343_v48, %v9347_v37  ;;  %vm23031_vm0 = vmmov %vm23030_vm10 }
 0x280   : > { %15721 = vmatpush3.bf16.msra.mxu1 %v17400_v12  ;;  %v21080_v12 = vld [vmem:[#allocation2 + $0xc] sm:$0xf]  ;;  %vm23032_vm4 = vmmov %vm23031_vm0 }
 0x281   : > { %15722 = vmatprep.subr.bf16.mxu1 %v17403_v9  ;;  %15979 = vmatpush3.bf16.msra.mxu0 %v17431_v50  ;;  %v9355_v50 = vrot.slane %v9353_v21, 1  ;;  %vm23033_vm2 = vmmov %vm23029_vm1 }
 0x282   : > { %15980 = vmatprep.subr.bf16.mxu0 %v17433_v39  ;;  %vm23034_vm11 = vmmov %vm23031_vm0 }
 0x283   : > { %15707 = vmatmul.mubr.bf16.gmra.mrb[28].mxu1 %v7179_v18  ;;  %v17447_v18 = vld [vmem:[%s22412_s3 + $0x18] sm:$0xff]   ;;  %vm23035_vm6 = vmmov %vm23029_vm1 }
 0x284   : > { %15723 = vmatpush3.bf16.msra.mxu1 %v17403_v9  ;;  %15726 = vmatprep.mubr.bf16.mxu1 %v23023_v28  ;;  %v13590_v9 = vcombine.low %v8226_v59, %v21080_v12  ;;  %v21113_v28 = vld [vmem:[#allocation2 + $0x20] sm:$0xff]   ;;  %vm23036_vm8 = vmmov %vm23031_vm0 }
 0x285   : > { %15724 = vmatprep.subr.bf16.mxu1 %v17406_v14  ;;  %15981 = vmatpush3.bf16.msra.mxu0 %v17433_v39  ;;  %v9361_v39 = vshll.u32 %v21089_v29, 16  ;;  %v8252_v52 = vrot.slane %v21113_v28, 2  ;;  %vm23037_vm14 = vmmov %vm23031_vm0 }
 0x286   : > { %15998 = vmatprep.subr.bf16.mxu0 %v17436_v13  ;;  %vm23038_vm5 = vmmov %vm23031_vm0 }
 0x287   : > { %v9363_v32 = vrot.slane %v9361_v39, 1  ;;  %vm23039_vm9 = vmmov %vm23029_vm1 }
 0x288   : > { %15725 = vmatpush3.bf16.msra.mxu1 %v17406_v14  ;;  %15983 = vmatmul.mubr.bf16.vlgmr.msra.gmra.mrb[20].mxu0 %v9332_v33  ;;  %v9351_v14 = vor.u32 %v9349_v44, %v9347_v37  ;;  %v21141_v33 = vld [vmem:[#allocation2 + $0x80] ss:$0 sps:$4 sm:$0x11]   ;;  %v8256_v44 = vrot.slane %v21129_v27, 2  ;;  %vm23040_vm7 = vmmov %vm23026_vm3 }
 0x289   : > { %15742 = vmatprep.subr.bf16.mxu1 %v17408_v61  ;;  %15986 = vmatprep.mubr.bf16.mxu0 %v9340_v23  ;;  %v9365_v23 = vshrl.u32 %v21089_v29, 16 }
 0x28a   : > { %15999 = vmatpush3.bf16.msra.mxu0 %v17436_v13  ;;  %v8247_v13 = vrot.slane %v13590_v9, 2  ;;  %v9356_v55 = vsel %vm23029_vm1, %v9351_v14, %v9355_v50  ;;  %v17455_v9 = vld [vmem:[%s22412_s3 + $0x28] sm:$0xff]   ;;  %vm23041_vm1 = vcmask 1044480  }
 0x28b   : > { %15727 = vmatmul.mubr.bf16.vlgmr.msra.gmra.mrb[16].mxu1 %v20872_v7  ;;  %16000 = vmatprep.subr.bf16.mxu0 %v17439_v57  ;;  %v9367_v48 = vor.u32 %v9365_v23, %v9363_v32  ;;  %v17430_v23 = vld [vmem:[%s22412_s3 + $0xc8] sm:$0xff]  }
 0x28c   : > { %15743 = vmatpush3.bf16.msra.mxu1 %v17408_v61  ;;  %15730 = vmatprep.mubr.bf16.mxu1 %v20893_v58  ;;  %v17417_v61 = vld [vmem:[%s22412_s3 + $0xa0] sm:$0xff]   ;;  %v17470_v58 = vld [vmem:[%s22412_s3 + $0x90] sm:$0xff]  }
 0x28d   : > { %15744 = vmatprep.subr.bf16.mxu1 %v17410_v38 }
 0x28e   : > { %16001 = vmatpush3.bf16.msra.mxu0 %v17439_v57  ;;  %v8250_v57 = vrot.slane %v21111_v15, 2 }
 0x28f   : > { %16002 = vmatprep.subr.bf16.mxu0 %v17442_v49 }
 0x290   : > { %15745 = vmatpush3.bf16.msra.mxu1 %v17410_v38  ;;  %15987 = vmatmul.mubr.bf16.gmra.mrb[24].mxu0 %v9348_v36  ;;  %v9357_v38 = vshrl.u32 %v21064_v11, 16  ;;  %v21150_v37 = vsel %vm23032_vm4, %v8250_v57, %v8252_v52  ;;  %v17423_v36 = vld [vmem:[%s22412_s3 + $0xb0] sm:$0xff]  }
 0x291   : > { %15746 = vmatprep.subr.bf16.mxu1 %v17412_v0  ;;  %15990 = vmatprep.mubr.bf16.mxu0 %v9356_v55 }
 0x292   : > { %16003 = vmatpush3.bf16.msra.mxu0 %v17442_v49  ;;  %v9359_v19 = vor.u32 %v9357_v38, %v9355_v50  ;;  %v17682_v49 = vld [vmem:[#allocation2 + $0x4] sm:$0xf]  ;;  %v8258_v50 = vrot.slane %v21137_v5, 2  ;;  %v17458_v38 = vld [vmem:[%s22412_s3 + $0x30] sm:$0xff]  }
 0x293   : > { %15731 = vmatmul.mubr.bf16.gmra.mrb[20].mxu1 %v20906_v26  ;;  %v8248_v26 = vrot.slane %v21095_v56, 2  ;;  %16004 = vmatprep.subr.bf16.mxu0 %v17447_v18  ;;  %v13507_v59 = vcombine.low %v7486_v53, %v17682_v49  ;;  %v17432_v49 = vld [vmem:[%s22412_s3 + $0xd0] sm:$0xff]  }
 0x294   : > { %15747 = vmatpush3.bf16.msra.mxu1 %v17412_v0  ;;  %15734 = vmatprep.mubr.bf16.mxu1 %v20919_v63  ;;  %v9369_v63 = vshll.u32 %v21097_v20, 16  ;;  %v21143_v0 = vld [vmem:[#allocation2 + $0x40] sm:$0xff]   ;;  %v9364_v14 = vsel %vm23033_vm2, %v9359_v19, %v9363_v32  ;;  %v21175_v53 = vsel %vm23037_vm14, %v8256_v44, %v8258_v50  ;;  %vm23056_vm14 = vmmov %vm23038_vm5 }
 0x295   : > { %15748 = vmatprep.subr.bf16.mxu1 %v17414_v35  ;;  %v21132_v51 = vsel %vm23030_vm10, %v8247_v13, %v8248_v26  ;;  %v21147_v34 = vsel %vm23031_vm0, %v8248_v26, %v8250_v57  ;;  %v9373_v26 = vshrl.u32 %v21097_v20, 16  ;;  %v17426_v57 = vld [vmem:[%s22412_s3 + $0xb8] sm:$0xff]   ;;  %v17428_v19 = vld [vmem:[%s22412_s3 + $0xc0] sm:$0xff]   ;;  %vm23043_vm10 = vmmov %vm23041_vm1 }
 0x296   : > { %v9371_v21 = vrot.slane %v9369_v63, 1  ;;  %16005 = vmatpush3.bf16.msra.mxu0 %v17447_v18  ;;  %v9377_v18 = vshll.u32 %v21141_v33, 16  ;;  %v7508_v63 = vrot.slane %v20872_v7, 1  ;;  %v17462_v7 = vld [vmem:[%s22412_s3 + $0x38] sm:$0xff]   ;;  %vm23045_vm0 = vmmov %vm23041_vm1 }
 0x297   : > { %16006 = vmatprep.subr.bf16.mxu0 %v17450_v2  ;;  %vm23047_vm4 = vmmov %vm23045_vm0 }
 0x298   : > { %15749 = vmatpush3.bf16.msra.mxu1 %v17414_v35  ;;  %v8254_v35 = vrot.slane %v21126_v46, 2  ;;  %15991 = vmatmul.mubr.bf16.gmra.mrb[28].mxu0 %v9364_v14  ;;  %v9372_v13 = vsel %vm23035_vm6, %v9367_v48, %v9371_v21  ;;  %v9375_v32 = vor.u32 %v9373_v26, %v9371_v21  ;;  %v7511_v21 = vsel %vm23040_vm7, %v7508_v63, %v7510_v45  ;;  %v17434_v45 = vld [vmem:[%s22412_s3 + $0xd8] sm:$0xff]   ;;  %v8966_v14 = vld [vmem:[#allocation2 + $0x10] sm:$0x8]  ;;  %vm23049_vm2 = vmmov %vm23045_vm0 }
 0x299   : > { %15750 = vmatprep.subr.bf16.mxu1 %v17417_v61  ;;  %15994 = vmatprep.mubr.bf16.mxu0 %v9372_v13  ;;  %v21242_v48 = vld [vmem:[#allocation2 + $0x18] sm:$0xff]   ;;  %v22539_v26 = vrot.slane %v21095_v56, 1  ;;  %vm23053_vm6 = vmmov %vm23026_vm3 }
 0x29a   : > { %v21163_v39 = vsel %vm23034_vm11, %v8252_v52, %v8254_v35  ;;  %16007 = vmatpush3.bf16.msra.mxu0 %v17450_v2  ;;  %v9379_v2 = vrot.slane %v9377_v18, 1  ;;  %v17477_v18 = vld [vmem:[%s22412_s3 + $0xa8] sm:$0xff]   ;;  %v21259_v13 = vld [vmem:[#allocation2 + $0x38] sm:$0xff]   ;;  %vm23051_vm11 = vmmov %vm23045_vm0 }
 0x29b   : > { %15735 = vmatmul.mubr.bf16.gmra.mrb[24].mxu1 %v20923_v10  ;;  %v22537_v10 = vrot.slane %v21143_v0, 2  ;;  %16008 = vmatprep.subr.bf16.mxu0 %v17455_v9 }
 0x29c   : > { %15751 = vmatpush3.bf16.msra.mxu1 %v17417_v61  ;;  %15738 = vmatprep.mubr.bf16.mxu1 %v20929_v60  ;;  %v21171_v61 = vsel %vm23036_vm8, %v8254_v35, %v8256_v44  ;;  %v7507_v60 = vrot.slane %v13507_v59, 1  ;;  %v7693_v59 = vld [vmem:[#allocation2 + $0x8] sm:$0xe]  ;;  %v21246_v44 = vld [vmem:[#allocation2 + $0x14] sm:$0xf]  ;;  %vm23054_vm8 = vmmov %vm23045_vm0 }
 0x29d   : > { %15752 = vmatprep.subr.bf16.mxu1 %v17421_v31  ;;  %v21180_v55 = vsel %vm23038_vm5, %v8258_v50, %v22537_v10  ;;  %v21240_v35 = vcombine.low %v7693_v59, %v21080_v12  ;;  %v21248_v50 = vld [vmem:[#allocation2 + $0x28] sm:$0xff]   ;;  %v17443_v12 = vld [vmem:[%s22412_s3 + $0xf0] sm:$0xff]  }
 0x29e   : > { %16009 = vmatpush3.bf16.msra.mxu0 %v17455_v9  ;;  %v7509_v52 = vsel %vm23026_vm3, %v7507_v60, %v7508_v63  ;;  %v21244_v9 = vld [vmem:[#allocation2 + $0x20] sm:$0xff]   ;;  %v21300_v59 = vld [vmem:[#allocation2 + $0x68] sm:$0xff]   ;;  %vm23059_vm3 = vmmov %vm23038_vm5 }
 0x29f   : > { %16010 = vmatprep.subr.bf16.mxu0 %v17458_v38  ;;  %v7770_v60 = vrot.slane %v21240_v35, 1  ;;  %v21264_v63 = vld [vmem:[#allocation2 + $0x40] sm:$0xff]   ;;  %vm23063_vm7 = vmmov %vm23059_vm3 }
 0x2a0   : > { %15753 = vmatpush3.bf16.msra.mxu1 %v17421_v31  ;;  %v9380_v31 = vsel %vm23039_vm9, %v9375_v32, %v9379_v2  ;;  %v17479_v32 = vld [vmem:[%s22412_s3 + $0xb0] sm:$0xff]   ;;  %vm23061_vm9 = vmmov %vm23059_vm3 }
 0x2a1   : > { %15754 = vmatprep.subr.bf16.mxu1 %v17423_v36  ;;  %15995 = vmatmul.mubr.bf16.gmra.mrb[32].mxu0 %v9380_v31  ;;  %v21273_v2 = vld [vmem:[#allocation2 + $0x50] sm:$0xff]   ;;  %v8992_v31 = vrot.slane %v21248_v50, 3 }
 0x2a2   : > { %16011 = vmatpush3.bf16.msra.mxu0 %v17458_v38  ;;  %16014 = vmatprep.mubr.bf16.mxu0 %v21001_v4  ;;  %v17468_v4 = vld [vmem:[%s22412_s3 + $0x88] sm:$0xff]  }
 0x2a3   : > { %15739 = vmatmul.mubr.bf16.gmra.mrb[28].mxu1 %v20983_v1  ;;  %16012 = vmatprep.subr.bf16.mxu0 %v17462_v7  ;;  %v17464_v1 = vld [vmem:[%s22412_s3 + $0x80] sm:$0xff]   ;;  %v21266_v38 = vld [vmem:[#allocation2 + $0x48] sm:$0xff]  }
 0x2a4   : > { %15755 = vmatpush3.bf16.msra.mxu1 %v17423_v36  ;;  %15758 = vmatprep.mubr.bf16.mxu1 %v7509_v52  ;;  %v21253_v36 = vld [vmem:[#allocation2 + $0x30] sm:$0xff]   ;;  %v8990_v52 = vrot.slane %v21244_v9, 3 }
 0x2a5   : > { %15756 = vmatprep.subr.bf16.mxu1 %v17426_v57 }
 0x2a6   : > { %16013 = vmatpush3.bf16.msra.mxu0 %v17462_v7 }
 0x2a7   : > { %16030 = vmatprep.subr.bf16.mxu0 %v17464_v1 }
 0x2a8   : > { %15757 = vmatpush3.bf16.msra.mxu1 %v17426_v57  ;;  %v8988_v57 = vrot.slane %v21242_v48, 3 }
 0x2a9   : > { %15774 = vmatprep.subr.bf16.mxu1 %v17428_v19  ;;  %16015 = vmatmul.mubr.bf16.vlgmr.msra.gmra.mrb[20].mxu0 %v21007_v25  ;;  %v17437_v25 = vld [vmem:[%s22412_s3 + $0xe0] sm:$0xff]  }
 0x2aa   : > { %16018 = vmatprep.mubr.bf16.mxu0 %v21037_v24  ;;  %16031 = vmatpush3.bf16.msra.mxu0 %v17464_v1  ;;  %v21281_v1 = vld [vmem:[#allocation2 + $0x4c] sm:$0xf] }
 0x2ab   : > { %15759 = vmatmul.mubr.bf16.vlgmr.msra.gmra.mrb[16].mxu1 %v7511_v21  ;;  %16032 = vmatprep.subr.bf16.mxu0 %v17468_v4  ;;  %v8994_v21 = vrot.slane %v21253_v36, 3 }
 0x2ac   : > { %15775 = vmatpush3.bf16.msra.mxu1 %v17428_v19  ;;  %15762 = vmatprep.mubr.bf16.mxu1 %v20979_v40  ;;  %v17473_v40 = vld [vmem:[%s22412_s3 + $0x98] sm:$0xff]   ;;  %v10424_v19 = vld [vmem:[#allocation2 + $0x48] sm:$0xc] }
 0x2ad   : > { %15776 = vmatprep.subr.bf16.mxu1 %v17430_v23  ;;  %v13822_v10 = vcombine.low %v10424_v19, %v21281_v1 }
 0x2ae   : > { %16033 = vmatpush3.bf16.msra.mxu0 %v17468_v4  ;;  %v8996_v4 = vrot.slane %v21259_v13, 3 }
 0x2af   : > { %16034 = vmatprep.subr.bf16.mxu0 %v17470_v58 }
 0x2b0   : > { %15777 = vmatpush3.bf16.msra.mxu1 %v17430_v23  ;;  %v21284_v23 = vsel %vm23041_vm1, %v8988_v57, %v8990_v52  ;;  %vm23065_vm1 = vmmov %vm23059_vm3 }
 0x2b1   : > { %15778 = vmatprep.subr.bf16.mxu1 %v17432_v49  ;;  %16019 = vmatmul.mubr.bf16.gmra.mrb[24].mxu0 %v21043_v54  ;;  %23042 = vst [vmem:[#allocation11_spill] sm:$0xff] %v21284_v23 }
 0x2b2   : > { %16022 = vmatprep.mubr.bf16.mxu0 %v21058_v41  ;;  %16035 = vmatpush3.bf16.msra.mxu0 %v17470_v58  ;;  %v21291_v58 = vld [vmem:[#allocation2 + $0x60] sm:$0xff]  }
 0x2b3   : > { %15763 = vmatmul.mubr.bf16.gmra.mrb[20].mxu1 %v20990_v17  ;;  %v17440_v17 = vld [vmem:[%s22412_s3 + $0xe8] sm:$0xff]   ;;  %16036 = vmatprep.subr.bf16.mxu0 %v17473_v40  ;;  %v10449_v8 = vrot.slane %v21291_v58, 2 }
 0x2b4   : > { %15779 = vmatpush3.bf16.msra.mxu1 %v17432_v49  ;;  %15766 = vmatprep.mubr.bf16.mxu1 %v20994_v16  ;;  %v17475_v16 = vld [vmem:[%s22412_s3 + $0xa0] sm:$0xff]   ;;  %v17448_v49 = vld [vmem:[%s22412_s3 + $0xf8] sm:$0xff]  }
 0x2b5   : > { %15780 = vmatprep.subr.bf16.mxu1 %v17434_v45 }
 0x2b6   : > { %16037 = vmatpush3.bf16.msra.mxu0 %v17473_v40  ;;  %v21297_v40 = vsel %vm23045_vm0, %v8990_v52, %v8992_v31  ;;  %v21313_v52 = vld [vmem:[#allocation2 + $0x80] sm:$0xff]   ;;  %vm23070_vm0 = vmmov %vm23053_vm6 }
 0x2b7   : > { %16038 = vmatprep.subr.bf16.mxu0 %v17475_v16  ;;  %23046 = vst [vmem:[#allocation67_spill] sm:$0xff] %v21297_v40 }
 0x2b8   : > { %15781 = vmatpush3.bf16.msra.mxu1 %v17434_v45 }
 0x2b9   : > { %15782 = vmatprep.subr.bf16.mxu1 %v17437_v25  ;;  %16023 = vmatmul.mubr.bf16.gmra.mrb[28].mxu0 %v21064_v11 }
 0x2ba   : > { %16026 = vmatprep.mubr.bf16.mxu0 %v21089_v29  ;;  %16039 = vmatpush3.bf16.msra.mxu0 %v17475_v16  ;;  %v21302_v16 = vld [vmem:[#allocation2 + $0x70] sm:$0xff]  }
 0x2bb   : > { %15767 = vmatmul.mubr.bf16.gmra.mrb[24].mxu1 %v21010_v3  ;;  %v13673_v3 = vcombine.low %v8966_v14, %v21246_v44  ;;  %16040 = vmatprep.subr.bf16.mxu0 %v17477_v18  ;;  %v21307_v14 = vsel %vm23047_vm4, %v8992_v31, %v8994_v21  ;;  %v7772_v31 = vsel %vm23053_vm6, %v7770_v60, %v22539_v26  ;;  %v17451_v60 = vld [vmem:[%s22412_s3 + $0x100] sm:$0xff]   ;;  %vm23071_vm4 = vmmov %vm23070_vm0 }
 0x2bc   : > { %15783 = vmatpush3.bf16.msra.mxu1 %v17437_v25  ;;  %15770 = vmatprep.mubr.bf16.mxu1 %v21024_v22  ;;  %v21275_v22 = vld [vmem:[#allocation2 + $0x58] sm:$0xff]   ;;  %v8998_v25 = vrot.slane %v21264_v63, 3  ;;  %23048 = vst [vmem:[#allocation47_spill] sm:$0xff] %v21307_v14  ;;  %v17484_v14 = vld [vmem:[%s22412_s3 + $0xc0] sm:$0xff]   ;;  %vm23075_vm6 = vmmov %vm23070_vm0 }
 0x2bd   : > { %15784 = vmatprep.subr.bf16.mxu1 %v17440_v17  ;;  %v8987_v7 = vrot.slane %v13673_v3, 3  ;;  %v21310_v3 = vsel %vm23049_vm2, %v8994_v21, %v8996_v4  ;;  %v17482_v21 = vld [vmem:[%s22412_s3 + $0xb8] sm:$0xff]   ;;  %v10447_v19 = vrot.slane %v21275_v22, 2  ;;  %vm23073_vm2 = vmmov %vm23070_vm0 }
 0x2be   : > { %23050 = vst [vmem:[#allocation68_spill] sm:$0xff] %v21310_v3  ;;  %16041 = vmatpush3.bf16.msra.mxu0 %v17477_v18  ;;  %v7775_v3 = vrot.slane %v21113_v28, 1 }
 0x2bf   : > { %v21294_v45 = vsel %vm23043_vm10, %v8987_v7, %v8988_v57  ;;  %v22540_v57 = vrot.slane %v21266_v38, 3  ;;  %v21316_v7 = vsel %vm23051_vm11, %v8996_v4, %v8998_v25  ;;  %16042 = vmatprep.subr.bf16.mxu0 %v17479_v32  ;;  %v10445_v4 = vrot.slane %v21273_v2, 2  ;;  %vm23067_vm10 = vmmov %vm23065_vm1 }
 0x2c0   : > { %15785 = vmatpush3.bf16.msra.mxu1 %v17440_v17  ;;  %23044 = vst [vmem:[#allocation46_spill] sm:$0xff] %v21294_v45  ;;  %v21304_v17 = vld [vmem:[#allocation2 + $0x78] sm:$0xff]   ;;  %23052 = vst [vmem:[#allocation49_spill] sm:$0xff] %v21316_v7  ;;  %v22541_v7 = vrot.slane %v21313_v52, 2 }
 0x2c1   : > { %15786 = vmatprep.subr.bf16.mxu1 %v17443_v12  ;;  %v21329_v18 = vsel %vm23054_vm8, %v8998_v25, %v22540_v57  ;;  %16027 = vmatmul.mubr.bf16.gmra.mrb[32].mxu0 %v21097_v20  ;;  %v21339_v26 = vsel %vm23056_vm14, %v10445_v4, %v10447_v19  ;;  %v10451_v25 = vrot.slane %v21300_v59, 2  ;;  %v10453_v57 = vrot.slane %v21302_v16, 2  ;;  %vm23074_vm11 = vmmov %vm23070_vm0 }
 0x2c2   : > { %23055 = vst [vmem:[#allocation50_spill] sm:$0xff] %v21329_v18  ;;  %23057 = vst [vmem:[#allocation54_spill] sm:$0xff] %v21339_v26  ;;  %16043 = vmatpush3.bf16.msra.mxu0 %v17479_v32  ;;  %16046 = vmatprep.mubr.bf16.mxu0 %v21083_v42  ;;  %v21350_v18 = vsel %vm23059_vm3, %v10447_v19, %v10449_v8  ;;  %v17456_v19 = vld [vmem:[%s22412_s3 + $0x108] sm:$0xff]  }
 0x2c3   : > { %15771 = vmatmul.mubr.bf16.gmra.mrb[28].mxu1 %v21034_v62  ;;  %v10444_v62 = vrot.slane %v13822_v10, 2  ;;  %v7773_v10 = vrot.slane %v21111_v15, 1  ;;  %23060 = vst [vmem:[#allocation59_spill] sm:$0xff] %v21350_v18  ;;  %16044 = vmatprep.subr.bf16.mxu0 %v17482_v21  ;;  %v21358_v40 = vsel %vm23061_vm9, %v10449_v8, %v10451_v25  ;;  %v21361_v42 = vsel %vm23063_vm7, %v10451_v25, %v10453_v57  ;;  %vm23076_vm8 = vmmov %vm23070_vm0 }
 0x2c4   : > { %15787 = vmatpush3.bf16.msra.mxu1 %v17443_v12  ;;  %15790 = vmatprep.mubr.bf16.mxu1 %v7772_v31  ;;  %v10455_v12 = vrot.slane %v21304_v17, 2  ;;  %23062 = vst [vmem:[#allocation14_spill] sm:$0xff] %v21358_v40  ;;  %23064 = vst [vmem:[#allocation15_spill] sm:$0xff] %v21361_v42  ;;  %v9712_v8 = vrot.slane %v21043_v54, 1  ;;  %v17459_v54 = vld [vmem:[%s22412_s3 + $0x110] sm:$0xff]   ;;  %v23077_v40 = vrot.slane %v21064_v11, 1 }
 0x2c5   : > { %15788 = vmatprep.subr.bf16.mxu1 %v17448_v49  ;;  %v21347_v31 = vsel %vm23038_vm5, %v10444_v62, %v10445_v4  ;;  %v23069_v62 = vrot.slane %v21095_v56, 1  ;;  %vm23078_vm14 = vmmov %vm23070_vm0  ;;  %v7981_v42 = vshll.u32 %v21240_v35, 16  ;;  %vm23079_vm5 = vcmask 1044480  }
 0x2c6   : > { %23058 = vst [vmem:[#allocation56_spill] sm:$0xff] %v21347_v31  ;;  %v21364_v32 = vsel %vm23065_vm1, %v10453_v57, %v10455_v12  ;;  %v21369_v4 = vsel %vm23067_vm10, %v10455_v12, %v22541_v7  ;;  %16045 = vmatpush3.bf16.msra.mxu0 %v17482_v21  ;;  %v17486_v57 = vld [vmem:[%s22412_s3 + $0xc8] sm:$0xff]   ;;  %v23072_v12 = vrot.slane %v21037_v24, 1  ;;  %v17463_v24 = vld [vmem:[%s22412_s3 + $0x118] sm:$0xff]   ;;  %v17598_v7 = vld [vmem:[#allocation2 + $0x70] sm:$0xff]   ;;  %v7986_v31 = vshrl.u32 %v21095_v56, 16 }
 0x2c7   : > { %23066 = vst [vmem:[#allocation70_spill] sm:$0xff] %v21364_v32  ;;  %23068 = vst [vmem:[#allocation10_spill] sm:$0xff] %v21369_v4  ;;  %v7774_v25 = vsel %vm23070_vm0, %v23069_v62, %v7773_v10  ;;  %16062 = vmatprep.subr.bf16.mxu0 %v17484_v14  ;;  %v7779_v62 = vrot.slane %v21129_v27, 1  ;;  %v11161_v4 = vld [vmem:[#allocation2 + $0x50] sm:$0x8]  ;;  %v17600_v32 = vld [vmem:[#allocation2 + $0x78] sm:$0xff]  }
 0x2c8   : > { %15789 = vmatpush3.bf16.msra.mxu1 %v17448_v49  ;;  %v7776_v49 = vsel %vm23071_vm4, %v7773_v10, %v7775_v3  ;;  %v9713_v21 = vsel %vm23073_vm2, %v23072_v12, %v9712_v8  ;;  %v7777_v10 = vrot.slane %v21126_v46, 1  ;;  %v17592_v12 = vld [vmem:[#allocation2 + $0x60] sm:$0xff]   ;;  %v11188_v26 = vrot.slane %v17598_v7, 3  ;;  %vm23080_vm3 = vmmov %vm23079_vm5  ;;  %v17469_v56 = vld [vmem:[%s22412_s3 + $0x128] sm:$0xff]  }
 0x2c9   : > { %15806 = vmatprep.subr.bf16.mxu1 %v17451_v60  ;;  %16047 = vmatmul.mubr.bf16.vlgmr.msra.gmra.mrb[20].mxu0 %v21104_v6  ;;  %v7781_v6 = vrot.slane %v21137_v5, 1  ;;  %vm23081_vm9 = vmmov %vm23080_vm3 }
 0x2ca   : > { %16050 = vmatprep.mubr.bf16.mxu0 %v9713_v21  ;;  %16063 = vmatpush3.bf16.msra.mxu0 %v17484_v14  ;;  %v7778_v14 = vsel %vm23074_vm11, %v7775_v3, %v7777_v10  ;;  %v17594_v21 = vld [vmem:[#allocation2 + $0x68] sm:$0xff]   ;;  %vm23082_vm7 = vmmov %vm23080_vm3 }
 0x2cb   : > { %15791 = vmatmul.mubr.bf16.vlgmr.msra.gmra.mrb[16].mxu1 %v7774_v25  ;;  %16064 = vmatprep.subr.bf16.mxu0 %v17486_v57  ;;  %v9714_v25 = vrot.slane %v21058_v41, 1  ;;  %v17492_v41 = vld [vmem:[%s22412_s3 + $0xd8] sm:$0xff]   ;;  %v11186_v45 = vrot.slane %v17594_v21, 3  ;;  %vm23083_vm1 = vmmov %vm23080_vm3  ;;  %v17472_v21 = vld [vmem:[#allocation2 + $0x48] ss:$0 sps:$4 sm:$0x11]  }
 0x2cc   : > { %15807 = vmatpush3.bf16.msra.mxu1 %v17451_v60  ;;  %15794 = vmatprep.mubr.bf16.mxu1 %v7776_v49  ;;  %v17488_v60 = vld [vmem:[%s22412_s3 + $0xd0] sm:$0xff]   ;;  %v17587_v49 = vld [vmem:[#allocation2 + $0x58] sm:$0xff]   ;;  %vm23084_vm10 = vmmov %vm23070_vm0 }
 0x2cd   : > { %15808 = vmatprep.subr.bf16.mxu1 %v17456_v19  ;;  %v9715_v3 = vsel %vm23076_vm8, %v9712_v8, %v9714_v25  ;;  %v11182_v18 = vrot.slane %v17587_v49, 3  ;;  %v11184_v8 = vrot.slane %v17592_v12, 3  ;;  %v21430_v7 = vsel %vm23081_vm9, %v11186_v45, %v11188_v26  ;;  %vm23086_vm4 = vmmov %vm23083_vm1 }
 0x2ce   : > { %16065 = vmatpush3.bf16.msra.mxu0 %v17486_v57  ;;  %v10631_v57 = vld [vmem:[#allocation2 + $0x54] sm:$0xf]  ;;  %v7782_v49 = vsel %vm23084_vm10, %v7779_v62, %v7781_v6  ;;  %vm23088_vm2 = vmmov %vm23070_vm0  ;;  %vm23092_vm8 = vsmask.f32 6400 }
 0x2cf   : > { %16066 = vmatprep.subr.bf16.mxu0 %v17488_v60  ;;  %v13905_v23 = vcombine.low %v11161_v4, %v10631_v57  ;;  %v9718_v4 = vrot.slane %v21089_v29, 1  ;;  %vm23089_vm11 = vmmov %vm23070_vm0 }
 0x2d0   : > { %15809 = vmatpush3.bf16.msra.mxu1 %v17456_v19  ;;  %v7780_v19 = vsel %vm23075_vm6, %v7777_v10, %v7779_v62  ;;  %v17465_v10 = vld [vmem:[%s22412_s3 + $0x120] sm:$0xff]   ;;  %vm23091_vm6 = vmmov %vm23070_vm0 }
 0x2d1   : > { %15810 = vmatprep.subr.bf16.mxu1 %v17459_v54  ;;  %16051 = vmatmul.mubr.bf16.gmra.mrb[24].mxu0 %v9715_v3  ;;  %v11190_v3 = vrot.slane %v17600_v32, 3 }
 0x2d2   : > { %16067 = vmatpush3.bf16.msra.mxu0 %v17488_v60  ;;  %v21427_v60 = vsel %vm23080_vm3, %v11184_v8, %v11186_v45  ;;  %v23085_v45 = vrot.slane %v21143_v0, 1  ;;  %vm23095_vm3 = vmmov %vm23092_vm8 }
 0x2d3   : > { %15795 = vmatmul.mubr.bf16.gmra.mrb[20].mxu1 %v7778_v14  ;;  %v7978_v14 = vshrl.u32 %v21240_v35, 16  ;;  %16068 = vmatprep.subr.bf16.mxu0 %v17492_v41  ;;  %v21424_v35 = vsel %vm23079_vm5, %v11182_v18, %v11184_v8  ;;  %v21440_v29 = vsel %vm23083_vm1, %v11188_v26, %v11190_v3  ;;  %v7988_v8 = vrot.slane %v7986_v31, 1  ;;  %v17496_v26 = vld [vmem:[%s22412_s3 + $0xe8] sm:$0xff]   ;;  %vm23094_vm5 = vmmov %vm23070_vm0 }
 0x2d4   : > { %15811 = vmatpush3.bf16.msra.mxu1 %v17459_v54  ;;  %15798 = vmatprep.mubr.bf16.mxu1 %v7780_v19  ;;  %v9717_v54 = vsel %vm23078_vm14, %v9714_v25, %v23077_v40  ;;  %v21414_v19 = vld [vmem:[#allocation2 + $0x80] sm:$0xff]   ;;  %v11181_v25 = vrot.slane %v13905_v23, 3  ;;  %v9720_v23 = vrot.slane %v21097_v20, 1  ;;  %v7784_v12 = vsel %vm23070_vm0, %v7781_v6, %v23085_v45  ;;  %vm23093_vm14 = vmmov %vm23070_vm0 }
 0x2d5   : > { %15812 = vmatprep.subr.bf16.mxu1 %v17463_v24  ;;  %16054 = vmatprep.mubr.bf16.mxu0 %v9717_v54  ;;  %v17494_v40 = vld [vmem:[%s22412_s3 + $0xe0] sm:$0xff]   ;;  %v7980_v57 = vrot.slane %v7978_v14, 1  ;;  %v9893_v54 = vld [vmem:[#allocation2 + $0x48] sm:$0xe]  ;;  %v7983_v20 = vrot.slane %v7981_v42, 2  ;;  %v23087_v6 = vrot.slane %v21064_v11, 1  ;;  %vm23096_vm9 = vmmov %vm23095_vm3 }
 0x2d6   : > { %v21437_v32 = vsel %vm23082_vm7, %v11181_v25, %v11182_v18  ;;  %16069 = vmatpush3.bf16.msra.mxu0 %v17492_v41  ;;  %v7991_v18 = vrot.slane %v7989_v47, 2  ;;  %v17471_v47 = vld [vmem:[%s22412_s3 + $0x130] sm:$0xff]   ;;  %v9721_v31 = vsel %vm23089_vm11, %v9718_v4, %v9720_v23  ;;  %v21463_v42 = vcombine.low %v9893_v54, %v21281_v1  ;;  %vm23097_vm7 = vmmov %vm23070_vm0 }
 0x2d7   : > { %16070 = vmatprep.subr.bf16.mxu0 %v17494_v40  ;;  %v9719_v41 = vsel %vm23088_vm2, %v23087_v6, %v9718_v4  ;;  %v7785_v14 = vrot.slane %v17472_v21, 1  ;;  %v7995_v25 = vshrl.u32 %v21111_v15, 16  ;;  %v7984_v11 = vor.u32 %v7983_v20, %v7980_v57  ;;  %v17498_v4 = vld [vmem:[%s22412_s3 + $0xf0] sm:$0xff]   ;;  %vm23098_vm1 = vmmov %vm23070_vm0 }
 0x2d8   : > { %15813 = vmatpush3.bf16.msra.mxu1 %v17463_v24  ;;  %v11192_v24 = vrot.slane %v21414_v19, 3  ;;  %v8007_v45 = vshll.u32 %v21113_v28, 16  ;;  %v9722_v1 = vrot.slane %v21141_v33, 1  ;;  %v9970_v33 = vrot.slane %v21273_v2, 1  ;;  %vm23099_vm10 = vmmov %vm23095_vm3  ;;  %v17559_v19 = vld [vmem:[%s22412_s3 + $0x68] sm:$0xff]  }
 0x2d9   : > { %15814 = vmatprep.subr.bf16.mxu1 %v17465_v10  ;;  %16055 = vmatmul.mubr.bf16.gmra.mrb[28].mxu0 %v9719_v41  ;;  %vm23100_vm0 = vmmov %vm23095_vm3 }
 0x2da   : > { %v21453_v62 = vsel %vm23086_vm4, %v11190_v3, %v11192_v24  ;;  %16058 = vmatprep.mubr.bf16.mxu0 %v9721_v31  ;;  %16071 = vmatpush3.bf16.msra.mxu0 %v17494_v40  ;;  %v7992_v3 = vor.u32 %v7991_v18, %v7988_v8  ;;  %v9969_v40 = vrot.slane %v21463_v42, 1  ;;  %v8009_v20 = vrot.slane %v8007_v45, 2  ;;  %v17502_v8 = vld [vmem:[%s22412_s3 + $0xf8] sm:$0xff]   ;;  %vm23101_vm4 = vmmov %vm23098_vm1 }
 0x2db   : > { %15799 = vmatmul.mubr.bf16.gmra.mrb[24].mxu1 %v7782_v49  ;;  %v8004_v49 = vshrl.u32 %v21113_v28, 16  ;;  %16072 = vmatprep.subr.bf16.mxu0 %v17496_v26  ;;  %v7997_v28 = vrot.slane %v7995_v25, 1  ;;  %v9723_v18 = vsel %vm23093_vm14, %v9720_v23, %v9722_v1  ;;  %v8013_v31 = vshrl.u32 %v21126_v46, 16  ;;  %vm23102_vm2 = vmmov %vm23098_vm1 }
 0x2dc   : > { %15815 = vmatpush3.bf16.msra.mxu1 %v17465_v10  ;;  %15802 = vmatprep.mubr.bf16.mxu1 %v7784_v12  ;;  %v7998_v10 = vshll.u32 %v21111_v15, 16  ;;  %v17474_v15 = vld [vmem:[%s22412_s3 + $0x138] sm:$0xff]   ;;  %v23090_v12 = vrot.slane %v21143_v0, 1  ;;  %v7993_v54 = vsel %vm23092_vm8, %v7984_v11, %v7992_v3  ;;  %v9971_v6 = vsel %vm23094_vm5, %v9969_v40, %v9970_v33  ;;  %vm23103_vm11 = vmmov %vm23100_vm0 }
 0x2dd   : > { %15816 = vmatprep.subr.bf16.mxu1 %v17469_v56  ;;  %v8025_v23 = vshll.u32 %v21129_v27, 16  ;;  %v9972_v11 = vrot.slane %v21275_v22, 1  ;;  %vm23105_vm8 = vmmov %vm23098_vm1 }
 0x2de   : > { %v7786_v21 = vsel %vm23091_vm6, %v23090_v12, %v7785_v14  ;;  %v8000_v57 = vrot.slane %v7998_v10, 2  ;;  %16073 = vmatpush3.bf16.msra.mxu0 %v17496_v26  ;;  %v17476_v26 = vld [vmem:[%s22412_s3 + $0x140] sm:$0xff]   ;;  %v8016_v14 = vshll.u32 %v21126_v46, 16  ;;  %v17478_v46 = vld [vmem:[%s22412_s3 + $0x148] sm:$0xff]   ;;  %vm23104_vm6 = vmmov %vm23100_vm0 }
 0x2df   : > { %16074 = vmatprep.subr.bf16.mxu0 %v17498_v4  ;;  %v17505_v10 = vld [vmem:[%s22412_s3 + $0x100] sm:$0xff]   ;;  %v8027_v12 = vrot.slane %v8025_v23, 2  ;;  %vm23106_vm14 = vmmov %vm23098_vm1 }
 0x2e0   : > { %15817 = vmatpush3.bf16.msra.mxu1 %v17469_v56  ;;  %v8006_v56 = vrot.slane %v8004_v49, 1  ;;  %v8001_v41 = vor.u32 %v8000_v57, %v7997_v28  ;;  %v9974_v49 = vrot.slane %v21291_v58, 1  ;;  %v8018_v1 = vrot.slane %v8016_v14, 2  ;;  %vm23107_vm5 = vmmov %vm23100_vm0 }
 0x2e1   : > { %15818 = vmatprep.subr.bf16.mxu1 %v17471_v47  ;;  %16059 = vmatmul.mubr.bf16.gmra.mrb[32].mxu0 %v9723_v18  ;;  %v17511_v18 = vld [vmem:[%s22412_s3 + $0x110] sm:$0xff]  }
 0x2e2   : > { %16075 = vmatpush3.bf16.msra.mxu0 %v17498_v4  ;;  %16078 = vmatprep.mubr.bf16.mxu0 %v9971_v6  ;;  %v8010_v25 = vor.u32 %v8009_v20, %v8006_v56  ;;  %v8002_v45 = vsel %vm23095_vm3, %v7992_v3, %v8001_v41  ;;  %v8015_v4 = vrot.slane %v8013_v31, 1  ;;  %v17480_v3 = vld [vmem:[%s22412_s3 + $0x150] sm:$0xff]   ;;  %v9975_v28 = vsel %vm23098_vm1, %v9972_v11, %v9974_v49  ;;  %vm23108_vm3 = vmmov %vm23098_vm1 }
 0x2e3   : > { %15803 = vmatmul.mubr.bf16.gmra.mrb[28].mxu1 %v7786_v21  ;;  %16076 = vmatprep.subr.bf16.mxu0 %v17502_v8  ;;  %v9973_v21 = vsel %vm23097_vm7, %v9970_v33, %v9972_v11  ;;  %v8034_v56 = vshll.u32 %v21137_v5, 16  ;;  %v8043_v33 = vshll.u32 %v21143_v0, 16  ;;  %v9978_v6 = vrot.slane %v21302_v16, 1  ;;  %vm23110_vm7 = vmmov %vm23100_vm0 }
 0x2e4   : > { %15819 = vmatpush3.bf16.msra.mxu1 %v17471_v47  ;;  %15822 = vmatprep.mubr.bf16.mxu1 %v7993_v54  ;;  %v8022_v47 = vshrl.u32 %v21129_v27, 16  ;;  %v8011_v27 = vsel %vm23096_vm9, %v8001_v41, %v8010_v25  ;;  %v8019_v57 = vor.u32 %v8018_v1, %v8015_v4  ;;  %v8031_v54 = vshrl.u32 %v21137_v5, 16  ;;  %v17483_v5 = vld [vmem:[%s22412_s3 + $0x158] sm:$0xff]   ;;  %vm23109_vm9 = vmmov %vm23100_vm0 }
 0x2e5   : > { %15820 = vmatprep.subr.bf16.mxu1 %v17474_v15  ;;  %v8036_v14 = vrot.slane %v8034_v56, 2  ;;  %v8045_v11 = vrot.slane %v8043_v33, 2  ;;  %vm23111_vm1 = vmmov %vm23100_vm0 }
 0x2e6   : > { %16077 = vmatpush3.bf16.msra.mxu0 %v17502_v8  ;;  %v8024_v40 = vrot.slane %v8022_v47, 1  ;;  %v8040_v8 = vshrl.u32 %v21143_v0, 16  ;;  %v8020_v41 = vsel %vm23099_vm10, %v8010_v25, %v8019_v57  ;;  %v8033_v31 = vrot.slane %v8031_v54, 1  ;;  %v21525_v47 = vld [vmem:[#allocation2 + $0x48] ss:$0 sps:$4 sm:$0x33]   ;;  %vm23112_vm10 = vmmov %vm23100_vm0 }
 0x2e7   : > { %16094 = vmatprep.subr.bf16.mxu0 %v17505_v10  ;;  %v17485_v25 = vld [vmem:[%s22412_s3 + $0x160] sm:$0xff]  }
 0x2e8   : > { %15821 = vmatpush3.bf16.msra.mxu1 %v17474_v15  ;;  %v17508_v15 = vld [vmem:[%s22412_s3 + $0x108] sm:$0xff]   ;;  %v8028_v20 = vor.u32 %v8027_v12, %v8024_v40  ;;  %v8037_v1 = vor.u32 %v8036_v14, %v8033_v31  ;;  %v8052_v40 = vshll.u32 %v21525_v47, 16 }
 0x2e9   : > { %15838 = vmatprep.subr.bf16.mxu1 %v17476_v26  ;;  %16079 = vmatmul.mubr.bf16.vlgmr.msra.gmra.mrb[20].mxu0 %v9973_v21  ;;  %v17487_v21 = vld [vmem:[%s22412_s3 + $0x168] sm:$0xff]  }
 0x2ea   : > { %16082 = vmatprep.mubr.bf16.mxu0 %v9975_v28  ;;  %16095 = vmatpush3.bf16.msra.mxu0 %v17505_v10  ;;  %v8029_v23 = vsel %vm23100_vm0, %v8019_v57, %v8028_v20  ;;  %v8042_v10 = vrot.slane %v8040_v8, 1  ;;  %v10176_v28 = vshrl.u32 %v21463_v42, 16  ;;  %v10179_v57 = vshll.u32 %v21463_v42, 16 }
 0x2eb   : > { %15823 = vmatmul.mubr.bf16.vlgmr.msra.gmra.mrb[16].mxu1 %v8002_v45  ;;  %16096 = vmatprep.subr.bf16.mxu0 %v17508_v15  ;;  %v8038_v54 = vsel %vm23103_vm11, %v8028_v20, %v8037_v1  ;;  %v8054_v8 = vrot.slane %v8052_v40, 2  ;;  %v17526_v20 = vld [vmem:[#allocation2 + $0x88] ss:$0 sps:$4 sm:$0x11]   ;;  %v10205_v40 = vshll.u32 %v21291_v58, 16  ;;  %vm23120_vm11 = vcmask 1045504  }
 0x2ec   : > { %15839 = vmatpush3.bf16.msra.mxu1 %v17476_v26  ;;  %15826 = vmatprep.mubr.bf16.mxu1 %v8011_v27  ;;  %v9976_v26 = vrot.slane %v21300_v59, 1  ;;  %v8049_v27 = vshrl.u32 %v21525_v47, 16  ;;  %v8046_v12 = vor.u32 %v8045_v11, %v8042_v10  ;;  %v10178_v14 = vrot.slane %v10176_v28, 1 }
 0x2ed   : > { %15840 = vmatprep.subr.bf16.mxu1 %v17478_v46 }
 0x2ee   : > { %16097 = vmatpush3.bf16.msra.mxu0 %v17508_v15  ;;  %v9977_v45 = vsel %vm23101_vm4, %v9974_v49, %v9976_v26  ;;  %v9979_v4 = vsel %vm23102_vm2, %v9976_v26, %v9978_v6  ;;  %v17519_v49 = vld [vmem:[%s22412_s3 + $0x120] sm:$0xff]   ;;  %v9980_v15 = vrot.slane %v21304_v17, 1  ;;  %v8051_v56 = vrot.slane %v8049_v27, 1  ;;  %vm23113_vm4 = vmmov %vm23100_vm0 }
 0x2ef   : > { %16098 = vmatprep.subr.bf16.mxu0 %v17511_v18  ;;  %v8047_v33 = vsel %vm23104_vm6, %v8037_v1, %v8046_v12  ;;  %v10184_v26 = vshrl.u32 %v21273_v2, 16  ;;  %v10202_v27 = vshrl.u32 %v21291_v58, 16  ;;  %v17495_v58 = vld [vmem:[%s22412_s3 + $0x180] sm:$0xff]   ;;  %vm23115_vm2 = vmmov %vm23100_vm0 }
 0x2f0   : > { %15841 = vmatpush3.bf16.msra.mxu1 %v17478_v46  ;;  %v17516_v46 = vld [vmem:[%s22412_s3 + $0x118] sm:$0xff]   ;;  %v9981_v42 = vsel %vm23105_vm8, %v9978_v6, %v9980_v15  ;;  %v8055_v10 = vor.u32 %v8054_v8, %v8051_v56  ;;  %v10207_v56 = vrot.slane %v10205_v40, 2  ;;  %v10211_v8 = vshrl.u32 %v21300_v59, 16  ;;  %v17506_v40 = vld [vmem:[%s22412_s3 + $0x1a0] sm:$0xff]   ;;  %vm23121_vm6 = vmmov %vm23120_vm11 }
 0x2f1   : > { %15842 = vmatprep.subr.bf16.mxu1 %v17480_v3  ;;  %16083 = vmatmul.mubr.bf16.gmra.mrb[24].mxu0 %v9977_v45  ;;  %v10186_v6 = vrot.slane %v10184_v26, 1  ;;  %v10193_v45 = vshrl.u32 %v21275_v22, 16  ;;  %vm23122_vm8 = vmmov %vm23121_vm6 }
 0x2f2   : > { %16086 = vmatprep.mubr.bf16.mxu0 %v9979_v4  ;;  %16099 = vmatpush3.bf16.msra.mxu0 %v17511_v18  ;;  %v17524_v18 = vld [vmem:[%s22412_s3 + $0x128] sm:$0xff]   ;;  %v17493_v4 = vld [vmem:[%s22412_s3 + $0x178] sm:$0xff]  }
 0x2f3   : > { %15827 = vmatmul.mubr.bf16.gmra.mrb[20].mxu1 %v8020_v41  ;;  %16100 = vmatprep.subr.bf16.mxu0 %v17516_v46  ;;  %v17489_v41 = vld [vmem:[%s22412_s3 + $0x170] sm:$0xff]   ;;  %v10195_v28 = vrot.slane %v10193_v45, 1  ;;  %v10238_v45 = vshrl.u32 %v21313_v52, 16 }
 0x2f4   : > { %15843 = vmatpush3.bf16.msra.mxu1 %v17480_v3  ;;  %15830 = vmatprep.mubr.bf16.mxu1 %v8029_v23  ;;  %v9982_v3 = vrot.slane %v21313_v52, 1  ;;  %v10181_v23 = vrot.slane %v10179_v57, 2 }
 0x2f5   : > { %15844 = vmatprep.subr.bf16.mxu1 %v17483_v5 }
 0x2f6   : > { %16101 = vmatpush3.bf16.msra.mxu0 %v17516_v46  ;;  %v9983_v31 = vsel %vm23106_vm14, %v9980_v15, %v9982_v3  ;;  %v9984_v46 = vrot.slane %v17526_v20, 1  ;;  %v10182_v1 = vor.u32 %v10181_v23, %v10178_v14  ;;  %v17554_v20 = vld [vmem:[%s22412_s3 + $0x148] sm:$0xff]   ;;  %vm23123_vm14 = vmmov %vm23121_vm6 }
 0x2f7   : > { %16102 = vmatprep.subr.bf16.mxu0 %v17519_v49 }
 0x2f8   : > { %15845 = vmatpush3.bf16.msra.mxu1 %v17483_v5  ;;  %v10187_v5 = vshll.u32 %v21273_v2, 16  ;;  %v17527_v2 = vld [vmem:[%s22412_s3 + $0x130] sm:$0xff]  }
 0x2f9   : > { %15846 = vmatprep.subr.bf16.mxu1 %v17485_v25  ;;  %16087 = vmatmul.mubr.bf16.gmra.mrb[28].mxu0 %v9981_v42  ;;  %v10223_v42 = vshll.u32 %v21302_v16, 16 }
 0x2fa   : > { %16090 = vmatprep.mubr.bf16.mxu0 %v9983_v31  ;;  %16103 = vmatpush3.bf16.msra.mxu0 %v17519_v49  ;;  %v10189_v11 = vrot.slane %v10187_v5, 2  ;;  %v8056_v49 = vsel %vm23107_vm5, %v8046_v12, %v8055_v10  ;;  %v10220_v5 = vshrl.u32 %v21302_v16, 16  ;;  %v17499_v16 = vld [vmem:[%s22412_s3 + $0x190] sm:$0xff]   ;;  %vm23124_vm5 = vmmov %vm23121_vm6 }
 0x2fb   : > { %15831 = vmatmul.mubr.bf16.gmra.mrb[24].mxu1 %v8038_v54  ;;  %16104 = vmatprep.subr.bf16.mxu0 %v17524_v18  ;;  %v10204_v54 = vrot.slane %v10202_v27, 1  ;;  %v10225_v23 = vrot.slane %v10223_v42, 2  ;;  %v23118_v42 = vld [vmem:[#allocation9_spill] sm:$0xff] }
 0x2fc   : > { %15847 = vmatpush3.bf16.msra.mxu1 %v17485_v25  ;;  %15834 = vmatprep.mubr.bf16.mxu1 %v8047_v33  ;;  %v10196_v25 = vshll.u32 %v21275_v22, 16  ;;  %v10190_v15 = vor.u32 %v10189_v11, %v10186_v6  ;;  %v17531_v22 = vld [vmem:[%s22412_s3 + $0x138] sm:$0xff]   ;;  %v10214_v33 = vshll.u32 %v21300_v59, 16  ;;  %v10222_v14 = vrot.slane %v10220_v5, 1 }
 0x2fd   : > { %15848 = vmatprep.subr.bf16.mxu1 %v17487_v21  ;;  %v10208_v26 = vor.u32 %v10207_v56, %v10204_v54  ;;  %v10232_v6 = vshll.u32 %v21304_v17, 16  ;;  %v17503_v11 = vld [vmem:[%s22412_s3 + $0x198] sm:$0xff]   ;;  %v23114_v54 = vld [vmem:[#allocation7_spill] sm:$0xff]  ;;  %v8511_v5 = vrot.slane %v21242_v48, 2 }
 0x2fe   : > { %16105 = vmatpush3.bf16.msra.mxu0 %v17524_v18  ;;  %v10198_v57 = vrot.slane %v10196_v25, 2  ;;  %v10191_v12 = vsel %vm23109_vm9, %v10182_v1, %v10190_v15  ;;  %v17497_v18 = vld [vmem:[%s22412_s3 + $0x188] sm:$0xff]   ;;  %v10216_v31 = vrot.slane %v10214_v33, 2  ;;  %v10241_v25 = vshll.u32 %v21313_v52, 16 }
 0x2ff   : > { %16106 = vmatprep.subr.bf16.mxu0 %v17527_v2  ;;  %v10234_v27 = vrot.slane %v10232_v6, 2  ;;  %v21635_v56 = vadd.s32 256, %v23114_v54  ;;  %v17532_v54 = vld [vmem:[%s22412_s3 + $0x1d8] sm:$0xff]  }
 0x300   : > { %15849 = vmatpush3.bf16.msra.mxu1 %v17487_v21  ;;  %v9985_v21 = vsel %vm23108_vm3, %v9982_v3, %v9984_v46  ;;  %v10199_v3 = vor.u32 %v10198_v57, %v10195_v28  ;;  %v10226_v46 = vor.u32 %v10225_v23, %v10222_v14  ;;  %v8433_v57 = vld [vmem:[#allocation2 + $0x10] sm:$0xc]  ;;  %v23119_v14 = vrot.slane %v21143_v0, 2  ;;  %v17520_v0 = vld [vmem:[%s22412_s3 + $0x1c0] sm:$0xff]   ;;  %vm23125_vm3 = vmmov %vm23124_vm5 }
 0x301   : > { %15850 = vmatprep.subr.bf16.mxu1 %v17489_v41  ;;  %16091 = vmatmul.mubr.bf16.gmra.mrb[32].mxu0 %v9985_v21  ;;  %v17509_v21 = vld [vmem:[%s22412_s3 + $0x1a8] sm:$0xff]  }
 0x302   : > { %16107 = vmatpush3.bf16.msra.mxu0 %v17527_v2  ;;  %16110 = vmatprep.mubr.bf16.mxu0 %v10191_v12  ;;  %v10200_v59 = vsel %vm23110_vm7, %v10190_v15, %v10199_v3  ;;  %v10229_v2 = vshrl.u32 %v21304_v17, 16  ;;  %v10243_v15 = vrot.slane %v10241_v25, 2  ;;  %v8515_v25 = vrot.slane %v21248_v50, 2 }
 0x303   : > { %15835 = vmatmul.mubr.bf16.gmra.mrb[28].mxu1 %v8056_v49  ;;  %16108 = vmatprep.subr.bf16.mxu0 %v17531_v22  ;;  %v10240_v49 = vrot.slane %v10238_v45, 1  ;;  %v8513_v45 = vrot.slane %v21244_v9, 2 }
 0x304   : > { %15851 = vmatpush3.bf16.msra.mxu1 %v17489_v41  ;;  %15854 = vmatprep.mubr.bf16.mxu1 %v21132_v51  ;;  %v17552_v51 = vld [vmem:[%s22412_s3 + $0x140] sm:$0xff]   ;;  %v10213_v41 = vrot.slane %v10211_v8, 1  ;;  %v10231_v1 = vrot.slane %v10229_v2, 1 }
 0x305   : > { %15852 = vmatprep.subr.bf16.mxu1 %v17493_v4  ;;  %v21626_v28 = vor.u32 %v10243_v15, %v10240_v49  ;;  %v23116_v8 = vld [vmem:[#allocation6_spill] sm:$0xff]  ;;  %v8514_v9 = vsel %vm23122_vm8, %v8511_v5, %v8513_v45  ;;  %v17528_v15 = vld [vmem:[%s22412_s3 + $0x1d0] sm:$0xff]  }
 0x306   : > { %16109 = vmatpush3.bf16.msra.mxu0 %v17531_v22  ;;  %v10217_v10 = vor.u32 %v10216_v31, %v10213_v41  ;;  %v10235_v22 = vor.u32 %v10234_v27, %v10231_v1  ;;  %v6878_v33 = vadd.s32 256, %v23116_v8  ;;  %v17517_v31 = vld [vmem:[%s22412_s3 + $0x1b8] sm:$0xff]   ;;  %v17525_v1 = vld [vmem:[%s22412_s3 + $0x1c8] sm:$0xff]   ;;  %v8726_v8 = vshrl.u32 %v21242_v48, 16 }
 0x307   : > { %16126 = vmatprep.subr.bf16.mxu0 %v17552_v51 }
 0x308   : > { %15853 = vmatpush3.bf16.msra.mxu1 %v17493_v4  ;;  %v17558_v4 = vld [vmem:[%s22412_s3 + $0x158] sm:$0xff]   ;;  %v10218_v17 = vsel %vm23112_vm10, %v10208_v26, %v10217_v10  ;;  %v10236_v12 = vsel %vm23113_vm4, %v10226_v46, %v10235_v22 }
 0x309   : > { %15870 = vmatprep.subr.bf16.mxu1 %v17495_v58  ;;  %16111 = vmatmul.mubr.bf16.vlgmr.msra.gmra.mrb[20].mxu0 %v10200_v59  ;;  %v21656_v59 = vmul.u32.u64.low 3817748708, %v21635_v56  ;;  %v21657_v41 = vmul.u32.u64.high 3817748708, %v21635_v56, %v21656_v59 }
 0x30a   : > { %16127 = vmatpush3.bf16.msra.mxu0 %v17552_v51  ;;  %v17512_v51 = vld [vmem:[%s22412_s3 + $0x1b0] sm:$0xff]  }
 0x30b   : > { %15855 = vmatmul.mubr.bf16.vlgmr.msra.gmra.mrb[16].mxu1 %v21147_v34  ;;  %v10209_v34 = vsel %vm23111_vm1, %v10199_v3, %v10208_v26  ;;  %16128 = vmatprep.subr.bf16.mxu0 %v17554_v20  ;;  %v10245_v3 = vsel %vm23115_vm2, %v10235_v22, %v21626_v28  ;;  %v8517_v22 = vrot.slane %v21253_v36, 2 }
 0x30c   : > { %15871 = vmatpush3.bf16.msra.mxu1 %v17495_v58  ;;  %15858 = vmatprep.mubr.bf16.mxu1 %v21150_v37  ;;  %v17556_v37 = vld [vmem:[%s22412_s3 + $0x150] sm:$0xff]   ;;  %v17562_v58 = vld [vmem:[%s22412_s3 + $0x168] sm:$0xff]  }
 0x30d   : > { %15872 = vmatprep.subr.bf16.mxu1 %v17497_v18  ;;  %16114 = vmatprep.mubr.bf16.mxu0 %v10209_v34 }
 0x30e   : > { %16129 = vmatpush3.bf16.msra.mxu0 %v17554_v20  ;;  %v21650_v20 = vadd.s32 256, %v23118_v42  ;;  %v8728_v42 = vrot.slane %v8726_v8, 2 }
 0x30f   : > { %16130 = vmatprep.subr.bf16.mxu0 %v17556_v37 }
 0x310   : > { %15873 = vmatpush3.bf16.msra.mxu1 %v17497_v18  ;;  %v23117_v18 = vld [vmem:[#allocation8_spill] sm:$0xff] }
 0x311   : > { %15874 = vmatprep.subr.bf16.mxu1 %v17499_v16  ;;  %16115 = vmatmul.mubr.bf16.gmra.mrb[24].mxu0 %v10218_v17  ;;  %v6881_v26 = vadd.s32 256, %v23117_v18  ;;  %v6910_v17 = vshrl.u32 %v21657_v41, 4  ;;  %v8521_v18 = vrot.slane %v21264_v63, 2 }
 0x312   : > { %16131 = vmatpush3.bf16.msra.mxu0 %v17556_v37 }
 0x313   : > { %15859 = vmatmul.mubr.bf16.gmra.mrb[20].mxu1 %v21163_v39  ;;  %v10227_v39 = vsel %vm23100_vm0, %v10217_v10, %v10226_v46  ;;  %16132 = vmatprep.subr.bf16.mxu0 %v17558_v4  ;;  %v21669_v37 = vmul.u32.u64.low 3817748708, %v6881_v26  ;;  %v21670_v10 = vmul.u32.u64.high 3817748708, %v6881_v26, %v21669_v37  ;;  %v17571_v46 = vld [vmem:[%s22412_s3 + $0x178] sm:$0xff]   ;;  %v6911_v49 = vmul.u32 18, %v6910_v17  ;;  %v17684_v17 = vld [vmem:[#allocation2 + $0x28] sm:$0xff]  }
 0x314   : > { %15875 = vmatpush3.bf16.msra.mxu1 %v17499_v16  ;;  %15862 = vmatprep.mubr.bf16.mxu1 %v21171_v61  ;;  %v17560_v61 = vld [vmem:[%s22412_s3 + $0x160] sm:$0xff]   ;;  %v21663_v16 = vmul.u32.u64.low 3817748708, %v6878_v33  ;;  %v21664_v34 = vmul.u32.u64.high 3817748708, %v6878_v33, %v21663_v16 }
 0x315   : > { %15876 = vmatprep.subr.bf16.mxu1 %v17503_v11  ;;  %16118 = vmatprep.mubr.bf16.mxu0 %v10227_v39  ;;  %v6921_v50 = vshrl.u32 %v21670_v10, 4  ;;  %v17683_v10 = vld [vmem:[#allocation2 + $0x20] sm:$0xff]  }
 0x316   : > { %16133 = vmatpush3.bf16.msra.mxu0 %v17558_v4  ;;  %v21688_v4 = vld [vmem:[%s22412_s3 + $0x180] sm:$0xff]   ;;  %v6888_v27 = vshrl.u32 %v21664_v34, 4 }
 0x317   : > { %16134 = vmatprep.subr.bf16.mxu0 %v17560_v61 }
 0x318   : > { %15877 = vmatpush3.bf16.msra.mxu1 %v17503_v11  ;;  %v21674_v6 = vmul.u32.u64.low 3817748708, %v21650_v20  ;;  %v21675_v11 = vmul.u32.u64.high 3817748708, %v21650_v20, %v21674_v6 }
 0x319   : > { %15878 = vmatprep.subr.bf16.mxu1 %v17506_v40  ;;  %16119 = vmatmul.mubr.bf16.gmra.mrb[28].mxu0 %v10236_v12  ;;  %v6912_v12 = vsub.s32 %v21635_v56, %v6911_v49  ;;  %v8738_v6 = vshll.u32 %v17683_v10, 16 }
 0x31a   : > { %16122 = vmatprep.mubr.bf16.mxu0 %v10245_v3  ;;  %16135 = vmatpush3.bf16.msra.mxu0 %v17560_v61  ;;  %v6899_v39 = vshrl.u32 %v21675_v11, 4  ;;  %v6889_v61 = vmul.u32 18, %v6888_v27  ;;  %v8518_v3 = vsel %vm23124_vm5, %v8515_v25, %v8517_v22  ;;  %vm23132_vm5 = vmmov %vm23125_vm3 }
 0x31b   : > { %15863 = vmatmul.mubr.bf16.gmra.mrb[24].mxu1 %v21175_v53  ;;  %v21641_v53 = vcombine.low %v8433_v57, %v21246_v44  ;;  %16136 = vmatprep.subr.bf16.mxu0 %v17562_v58  ;;  %v17565_v44 = vld [vmem:[%s22412_s3 + $0x170] sm:$0xff]   ;;  %v8519_v57 = vrot.slane %v21259_v13, 2  ;;  %v8729_v13 = vshll.u32 %v21242_v48, 16  ;;  %vm6928_vm9 = vcmp.ne.s32.totalorder %v6912_v12, 0 }
 0x31c   : > { %15879 = vmatpush3.bf16.msra.mxu1 %v17506_v40  ;;  %15866 = vmatprep.mubr.bf16.mxu1 %v21180_v55  ;;  %v8262_v55 = vrot.slane %v21525_v47, 2  ;;  %v8516_v40 = vsel %vm23123_vm14, %v8513_v45, %v8515_v25  ;;  %vm6932_vm7 = vcmp.lt.s32.totalorder %v6912_v12, 0 }
 0x31d   : > { %15880 = vmatprep.subr.bf16.mxu1 %v17509_v21  ;;  %v8510_v47 = vrot.slane %v21641_v53, 2  ;;  %v8520_v36 = vsel %vm23125_vm3, %v8517_v22, %v8519_v57  ;;  %v8721_v48 = vshll.u32 %v21641_v53, 16  ;;  %v8731_v63 = vrot.slane %v8729_v13, 3  ;;  %vm21731_vm2 = vmand %vm6932_vm7, %vm6928_vm9  ;;  %v17539_v13 = vld [vmem:[%s22412_s3 + $0x1f8] sm:$0xff]  }
 0x31e   : > { %v8263_v23 = vsel %vm23120_vm11, %v23119_v14, %v8262_v55  ;;  %16137 = vmatpush3.bf16.msra.mxu0 %v17562_v58  ;;  %v6900_v58 = vmul.u32 18, %v6899_v39  ;;  %v8522_v37 = vsel %vm23132_vm5, %v8519_v57, %v8521_v18  ;;  %vm23135_vm9 = vmmov %vm23132_vm5 }
 0x31f   : > { %v8512_v2 = vsel %vm23121_vm6, %v8510_v47, %v8511_v5  ;;  %16138 = vmatprep.subr.bf16.mxu0 %v17565_v44  ;;  %v8718_v5 = vshrl.u32 %v21641_v53, 16  ;;  %v17538_v53 = vld [vmem:[#allocation2 + $0x50] ss:$0 sps:$4 sm:$0x33]   ;;  %v8723_v34 = vrot.slane %v8721_v48, 3  ;;  %v21765_v45 = vor.u32 %v8731_v63, %v8728_v42 }
 0x320   : > { %15881 = vmatpush3.bf16.msra.mxu1 %v17509_v21  ;;  %v6922_v21 = vmul.u32 18, %v6921_v50  ;;  %v21718_v56 = vsub.s32 %v21650_v20, %v6900_v58  ;;  %v6940_v20 = vadd.s32 18, %v6912_v12  ;;  %v8525_v50 = vrot.slane %v17538_v53, 2 }
 0x321   : > { %15882 = vmatprep.subr.bf16.mxu1 %v17512_v51  ;;  %v8720_v16 = vrot.slane %v8718_v5, 2 }
 0x322   : > { %16139 = vmatpush3.bf16.msra.mxu0 %v17565_v44  ;;  %v21713_v55 = vsub.s32 %v6881_v26, %v6922_v21  ;;  %v17533_v26 = vld [vmem:[%s22412_s3 + $0x1e0] sm:$0xff]   ;;  %vm6927_vm11 = vcmp.ne.s32.totalorder %v21718_v56, 0  ;;  %vm6931_vm6 = vcmp.lt.s32.totalorder %v21718_v56, 0  ;;  %v6944_v11 = vsel %vm21731_vm2, %v6940_v20, %v6912_v12 }
 0x323   : > { %15867 = vmatmul.mubr.bf16.gmra.mrb[28].mxu1 %v8263_v23  ;;  %16140 = vmatprep.subr.bf16.mxu0 %v17571_v46  ;;  %v6939_v23 = vadd.s32 18, %v21718_v56  ;;  %vm21760_vm3 = vmand %vm6931_vm6, %vm6927_vm11  ;;  %vm6948_vm7 = vcmp.lt.s32.totalorder %v6944_v11, 16 }
 0x324   : > { %15883 = vmatpush3.bf16.msra.mxu1 %v17512_v51  ;;  %15886 = vmatprep.mubr.bf16.mxu1 %v8512_v2  ;;  %v21709_v51 = vsub.s32 %v6878_v33, %v6889_v61  ;;  %v8523_v33 = vrot.slane %v21266_v38, 2  ;;  %vm6929_vm0 = vcmp.ne.s32.totalorder %v21713_v55, 0  ;;  %vm6933_vm4 = vcmp.lt.s32.totalorder %v21713_v55, 0 }
 0x325   : > { %15884 = vmatprep.subr.bf16.mxu1 %v17517_v31  ;;  %v6941_v47 = vadd.s32 18, %v21713_v55  ;;  %vm21748_vm14 = vmand %vm6933_vm4, %vm6929_vm0  ;;  %v8735_v2 = vshrl.u32 %v17683_v10, 16  ;;  %v6943_v39 = vsel %vm21760_vm3, %v6939_v23, %v21718_v56  ;;  %v8747_v61 = vshll.u32 %v17684_v17, 16 }
 0x326   : > { %16141 = vmatpush3.bf16.msra.mxu0 %v17571_v46  ;;  %vm6926_vm1 = vcmp.ne.s32.totalorder %v21709_v51, 0  ;;  %vm6930_vm10 = vcmp.lt.s32.totalorder %v21709_v51, 0  ;;  %v6938_v59 = vadd.s32 18, %v21709_v51  ;;  %vm23139_vm0 = vsmask.f32 5376 }
 0x327   : > { %16158 = vmatprep.subr.bf16.mxu0 %v21688_v4  ;;  %vm21738_vm8 = vmand %vm6930_vm10, %vm6926_vm1  ;;  %v6945_v27 = vsel %vm21748_vm14, %v6941_v47, %v21713_v55  ;;  %v8737_v49 = vrot.slane %v8735_v2, 2  ;;  %vm21790_vm2 = vcmp.lt.s32.totalorder %v6943_v39, 16  ;;  %v8749_v20 = vrot.slane %v8747_v61, 3  ;;  %v17541_v61 = vld [vmem:[%s22412_s3 + $0x208] sm:$0xff]  }
 0x328   : > { %15885 = vmatpush3.bf16.msra.mxu1 %v17517_v31  ;;  %v17536_v31 = vld [vmem:[%s22412_s3 + $0x1e8] sm:$0xff]   ;;  %v6942_v25 = vsel %vm21738_vm8, %v6938_v59, %v21709_v51  ;;  %vm23138_vm10 = vmmov %vm23132_vm5  ;;  %vm21786_vm4 = vcmp.lt.s32.totalorder %v6945_v27, 16  ;;  %v17685_v51 = vld [vmem:[#allocation2 + $0x30] sm:$0xff]   ;;  %vm23150_vm8 = vsmask.f32 6400  ;;  %vm23165_vm3 = vcmask 1044480  }
 0x329   : > { %15902 = vmatprep.subr.bf16.mxu1 %v17520_v0  ;;  %vm21779_vm1 = vcmp.lt.s32.totalorder %v6942_v25, 16  ;;  %v8526_v21 = vsel %vm23138_vm10, %v8523_v33, %v8525_v50  ;;  %v8756_v56 = vshll.u32 %v17685_v51, 16  ;;  %vm23144_vm11 = vmmov %vm23139_vm0 }
 0x32a   : > { %vm23145_vm6 = vmmov %vm23139_vm0 }
 0x32b   : > { %15887 = vmatmul.mubr.bf16.vlgmr.msra.gmra.mrb[16].mxu1 %v8514_v9  ;;  %v17537_v9 = vld [vmem:[%s22412_s3 + $0x1f0] sm:$0xff]   ;;  %v8758_v22 = vrot.slane %v8756_v56, 3  ;;  %vm23151_vm14 = vmmov %vm23139_vm0 }
 0x32c   : > { %15903 = vmatpush3.bf16.msra.mxu1 %v17520_v0  ;;  %15890 = vmatprep.mubr.bf16.mxu1 %v8516_v40  ;;  %v8524_v0 = vsel %vm23135_vm9, %v8521_v18, %v8523_v33  ;;  %v8724_v40 = vor.u32 %v8723_v34, %v8720_v16  ;;  %v17686_v18 = vld [vmem:[#allocation2 + $0x38] sm:$0xff]   ;;  %vm23153_vm5 = vmmov %vm23139_vm0 }
 0x32d   : > { %15904 = vmatprep.subr.bf16.mxu1 %v17525_v1  ;;  %v8762_v33 = vshrl.u32 %v17686_v18, 16  ;;  %v8765_v16 = vshll.u32 %v17686_v18, 16  ;;  %vm23171_vm10 = vmmov %vm23165_vm3 }
 0x32e   : > { %v8733_v57 = vsel %vm23139_vm0, %v8724_v40, %v21765_v45 }
 0x330   : > { %15905 = vmatpush3.bf16.msra.mxu1 %v17525_v1  ;;  %v8744_v1 = vshrl.u32 %v17684_v17, 16 }
 0x331   : > { %15906 = vmatprep.subr.bf16.mxu1 %v17528_v15 }
 0x333   : > { %15891 = vmatmul.mubr.bf16.gmra.mrb[20].mxu1 %v8518_v3  ;;  %v8753_v3 = vshrl.u32 %v17685_v51, 16 }
 0x334   : > { %15907 = vmatpush3.bf16.msra.mxu1 %v17528_v15  ;;  %15894 = vmatprep.mubr.bf16.mxu1 %v8520_v36  ;;  %v8740_v15 = vrot.slane %v8738_v6, 3 }
 0x335   : > { %15908 = vmatprep.subr.bf16.mxu1 %v17532_v54  ;;  %v8755_v40 = vrot.slane %v8753_v3, 2 }
 0x336   : > { %v8741_v42 = vor.u32 %v8740_v15, %v8737_v49 }
 0x338   : > { %15909 = vmatpush3.bf16.msra.mxu1 %v17532_v54  ;;  %v8746_v54 = vrot.slane %v8744_v1, 2 }
 0x339   : > { %15910 = vmatprep.subr.bf16.mxu1 %v17533_v26 }
 0x33a   : > { %v15676_v58 = vpop.f32.mrb[16].mxu0  ;;  %v8750_v1 = vor.u32 %v8749_v20, %v8746_v54  ;;  %v8742_v54 = vsel %vm23144_vm11, %v21765_v45, %v8741_v42  ;;  %v8759_v20 = vor.u32 %v8758_v22, %v8755_v40  ;;  %v17545_v40 = vld [vmem:[%s22412_s3 + $0x228] sm:$0xff]  }
 0x33b   : > { %15895 = vmatmul.mubr.bf16.gmra.mrb[24].mxu1 %v8522_v37  ;;  %v6952_v8 = vsel %vm6948_vm7, %v15676_v58, 0.0  ;;  %v6859_v55 = vpop.f32.mrb[17].mxu0  ;;  %v17540_v37 = vld [vmem:[%s22412_s3 + $0x200] sm:$0xff]   ;;  %v7010_v58 = vld [vmem:[#allocation2 + $0x88] sm:$0xe]  ;;  %vm23167_vm7 = vmmov %vm23135_vm9 }
 0x33c   : > { %15911 = vmatpush3.bf16.msra.mxu1 %v17533_v26  ;;  %15898 = vmatprep.mubr.bf16.mxu1 %v8524_v0  ;;  %v14164_v26 = vpack.c.bf16 %v6952_v8, %v6952_v8  ;;  %v6950_v5 = vsel %vm21779_vm1, %v6859_v55, 0.0  ;;  %v15677_v48 = vpop.f32.mrb[18].mxu0  ;;  %v7016_v8 = vld [vmem:[#allocation2 + $0x98] sm:$0x3]  ;;  %v8751_v36 = vsel %vm23145_vm6, %v8741_v42, %v8750_v1  ;;  %vm23170_vm1 = vmmov %vm23167_vm7 }
 0x33d   : > { %15912 = vmatprep.subr.bf16.mxu1 %v17536_v31  ;;  %v14162_v63 = vpack.c.bf16 %v6950_v5, %v6950_v5  ;;  %v6953_v44 = vsel %vm21786_vm4, %v15677_v48, 0.0  ;;  %v6862_v59 = vpop.f32.mrb[19].mxu0  ;;  %vm23174_vm4 = vmmov %vm23165_vm3 }
 0x33e   : > { %v6986_v53 = vshrl.u32 %v14164_v26, 16  ;;  %v6989_v41 = vshll.u32 %v14164_v26, 16  ;;  %v14165_v47 = vpack.c.bf16 %v6953_v44, %v6953_v44  ;;  %v17687_v26 = vld [vmem:[#allocation2 + $0x40] sm:$0xff]   ;;  %vm23176_vm11 = vmmov %vm23170_vm1 }
 0x33f   : > { %v6967_v34 = vshrl.u32 %v14162_v63, 16  ;;  %v6970_v14 = vshll.u32 %v14162_v63, 16  ;;  %v8771_v5 = vshrl.u32 %v17687_v26, 16  ;;  %v8774_v63 = vshll.u32 %v17687_v26, 16  ;;  %v11415_v26 = vld [vmem:[#allocation2 + $0x80] sm:$0xf] }
 0x340   : > { %15913 = vmatpush3.bf16.msra.mxu1 %v17536_v31  ;;  %v6951_v31 = vsel %vm21790_vm2, %v6862_v59, 0.0  ;;  %v6988_v10 = vrot.slane %v6986_v53, 6  ;;  %v6991_v2 = vrot.slane %v6989_v41, 7  ;;  %v6996_v6 = vshrl.u32 %v14165_v47, 16  ;;  %v17688_v53 = vld [vmem:[#allocation2 + $0x48] sm:$0xff]   ;;  %vm23175_vm2 = vmmov %vm23170_vm1 }
 0x341   : > { %15914 = vmatprep.subr.bf16.mxu1 %v17537_v9  ;;  %v14163_v23 = vpack.c.bf16 %v6951_v31, %v6951_v31  ;;  %v6999_v11 = vshll.u32 %v14165_v47, 16  ;;  %v6969_v46 = vrot.slane %v6967_v34, 6  ;;  %v6972_v0 = vrot.slane %v6970_v14, 7  ;;  %v17543_v31 = vld [vmem:[%s22412_s3 + $0x218] sm:$0xff]  }
 0x342   : > { %v6992_v27 = vor.u32 %v6991_v2, %v6988_v10  ;;  %v8780_v41 = vshrl.u32 %v17688_v53, 16  ;;  %v8783_v47 = vshll.u32 %v17688_v53, 16  ;;  %v8776_v14 = vrot.slane %v8774_v63, 3  ;;  %v21892_v63 = vld [vmem:[#allocation2 + $0x84] sm:$0xf]  ;;  %v23161_v53 = vld [vmem:[#allocation47_spill] sm:$0xff] }
 0x343   : > { %15899 = vmatmul.mubr.bf16.gmra.mrb[28].mxu1 %v8526_v21  ;;  %v6976_v25 = vshrl.u32 %v14163_v23, 16  ;;  %v6979_v17 = vshll.u32 %v14163_v23, 16  ;;  %v7001_v50 = vrot.slane %v6999_v11, 7  ;;  %v6973_v39 = vor.u32 %v6972_v0, %v6969_v46  ;;  %v21829_v23 = vld [vmem:[#allocation2 + $0x50] ss:$0 sps:$4 sm:$0x77]  }
 0x344   : > { %15915 = vmatpush3.bf16.msra.mxu1 %v17537_v9  ;;  %15918 = vmatprep.mubr.bf16.mxu1 %v8733_v57  ;;  %v6998_v9 = vrot.slane %v6996_v6, 6  ;;  %v8764_v21 = vrot.slane %v8762_v33, 2  ;;  %v6994_v57 = vrot.slane %v6992_v27, 4  ;;  %v8782_v10 = vrot.slane %v8780_v41, 2  ;;  %v17544_v46 = vld [vmem:[%s22412_s3 + $0x220] sm:$0xff]  }
 0x345   : > { %15916 = vmatprep.subr.bf16.mxu1 %v17539_v13  ;;  %v6978_v49 = vrot.slane %v6976_v25, 6  ;;  %v6981_v15 = vrot.slane %v6979_v17, 7  ;;  %v6974_v51 = vrot.slane %v6973_v39, 4  ;;  %v7011_v3 = vsel %vm22878_vm13, %v6973_v39, %v7010_v58  ;;  %vm23147_vm13 = vmmov %vm23139_vm0 }
 0x346   : > { %v7002_v12 = vor.u32 %v7001_v50, %v6998_v9  ;;  %7012 = vst [vmem:[#allocation2 + $0x88] sm:$0xe] %v7011_v3  ;;  %v8760_v34 = vsel %vm23147_vm13, %v8750_v1, %v8759_v20  ;;  %v8785_v2 = vrot.slane %v8783_v47, 3  ;;  %v8792_v9 = vshll.u32 %v21829_v23, 16  ;;  %v23155_v3 = vld [vmem:[#allocation46_spill] sm:$0xff]  ;;  %vm23178_vm13 = vmmov %vm23170_vm1 }
 0x347   : > { %v6982_v55 = vor.u32 %v6981_v15, %v6978_v49  ;;  %v21898_v41 = vcombine.low %v11415_v26, %v21892_v63  ;;  %v23162_v47 = vld [vmem:[#allocation70_spill] sm:$0xff] }
 0x348   : > { %15917 = vmatpush3.bf16.msra.mxu1 %v17539_v13  ;;  %v8767_v13 = vrot.slane %v8765_v16, 3  ;;  %v7003_v56 = vsel %vm20442_vm12, %v6994_v57, %v7002_v12  ;;  %v7004_v18 = vrot.slane %v7002_v12, 4  ;;  %v8773_v16 = vrot.slane %v8771_v5, 2  ;;  %v23152_v57 = vld [vmem:[#allocation56_spill] sm:$0xff] }
 0x349   : > { %15934 = vmatprep.subr.bf16.mxu1 %v17540_v37  ;;  %7015 = vst [vmem:[#allocation2 + $0x94] sm:$0xf] %v7003_v56  ;;  %v6983_v45 = vsel %vm20442_vm12, %v6974_v51, %v6982_v55  ;;  %v6984_v33 = vrot.slane %v6982_v55, 4  ;;  %v8786_v1 = vor.u32 %v8785_v2, %v8782_v10  ;;  %v8794_v22 = vrot.slane %v8792_v9, 3  ;;  %v17575_v51 = vld [vmem:[%s22412_s3 + $0x188] sm:$0xff]   ;;  %v17557_v10 = vld [vmem:[%s22412_s3 + $0x60] sm:$0xff]  }
 0x34a   : > { %v7017_v42 = vsel %vm23003_vm15, %v7004_v18, %v7016_v8  ;;  %7013 = vst [vmem:[#allocation2 + $0x8c] sm:$0xf] %v6983_v45  ;;  %v8768_v59 = vor.u32 %v8767_v13, %v8764_v21  ;;  %v8777_v0 = vor.u32 %v8776_v14, %v8773_v16  ;;  %vm23149_vm15 = vmmov %vm23139_vm0  ;;  %v17546_v21 = vld [vmem:[%s22412_s3 + $0x230] sm:$0xff]   ;;  %v17550_v8 = vld [vmem:[%s22412_s3 + $0x40] sm:$0xff]  }
 0x34b   : > { %15919 = vmatmul.mubr.bf16.vlgmr.msra.gmra.mrb[16].mxu1 %v8742_v54  ;;  %7018 = vst [vmem:[#allocation2 + $0x98] sm:$0x3] %v7017_v42  ;;  %v6993_v44 = vsel %vm20442_vm12, %v6984_v33, %v6992_v27  ;;  %vm23148_vm12 = vmmov %vm23139_vm0  ;;  %v8789_v27 = vshrl.u32 %v21829_v23, 16  ;;  %v23154_v54 = vld [vmem:[#allocation54_spill] sm:$0xff]  ;;  %v23156_v55 = vld [vmem:[#allocation59_spill] sm:$0xff] }
 0x34c   : > { %15935 = vmatpush3.bf16.msra.mxu1 %v17540_v37  ;;  %15922 = vmatprep.mubr.bf16.mxu1 %v8751_v36  ;;  %7014 = vst [vmem:[#allocation2 + $0x90] sm:$0xf] %v6993_v44  ;;  %v21831_v37 = vld [vmem:[#allocation2 + $0x88] ss:$0 sps:$4 sm:$0x33]   ;;  %v8769_v43 = vsel %vm23148_vm12, %v8759_v20, %v8768_v59  ;;  %v8778_v39 = vsel %vm23149_vm15, %v8768_v59, %v8777_v0  ;;  %v17577_v13 = vld [vmem:[%s22412_s3 + $0x190] sm:$0xff]   ;;  %vm23179_vm12 = vmmov %vm23170_vm1 }
 0x34d   : > { %15936 = vmatprep.subr.bf16.mxu1 %v17541_v61  ;;  %v10247_v6 = vshrl.u32 %v21831_v37, 16  ;;  %v10250_v11 = vshll.u32 %v21831_v37, 16  ;;  %v8787_v15 = vsel %vm23151_vm14, %v8777_v0, %v8786_v1  ;;  %v17551_v36 = vld [vmem:[%s22412_s3 + $0x48] sm:$0xff]   ;;  %v17553_v33 = vld [vmem:[%s22412_s3 + $0x50] sm:$0xff]   ;;  %v17555_v42 = vld [vmem:[%s22412_s3 + $0x58] sm:$0xff]  }
 0x34e   : > { %v23157_v56 = vld [vmem:[#allocation11_spill] sm:$0xff]  ;;  %v23158_v18 = vld [vmem:[#allocation14_spill] sm:$0xff]  ;;  %vm23172_vm0 = vsmask.f32 7424  ;;  %vm23180_vm15 = vmmov %vm23170_vm1 }
 0x34f   : > { %v10249_v25 = vrot.slane %v10247_v6, 1  ;;  %v10252_v17 = vrot.slane %v10250_v11, 2  ;;  %v23159_v45 = vld [vmem:[#allocation67_spill] sm:$0xff]  ;;  %v17581_v20 = vld [vmem:[%s22412_s3 + $0x1a0] sm:$0xff]   ;;  %v12102_v59 = vld [vmem:[#allocation2 + $0x88] sm:$0xc] }
 0x350   : > { %15937 = vmatpush3.bf16.msra.mxu1 %v17541_v61  ;;  %v8791_v61 = vrot.slane %v8789_v27, 2  ;;  %v10630_v14 = vld [vmem:[#allocation2 + $0x50] sm:$0xc]  ;;  %v23164_v11 = vld [vmem:[#allocation10_spill] sm:$0xff]  ;;  %vm23177_vm6 = vmmov %vm23172_vm0 }
 0x351   : > { %15938 = vmatprep.subr.bf16.mxu1 %v17542_v30  ;;  %v10253_v50 = vor.u32 %v10252_v17, %v10249_v25  ;;  %v21882_v5 = vld [vmem:[#allocation2 + $0x88] sm:$0xff]   ;;  %v11468_v17 = vshll.u32 %v21898_v41, 16  ;;  %v17585_v9 = vld [vmem:[%s22412_s3 + $0x1b0] sm:$0xff]   ;;  %vm23182_vm14 = vmmov %vm23170_vm1 }
 0x352   : > { %v8795_v58 = vor.u32 %v8794_v22, %v8791_v61  ;;  %v21884_v48 = vld [vmem:[#allocation2 + $0x8c] sm:$0xf]  ;;  %v21943_v61 = vld [vmem:[#allocation2 + $0x98] sm:$0xff]  }
 0x353   : > { %15923 = vmatmul.mubr.bf16.gmra.mrb[20].mxu1 %v8760_v34  ;;  %v10254_v49 = vsel %vm23150_vm8, %v21626_v28, %v10253_v50  ;;  %v17549_v28 = vld [vmem:[%s22412_s3 + $0x238] sm:$0xff]   ;;  %v21894_v44 = vld [vmem:[#allocation2 + $0x90] sm:$0xff]   ;;  %v14042_v16 = vcombine.low %v12102_v59, %v21884_v48  ;;  %v21910_v2 = vld [vmem:[#allocation2 + $0x88] sm:$0xff]  }
 0x354   : > { %15939 = vmatpush3.bf16.msra.mxu1 %v17542_v30  ;;  %15926 = vmatprep.mubr.bf16.mxu1 %v8769_v43  ;;  %v8796_v12 = vsel %vm23153_vm5, %v8786_v1, %v8795_v58  ;;  %v23160_v30 = vld [vmem:[#allocation15_spill] sm:$0xff]  ;;  %v23163_v34 = vld [vmem:[#allocation68_spill] sm:$0xff]  ;;  %v11194_v43 = vrot.slane %v21882_v5, 3  ;;  %v12123_v25 = vrot.slane %v21894_v44, 2  ;;  %v23168_v22 = vld [vmem:[#allocation49_spill] sm:$0xff] }
 0x355   : > { %15940 = vmatprep.subr.bf16.mxu1 %v17543_v31  ;;  %16123 = vmatmul.mubr.bf16.gmra.mrb[32].mxu0 %v10254_v49  ;;  %v12122_v6 = vrot.slane %v14042_v16, 2  ;;  %v17689_v1 = vld [vmem:[#allocation2 + $0x54] sm:$0xf]  ;;  %v21937_v50 = vld [vmem:[#allocation2 + $0x58] sm:$0xff]   ;;  %v23166_v49 = vrot.slane %v21313_v52, 2  ;;  %v21979_v59 = vld [vmem:[#allocation2 + $0x68] sm:$0xff]  }
 0x356   : > { %16142 = vmatprep.mubr.bf16.mxu0 %v23152_v57  ;;  %v21919_v0 = vsel %vm23165_vm3, %v11192_v24, %v11194_v43  ;;  %v21923_v27 = vcombine.low %v10630_v14, %v17689_v1  ;;  %v11473_v24 = vshll.u32 %v21910_v2, 16  ;;  %v17590_v58 = vld [vmem:[%s22412_s3 + $0x1b8] sm:$0xff]   ;;  %v21953_v52 = vld [vmem:[#allocation2 + $0x90] ss:$0 sps:$4 sm:$0x11]   ;;  %v17596_v16 = vld [vmem:[%s22412_s3 + $0x1c8] sm:$0xff]  }
 0x357   : > { %vm23181_vm8 = vmmov %vm23170_vm1 }
 0x358   : > { %15941 = vmatpush3.bf16.msra.mxu1 %v17543_v31  ;;  %v17583_v31 = vld [vmem:[%s22412_s3 + $0x1a8] sm:$0xff]   ;;  %v10706_v57 = vrot.slane %v21923_v27, 2  ;;  %vm23183_vm3 = vmmov %vm23153_vm5 }
 0x359   : > { %15942 = vmatprep.subr.bf16.mxu1 %v17544_v46 }
 0x35b   : > { %15927 = vmatmul.mubr.bf16.gmra.mrb[24].mxu1 %v8778_v39  ;;  %v12521_v39 = vld [vmem:[#allocation2 + $0x90] sm:$0x8] }
 0x35c   : > { %15943 = vmatpush3.bf16.msra.mxu1 %v17544_v46  ;;  %15930 = vmatprep.mubr.bf16.mxu1 %v8787_v15  ;;  %v10459_v46 = vrot.slane %v21831_v37, 2  ;;  %v21928_v37 = vsel %vm23135_vm9, %v12122_v6, %v12123_v25  ;;  %vm23184_vm9 = vmmov %vm23183_vm3 }
 0x35d   : > { %15944 = vmatprep.subr.bf16.mxu1 %v17545_v40  ;;  %16143 = vmatmul.mubr.bf16.vlgmr.msra.gmra.mrb[20].mxu0 %v23154_v54 }
 0x35e   : > { %16146 = vmatprep.mubr.bf16.mxu0 %v23156_v55  ;;  %16159 = vmatpush3.bf16.msra.mxu0 %v21688_v4  ;;  %v17579_v4 = vld [vmem:[%s22412_s3 + $0x198] sm:$0xff]   ;;  %v10460_v15 = vsel %vm23167_vm7, %v23166_v49, %v10459_v46  ;;  %v17574_v49 = vld [vmem:[%s22412_s3 + $0x10] sm:$0xff]   ;;  %vm23185_vm7 = vcmask 1046528  }
 0x35f   : > { %16160 = vmatprep.subr.bf16.mxu0 %v17575_v51 }
 0x360   : > { %15945 = vmatpush3.bf16.msra.mxu1 %v17545_v40  ;;  %v10707_v40 = vrot.slane %v21937_v50, 2 }
 0x361   : > { %15946 = vmatprep.subr.bf16.mxu1 %v17546_v21 }
 0x362   : > { %16161 = vmatpush3.bf16.msra.mxu0 %v17575_v51  ;;  %v17561_v51 = vld [vmem:[%s22412_s3 + $0x70] sm:$0xff]   ;;  %v10708_v55 = vsel %vm23170_vm1, %v10706_v57, %v10707_v40  ;;  %v17576_v57 = vld [vmem:[%s22412_s3 + $0x18] sm:$0xff]   ;;  %vm23186_vm1 = vmmov %vm23183_vm3 }
 0x363   : > { %15931 = vmatmul.mubr.bf16.gmra.mrb[28].mxu1 %v8796_v12  ;;  %16162 = vmatprep.subr.bf16.mxu0 %v17577_v13  ;;  %v23169_v12 = vld [vmem:[#allocation50_spill] sm:$0xff] }
 0x364   : > { %15947 = vmatpush3.bf16.msra.mxu1 %v17546_v21  ;;  %15950 = vmatprep.mubr.bf16.mxu1 %v23155_v3  ;;  %v11470_v21 = vrot.slane %v11468_v17, 1  ;;  %v11466_v3 = vshrl.u32 %v21898_v41, 16  ;;  %v21998_v17 = vld [vmem:[#allocation2 + $0x70] sm:$0xff]  }
 0x365   : > { %15948 = vmatprep.subr.bf16.mxu1 %v17549_v28  ;;  %16147 = vmatmul.mubr.bf16.gmra.mrb[24].mxu0 %v23158_v18  ;;  %v17593_v18 = vld [vmem:[%s22412_s3 + $0x1c0] sm:$0xff]   ;;  %v10713_v1 = vrot.slane %v21998_v17, 2 }
 0x366   : > { %16150 = vmatprep.mubr.bf16.mxu0 %v23160_v30  ;;  %16163 = vmatpush3.bf16.msra.mxu0 %v17577_v13  ;;  %v12542_v13 = vrot.slane %v21943_v61, 3 }
 0x367   : > { %16164 = vmatprep.subr.bf16.mxu0 %v17579_v4 }
 0x368   : > { %15949 = vmatpush3.bf16.msra.mxu1 %v17549_v28  ;;  %v21950_v28 = vld [vmem:[#allocation2 + $0x94] sm:$0xf] }
 0x369   : > { %16254 = vmatprep.subr.bf16.mxu1 %v17550_v8  ;;  %v14119_v54 = vcombine.low %v12521_v39, %v21950_v28 }
 0x36a   : > { %16165 = vmatpush3.bf16.msra.mxu0 %v17579_v4  ;;  %v9002_v4 = vrot.slane %v21829_v23, 3  ;;  %v10711_v23 = vrot.slane %v21979_v59, 2 }
 0x36b   : > { %15951 = vmatmul.mubr.bf16.vlgmr.msra.gmra.mrb[16].mxu1 %v23157_v56  ;;  %16166 = vmatprep.subr.bf16.mxu0 %v17581_v20  ;;  %v11471_v56 = vor.u32 %v11470_v21, %v11466_v3  ;;  %v22019_v21 = vld [vmem:[#allocation2 + $0x80] sm:$0xff]   ;;  %v10913_v3 = vshrl.u32 %v21923_v27, 16 }
 0x36c   : > { %16255 = vmatpush3.bf16.msra.mxu1 %v17550_v8  ;;  %15954 = vmatprep.mubr.bf16.mxu1 %v23159_v45  ;;  %v11475_v8 = vrot.slane %v11473_v24, 1  ;;  %v11481_v45 = vshll.u32 %v21953_v52, 16  ;;  %v22004_v24 = vld [vmem:[#allocation2 + $0x78] sm:$0xff]   ;;  %v10714_v39 = vsel %vm23178_vm13, %v10711_v23, %v10713_v1  ;;  %vm23193_vm13 = vcmask 1044480  }
 0x36d   : > { %16256 = vmatprep.subr.bf16.mxu1 %v17551_v36  ;;  %16151 = vmatmul.mubr.bf16.gmra.mrb[28].mxu0 %v23162_v47 }
 0x36e   : > { %16154 = vmatprep.mubr.bf16.mxu0 %v23164_v11  ;;  %16167 = vmatpush3.bf16.msra.mxu0 %v17581_v20  ;;  %v11476_v20 = vsel %vm23172_vm0, %v11471_v56, %v11475_v8  ;;  %v11483_v14 = vrot.slane %v11481_v45, 1  ;;  %v17599_v11 = vld [vmem:[%s22412_s3 + $0x1d0] sm:$0xff]   ;;  %v17578_v56 = vld [vmem:[%s22412_s3 + $0x20] sm:$0xff]   ;;  %v10915_v45 = vrot.slane %v10913_v3, 2  ;;  %vm23188_vm0 = vmmov %vm23186_vm1 }
 0x36f   : > { %16168 = vmatprep.subr.bf16.mxu0 %v17583_v31 }
 0x370   : > { %16257 = vmatpush3.bf16.msra.mxu1 %v17551_v36  ;;  %v12541_v36 = vrot.slane %v14119_v54, 3  ;;  %v10924_v54 = vshll.u32 %v21937_v50, 16 }
 0x371   : > { %16258 = vmatprep.subr.bf16.mxu1 %v17553_v33 }
 0x372   : > { %16169 = vmatpush3.bf16.msra.mxu0 %v17583_v31  ;;  %v21973_v26 = vsel %vm23171_vm10, %v12541_v36, %v12542_v13  ;;  %v11477_v31 = vshrl.u32 %v21910_v2, 16  ;;  %v17610_v36 = vld [vmem:[#allocation2 + $0x90] ss:$0 sps:$4 sm:$0x33]   ;;  %vm23187_vm10 = vmmov %vm23186_vm1 }
 0x373   : > { %15955 = vmatmul.mubr.bf16.gmra.mrb[20].mxu1 %v23161_v53  ;;  %16170 = vmatprep.subr.bf16.mxu0 %v17585_v9  ;;  %v23173_v53 = vrot.slane %v21266_v38, 3  ;;  %v17569_v38 = vld [vmem:[%s22412_s3] sm:$0xff]  }
 0x374   : > { %16259 = vmatpush3.bf16.msra.mxu1 %v17553_v33  ;;  %15958 = vmatprep.mubr.bf16.mxu1 %v23163_v34  ;;  %v21967_v33 = vld [vmem:[#allocation2 + $0x60] sm:$0xff]   ;;  %v11479_v34 = vor.u32 %v11477_v31, %v11475_v8  ;;  %v10916_v8 = vshll.u32 %v21923_v27, 16  ;;  %v17611_v27 = vld [vmem:[%s22412_s3 + $0x1f0] sm:$0xff]   ;;  %v10939_v31 = vshrl.u32 %v21979_v59, 16 }
 0x375   : > { %16260 = vmatprep.subr.bf16.mxu1 %v17555_v42  ;;  %16155 = vmatmul.mubr.bf16.gmra.mrb[32].mxu0 %v10460_v15  ;;  %v10709_v30 = vrot.slane %v21967_v33, 2  ;;  %v9003_v47 = vsel %vm23174_vm4, %v23173_v53, %v9002_v4  ;;  %v10926_v4 = vrot.slane %v10924_v54, 3  ;;  %v17580_v53 = vld [vmem:[%s22412_s3 + $0x28] sm:$0xff]   ;;  %v17588_v54 = vld [vmem:[%s22412_s3 + $0x80] sm:$0xff]   ;;  %vm23189_vm4 = vmmov %vm23188_vm0 }
 0x376   : > { %16171 = vmatpush3.bf16.msra.mxu0 %v17585_v9  ;;  %16174 = vmatprep.mubr.bf16.mxu0 %v10708_v55  ;;  %v11484_v46 = vsel %vm23177_vm6, %v11479_v34, %v11483_v14  ;;  %v10715_v9 = vrot.slane %v22004_v24, 2  ;;  %v17615_v14 = vld [vmem:[%s22412_s3 + $0x1f8] sm:$0xff]   ;;  %vm23192_vm6 = vmmov %vm23185_vm7 }
 0x377   : > { %16172 = vmatprep.subr.bf16.mxu0 %v17590_v58  ;;  %v10712_v6 = vsel %vm23176_vm11, %v10709_v30, %v10711_v23  ;;  %v10933_v23 = vshll.u32 %v21967_v33, 16  ;;  %vm23191_vm11 = vmmov %vm23185_vm7 }
 0x378   : > { %16261 = vmatpush3.bf16.msra.mxu1 %v17555_v42  ;;  %v17563_v42 = vld [vmem:[%s22412_s3 + $0x78] sm:$0xff]   ;;  %v10716_v15 = vsel %vm23179_vm12, %v10713_v1, %v10715_v9  ;;  %v17617_v1 = vld [vmem:[%s22412_s3 + $0x200] sm:$0xff]   ;;  %vm23194_vm12 = vmmov %vm23192_vm6 }
 0x379   : > { %16262 = vmatprep.subr.bf16.mxu1 %v17557_v10 }
 0x37a   : > { %16173 = vmatpush3.bf16.msra.mxu0 %v17590_v58  ;;  %v10719_v58 = vrot.slane %v21882_v5, 2 }
 0x37b   : > { %15959 = vmatmul.mubr.bf16.gmra.mrb[24].mxu1 %v23168_v22  ;;  %16190 = vmatprep.subr.bf16.mxu0 %v17593_v18  ;;  %v17605_v22 = vld [vmem:[%s22412_s3 + $0x1e0] sm:$0xff]  }
 0x37c   : > { %16263 = vmatpush3.bf16.msra.mxu1 %v17557_v10  ;;  %15962 = vmatprep.mubr.bf16.mxu1 %v23169_v12  ;;  %v10710_v10 = vsel %vm23175_vm2, %v10707_v40, %v10709_v30  ;;  %v17602_v40 = vld [vmem:[%s22412_s3 + $0x1d8] sm:$0xff]   ;;  %v10921_v12 = vshrl.u32 %v21937_v50, 16  ;;  %v10918_v30 = vrot.slane %v10916_v8, 3  ;;  %vm23190_vm2 = vmmov %vm23188_vm0 }
 0x37d   : > { %16264 = vmatprep.subr.bf16.mxu1 %v17559_v19  ;;  %16175 = vmatmul.mubr.bf16.vlgmr.msra.gmra.mrb[20].mxu0 %v10710_v10 }
 0x37e   : > { %16178 = vmatprep.mubr.bf16.mxu0 %v10712_v6  ;;  %16191 = vmatpush3.bf16.msra.mxu0 %v17593_v18  ;;  %v10923_v18 = vrot.slane %v10921_v12, 2  ;;  %v10919_v34 = vor.u32 %v10918_v30, %v10915_v45  ;;  %v17582_v6 = vld [vmem:[%s22412_s3 + $0x30] sm:$0xff]   ;;  %v10975_v45 = vshrl.u32 %v21882_v5, 16  ;;  %v10978_v30 = vshll.u32 %v21882_v5, 16  ;;  %v17628_v5 = vld [vmem:[%s22412_s3 + $0xf8] sm:$0xff]  }
 0x37f   : > { %16192 = vmatprep.subr.bf16.mxu0 %v17596_v16 }
 0x380   : > { %16265 = vmatpush3.bf16.msra.mxu1 %v17559_v19  ;;  %v17572_v19 = vld [vmem:[%s22412_s3 + $0x8] sm:$0xff]  }
 0x381   : > { %16266 = vmatprep.subr.bf16.mxu1 %v17561_v51 }
 0x382   : > { %16193 = vmatpush3.bf16.msra.mxu0 %v17596_v16  ;;  %v10942_v16 = vshll.u32 %v21979_v59, 16 }
 0x383   : > { %15963 = vmatmul.mubr.bf16.gmra.mrb[28].mxu1 %v9003_v47  ;;  %16194 = vmatprep.subr.bf16.mxu0 %v17599_v11  ;;  %v10927_v47 = vor.u32 %v10926_v4, %v10923_v18  ;;  %v17591_v4 = vld [vmem:[%s22412_s3 + $0x88] sm:$0xff]  }
 0x384   : > { %16267 = vmatpush3.bf16.msra.mxu1 %v17561_v51  ;;  %16270 = vmatprep.mubr.bf16.mxu1 %v11476_v20  ;;  %v17608_v51 = vld [vmem:[%s22412_s3 + $0x1e8] sm:$0xff]   ;;  %v10930_v20 = vshrl.u32 %v21967_v33, 16 }
 0x385   : > { %16268 = vmatprep.subr.bf16.mxu1 %v17563_v42  ;;  %16179 = vmatmul.mubr.bf16.gmra.mrb[24].mxu0 %v10714_v39  ;;  %v10928_v59 = vsel %vm23153_vm5, %v10919_v34, %v10927_v47  ;;  %v17584_v39 = vld [vmem:[%s22412_s3 + $0x38] sm:$0xff]   ;;  %v10977_v34 = vrot.slane %v10975_v45, 2  ;;  %v17633_v45 = vld [vmem:[%s22412_s3 + $0x100] sm:$0xff]   ;;  %vm23197_vm5 = vmmov %vm23182_vm14 }
 0x386   : > { %16182 = vmatprep.mubr.bf16.mxu0 %v10716_v15  ;;  %16195 = vmatpush3.bf16.msra.mxu0 %v17599_v11  ;;  %v10932_v10 = vrot.slane %v10930_v20, 2  ;;  %v10941_v11 = vrot.slane %v10939_v31, 2  ;;  %v10957_v15 = vshrl.u32 %v22004_v24, 16  ;;  %v17595_v31 = vld [vmem:[%s22412_s3 + $0x90] sm:$0xff]  }
 0x387   : > { %16196 = vmatprep.subr.bf16.mxu0 %v17602_v40 }
 0x388   : > { %16269 = vmatpush3.bf16.msra.mxu1 %v17563_v42  ;;  %v10721_v42 = vrot.slane %v17610_v36, 2  ;;  %v10959_v3 = vrot.slane %v10957_v15, 2  ;;  %v17621_v36 = vld [vmem:[%s22412_s3 + $0x210] sm:$0xff]  }
 0x389   : > { %16274 = vmatprep.subr.bf16.mxu1 %v17569_v38 }
 0x38a   : > { %16197 = vmatpush3.bf16.msra.mxu0 %v17602_v40  ;;  %v10722_v33 = vsel %vm23182_vm14, %v10719_v58, %v10721_v42  ;;  %v10951_v40 = vshll.u32 %v21998_v17, 16 }
 0x38b   : > { %16271 = vmatmul.mubr.bf16.vlgmr.msra.gmra.mrb[32].mxu1 %v11484_v46  ;;  %16198 = vmatprep.subr.bf16.mxu0 %v17605_v22  ;;  %v10944_v46 = vrot.slane %v10942_v16, 3 }
 0x38c   : > { %16275 = vmatpush3.bf16.msra.mxu1 %v17569_v38  ;;  %16290 = vmatprep.mubr.bf16.mxu1 %v21898_v41  ;;  %v10717_v41 = vrot.slane %v22019_v21, 2  ;;  %v10935_v38 = vrot.slane %v10933_v23, 3  ;;  %v10953_v12 = vrot.slane %v10951_v40, 3  ;;  %v17601_v40 = vld [vmem:[%s22412_s3 + $0xa0] sm:$0xff]  }
 0x38d   : > { %16276 = vmatprep.subr.bf16.mxu1 %v17572_v19 }
 0x38e   : > { %v10718_v55 = vsel %vm23180_vm15, %v10715_v9, %v10717_v41  ;;  %v10720_v50 = vsel %vm23181_vm8, %v10717_v41, %v10719_v58  ;;  %16199 = vmatpush3.bf16.msra.mxu0 %v17605_v22  ;;  %v10948_v9 = vshrl.u32 %v21998_v17, 16  ;;  %v10960_v22 = vshll.u32 %v22004_v24, 16  ;;  %v11683_v41 = vld [vmem:[#allocation2 + $0x80] sm:$0xe] }
 0x38f   : > { %16183 = vmatmul.mubr.bf16.gmra.mrb[28].mxu0 %v10718_v55  ;;  %16200 = vmatprep.subr.bf16.mxu0 %v17608_v51  ;;  %v11704_v55 = vrot.slane %v21910_v2, 1  ;;  %vm23195_vm15 = vsmask.f32 6400 }
 0x390   : > { %16277 = vmatpush3.bf16.msra.mxu1 %v17572_v19  ;;  %16186 = vmatprep.mubr.bf16.mxu0 %v10720_v50  ;;  %v10936_v19 = vor.u32 %v10935_v38, %v10932_v10  ;;  %v10950_v58 = vrot.slane %v10948_v9, 2  ;;  %v10962_v8 = vrot.slane %v10960_v22, 3  ;;  %v10966_v50 = vshrl.u32 %v22019_v21, 16  ;;  %v17603_v22 = vld [vmem:[%s22412_s3 + $0xa8] sm:$0xff]   ;;  %vm23196_vm8 = vmmov %vm23195_vm15 }
 0x391   : > { %16278 = vmatprep.subr.bf16.mxu1 %v17574_v49 }
 0x392   : > { %16201 = vmatpush3.bf16.msra.mxu0 %v17608_v51  ;;  %v10937_v17 = vsel %vm23183_vm3, %v10927_v47, %v10936_v19  ;;  %v13965_v51 = vcombine.low %v11683_v41, %v21892_v63  ;;  %v10969_v63 = vshll.u32 %v22019_v21, 16  ;;  %v17623_v21 = vld [vmem:[%s22412_s3 + $0x218] sm:$0xff]   ;;  %v10968_v23 = vrot.slane %v10966_v50, 2  ;;  %v22094_v47 = vld [vmem:[#allocation2 + $0x90] ss:$0 sps:$4 sm:$0x77]   ;;  %vm23198_vm3 = vmmov %vm23197_vm5 }
 0x393   : > { %16202 = vmatprep.subr.bf16.mxu0 %v17611_v27  ;;  %v10984_v38 = vshrl.u32 %v22094_v47, 16  ;;  %v17634_v41 = vld [vmem:[%s22412_s3 + $0x238] sm:$0xff]   ;;  %v11985_v50 = vshll.u32 %v21894_v44, 16 }
 0x394   : > { %16279 = vmatpush3.bf16.msra.mxu1 %v17574_v49  ;;  %v10945_v49 = vor.u32 %v10944_v46, %v10941_v11  ;;  %v11703_v18 = vrot.slane %v13965_v51, 1  ;;  %v17627_v46 = vld [vmem:[%s22412_s3 + $0x228] sm:$0xff]   ;;  %v17612_v51 = vld [vmem:[%s22412_s3 + $0xc0] sm:$0xff]  }
 0x395   : > { %16280 = vmatprep.subr.bf16.mxu1 %v17576_v57 }
 0x396   : > { %16203 = vmatpush3.bf16.msra.mxu0 %v17611_v27  ;;  %v10946_v24 = vsel %vm23184_vm9, %v10936_v19, %v10945_v49  ;;  %v10963_v27 = vor.u32 %v10962_v8, %v10959_v3  ;;  %v11705_v42 = vsel %vm23185_vm7, %v11703_v18, %v11704_v55  ;;  %v10986_v19 = vrot.slane %v10984_v38, 2  ;;  %vm23199_vm9 = vmmov %vm23188_vm0 }
 0x397   : > { %16187 = vmatmul.mubr.bf16.gmra.mrb[32].mxu0 %v10722_v33  ;;  %16204 = vmatprep.subr.bf16.mxu0 %v17615_v14  ;;  %v17625_v33 = vld [vmem:[%s22412_s3 + $0x220] sm:$0xff]   ;;  %v11846_v3 = vrot.slane %v21894_v44, 1  ;;  %vm23200_vm7 = vmmov %vm23188_vm0 }
 0x398   : > { %16281 = vmatpush3.bf16.msra.mxu1 %v17576_v57  ;;  %16206 = vmatprep.mubr.bf16.mxu0 %v10928_v59  ;;  %v17619_v57 = vld [vmem:[%s22412_s3 + $0x208] sm:$0xff]   ;;  %v17597_v59 = vld [vmem:[%s22412_s3 + $0x98] sm:$0xff]  }
 0x399   : > { %16282 = vmatprep.subr.bf16.mxu1 %v17578_v56 }
 0x39a   : > { %16205 = vmatpush3.bf16.msra.mxu0 %v17615_v14  ;;  %v10980_v14 = vrot.slane %v10978_v30, 3 }
 0x39b   : > { %16222 = vmatprep.subr.bf16.mxu0 %v17617_v1 }
 0x39c   : > { %16283 = vmatpush3.bf16.msra.mxu1 %v17578_v56  ;;  %v10954_v56 = vor.u32 %v10953_v12, %v10950_v58  ;;  %v10981_v11 = vor.u32 %v10980_v14, %v10977_v34  ;;  %v17609_v58 = vld [vmem:[%s22412_s3 + $0xb8] sm:$0xff]   ;;  %v11811_v12 = vld [vmem:[#allocation2 + $0x88] sm:$0xe] }
 0x39d   : > { %16284 = vmatprep.subr.bf16.mxu1 %v17580_v53  ;;  %v17639_v34 = vld [vmem:[%s22412_s3 + $0x128] sm:$0xff]   ;;  %v17642_v14 = vld [vmem:[#allocation2 + $0x98] ss:$0 sps:$4 sm:$0x33]  }
 0x39e   : > { %v10955_v20 = vsel %vm23186_vm1, %v10945_v49, %v10954_v56  ;;  %v10964_v16 = vsel %vm23187_vm10, %v10954_v56, %v10963_v27  ;;  %v17630_v49 = vld [vmem:[%s22412_s3 + $0x230] sm:$0xff]   ;;  %v11982_v56 = vshrl.u32 %v21894_v44, 16  ;;  %v11994_v38 = vshll.u32 %v17642_v14, 16  ;;  %v17657_v44 = vld [vmem:[%s22412_s3 + $0x198] sm:$0xff]   ;;  %vm23201_vm1 = vmmov %vm23193_vm13 }
 0x39f   : > { %16207 = vmatmul.mubr.bf16.vlgmr.msra.gmra.mrb[20].mxu0 %v10937_v17  ;;  %v17607_v17 = vld [vmem:[%s22412_s3 + $0xb0] sm:$0xff]  }
 0x3a0   : > { %16285 = vmatpush3.bf16.msra.mxu1 %v17580_v53  ;;  %16210 = vmatprep.mubr.bf16.mxu0 %v10946_v24  ;;  %v10971_v53 = vrot.slane %v10969_v63, 3  ;;  %v17632_v63 = vld [vmem:[#allocation2 + $0x98] ss:$0 sps:$4 sm:$0x11]  }
 0x3a1   : > { %16286 = vmatprep.subr.bf16.mxu1 %v17582_v6  ;;  %16223 = vmatpush3.bf16.msra.mxu0 %v17617_v1  ;;  %v11848_v30 = vrot.slane %v17632_v63, 1  ;;  %v12401_v63 = vshrl.u32 %v21943_v61, 16 }
 0x3a2   : > { %16224 = vmatprep.subr.bf16.mxu0 %v17619_v57  ;;  %v10972_v10 = vor.u32 %v10971_v53, %v10968_v23 }
 0x3a3   : > { %v11849_v23 = vsel %vm23194_vm12, %v11846_v3, %v11848_v30  ;;  %v9179_v30 = vld [vmem:[%s22255_s28 + $0x30] sm:$0xff] }
 0x3a4   : > { %16287 = vmatpush3.bf16.msra.mxu1 %v17582_v6  ;;  %v10987_v6 = vshll.u32 %v22094_v47, 16  ;;  %v10973_v1 = vsel %vm23188_vm0, %v10963_v27, %v10972_v10  ;;  %v11987_v27 = vrot.slane %v11985_v50, 2 }
 0x3a5   : > { %16288 = vmatprep.subr.bf16.mxu1 %v17584_v39  ;;  %16225 = vmatpush3.bf16.msra.mxu0 %v17619_v57 }
 0x3a6   : > { %16226 = vmatprep.subr.bf16.mxu0 %v17621_v36  ;;  %v10989_v9 = vrot.slane %v10987_v6, 3  ;;  %v17641_v6 = vld [vmem:[%s22412_s3 + $0x138] sm:$0xff]  }
 0x3a7   : > { %16211 = vmatmul.mubr.bf16.gmra.mrb[24].mxu0 %v10955_v20  ;;  %v17635_v20 = vld [vmem:[%s22412_s3 + $0x108] sm:$0xff]  }
 0x3a8   : > { %16289 = vmatpush3.bf16.msra.mxu1 %v17584_v39  ;;  %16214 = vmatprep.mubr.bf16.mxu0 %v10964_v16  ;;  %v10982_v39 = vsel %vm23189_vm4, %v10972_v10, %v10981_v11  ;;  %v10990_v15 = vor.u32 %v10989_v9, %v10986_v19  ;;  %v17638_v16 = vld [vmem:[%s22412_s3 + $0x120] sm:$0xff]   ;;  %v11991_v10 = vshrl.u32 %v17642_v14, 16  ;;  %v17645_v19 = vld [vmem:[%s22412_s3 + $0x148] sm:$0xff]  }
 0x3a9   : > { %16294 = vmatprep.subr.bf16.mxu1 %v17588_v54  ;;  %16227 = vmatpush3.bf16.msra.mxu0 %v17621_v36 }
 0x3aa   : > { %16228 = vmatprep.subr.bf16.mxu0 %v17623_v21  ;;  %v10991_v57 = vsel %vm23190_vm2, %v10981_v11, %v10990_v15  ;;  %v11996_v11 = vrot.slane %v11994_v38, 2  ;;  %v17650_v15 = vld [vmem:[%s22412_s3 + $0x170] sm:$0xff]  }
 0x3ab   : > { %16291 = vmatmul.mubr.bf16.vlgmr.msra.gmra.mrb[32].mxu1 %v21910_v2  ;;  %v17620_v2 = vld [vmem:[%s22412_s3 + $0xd8] sm:$0xff]  }
 0x3ac   : > { %16295 = vmatpush3.bf16.msra.mxu1 %v17588_v54  ;;  %16310 = vmatprep.mubr.bf16.mxu1 %v11705_v42  ;;  %v13990_v54 = vcombine.low %v11811_v12, %v21884_v48  ;;  %v17616_v48 = vld [vmem:[%s22412_s3 + $0xc8] sm:$0xff]  }
 0x3ad   : > { %16296 = vmatprep.subr.bf16.mxu1 %v17591_v4  ;;  %16229 = vmatpush3.bf16.msra.mxu0 %v17623_v21 }
 0x3ae   : > { %16230 = vmatprep.subr.bf16.mxu0 %v17625_v33  ;;  %v11845_v24 = vrot.slane %v13990_v54, 1  ;;  %v11977_v36 = vshll.u32 %v13990_v54, 16 }
 0x3af   : > { %16215 = vmatmul.mubr.bf16.gmra.mrb[28].mxu0 %v10973_v1 }
 0x3b0   : > { %16297 = vmatpush3.bf16.msra.mxu1 %v17591_v4  ;;  %16218 = vmatprep.mubr.bf16.mxu0 %v10982_v39  ;;  %v11979_v18 = vrot.slane %v11977_v36, 2  ;;  %v11984_v4 = vrot.slane %v11982_v56, 1  ;;  %v17647_v39 = vld [vmem:[%s22412_s3 + $0x158] sm:$0xff]  }
 0x3b1   : > { %16298 = vmatprep.subr.bf16.mxu1 %v17595_v31  ;;  %16231 = vmatpush3.bf16.msra.mxu0 %v17625_v33  ;;  %v17640_v33 = vld [vmem:[%s22412_s3 + $0x130] sm:$0xff]  }
 0x3b2   : > { %16232 = vmatprep.subr.bf16.mxu0 %v17627_v46  ;;  %v11988_v21 = vor.u32 %v11987_v27, %v11984_v4  ;;  %v17662_v4 = vld [vmem:[#allocation2 + $0xa0] ss:$0 sps:$4 sm:$0x33]  }
 0x3b4   : > { %16299 = vmatpush3.bf16.msra.mxu1 %v17595_v31  ;;  %v17637_v31 = vld [vmem:[%s22412_s3 + $0x118] sm:$0xff]  }
 0x3b5   : > { %16300 = vmatprep.subr.bf16.mxu1 %v17597_v59  ;;  %16233 = vmatpush3.bf16.msra.mxu0 %v17627_v46  ;;  %v17643_v46 = vld [vmem:[%s22412_s3 + $0x140] sm:$0xff]  }
 0x3b6   : > { %16234 = vmatprep.subr.bf16.mxu0 %v17630_v49 }
 0x3b7   : > { %16219 = vmatmul.mubr.bf16.gmra.mrb[32].mxu0 %v10991_v57 }
 0x3b8   : > { %16301 = vmatpush3.bf16.msra.mxu1 %v17597_v59  ;;  %16238 = vmatprep.mubr.bf16.mxu0 %v21437_v32  ;;  %v11706_v32 = vrot.slane %v21953_v52, 1  ;;  %v17622_v52 = vld [vmem:[%s22412_s3 + $0xe0] sm:$0xff]   ;;  %v11993_v59 = vrot.slane %v11991_v10, 1 }
 0x3b9   : > { %16302 = vmatprep.subr.bf16.mxu1 %v17601_v40  ;;  %16235 = vmatpush3.bf16.msra.mxu0 %v17630_v49  ;;  %v17648_v49 = vld [vmem:[%s22412_s3 + $0x160] sm:$0xff]  }
 0x3ba   : > { %16236 = vmatprep.subr.bf16.mxu0 %v17634_v41  ;;  %v11707_v8 = vsel %vm23191_vm11, %v11704_v55, %v11706_v32  ;;  %v11997_v1 = vor.u32 %v11996_v11, %v11993_v59 }
 0x3bc   : > { %16303 = vmatpush3.bf16.msra.mxu1 %v17601_v40  ;;  %v11998_v9 = vsel %vm23196_vm8, %v11988_v21, %v11997_v1  ;;  %v17646_v40 = vld [vmem:[%s22412_s3 + $0x150] sm:$0xff]  }
 0x3bd   : > { %16304 = vmatprep.subr.bf16.mxu1 %v17603_v22  ;;  %16237 = vmatpush3.bf16.msra.mxu0 %v17634_v41  ;;  %v17651_v41 = vld [vmem:[%s22412_s3 + $0x178] sm:$0xff]  }
 0x3c0   : > { %16305 = vmatpush3.bf16.msra.mxu1 %v17603_v22  ;;  %16239 = vmatmul.mubr.bf16.vlgmr.msra.gmra.mrb[20].mxu0 %v21424_v35  ;;  %v11847_v35 = vsel %vm23192_vm6, %v11845_v24, %v11846_v3  ;;  %v12230_v22 = vld [vmem:[#allocation2 + $0x90] sm:$0xc]  ;;  %v17659_v3 = vld [vmem:[%s22412_s3 + $0x1a8] sm:$0xff]  }
 0x3c1   : > { %16306 = vmatprep.subr.bf16.mxu1 %v17607_v17  ;;  %16242 = vmatprep.mubr.bf16.mxu0 %v21427_v60  ;;  %v17618_v60 = vld [vmem:[%s22412_s3 + $0xd0] sm:$0xff]   ;;  %v14067_v57 = vcombine.low %v12230_v22, %v21950_v28 }
 0x3c2   : > { %v17656_v24 = vld [vmem:[%s22412_s3 + $0x190] sm:$0xff]  }
 0x3c3   : > { %v12264_v12 = vrot.slane %v14067_v57, 2 }
 0x3c4   : > { %16307 = vmatpush3.bf16.msra.mxu1 %v17607_v17  ;;  %v17652_v17 = vld [vmem:[%s22412_s3 + $0x180] sm:$0xff]  }
 0x3c5   : > { %16308 = vmatprep.subr.bf16.mxu1 %v17609_v58 }
 0x3c8   : > { %16309 = vmatpush3.bf16.msra.mxu1 %v17609_v58  ;;  %16243 = vmatmul.mubr.bf16.gmra.mrb[24].mxu0 %v21430_v7  ;;  %v11196_v7 = vrot.slane %v22094_v47, 3  ;;  %v17636_v47 = vld [vmem:[%s22412_s3 + $0x110] sm:$0xff]   ;;  %v12125_v58 = vrot.slane %v17642_v14, 2  ;;  %v9178_v14 = vld [vmem:[%s22255_s28 + $0x28] sm:$0xff] }
 0x3c9   : > { %16314 = vmatprep.subr.bf16.mxu1 %v17612_v51  ;;  %16246 = vmatprep.mubr.bf16.mxu0 %v21440_v29  ;;  %v17624_v29 = vld [vmem:[%s22412_s3 + $0xe8] sm:$0xff]  }
 0x3ca   : > { %v11197_v55 = vsel %vm23193_vm13, %v11194_v43, %v11196_v7  ;;  %v12126_v28 = vsel %vm23182_vm14, %v12123_v25, %v12125_v58  ;;  %v17658_v25 = vld [vmem:[%s22412_s3 + $0x1a0] sm:$0xff]  }
 0x3cb   : > { %16311 = vmatmul.mubr.bf16.vlgmr.msra.gmra.mrb[32].mxu1 %v11707_v8  ;;  %v9173_v8 = vld [vmem:[%s22255_s28] sm:$0xff] }
 0x3cc   : > { %16315 = vmatpush3.bf16.msra.mxu1 %v17612_v51  ;;  %16330 = vmatprep.mubr.bf16.mxu1 %v11847_v35  ;;  %v17655_v51 = vld [vmem:[%s22412_s3 + $0x188] sm:$0xff]   ;;  %v17660_v35 = vld [vmem:[%s22412_s3 + $0x1b0] sm:$0xff]  }
 0x3cd   : > { %16316 = vmatprep.subr.bf16.mxu1 %v17616_v48 }
 0x3d0   : > { %16317 = vmatpush3.bf16.msra.mxu1 %v17616_v48  ;;  %16247 = vmatmul.mubr.bf16.gmra.mrb[28].mxu0 %v21453_v62  ;;  %v17626_v62 = vld [vmem:[%s22412_s3 + $0xf0] sm:$0xff]  }
 0x3d1   : > { %16318 = vmatprep.subr.bf16.mxu1 %v17618_v60  ;;  %16250 = vmatprep.mubr.bf16.mxu0 %v21919_v0  ;;  %v11974_v0 = vshrl.u32 %v13990_v54, 16  ;;  %v12265_v54 = vrot.slane %v21943_v61, 2  ;;  %v9175_v48 = vld [vmem:[%s22255_s28 + $0x10] sm:$0xff] }
 0x3d3   : > { %v11976_v43 = vrot.slane %v11974_v0, 1  ;;  %v12266_v32 = vsel %vm23197_vm5, %v12264_v12, %v12265_v54 }
 0x3d4   : > { %16319 = vmatpush3.bf16.msra.mxu1 %v17618_v60 }
 0x3d5   : > { %16320 = vmatprep.subr.bf16.mxu1 %v17620_v2  ;;  %v11980_v42 = vor.u32 %v11979_v18, %v11976_v43  ;;  %v12404_v43 = vshll.u32 %v21943_v61, 16 }
 0x3d7   : > { %v11989_v53 = vsel %vm23195_vm15, %v11980_v42, %v11988_v21  ;;  %v9177_v42 = vld [vmem:[%s22255_s28 + $0x20] sm:$0xff] }
 0x3d8   : > { %16321 = vmatpush3.bf16.msra.mxu1 %v17620_v2  ;;  %16251 = vmatmul.mubr.bf16.gmra.mrb[32].mxu0 %v11197_v55  ;;  %v9176_v2 = vld [vmem:[%s22255_s28 + $0x18] sm:$0xff]  ;;  %v12393_v55 = vshrl.u32 %v14067_v57, 16  ;;  %v17663_v21 = vld [vmem:[%s22412_s3 + $0x1c0] sm:$0xff]  }
 0x3d9   : > { %16322 = vmatprep.subr.bf16.mxu1 %v17622_v52 }
 0x3da   : > { %v12395_v27 = vrot.slane %v12393_v55, 2 }
 0x3dc   : > { %16323 = vmatpush3.bf16.msra.mxu1 %v17622_v52 }
 0x3dd   : > { %16324 = vmatprep.subr.bf16.mxu1 %v17624_v29 }
 0x3e0   : > { %16325 = vmatpush3.bf16.msra.mxu1 %v17624_v29  ;;  %v9174_v29 = vld [vmem:[%s22255_s28 + $0x8] sm:$0xff] }
 0x3e1   : > { %16326 = vmatprep.subr.bf16.mxu1 %v17626_v62 }
 0x3e4   : > { %16327 = vmatpush3.bf16.msra.mxu1 %v17626_v62  ;;  %v12396_v62 = vshll.u32 %v14067_v57, 16  ;;  %v9182_v57 = vld [vmem:[%s22255_s28 + $0x48] sm:$0xff] }
 0x3e5   : > { %16328 = vmatprep.subr.bf16.mxu1 %v17628_v5 }
 0x3e8   : > { %16329 = vmatpush3.bf16.msra.mxu1 %v17628_v5  ;;  %v17661_v5 = vld [vmem:[%s22412_s3 + $0x1b8] sm:$0xff]  }
 0x3e9   : > { %16334 = vmatprep.subr.bf16.mxu1 %v17633_v45 }
 0x3eb   : > { %16331 = vmatmul.mubr.bf16.vlgmr.msra.gmra.mrb[32].mxu1 %v11849_v23  ;;  %v12406_v23 = vrot.slane %v12404_v43, 3  ;;  %v17672_v43 = vld [vmem:[%s22412_s3 + $0x200] sm:$0xff]  }
 0x3ec   : > { %16335 = vmatpush3.bf16.msra.mxu1 %v17633_v45  ;;  %16350 = vmatprep.mubr.bf16.mxu1 %v11989_v53  ;;  %v12398_v45 = vrot.slane %v12396_v62, 3  ;;  %v17671_v62 = vld [vmem:[#allocation2 + $0xa0] ss:$0 sps:$4 sm:$0x77]  }
 0x3ed   : > { %16336 = vmatprep.subr.bf16.mxu1 %v17635_v20 }
 0x3f0   : > { %16337 = vmatpush3.bf16.msra.mxu1 %v17635_v20  ;;  %v12403_v20 = vrot.slane %v12401_v63, 2 }
 0x3f1   : > { %16338 = vmatprep.subr.bf16.mxu1 %v17636_v47 }
 0x3f2   : > { %v22289_v11 = vor.u32 %v12406_v23, %v12403_v20  ;;  %v17680_v20 = vld [vmem:[%s22412_s3 + $0x238] sm:$0xff]   ;;  %v12544_v23 = vrot.slane %v17671_v62, 3 }
 0x3f4   : > { %16339 = vmatpush3.bf16.msra.mxu1 %v17636_v47  ;;  %v9180_v47 = vld [vmem:[%s22255_s28 + $0x38] sm:$0xff] }
 0x3f5   : > { %16340 = vmatprep.subr.bf16.mxu1 %v17637_v31 }
 0x3f8   : > { %16341 = vmatpush3.bf16.msra.mxu1 %v17637_v31  ;;  %v12267_v31 = vrot.slane %v17662_v4, 2  ;;  %v17674_v4 = vld [vmem:[%s22412_s3 + $0x208] sm:$0xff]  }
 0x3f9   : > { %16342 = vmatprep.subr.bf16.mxu1 %v17638_v16 }
 0x3fc   : > { %16343 = vmatpush3.bf16.msra.mxu1 %v17638_v16 }
 0x3fd   : > { %16344 = vmatprep.subr.bf16.mxu1 %v17639_v34 }
 0x400   : > { %16345 = vmatpush3.bf16.msra.mxu1 %v17639_v34 }
 0x401   : > { %16346 = vmatprep.subr.bf16.mxu1 %v17640_v33 }
 0x404   : > { %16347 = vmatpush3.bf16.msra.mxu1 %v17640_v33  ;;  %v12399_v33 = vor.u32 %v12398_v45, %v12395_v27  ;;  %v17675_v45 = vld [vmem:[%s22412_s3 + $0x210] sm:$0xff]  }
 0x405   : > { %16348 = vmatprep.subr.bf16.mxu1 %v17641_v6 }
 0x408   : > { %16349 = vmatpush3.bf16.msra.mxu1 %v17641_v6 }
 0x409   : > { %16354 = vmatprep.subr.bf16.mxu1 %v17643_v46 }
 0x40b   : > { %16351 = vmatmul.mubr.bf16.vlgmr.msra.gmra.mrb[32].mxu1 %v11998_v9  ;;  %v12408_v9 = vsel %vm23199_vm9, %v12399_v33, %v22289_v11 }
 0x40c   : > { %16355 = vmatpush3.bf16.msra.mxu1 %v17643_v46  ;;  %16370 = vmatprep.mubr.bf16.mxu1 %v21928_v37  ;;  %v17649_v37 = vld [vmem:[%s22412_s3 + $0x168] sm:$0xff]  }
 0x40d   : > { %16356 = vmatprep.subr.bf16.mxu1 %v17645_v19  ;;  %v17664_v46 = vld [vmem:[%s22412_s3 + $0x1c8] sm:$0xff]  }
 0x410   : > { %16357 = vmatpush3.bf16.msra.mxu1 %v17645_v19  ;;  %v12268_v19 = vsel %vm23198_vm3, %v12265_v54, %v12267_v31  ;;  %v11367_v31 = vld [vmem:[%s22255_s28 + $0x80] sm:$0xff] }
 0x411   : > { %16358 = vmatprep.subr.bf16.mxu1 %v17646_v40 }
 0x414   : > { %16359 = vmatpush3.bf16.msra.mxu1 %v17646_v40  ;;  %v9183_v40 = vld [vmem:[%s22255_s28 + $0x50] sm:$0xff] }
 0x415   : > { %16360 = vmatprep.subr.bf16.mxu1 %v17647_v39 }
 0x418   : > { %16361 = vmatpush3.bf16.msra.mxu1 %v17647_v39  ;;  %v9181_v39 = vld [vmem:[%s22255_s28 + $0x40] sm:$0xff] }
 0x419   : > { %16362 = vmatprep.subr.bf16.mxu1 %v17648_v49 }
 0x41c   : > { %16363 = vmatpush3.bf16.msra.mxu1 %v17648_v49  ;;  %v17665_v49 = vld [vmem:[%s22412_s3 + $0x1d0] sm:$0xff]  }
 0x41d   : > { %16364 = vmatprep.subr.bf16.mxu1 %v17649_v37 }
 0x420   : > { %16365 = vmatpush3.bf16.msra.mxu1 %v17649_v37 }
 0x421   : > { %16366 = vmatprep.subr.bf16.mxu1 %v17650_v15 }
 0x424   : > { %16367 = vmatpush3.bf16.msra.mxu1 %v17650_v15  ;;  %v9184_v15 = vld [vmem:[%s22255_s28 + $0x58] sm:$0xff] }
 0x425   : > { %16368 = vmatprep.subr.bf16.mxu1 %v17651_v41 }
 0x428   : > { %16369 = vmatpush3.bf16.msra.mxu1 %v17651_v41 }
 0x429   : > { %16374 = vmatprep.subr.bf16.mxu1 %v17652_v17 }
 0x42b   : > { %16371 = vmatmul.mubr.bf16.vlgmr.msra.gmra.mrb[32].mxu1 %v12126_v28 }
 0x42c   : > { %16375 = vmatpush3.bf16.msra.mxu1 %v17652_v17  ;;  %16390 = vmatprep.mubr.bf16.mxu1 %v12266_v32  ;;  %v9187_v32 = vld [vmem:[%s22255_s28 + $0x70] sm:$0xff] }
 0x42d   : > { %16376 = vmatprep.subr.bf16.mxu1 %v17655_v51 }
 0x430   : > { %16377 = vmatpush3.bf16.msra.mxu1 %v17655_v51  ;;  %v17666_v51 = vld [vmem:[%s22412_s3 + $0x1d8] sm:$0xff]  }
 0x431   : > { %16378 = vmatprep.subr.bf16.mxu1 %v17656_v24 }
 0x434   : > { %16379 = vmatpush3.bf16.msra.mxu1 %v17656_v24  ;;  %v9185_v24 = vld [vmem:[%s22255_s28 + $0x60] sm:$0xff] }
 0x435   : > { %16380 = vmatprep.subr.bf16.mxu1 %v17657_v44 }
 0x438   : > { %16381 = vmatpush3.bf16.msra.mxu1 %v17657_v44  ;;  %v17667_v44 = vld [vmem:[%s22412_s3 + $0x1e0] sm:$0xff]  }
 0x439   : > { %16382 = vmatprep.subr.bf16.mxu1 %v17658_v25 }
 0x43c   : > { %16383 = vmatpush3.bf16.msra.mxu1 %v17658_v25 }
 0x43d   : > { %16384 = vmatprep.subr.bf16.mxu1 %v17659_v3 }
 0x43e   : > { %v15952_v60 = vpop.f32.mrb[16].mxu1 }
 0x43f   : > { %v9191_v52 = vadd.f32 %v15952_v60, %v9175_v48  ;;  %v9094_v7 = vpop.f32.mrb[17].mxu1 }
 0x440   : > { %v9189_v0 = vadd.f32 %v9173_v8, %v9094_v7  ;;  %16385 = vmatpush3.bf16.msra.mxu1 %v17659_v3  ;;  %v15953_v36 = vpop.f32.mrb[18].mxu1  ;;  %v9188_v3 = vld [vmem:[%s22255_s28 + $0x78] sm:$0xff] }
 0x441   : > { %9207 = vst [vmem:[%s22268_s8 + $0x10] sm:$0xff] %v9191_v52  ;;  %v9192_v56 = vadd.f32 %v15953_v36, %v9176_v2  ;;  %v9097_v50 = vpop.f32.mrb[19].mxu1  ;;  %16386 = vmatprep.subr.bf16.mxu1 %v17660_v35  ;;  %v12410_v36 = vshrl.u32 %v17671_v62, 16 }
 0x442   : > { %9205 = vst [vmem:[%s22268_s8] sm:$0xff] %v9189_v0  ;;  %v9190_v18 = vadd.f32 %v9174_v29, %v9097_v50  ;;  %v17668_v29 = vld [vmem:[%s22412_s3 + $0x1e8] sm:$0xff]   ;;  %v17669_v0 = vld [vmem:[%s22412_s3 + $0x1f0] sm:$0xff]   ;;  %v17670_v50 = vld [vmem:[%s22412_s3 + $0x1f8] sm:$0xff]  }
 0x443   : > { %9208 = vst [vmem:[%s22268_s8 + $0x18] sm:$0xff] %v9192_v56  ;;  %v12413_v56 = vshll.u32 %v17671_v62, 16 }
 0x444   : > { %9206 = vst [vmem:[%s22268_s8 + $0x8] sm:$0xff] %v9190_v18  ;;  %16387 = vmatpush3.bf16.msra.mxu1 %v17660_v35  ;;  %v9186_v35 = vld [vmem:[%s22255_s28 + $0x68] sm:$0xff] }
 0x445   : > { %16388 = vmatprep.subr.bf16.mxu1 %v17661_v5  ;;  %v12415_v63 = vrot.slane %v12413_v56, 3  ;;  %v12651_v56 = vld [vmem:[%s22255_s28 + $0x110] sm:$0xff] }
 0x446   : > { %v15956_v53 = vpop.f32.mrb[20].mxu1 }
 0x447   : > { %v9195_v16 = vadd.f32 %v15956_v53, %v9179_v30  ;;  %v9110_v34 = vpop.f32.mrb[21].mxu1  ;;  %v17676_v30 = vld [vmem:[%s22412_s3 + $0x218] sm:$0xff]   ;;  %v12545_v53 = vsel %vm23201_vm1, %v12542_v13, %v12544_v23 }
 0x448   : > { %v9193_v10 = vadd.f32 %v9177_v42, %v9110_v34  ;;  %16389 = vmatpush3.bf16.msra.mxu1 %v17661_v5  ;;  %v15957_v38 = vpop.f32.mrb[22].mxu1  ;;  %v12412_v5 = vrot.slane %v12410_v36, 2  ;;  %v17677_v42 = vld [vmem:[%s22412_s3 + $0x220] sm:$0xff]   ;;  %v11370_v34 = vld [vmem:[%s22255_s28 + $0x98] sm:$0xff] }
 0x449   : > { %9211 = vst [vmem:[%s22268_s8 + $0x30] sm:$0xff] %v9195_v16  ;;  %v9196_v6 = vadd.f32 %v15957_v38, %v9180_v47  ;;  %v9113_v59 = vpop.f32.mrb[23].mxu1  ;;  %16394 = vmatprep.subr.bf16.mxu1 %v17663_v21  ;;  %v11369_v47 = vld [vmem:[%s22255_s28 + $0x90] sm:$0xff] }
 0x44a   : > { %9209 = vst [vmem:[%s22268_s8 + $0x20] sm:$0xff] %v9193_v10  ;;  %v9194_v1 = vadd.f32 %v9178_v14, %v9113_v59  ;;  %v12416_v18 = vor.u32 %v12415_v63, %v12412_v5  ;;  %v11368_v10 = vld [vmem:[%s22255_s28 + $0x88] sm:$0xff]  ;;  %v12652_v63 = vld [vmem:[%s22255_s28 + $0x118] sm:$0xff] }
 0x44b   : > { %9212 = vst [vmem:[%s22268_s8 + $0x38] sm:$0xff] %v9196_v6  ;;  %16391 = vmatmul.mubr.bf16.vlgmr.msra.gmra.mrb[32].mxu1 %v12268_v19  ;;  %v11374_v19 = vld [vmem:[%s22255_s28 + $0xb8] sm:$0xff] }
 0x44c   : > { %9210 = vst [vmem:[%s22268_s8 + $0x28] sm:$0xff] %v9194_v1  ;;  %16395 = vmatpush3.bf16.msra.mxu1 %v17663_v21  ;;  %16410 = vmatprep.mubr.bf16.mxu1 %v12408_v9  ;;  %v12417_v27 = vsel %vm23200_vm7, %v22289_v11, %v12416_v18  ;;  %v17679_v21 = vld [vmem:[%s22412_s3 + $0x230] sm:$0xff]  }
 0x44d   : > { %16396 = vmatprep.subr.bf16.mxu1 %v17664_v46  ;;  %v11373_v11 = vld [vmem:[%s22255_s28 + $0xb0] sm:$0xff] }
 0x44e   : > { %v15960_v37 = vpop.f32.mrb[24].mxu1 }
 0x44f   : > { %v9199_v22 = vadd.f32 %v15960_v37, %v9183_v40  ;;  %v9126_v41 = vpop.f32.mrb[25].mxu1 }
 0x450   : > { %v9197_v17 = vadd.f32 %v9181_v39, %v9126_v41  ;;  %16397 = vmatpush3.bf16.msra.mxu1 %v17664_v46  ;;  %v15961_v58 = vpop.f32.mrb[26].mxu1  ;;  %v11371_v46 = vld [vmem:[%s22255_s28 + $0xa0] sm:$0xff]  ;;  %v11372_v39 = vld [vmem:[%s22255_s28 + $0xa8] sm:$0xff] }
 0x451   : > { %9215 = vst [vmem:[%s22268_s8 + $0x50] sm:$0xff] %v9199_v22  ;;  %v9200_v12 = vadd.f32 %v15961_v58, %v9184_v15  ;;  %v9129_v54 = vpop.f32.mrb[27].mxu1  ;;  %16398 = vmatprep.subr.bf16.mxu1 %v17665_v49 }
 0x452   : > { %9213 = vst [vmem:[%s22268_s8 + $0x40] sm:$0xff] %v9197_v17  ;;  %v9198_v28 = vadd.f32 %v9182_v57, %v9129_v54  ;;  %v11377_v57 = vld [vmem:[%s22255_s28 + $0xd0] sm:$0xff]  ;;  %v11375_v17 = vld [vmem:[%s22255_s28 + $0xc0] sm:$0xff] }
 0x453   : > { %9216 = vst [vmem:[%s22268_s8 + $0x58] sm:$0xff] %v9200_v12  ;;  %v11378_v12 = vld [vmem:[%s22255_s28 + $0xd8] sm:$0xff] }
 0x454   : > { %9214 = vst [vmem:[%s22268_s8 + $0x48] sm:$0xff] %v9198_v28  ;;  %16399 = vmatpush3.bf16.msra.mxu1 %v17665_v49  ;;  %v11376_v28 = vld [vmem:[%s22255_s28 + $0xc8] sm:$0xff] }
 0x455   : > { %16400 = vmatprep.subr.bf16.mxu1 %v17666_v51 }
 0x456   : > { %v15964_v25 = vpop.f32.mrb[28].mxu1 }
 0x457   : > { %v9203_v48 = vadd.f32 %v15964_v25, %v9187_v32  ;;  %v9142_v8 = vpop.f32.mrb[29].mxu1 }
 0x458   : > { %v9201_v60 = vadd.f32 %v9185_v24, %v9142_v8  ;;  %16401 = vmatpush3.bf16.msra.mxu1 %v17666_v51  ;;  %v15965_v2 = vpop.f32.mrb[30].mxu1  ;;  %v11379_v8 = vld [vmem:[%s22255_s28 + $0xe0] sm:$0xff] }
 0x459   : > { %9219 = vst [vmem:[%s22268_s8 + $0x70] sm:$0xff] %v9203_v48  ;;  %v9204_v52 = vadd.f32 %v15965_v2, %v9188_v3  ;;  %v9145_v7 = vpop.f32.mrb[31].mxu1  ;;  %16402 = vmatprep.subr.bf16.mxu1 %v17667_v44  ;;  %v11381_v48 = vld [vmem:[%s22255_s28 + $0xf0] sm:$0xff] }
 0x45a   : > { %9217 = vst [vmem:[%s22268_s8 + $0x60] sm:$0xff] %v9201_v60  ;;  %v9202_v55 = vadd.f32 %v9186_v35, %v9145_v7  ;;  %v11382_v60 = vld [vmem:[%s22255_s28 + $0xf8] sm:$0xff]  ;;  %v11380_v7 = vld [vmem:[%s22255_s28 + $0xe8] sm:$0xff] }
 0x45b   : > { %9220 = vst [vmem:[%s22268_s8 + $0x78] sm:$0xff] %v9204_v52 }
 0x45c   : > { %9218 = vst [vmem:[%s22268_s8 + $0x68] sm:$0xff] %v9202_v55  ;;  %16403 = vmatpush3.bf16.msra.mxu1 %v17667_v44 }
 0x45d   : > { %16404 = vmatprep.subr.bf16.mxu1 %v17668_v29 }
 0x460   : > { %16405 = vmatpush3.bf16.msra.mxu1 %v17668_v29 }
 0x461   : > { %16406 = vmatprep.subr.bf16.mxu1 %v17669_v0 }
 0x464   : > { %16407 = vmatpush3.bf16.msra.mxu1 %v17669_v0 }
 0x465   : > { %16408 = vmatprep.subr.bf16.mxu1 %v17670_v50 }
 0x468   : > { %16409 = vmatpush3.bf16.msra.mxu1 %v17670_v50  ;;  %v12649_v50 = vld [vmem:[%s22255_s28 + $0x100] sm:$0xff] }
 0x469   : > { %16414 = vmatprep.subr.bf16.mxu1 %v17672_v43 }
 0x46b   : > { %16411 = vmatmul.mubr.bf16.vlgmr.msra.gmra.mrb[32].mxu1 %v12417_v27 }
 0x46c   : > { %16415 = vmatpush3.bf16.msra.mxu1 %v17672_v43  ;;  %16430 = vmatprep.mubr.bf16.mxu1 %v21973_v26  ;;  %v17678_v26 = vld [vmem:[%s22412_s3 + $0x228] sm:$0xff]  }
 0x46d   : > { %16416 = vmatprep.subr.bf16.mxu1 %v17674_v4 }
 0x470   : > { %16417 = vmatpush3.bf16.msra.mxu1 %v17674_v4  ;;  %v12650_v4 = vld [vmem:[%s22255_s28 + $0x108] sm:$0xff] }
 0x471   : > { %16418 = vmatprep.subr.bf16.mxu1 %v17675_v45 }
 0x474   : > { %16419 = vmatpush3.bf16.msra.mxu1 %v17675_v45 }
 0x475   : > { %16420 = vmatprep.subr.bf16.mxu1 %v17676_v30 }
 0x478   : > { %16421 = vmatpush3.bf16.msra.mxu1 %v17676_v30 }
 0x479   : > { %16422 = vmatprep.subr.bf16.mxu1 %v17677_v42 }
 0x47c   : > { %16423 = vmatpush3.bf16.msra.mxu1 %v17677_v42 }
 0x47d   : > { %16424 = vmatprep.subr.bf16.mxu1 %v17678_v26 }
 0x480   : > { %16425 = vmatpush3.bf16.msra.mxu1 %v17678_v26 }
 0x481   : > { %16426 = vmatprep.subr.bf16.mxu1 %v17679_v21 }
 0x484   : > { %16427 = vmatpush3.bf16.msra.mxu1 %v17679_v21 }
 0x485   : > { %16428 = vmatprep.subr.bf16.mxu1 %v17680_v20 }
 0x488   : > { %16429 = vmatpush3.bf16.msra.mxu1 %v17680_v20 }
 0x48b   : > { %16431 = vmatmul.mubr.bf16.vlgmr.msra.gmra.mrb[32].mxu1 %v12545_v53 }
 0x493   : > { %v16240_v16 = vpop.f32.mrb[20].mxu0 }
 0x494   : > { %v11385_v14 = vadd.f32 %v16240_v16, %v11369_v47  ;;  %v11288_v33 = vpop.f32.mrb[21].mxu0 }
 0x495   : > { %v11383_v38 = vadd.f32 %v11367_v31, %v11288_v33  ;;  %v16241_v6 = vpop.f32.mrb[22].mxu0 }
 0x496   : > { %11401 = vst [vmem:[%s22268_s8 + $0x90] sm:$0xff] %v11385_v14  ;;  %v11386_v61 = vadd.f32 %v16241_v6, %v11370_v34  ;;  %v11291_v13 = vpop.f32.mrb[23].mxu0 }
 0x497   : > { %11399 = vst [vmem:[%s22268_s8 + $0x80] sm:$0xff] %v11383_v38  ;;  %v11384_v59 = vadd.f32 %v11368_v10, %v11291_v13 }
 0x498   : > { %11402 = vst [vmem:[%s22268_s8 + $0x98] sm:$0xff] %v11386_v61 }
 0x499   : > { %11400 = vst [vmem:[%s22268_s8 + $0x88] sm:$0xff] %v11384_v59 }
 0x49b   : > { %v16244_v1 = vpop.f32.mrb[24].mxu0 }
 0x49c   : > { %v11389_v9 = vadd.f32 %v16244_v1, %v11373_v11  ;;  %v11304_v40 = vpop.f32.mrb[25].mxu0 }
 0x49d   : > { %v11387_v49 = vadd.f32 %v11371_v46, %v11304_v40  ;;  %v16245_v37 = vpop.f32.mrb[26].mxu0 }
 0x49e   : > { %11405 = vst [vmem:[%s22268_s8 + $0xb0] sm:$0xff] %v11389_v9  ;;  %v11390_v15 = vadd.f32 %v16245_v37, %v11374_v19  ;;  %v11307_v22 = vpop.f32.mrb[27].mxu0 }
 0x49f   : > { %11403 = vst [vmem:[%s22268_s8 + $0xa0] sm:$0xff] %v11387_v49  ;;  %v11388_v41 = vadd.f32 %v11372_v39, %v11307_v22 }
 0x4a0   : > { %11406 = vst [vmem:[%s22268_s8 + $0xb8] sm:$0xff] %v11390_v15 }
 0x4a1   : > { %11404 = vst [vmem:[%s22268_s8 + $0xa8] sm:$0xff] %v11388_v41 }
 0x4a3   : > { %v16248_v58 = vpop.f32.mrb[28].mxu0 }
 0x4a4   : > { %v11393_v54 = vadd.f32 %v16248_v58, %v11377_v57  ;;  %v11320_v51 = vpop.f32.mrb[29].mxu0 }
 0x4a5   : > { %v11391_v32 = vadd.f32 %v11375_v17, %v11320_v51  ;;  %v16249_v24 = vpop.f32.mrb[30].mxu0 }
 0x4a6   : > { %11409 = vst [vmem:[%s22268_s8 + $0xd0] sm:$0xff] %v11393_v54  ;;  %v11394_v44 = vadd.f32 %v16249_v24, %v11378_v12  ;;  %v11323_v25 = vpop.f32.mrb[31].mxu0 }
 0x4a7   : > { %11407 = vst [vmem:[%s22268_s8 + $0xc0] sm:$0xff] %v11391_v32  ;;  %v11392_v3 = vadd.f32 %v11376_v28, %v11323_v25 }
 0x4a8   : > { %11410 = vst [vmem:[%s22268_s8 + $0xd8] sm:$0xff] %v11394_v44 }
 0x4a9   : > { %11408 = vst [vmem:[%s22268_s8 + $0xc8] sm:$0xff] %v11392_v3 }
 0x4ab   : > { %v16252_v35 = vpop.f32.mrb[32].mxu0 }
 0x4ac   : > { %v11397_v2 = vadd.f32 %v16252_v35, %v11381_v48  ;;  %v11336_v52 = vpop.f32.mrb[33].mxu0 }
 0x4ad   : > { %v11395_v29 = vadd.f32 %v11379_v8, %v11336_v52  ;;  %v16253_v55 = vpop.f32.mrb[34].mxu0 }
 0x4ae   : > { %11413 = vst [vmem:[%s22268_s8 + $0xf0] sm:$0xff] %v11397_v2  ;;  %v11398_v62 = vadd.f32 %v16253_v55, %v11382_v60  ;;  %v11339_v0 = vpop.f32.mrb[35].mxu0 }
 0x4af   : > { %11411 = vst [vmem:[%s22268_s8 + $0xe0] sm:$0xff] %v11395_v29  ;;  %v11396_v36 = vadd.f32 %v11380_v7, %v11339_v0 }
 0x4b0   : > { %11414 = vst [vmem:[%s22268_s8 + $0xf8] sm:$0xff] %v11398_v62 }
 0x4b1   : > { %11412 = vst [vmem:[%s22268_s8 + $0xe8] sm:$0xff] %v11396_v36 }
 0x55e   : > { %v16432_v5 = vpop.f32.mrb[32].mxu1 }
 0x55f   : > { %v12655_v43 = vadd.f32 %v16432_v5, %v12651_v56  ;;  %v12630_v18 = vpop.f32.mrb[33].mxu1 }
 0x560   : > { %v12653_v27 = vadd.f32 %v12649_v50, %v12630_v18  ;;  %v16433_v45 = vpop.f32.mrb[34].mxu1 }
 0x561   : > { %12659 = vst [vmem:[%s22268_s8 + $0x110] sm:$0xff] %v12655_v43  ;;  %v12656_v30 = vadd.f32 %v16433_v45, %v12652_v63  ;;  %v12633_v42 = vpop.f32.mrb[35].mxu1 }
 0x562   : > { %12657 = vst [vmem:[%s22268_s8 + $0x100] sm:$0xff] %v12653_v27  ;;  %v12654_v26 = vadd.f32 %v12650_v4, %v12633_v42 }
 0x563   : > { %12660 = vst [vmem:[%s22268_s8 + $0x118] sm:$0xff] %v12656_v30 }
 0x564   : > { %12658 = vst [vmem:[%s22268_s8 + $0x108] sm:$0xff] %v12654_v26 }
 0x565 PF: > { %s14_s15 = sadd.s32 1, %s17702_s15  }
 0x566   : > { %p11_p4 = scmp.ge.s32.totalorder %s14_s15, 4  }
 0x568   :  { %13 = sbr.rel (!%p11_p4) target bundleno = 1 (0x1), region = 85 }

</bundles_post_ra>
